<compile_context>
chip_gen: v7x
topology: tpu7x:2x2x1
jax: 0.10.0
libtpu: 0.0.40
codegen_flags: <defaults>
</compile_context>

<pallas_src>
import numpy as np

import jax
import jax.numpy as jnp
from jax.experimental import pallas as pl
from jax.experimental.pallas import tpu as pltpu

NEG_SLOPE = 0.2
BN_EPS = 1e-5
NDF = 64
NC = 1

_VMEM = pl.BlockSpec(memory_space=pltpu.MemorySpace.VMEM)
_ANY = pl.BlockSpec(memory_space=pl.ANY)


# --------------------------------------------------------------------------
# Fused forward kernel
# --------------------------------------------------------------------------
def _disc_kernel(p1_ref, w1_ref,
                 g2_ref, w2_ref, bn2g_ref, bn2b_ref,
                 g3_ref, w3_ref, bn3g_ref, bn3b_ref,
                 g4_ref, bn4g_ref, bn4b_ref,
                 dc_ref, dcw_ref, dcb_ref,
                 f1b_ref, f2b_ref, f3w_ref, f3b_ref,
                 w4_hbm, f1i_hbm, f1d_hbm, f2w_hbm,
                 out_ref,
                 pat2, pat3, pat4,
                 w4_v, f1i_v, f1d_v, f2w_v, sems):
    f32 = jnp.float32
    bf16 = jnp.bfloat16

    # Kick off the tail-weight DMAs immediately; conv1-3 compute hides them.
    cp_w4 = pltpu.make_async_copy(w4_hbm, w4_v, sems.at[0])
    cp_f1i = pltpu.make_async_copy(f1i_hbm, f1i_v, sems.at[1])
    cp_f1d = pltpu.make_async_copy(f1d_hbm, f1d_v, sems.at[2])
    cp_f2w = pltpu.make_async_copy(f2w_hbm, f2w_v, sems.at[3])
    cp_w4.start()
    cp_f1i.start()
    cp_f1d.start()
    cp_f2w.start()

    def lrelu(y):
        return jnp.where(y > 0, y, NEG_SLOPE * y)

    def conv(y_prev, g_ref, w_mat, pat_ref):
        # stride-2 / 4x4 / pad-1 conv as two stacked MXU matmuls.
        # G rows are 0/1 with at most one 1 per row, so the bf16 selection is exact.
        ic = y_prev.shape[1]
        out_rows = pat_ref.shape[0]
        block_rows = g_ref.shape[0] // 16
        sel = jnp.dot(g_ref[...], y_prev.astype(bf16), preferred_element_type=f32)
        for k in range(16):                                       # static unroll
            pat_ref[:, k * ic:(k + 1) * ic] = (
                sel[k * block_rows:k * block_rows + out_rows, :].astype(bf16))
        return jnp.dot(pat_ref[...], w_mat, preferred_element_type=f32)

    def bn_lrelu(y, gamma_ref, beta_ref):
        # Train-mode BatchNorm over axis 0 (= N*H*W of the conv output), biased variance.
        mean = jnp.mean(y, axis=0, keepdims=True)
        var = jnp.mean((y - mean) ** 2, axis=0, keepdims=True)
        yn = (y - mean) * jax.lax.rsqrt(var + BN_EPS) * gamma_ref[...] + beta_ref[...]
        return lrelu(yn)

    # conv1 (1->64) + LeakyReLU; im2col patches of the raw image precomputed in wrapper.
    y = lrelu(jnp.dot(p1_ref[...], w1_ref[...], preferred_element_type=f32))   # (128, 64)
    # conv2/3/4, each + BatchNorm(batch stats) + LeakyReLU
    y = bn_lrelu(conv(y, g2_ref, w2_ref[...], pat2), bn2g_ref, bn2b_ref)       # (32, 128)
    y = bn_lrelu(conv(y, g3_ref, w3_ref[...], pat3), bn3g_ref, bn3b_ref)       # (8, 256)
    cp_w4.wait()
    y = bn_lrelu(conv(y, g4_ref, w4_v[...], pat4), bn4g_ref, bn4b_ref)         # (N, 512)
    # AdaptiveAvgPool2d(1): conv4 output is already 1x1 spatially -> identity.
    img_feat = y

    # data / condition embeddings merged into one block-diagonal matmul (no activation).
    dc = jnp.dot(dc_ref[...], dcw_ref[...], preferred_element_type=f32) + dcb_ref[...]

    # head: fc1 consumes [img_feat | data_ebd | cond_ebd] via split weights (no concat).
    cp_f1i.wait()
    cp_f1d.wait()
    h = jnp.dot(img_feat.astype(bf16), f1i_v[...], preferred_element_type=f32)
    h = h + jnp.dot(dc.astype(bf16), f1d_v[...], preferred_element_type=f32)
    h = lrelu(h + f1b_ref[...])
    cp_f2w.wait()
    h = lrelu(jnp.dot(h.astype(bf16), f2w_v[...], preferred_element_type=f32)
              + f2b_ref[...])
    z = jnp.dot(h.astype(bf16), f3w_ref[...], preferred_element_type=f32) + f3b_ref[...]
    out_ref[...] = 1.0 / (1.0 + jnp.exp(-z))   # exact sigmoid (exp runs on the EUP anyway)


# --------------------------------------------------------------------------
# Stacked shift-selection matrices (im2col as ONE 0/1 matmul, zero padding included)
# --------------------------------------------------------------------------
def _selection_mats(n, h, w):
    """(16*BR, n*h*w) 0/1 matrix for a stride-2, k=4, pad=1 conv.

    Tap k occupies rows [k*BR, k*BR + n*(h//2)*(w//2)); BR is the out-row count rounded
    up to a multiple of 8 so every tap block starts on a sublane boundary."""
    oh, ow = h // 2, w // 2
    out_rows = n * oh * ow
    br = max(8, ((out_rows + 7) // 8) * 8)
    g = np.zeros((16 * br, n * h * w), np.float32)
    for ki in range(4):
        for kj in range(4):
            k = ki * 4 + kj
            for b in range(n):
                for i in range(oh):
                    for j in range(ow):
                        si = 2 * i + ki - 1
                        sj = 2 * j + kj - 1
                        if 0 <= si < h and 0 <= sj < w:
                            g[k * br + b * oh * ow + i * ow + j,
                              b * h * w + si * w + sj] = 1.0
    return g


# --------------------------------------------------------------------------
# Parameters (deterministic init, already in kernel-ready layout / dtype)
# --------------------------------------------------------------------------
def init_params(key, batch=2):
    ndf, nc = NDF, NC
    keys = jax.random.split(key, 9)

    def linear(k, fan_in, fan_out):
        kw, kb = jax.random.split(k)
        bound = float(fan_in) ** -0.5
        W = jax.random.uniform(kw, (fan_in, fan_out), jnp.float32, -bound, bound)
        b = jax.random.uniform(kb, (fan_out,), jnp.float32, -bound, bound)
        return W, b

    def conv_w(k, oc, ic):
        return 0.02 * jax.random.normal(k, (oc, ic, 4, 4), jnp.float32)

    def to_k_stacked(w):   # (OC, IC, 4, 4) -> (16*IC, OC), row = (ki*4+kj)*IC + ic
        oc, ic = w.shape[0], w.shape[1]
        return jnp.transpose(w, (2, 3, 1, 0)).reshape(16 * ic, oc).astype(jnp.bfloat16)

    w1 = conv_w(keys[0], ndf, nc)
    w2 = conv_w(keys[1], ndf * 2, ndf)
    w3 = conv_w(keys[2], ndf * 4, ndf * 2)
    w4 = conv_w(keys[3], ndf * 8, ndf * 4)

    p = {}
    p["w1"] = jnp.transpose(w1, (2, 3, 1, 0)).reshape(16 * nc, ndf).astype(jnp.bfloat16)
    p["w2"], p["w3"], p["w4"] = to_k_stacked(w2), to_k_stacked(w3), to_k_stacked(w4)

    for i, c in ((2, ndf * 2), (3, ndf * 4), (4, ndf * 8)):
        p[f"bn{i}_g"] = jnp.ones((1, c), jnp.float32)    # PyTorch BN default gamma=1
        p[f"bn{i}_b"] = jnp.zeros((1, c), jnp.float32)   # PyTorch BN default beta=0

    # batch size baked into the selection matrices (asserted in the wrapper)
    p["g2"] = jnp.asarray(_selection_mats(batch, 8, 8), jnp.bfloat16)   # (512, 128)
    p["g3"] = jnp.asarray(_selection_mats(batch, 4, 4), jnp.bfloat16)   # (128,  32)
    p["g4"] = jnp.asarray(_selection_mats(batch, 2, 2), jnp.bfloat16)   # (128,   8)

    # data_ebd (6->256) and condition_ebd (7->256) merged into one (16, 512) block-diag matmul
    dW, db = linear(keys[4], 6, 256)
    cW, cb = linear(keys[5], 7, 256)
    dcw = jnp.zeros((16, 512), jnp.float32)
    dcw = dcw.at[0:6, 0:256].set(dW).at[6:13, 256:512].set(cW)
    p["dc_w"] = dcw.astype(jnp.bfloat16)
    p["dc_b"] = jnp.concatenate([db, cb]).reshape(1, 512)

    f1W, f1b = linear(keys[6], 1024, 512)
    p["fc1_wi"] = f1W[:512].astype(jnp.bfloat16)      # consumes img_feat (512)
    p["fc1_wd"] = f1W[512:].astype(jnp.bfloat16)      # consumes [data_ebd | cond_ebd] (512)
    p["fc1_b"] = f1b.reshape(1, 512)
    f2W, f2b = linear(keys[7], 512, 256)
    p["fc2_w"] = f2W.astype(jnp.bfloat16)
    p["fc2_b"] = f2b.reshape(1, 256)
    f3W, f3b = linear(keys[8], 256, 1)
    p["fc3_w"] = f3W.astype(jnp.bfloat16)
    p["fc3_b"] = f3b.reshape(1, 1)
    return p


# --------------------------------------------------------------------------
# Forward pass: tiny wrapper glue + single fused pallas_call
# --------------------------------------------------------------------------
@jax.jit
def discriminator_forward(params, img_nchw, data, condition):
    N = img_nchw.shape[0]
    if params["g2"].shape[1] != N * 64:
        raise ValueError("batch size baked into selection matrices does not match input")

    # conv1 im2col on the raw (2 KB) input; all later layers stay inside the kernel.
    x = jnp.transpose(img_nchw, (0, 2, 3, 1)).astype(jnp.float32)   # NHWC
    xp = jnp.pad(x, ((0, 0), (1, 1), (1, 1), (0, 0)))
    cols = [xp[:, i:i + 15:2, j:j + 15:2, :] for i in range(4) for j in range(4)]
    p1 = jnp.stack(cols, axis=3).reshape(N * 8 * 8, 16).astype(jnp.bfloat16)

    # merged (data | condition) input, zero-padded to 16 columns
    dc_in = jnp.concatenate(
        [data.astype(jnp.float32), condition.astype(jnp.float32),
         jnp.zeros((N, 3), jnp.float32)], axis=1).astype(jnp.bfloat16)   # (N, 16)

    scratch_shapes = [
        pltpu.VMEM((N * 16, 16 * 64), jnp.bfloat16),    # conv2 patch buffer
        pltpu.VMEM((N * 4, 16 * 128), jnp.bfloat16),    # conv3 patch buffer
        pltpu.VMEM((N, 16 * 256), jnp.bfloat16),        # conv4 patch buffer
        pltpu.VMEM((16 * 256, 512), jnp.bfloat16),      # w4 landing buffer (manual DMA)
        pltpu.VMEM((512, 512), jnp.bfloat16),           # fc1_wi landing buffer
        pltpu.VMEM((512, 512), jnp.bfloat16),           # fc1_wd landing buffer
        pltpu.VMEM((512, 256), jnp.bfloat16),           # fc2_w landing buffer
        pltpu.SemaphoreType.DMA((4,)),
    ]

    return pl.pallas_call(
        _disc_kernel,
        out_shape=jax.ShapeDtypeStruct((N, 1), jnp.float32),
        in_specs=[_VMEM] * 20 + [_ANY] * 4,
        out_specs=_VMEM,
        scratch_shapes=scratch_shapes,
        compiler_params=pltpu.CompilerParams(vmem_limit_bytes=24 * 1024 * 1024),
    )(p1, params["w1"],
      params["g2"], params["w2"], params["bn2_g"], params["bn2_b"],
      params["g3"], params["w3"], params["bn3_g"], params["bn3_b"],
      params["g4"], params["bn4_g"], params["bn4_b"],
      dc_in, params["dc_w"], params["dc_b"],
      params["fc1_b"], params["fc2_b"],
      params["fc3_w"], params["fc3_b"],
      params["w4"], params["fc1_wi"], params["fc1_wd"], params["fc2_w"])


if __name__ == "__main__":
    key = jax.random.PRNGKey(0)
    pkey, ikey, dkey, ckey = jax.random.split(key, 4)

    params = init_params(pkey, batch=2)
    img = jax.random.normal(ikey, (2, 1, 16, 16), jnp.float32)   # NCHW, like PyTorch
    data = jax.random.normal(dkey, (2, 6), jnp.float32)
    condition = jax.random.normal(ckey, (2, 7), jnp.float32)

    out = discriminator_forward(params, img, data, condition)
    out = jax.block_until_ready(out)
    assert out.shape == (2, 1), out.shape
    assert bool(jnp.all((out >= 0.0) & (out <= 1.0)))
    print("KERNEL_OK")
</pallas_src>

<mosaic_0001>
module attributes {stable_mosaic.version = 11 : i64} {
  func.func @_disc_kernel(%arg0: memref<128x16xbf16, #tpu.memory_space<vmem>>, %arg1: memref<16x64xbf16, #tpu.memory_space<vmem>>, %arg2: memref<512x128xbf16, #tpu.memory_space<vmem>>, %arg3: memref<1024x128xbf16, #tpu.memory_space<vmem>>, %arg4: memref<1x128xf32, #tpu.memory_space<vmem>>, %arg5: memref<1x128xf32, #tpu.memory_space<vmem>>, %arg6: memref<128x32xbf16, #tpu.memory_space<vmem>>, %arg7: memref<2048x256xbf16, #tpu.memory_space<vmem>>, %arg8: memref<1x256xf32, #tpu.memory_space<vmem>>, %arg9: memref<1x256xf32, #tpu.memory_space<vmem>>, %arg10: memref<128x8xbf16, #tpu.memory_space<vmem>>, %arg11: memref<1x512xf32, #tpu.memory_space<vmem>>, %arg12: memref<1x512xf32, #tpu.memory_space<vmem>>, %arg13: memref<2x16xbf16, #tpu.memory_space<vmem>>, %arg14: memref<16x512xbf16, #tpu.memory_space<vmem>>, %arg15: memref<1x512xf32, #tpu.memory_space<vmem>>, %arg16: memref<1x512xf32, #tpu.memory_space<vmem>>, %arg17: memref<1x256xf32, #tpu.memory_space<vmem>>, %arg18: memref<256x1xbf16, #tpu.memory_space<vmem>>, %arg19: memref<1x1xf32, #tpu.memory_space<vmem>>, %arg20: memref<4096x512xbf16, #tpu.memory_space<any>>, %arg21: memref<512x512xbf16, #tpu.memory_space<any>>, %arg22: memref<512x512xbf16, #tpu.memory_space<any>>, %arg23: memref<512x256xbf16, #tpu.memory_space<any>>, %arg24: memref<2x1xf32, #tpu.memory_space<vmem>>, %arg25: memref<32x1024xbf16, #tpu.memory_space<vmem>>, %arg26: memref<8x2048xbf16, #tpu.memory_space<vmem>>, %arg27: memref<2x4096xbf16, #tpu.memory_space<vmem>>, %arg28: memref<4096x512xbf16, #tpu.memory_space<vmem>>, %arg29: memref<512x512xbf16, #tpu.memory_space<vmem>>, %arg30: memref<512x512xbf16, #tpu.memory_space<vmem>>, %arg31: memref<512x256xbf16, #tpu.memory_space<vmem>>, %arg32: memref<4x!tpu.dma_semaphore, #tpu.memory_space<semaphore_mem>>) attributes {dimension_semantics = [], scalar_prefetch = 0 : i64, scratch_operands = 8 : i64, tpu.core_type = #tpu.core_type<tc>} {
    %c0_i32 = arith.constant 0 : i32
    %0 = tpu.memref_slice %arg32[%c0_i32] : memref<4x!tpu.dma_semaphore, #tpu.memory_space<semaphore_mem>> -> memref<1x!tpu.dma_semaphore, #tpu.memory_space<semaphore_mem>>
    %1 = tpu.memref_squeeze %0 : memref<1x!tpu.dma_semaphore, #tpu.memory_space<semaphore_mem>> -> memref<!tpu.dma_semaphore, #tpu.memory_space<semaphore_mem>>
    tpu.enqueue_dma source(%arg20 : memref<4096x512xbf16, #tpu.memory_space<any>>) target(%arg28 : memref<4096x512xbf16, #tpu.memory_space<vmem>>) target_semaphore(%1 : memref<!tpu.dma_semaphore, #tpu.memory_space<semaphore_mem>>)
    %c1_i32 = arith.constant 1 : i32
    %2 = tpu.memref_slice %arg32[%c1_i32] : memref<4x!tpu.dma_semaphore, #tpu.memory_space<semaphore_mem>> -> memref<1x!tpu.dma_semaphore, #tpu.memory_space<semaphore_mem>>
    %3 = tpu.memref_squeeze %2 : memref<1x!tpu.dma_semaphore, #tpu.memory_space<semaphore_mem>> -> memref<!tpu.dma_semaphore, #tpu.memory_space<semaphore_mem>>
    tpu.enqueue_dma source(%arg21 : memref<512x512xbf16, #tpu.memory_space<any>>) target(%arg29 : memref<512x512xbf16, #tpu.memory_space<vmem>>) target_semaphore(%3 : memref<!tpu.dma_semaphore, #tpu.memory_space<semaphore_mem>>)
    %c2_i32 = arith.constant 2 : i32
    %4 = tpu.memref_slice %arg32[%c2_i32] : memref<4x!tpu.dma_semaphore, #tpu.memory_space<semaphore_mem>> -> memref<1x!tpu.dma_semaphore, #tpu.memory_space<semaphore_mem>>
    %5 = tpu.memref_squeeze %4 : memref<1x!tpu.dma_semaphore, #tpu.memory_space<semaphore_mem>> -> memref<!tpu.dma_semaphore, #tpu.memory_space<semaphore_mem>>
    tpu.enqueue_dma source(%arg22 : memref<512x512xbf16, #tpu.memory_space<any>>) target(%arg30 : memref<512x512xbf16, #tpu.memory_space<vmem>>) target_semaphore(%5 : memref<!tpu.dma_semaphore, #tpu.memory_space<semaphore_mem>>)
    %c3_i32 = arith.constant 3 : i32
    %6 = tpu.memref_slice %arg32[%c3_i32] : memref<4x!tpu.dma_semaphore, #tpu.memory_space<semaphore_mem>> -> memref<1x!tpu.dma_semaphore, #tpu.memory_space<semaphore_mem>>
    %7 = tpu.memref_squeeze %6 : memref<1x!tpu.dma_semaphore, #tpu.memory_space<semaphore_mem>> -> memref<!tpu.dma_semaphore, #tpu.memory_space<semaphore_mem>>
    tpu.enqueue_dma source(%arg23 : memref<512x256xbf16, #tpu.memory_space<any>>) target(%arg31 : memref<512x256xbf16, #tpu.memory_space<vmem>>) target_semaphore(%7 : memref<!tpu.dma_semaphore, #tpu.memory_space<semaphore_mem>>)
    %c0 = arith.constant 0 : index
    %c0_0 = arith.constant 0 : index
    %8 = vector.load %arg0[%c0, %c0_0] : memref<128x16xbf16, #tpu.memory_space<vmem>>, vector<128x16xbf16>
    %c0_1 = arith.constant 0 : index
    %c0_2 = arith.constant 0 : index
    %9 = vector.load %arg1[%c0_1, %c0_2] : memref<16x64xbf16, #tpu.memory_space<vmem>>, vector<16x64xbf16>
    %cst = arith.constant dense<0.000000e+00> : vector<128x64xf32>
    %10 = tpu.matmul %8, %9, %cst {dimension_numbers = #tpu.dot_dimension_numbers<[1], [0], [0], [1], [0, 0, 1, 1], [], []>} : vector<128x16xbf16>, vector<16x64xbf16>, vector<128x64xf32> -> vector<128x64xf32>
    %cst_3 = arith.constant 0.000000e+00 : f32
    %11 = vector.broadcast %cst_3 : f32 to vector<128x64xf32>
    %12 = arith.cmpf ogt, %10, %11 : vector<128x64xf32>
    %cst_4 = arith.constant 2.000000e-01 : f32
    %13 = vector.broadcast %cst_4 : f32 to vector<128x64xf32>
    %14 = arith.mulf %13, %10 : vector<128x64xf32>
    %15 = arith.select %12, %10, %14 : vector<128x64xi1>, vector<128x64xf32>
    %c0_5 = arith.constant 0 : index
    %c0_6 = arith.constant 0 : index
    %16 = vector.load %arg3[%c0_5, %c0_6] : memref<1024x128xbf16, #tpu.memory_space<vmem>>, vector<1024x128xbf16>
    %c0_7 = arith.constant 0 : index
    %c0_8 = arith.constant 0 : index
    %17 = vector.load %arg2[%c0_7, %c0_8] : memref<512x128xbf16, #tpu.memory_space<vmem>>, vector<512x128xbf16>
    %18 = arith.truncf %15 : vector<128x64xf32> to vector<128x64xbf16>
    %cst_9 = arith.constant dense<0.000000e+00> : vector<512x64xf32>
    %19 = tpu.matmul %17, %18, %cst_9 {dimension_numbers = #tpu.dot_dimension_numbers<[1], [0], [0], [1], [0, 0, 1, 1], [], []>} : vector<512x128xbf16>, vector<128x64xbf16>, vector<512x64xf32> -> vector<512x64xf32>
    %20 = vector.extract_strided_slice %19 {offsets = [0, 0], sizes = [32, 64], strides = [1, 1]} : vector<512x64xf32> to vector<32x64xf32>
    %21 = arith.truncf %20 : vector<32x64xf32> to vector<32x64xbf16>
    %c0_10 = arith.constant 0 : index
    %c0_11 = arith.constant 0 : index
    %22 = vector.load %arg25[%c0_10, %c0_11] : memref<32x1024xbf16, #tpu.memory_space<vmem>>, vector<32x64xbf16>
    tpu.vector_store %arg25[%c0_10, %c0_11], %21 {strides = array<i32>} : memref<32x1024xbf16, #tpu.memory_space<vmem>>, vector<32x64xbf16>,
    %23 = vector.extract_strided_slice %19 {offsets = [32, 0], sizes = [32, 64], strides = [1, 1]} : vector<512x64xf32> to vector<32x64xf32>
    %24 = arith.truncf %23 : vector<32x64xf32> to vector<32x64xbf16>
    %c0_12 = arith.constant 0 : index
    %c64 = arith.constant 64 : index
    %25 = vector.load %arg25[%c0_12, %c64] : memref<32x1024xbf16, #tpu.memory_space<vmem>>, vector<32x64xbf16>
    tpu.vector_store %arg25[%c0_12, %c64], %24 {strides = array<i32>} : memref<32x1024xbf16, #tpu.memory_space<vmem>>, vector<32x64xbf16>,
    %26 = vector.extract_strided_slice %19 {offsets = [64, 0], sizes = [32, 64], strides = [1, 1]} : vector<512x64xf32> to vector<32x64xf32>
    %27 = arith.truncf %26 : vector<32x64xf32> to vector<32x64xbf16>
    %c0_13 = arith.constant 0 : index
    %c128 = arith.constant 128 : index
    %28 = vector.load %arg25[%c0_13, %c128] : memref<32x1024xbf16, #tpu.memory_space<vmem>>, vector<32x64xbf16>
    tpu.vector_store %arg25[%c0_13, %c128], %27 {strides = array<i32>} : memref<32x1024xbf16, #tpu.memory_space<vmem>>, vector<32x64xbf16>,
    %29 = vector.extract_strided_slice %19 {offsets = [96, 0], sizes = [32, 64], strides = [1, 1]} : vector<512x64xf32> to vector<32x64xf32>
    %30 = arith.truncf %29 : vector<32x64xf32> to vector<32x64xbf16>
    %c0_14 = arith.constant 0 : index
    %c192 = arith.constant 192 : index
    %31 = vector.load %arg25[%c0_14, %c192] : memref<32x1024xbf16, #tpu.memory_space<vmem>>, vector<32x64xbf16>
    tpu.vector_store %arg25[%c0_14, %c192], %30 {strides = array<i32>} : memref<32x1024xbf16, #tpu.memory_space<vmem>>, vector<32x64xbf16>,
    %32 = vector.extract_strided_slice %19 {offsets = [128, 0], sizes = [32, 64], strides = [1, 1]} : vector<512x64xf32> to vector<32x64xf32>
    %33 = arith.truncf %32 : vector<32x64xf32> to vector<32x64xbf16>
    %c0_15 = arith.constant 0 : index
    %c256 = arith.constant 256 : index
    %34 = vector.load %arg25[%c0_15, %c256] : memref<32x1024xbf16, #tpu.memory_space<vmem>>, vector<32x64xbf16>
    tpu.vector_store %arg25[%c0_15, %c256], %33 {strides = array<i32>} : memref<32x1024xbf16, #tpu.memory_space<vmem>>, vector<32x64xbf16>,
    %35 = vector.extract_strided_slice %19 {offsets = [160, 0], sizes = [32, 64], strides = [1, 1]} : vector<512x64xf32> to vector<32x64xf32>
    %36 = arith.truncf %35 : vector<32x64xf32> to vector<32x64xbf16>
    %c0_16 = arith.constant 0 : index
    %c320 = arith.constant 320 : index
    %37 = vector.load %arg25[%c0_16, %c320] : memref<32x1024xbf16, #tpu.memory_space<vmem>>, vector<32x64xbf16>
    tpu.vector_store %arg25[%c0_16, %c320], %36 {strides = array<i32>} : memref<32x1024xbf16, #tpu.memory_space<vmem>>, vector<32x64xbf16>,
    %38 = vector.extract_strided_slice %19 {offsets = [192, 0], sizes = [32, 64], strides = [1, 1]} : vector<512x64xf32> to vector<32x64xf32>
    %39 = arith.truncf %38 : vector<32x64xf32> to vector<32x64xbf16>
    %c0_17 = arith.constant 0 : index
    %c384 = arith.constant 384 : index
    %40 = vector.load %arg25[%c0_17, %c384] : memref<32x1024xbf16, #tpu.memory_space<vmem>>, vector<32x64xbf16>
    tpu.vector_store %arg25[%c0_17, %c384], %39 {strides = array<i32>} : memref<32x1024xbf16, #tpu.memory_space<vmem>>, vector<32x64xbf16>,
    %41 = vector.extract_strided_slice %19 {offsets = [224, 0], sizes = [32, 64], strides = [1, 1]} : vector<512x64xf32> to vector<32x64xf32>
    %42 = arith.truncf %41 : vector<32x64xf32> to vector<32x64xbf16>
    %c0_18 = arith.constant 0 : index
    %c448 = arith.constant 448 : index
    %43 = vector.load %arg25[%c0_18, %c448] : memref<32x1024xbf16, #tpu.memory_space<vmem>>, vector<32x64xbf16>
    tpu.vector_store %arg25[%c0_18, %c448], %42 {strides = array<i32>} : memref<32x1024xbf16, #tpu.memory_space<vmem>>, vector<32x64xbf16>,
    %44 = vector.extract_strided_slice %19 {offsets = [256, 0], sizes = [32, 64], strides = [1, 1]} : vector<512x64xf32> to vector<32x64xf32>
    %45 = arith.truncf %44 : vector<32x64xf32> to vector<32x64xbf16>
    %c0_19 = arith.constant 0 : index
    %c512 = arith.constant 512 : index
    %46 = vector.load %arg25[%c0_19, %c512] : memref<32x1024xbf16, #tpu.memory_space<vmem>>, vector<32x64xbf16>
    tpu.vector_store %arg25[%c0_19, %c512], %45 {strides = array<i32>} : memref<32x1024xbf16, #tpu.memory_space<vmem>>, vector<32x64xbf16>,
    %47 = vector.extract_strided_slice %19 {offsets = [288, 0], sizes = [32, 64], strides = [1, 1]} : vector<512x64xf32> to vector<32x64xf32>
    %48 = arith.truncf %47 : vector<32x64xf32> to vector<32x64xbf16>
    %c0_20 = arith.constant 0 : index
    %c576 = arith.constant 576 : index
    %49 = vector.load %arg25[%c0_20, %c576] : memref<32x1024xbf16, #tpu.memory_space<vmem>>, vector<32x64xbf16>
    tpu.vector_store %arg25[%c0_20, %c576], %48 {strides = array<i32>} : memref<32x1024xbf16, #tpu.memory_space<vmem>>, vector<32x64xbf16>,
    %50 = vector.extract_strided_slice %19 {offsets = [320, 0], sizes = [32, 64], strides = [1, 1]} : vector<512x64xf32> to vector<32x64xf32>
    %51 = arith.truncf %50 : vector<32x64xf32> to vector<32x64xbf16>
    %c0_21 = arith.constant 0 : index
    %c640 = arith.constant 640 : index
    %52 = vector.load %arg25[%c0_21, %c640] : memref<32x1024xbf16, #tpu.memory_space<vmem>>, vector<32x64xbf16>
    tpu.vector_store %arg25[%c0_21, %c640], %51 {strides = array<i32>} : memref<32x1024xbf16, #tpu.memory_space<vmem>>, vector<32x64xbf16>,
    %53 = vector.extract_strided_slice %19 {offsets = [352, 0], sizes = [32, 64], strides = [1, 1]} : vector<512x64xf32> to vector<32x64xf32>
    %54 = arith.truncf %53 : vector<32x64xf32> to vector<32x64xbf16>
    %c0_22 = arith.constant 0 : index
    %c704 = arith.constant 704 : index
    %55 = vector.load %arg25[%c0_22, %c704] : memref<32x1024xbf16, #tpu.memory_space<vmem>>, vector<32x64xbf16>
    tpu.vector_store %arg25[%c0_22, %c704], %54 {strides = array<i32>} : memref<32x1024xbf16, #tpu.memory_space<vmem>>, vector<32x64xbf16>,
    %56 = vector.extract_strided_slice %19 {offsets = [384, 0], sizes = [32, 64], strides = [1, 1]} : vector<512x64xf32> to vector<32x64xf32>
    %57 = arith.truncf %56 : vector<32x64xf32> to vector<32x64xbf16>
    %c0_23 = arith.constant 0 : index
    %c768 = arith.constant 768 : index
    %58 = vector.load %arg25[%c0_23, %c768] : memref<32x1024xbf16, #tpu.memory_space<vmem>>, vector<32x64xbf16>
    tpu.vector_store %arg25[%c0_23, %c768], %57 {strides = array<i32>} : memref<32x1024xbf16, #tpu.memory_space<vmem>>, vector<32x64xbf16>,
    %59 = vector.extract_strided_slice %19 {offsets = [416, 0], sizes = [32, 64], strides = [1, 1]} : vector<512x64xf32> to vector<32x64xf32>
    %60 = arith.truncf %59 : vector<32x64xf32> to vector<32x64xbf16>
    %c0_24 = arith.constant 0 : index
    %c832 = arith.constant 832 : index
    %61 = vector.load %arg25[%c0_24, %c832] : memref<32x1024xbf16, #tpu.memory_space<vmem>>, vector<32x64xbf16>
    tpu.vector_store %arg25[%c0_24, %c832], %60 {strides = array<i32>} : memref<32x1024xbf16, #tpu.memory_space<vmem>>, vector<32x64xbf16>,
    %62 = vector.extract_strided_slice %19 {offsets = [448, 0], sizes = [32, 64], strides = [1, 1]} : vector<512x64xf32> to vector<32x64xf32>
    %63 = arith.truncf %62 : vector<32x64xf32> to vector<32x64xbf16>
    %c0_25 = arith.constant 0 : index
    %c896 = arith.constant 896 : index
    %64 = vector.load %arg25[%c0_25, %c896] : memref<32x1024xbf16, #tpu.memory_space<vmem>>, vector<32x64xbf16>
    tpu.vector_store %arg25[%c0_25, %c896], %63 {strides = array<i32>} : memref<32x1024xbf16, #tpu.memory_space<vmem>>, vector<32x64xbf16>,
    %65 = vector.extract_strided_slice %19 {offsets = [480, 0], sizes = [32, 64], strides = [1, 1]} : vector<512x64xf32> to vector<32x64xf32>
    %66 = arith.truncf %65 : vector<32x64xf32> to vector<32x64xbf16>
    %c0_26 = arith.constant 0 : index
    %c960 = arith.constant 960 : index
    %67 = vector.load %arg25[%c0_26, %c960] : memref<32x1024xbf16, #tpu.memory_space<vmem>>, vector<32x64xbf16>
    tpu.vector_store %arg25[%c0_26, %c960], %66 {strides = array<i32>} : memref<32x1024xbf16, #tpu.memory_space<vmem>>, vector<32x64xbf16>,
    %c0_27 = arith.constant 0 : index
    %c0_28 = arith.constant 0 : index
    %68 = vector.load %arg25[%c0_27, %c0_28] : memref<32x1024xbf16, #tpu.memory_space<vmem>>, vector<32x1024xbf16>
    %cst_29 = arith.constant dense<0.000000e+00> : vector<32x128xf32>
    %69 = tpu.matmul %68, %16, %cst_29 {dimension_numbers = #tpu.dot_dimension_numbers<[1], [0], [0], [1], [0, 0, 1, 1], [], []>} : vector<32x1024xbf16>, vector<1024x128xbf16>, vector<32x128xf32> -> vector<32x128xf32>
    %cst_30 = arith.constant dense<0.000000e+00> : vector<128xf32>
    %70 = vector.multi_reduction <add>, %69, %cst_30 [0] : vector<32x128xf32> to vector<128xf32>
    %71 = vector.shape_cast %70 : vector<128xf32> to vector<1x128xf32>
    %cst_31 = arith.constant 3.200000e+01 : f32
    %72 = vector.broadcast %cst_31 : f32 to vector<1x128xf32>
    %73 = arith.divf %71, %72 : vector<1x128xf32>
    %74 = vector.broadcast %73 : vector<1x128xf32> to vector<32x128xf32>
    %75 = arith.subf %69, %74 : vector<32x128xf32>
    %76 = arith.mulf %75, %75 : vector<32x128xf32>
    %cst_32 = arith.constant dense<0.000000e+00> : vector<128xf32>
    %77 = vector.multi_reduction <add>, %76, %cst_32 [0] : vector<32x128xf32> to vector<128xf32>
    %78 = vector.shape_cast %77 : vector<128xf32> to vector<1x128xf32>
    %cst_33 = arith.constant 3.200000e+01 : f32
    %79 = vector.broadcast %cst_33 : f32 to vector<1x128xf32>
    %80 = arith.divf %78, %79 : vector<1x128xf32>
    %81 = vector.broadcast %73 : vector<1x128xf32> to vector<32x128xf32>
    %82 = arith.subf %69, %81 : vector<32x128xf32>
    %cst_34 = arith.constant 9.99999974E-6 : f32
    %83 = vector.broadcast %cst_34 : f32 to vector<1x128xf32>
    %84 = arith.addf %80, %83 : vector<1x128xf32>
    %85 = math.rsqrt %84 : vector<1x128xf32>
    %86 = vector.broadcast %85 : vector<1x128xf32> to vector<32x128xf32>
    %87 = arith.mulf %82, %86 : vector<32x128xf32>
    %c0_35 = arith.constant 0 : index
    %c0_36 = arith.constant 0 : index
    %88 = vector.load %arg4[%c0_35, %c0_36] : memref<1x128xf32, #tpu.memory_space<vmem>>, vector<1x128xf32>
    %89 = vector.broadcast %88 : vector<1x128xf32> to vector<32x128xf32>
    %90 = arith.mulf %87, %89 : vector<32x128xf32>
    %c0_37 = arith.constant 0 : index
    %c0_38 = arith.constant 0 : index
    %91 = vector.load %arg5[%c0_37, %c0_38] : memref<1x128xf32, #tpu.memory_space<vmem>>, vector<1x128xf32>
    %92 = vector.broadcast %91 : vector<1x128xf32> to vector<32x128xf32>
    %93 = arith.addf %90, %92 : vector<32x128xf32>
    %cst_39 = arith.constant 0.000000e+00 : f32
    %94 = vector.broadcast %cst_39 : f32 to vector<32x128xf32>
    %95 = arith.cmpf ogt, %93, %94 : vector<32x128xf32>
    %cst_40 = arith.constant 2.000000e-01 : f32
    %96 = vector.broadcast %cst_40 : f32 to vector<32x128xf32>
    %97 = arith.mulf %96, %93 : vector<32x128xf32>
    %98 = arith.select %95, %93, %97 : vector<32x128xi1>, vector<32x128xf32>
    %c0_41 = arith.constant 0 : index
    %c0_42 = arith.constant 0 : index
    %99 = vector.load %arg7[%c0_41, %c0_42] : memref<2048x256xbf16, #tpu.memory_space<vmem>>, vector<2048x256xbf16>
    %c0_43 = arith.constant 0 : index
    %c0_44 = arith.constant 0 : index
    %100 = vector.load %arg6[%c0_43, %c0_44] : memref<128x32xbf16, #tpu.memory_space<vmem>>, vector<128x32xbf16>
    %101 = arith.truncf %98 : vector<32x128xf32> to vector<32x128xbf16>
    %cst_45 = arith.constant dense<0.000000e+00> : vector<128x128xf32>
    %102 = tpu.matmul %100, %101, %cst_45 {dimension_numbers = #tpu.dot_dimension_numbers<[1], [0], [0], [1], [0, 0, 1, 1], [], []>} : vector<128x32xbf16>, vector<32x128xbf16>, vector<128x128xf32> -> vector<128x128xf32>
    %103 = vector.extract_strided_slice %102 {offsets = [0, 0], sizes = [8, 128], strides = [1, 1]} : vector<128x128xf32> to vector<8x128xf32>
    %104 = arith.truncf %103 : vector<8x128xf32> to vector<8x128xbf16>
    %c0_46 = arith.constant 0 : index
    %c0_47 = arith.constant 0 : index
    %105 = vector.load %arg26[%c0_46, %c0_47] : memref<8x2048xbf16, #tpu.memory_space<vmem>>, vector<8x128xbf16>
    tpu.vector_store %arg26[%c0_46, %c0_47], %104 {strides = array<i32>} : memref<8x2048xbf16, #tpu.memory_space<vmem>>, vector<8x128xbf16>,
    %106 = vector.extract_strided_slice %102 {offsets = [8, 0], sizes = [8, 128], strides = [1, 1]} : vector<128x128xf32> to vector<8x128xf32>
    %107 = arith.truncf %106 : vector<8x128xf32> to vector<8x128xbf16>
    %c0_48 = arith.constant 0 : index
    %c128_49 = arith.constant 128 : index
    %108 = vector.load %arg26[%c0_48, %c128_49] : memref<8x2048xbf16, #tpu.memory_space<vmem>>, vector<8x128xbf16>
    tpu.vector_store %arg26[%c0_48, %c128_49], %107 {strides = array<i32>} : memref<8x2048xbf16, #tpu.memory_space<vmem>>, vector<8x128xbf16>,
    %109 = vector.extract_strided_slice %102 {offsets = [16, 0], sizes = [8, 128], strides = [1, 1]} : vector<128x128xf32> to vector<8x128xf32>
    %110 = arith.truncf %109 : vector<8x128xf32> to vector<8x128xbf16>
    %c0_50 = arith.constant 0 : index
    %c256_51 = arith.constant 256 : index
    %111 = vector.load %arg26[%c0_50, %c256_51] : memref<8x2048xbf16, #tpu.memory_space<vmem>>, vector<8x128xbf16>
    tpu.vector_store %arg26[%c0_50, %c256_51], %110 {strides = array<i32>} : memref<8x2048xbf16, #tpu.memory_space<vmem>>, vector<8x128xbf16>,
    %112 = vector.extract_strided_slice %102 {offsets = [24, 0], sizes = [8, 128], strides = [1, 1]} : vector<128x128xf32> to vector<8x128xf32>
    %113 = arith.truncf %112 : vector<8x128xf32> to vector<8x128xbf16>
    %c0_52 = arith.constant 0 : index
    %c384_53 = arith.constant 384 : index
    %114 = vector.load %arg26[%c0_52, %c384_53] : memref<8x2048xbf16, #tpu.memory_space<vmem>>, vector<8x128xbf16>
    tpu.vector_store %arg26[%c0_52, %c384_53], %113 {strides = array<i32>} : memref<8x2048xbf16, #tpu.memory_space<vmem>>, vector<8x128xbf16>,
    %115 = vector.extract_strided_slice %102 {offsets = [32, 0], sizes = [8, 128], strides = [1, 1]} : vector<128x128xf32> to vector<8x128xf32>
    %116 = arith.truncf %115 : vector<8x128xf32> to vector<8x128xbf16>
    %c0_54 = arith.constant 0 : index
    %c512_55 = arith.constant 512 : index
    %117 = vector.load %arg26[%c0_54, %c512_55] : memref<8x2048xbf16, #tpu.memory_space<vmem>>, vector<8x128xbf16>
    tpu.vector_store %arg26[%c0_54, %c512_55], %116 {strides = array<i32>} : memref<8x2048xbf16, #tpu.memory_space<vmem>>, vector<8x128xbf16>,
    %118 = vector.extract_strided_slice %102 {offsets = [40, 0], sizes = [8, 128], strides = [1, 1]} : vector<128x128xf32> to vector<8x128xf32>
    %119 = arith.truncf %118 : vector<8x128xf32> to vector<8x128xbf16>
    %c0_56 = arith.constant 0 : index
    %c640_57 = arith.constant 640 : index
    %120 = vector.load %arg26[%c0_56, %c640_57] : memref<8x2048xbf16, #tpu.memory_space<vmem>>, vector<8x128xbf16>
    tpu.vector_store %arg26[%c0_56, %c640_57], %119 {strides = array<i32>} : memref<8x2048xbf16, #tpu.memory_space<vmem>>, vector<8x128xbf16>,
    %121 = vector.extract_strided_slice %102 {offsets = [48, 0], sizes = [8, 128], strides = [1, 1]} : vector<128x128xf32> to vector<8x128xf32>
    %122 = arith.truncf %121 : vector<8x128xf32> to vector<8x128xbf16>
    %c0_58 = arith.constant 0 : index
    %c768_59 = arith.constant 768 : index
    %123 = vector.load %arg26[%c0_58, %c768_59] : memref<8x2048xbf16, #tpu.memory_space<vmem>>, vector<8x128xbf16>
    tpu.vector_store %arg26[%c0_58, %c768_59], %122 {strides = array<i32>} : memref<8x2048xbf16, #tpu.memory_space<vmem>>, vector<8x128xbf16>,
    %124 = vector.extract_strided_slice %102 {offsets = [56, 0], sizes = [8, 128], strides = [1, 1]} : vector<128x128xf32> to vector<8x128xf32>
    %125 = arith.truncf %124 : vector<8x128xf32> to vector<8x128xbf16>
    %c0_60 = arith.constant 0 : index
    %c896_61 = arith.constant 896 : index
    %126 = vector.load %arg26[%c0_60, %c896_61] : memref<8x2048xbf16, #tpu.memory_space<vmem>>, vector<8x128xbf16>
    tpu.vector_store %arg26[%c0_60, %c896_61], %125 {strides = array<i32>} : memref<8x2048xbf16, #tpu.memory_space<vmem>>, vector<8x128xbf16>,
    %127 = vector.extract_strided_slice %102 {offsets = [64, 0], sizes = [8, 128], strides = [1, 1]} : vector<128x128xf32> to vector<8x128xf32>
    %128 = arith.truncf %127 : vector<8x128xf32> to vector<8x128xbf16>
    %c0_62 = arith.constant 0 : index
    %c1024 = arith.constant 1024 : index
    %129 = vector.load %arg26[%c0_62, %c1024] : memref<8x2048xbf16, #tpu.memory_space<vmem>>, vector<8x128xbf16>
    tpu.vector_store %arg26[%c0_62, %c1024], %128 {strides = array<i32>} : memref<8x2048xbf16, #tpu.memory_space<vmem>>, vector<8x128xbf16>,
    %130 = vector.extract_strided_slice %102 {offsets = [72, 0], sizes = [8, 128], strides = [1, 1]} : vector<128x128xf32> to vector<8x128xf32>
    %131 = arith.truncf %130 : vector<8x128xf32> to vector<8x128xbf16>
    %c0_63 = arith.constant 0 : index
    %c1152 = arith.constant 1152 : index
    %132 = vector.load %arg26[%c0_63, %c1152] : memref<8x2048xbf16, #tpu.memory_space<vmem>>, vector<8x128xbf16>
    tpu.vector_store %arg26[%c0_63, %c1152], %131 {strides = array<i32>} : memref<8x2048xbf16, #tpu.memory_space<vmem>>, vector<8x128xbf16>,
    %133 = vector.extract_strided_slice %102 {offsets = [80, 0], sizes = [8, 128], strides = [1, 1]} : vector<128x128xf32> to vector<8x128xf32>
    %134 = arith.truncf %133 : vector<8x128xf32> to vector<8x128xbf16>
    %c0_64 = arith.constant 0 : index
    %c1280 = arith.constant 1280 : index
    %135 = vector.load %arg26[%c0_64, %c1280] : memref<8x2048xbf16, #tpu.memory_space<vmem>>, vector<8x128xbf16>
    tpu.vector_store %arg26[%c0_64, %c1280], %134 {strides = array<i32>} : memref<8x2048xbf16, #tpu.memory_space<vmem>>, vector<8x128xbf16>,
    %136 = vector.extract_strided_slice %102 {offsets = [88, 0], sizes = [8, 128], strides = [1, 1]} : vector<128x128xf32> to vector<8x128xf32>
    %137 = arith.truncf %136 : vector<8x128xf32> to vector<8x128xbf16>
    %c0_65 = arith.constant 0 : index
    %c1408 = arith.constant 1408 : index
    %138 = vector.load %arg26[%c0_65, %c1408] : memref<8x2048xbf16, #tpu.memory_space<vmem>>, vector<8x128xbf16>
    tpu.vector_store %arg26[%c0_65, %c1408], %137 {strides = array<i32>} : memref<8x2048xbf16, #tpu.memory_space<vmem>>, vector<8x128xbf16>,
    %139 = vector.extract_strided_slice %102 {offsets = [96, 0], sizes = [8, 128], strides = [1, 1]} : vector<128x128xf32> to vector<8x128xf32>
    %140 = arith.truncf %139 : vector<8x128xf32> to vector<8x128xbf16>
    %c0_66 = arith.constant 0 : index
    %c1536 = arith.constant 1536 : index
    %141 = vector.load %arg26[%c0_66, %c1536] : memref<8x2048xbf16, #tpu.memory_space<vmem>>, vector<8x128xbf16>
    tpu.vector_store %arg26[%c0_66, %c1536], %140 {strides = array<i32>} : memref<8x2048xbf16, #tpu.memory_space<vmem>>, vector<8x128xbf16>,
    %142 = vector.extract_strided_slice %102 {offsets = [104, 0], sizes = [8, 128], strides = [1, 1]} : vector<128x128xf32> to vector<8x128xf32>
    %143 = arith.truncf %142 : vector<8x128xf32> to vector<8x128xbf16>
    %c0_67 = arith.constant 0 : index
    %c1664 = arith.constant 1664 : index
    %144 = vector.load %arg26[%c0_67, %c1664] : memref<8x2048xbf16, #tpu.memory_space<vmem>>, vector<8x128xbf16>
    tpu.vector_store %arg26[%c0_67, %c1664], %143 {strides = array<i32>} : memref<8x2048xbf16, #tpu.memory_space<vmem>>, vector<8x128xbf16>,
    %145 = vector.extract_strided_slice %102 {offsets = [112, 0], sizes = [8, 128], strides = [1, 1]} : vector<128x128xf32> to vector<8x128xf32>
    %146 = arith.truncf %145 : vector<8x128xf32> to vector<8x128xbf16>
    %c0_68 = arith.constant 0 : index
    %c1792 = arith.constant 1792 : index
    %147 = vector.load %arg26[%c0_68, %c1792] : memref<8x2048xbf16, #tpu.memory_space<vmem>>, vector<8x128xbf16>
    tpu.vector_store %arg26[%c0_68, %c1792], %146 {strides = array<i32>} : memref<8x2048xbf16, #tpu.memory_space<vmem>>, vector<8x128xbf16>,
    %148 = vector.extract_strided_slice %102 {offsets = [120, 0], sizes = [8, 128], strides = [1, 1]} : vector<128x128xf32> to vector<8x128xf32>
    %149 = arith.truncf %148 : vector<8x128xf32> to vector<8x128xbf16>
    %c0_69 = arith.constant 0 : index
    %c1920 = arith.constant 1920 : index
    %150 = vector.load %arg26[%c0_69, %c1920] : memref<8x2048xbf16, #tpu.memory_space<vmem>>, vector<8x128xbf16>
    tpu.vector_store %arg26[%c0_69, %c1920], %149 {strides = array<i32>} : memref<8x2048xbf16, #tpu.memory_space<vmem>>, vector<8x128xbf16>,
    %c0_70 = arith.constant 0 : index
    %c0_71 = arith.constant 0 : index
    %151 = vector.load %arg26[%c0_70, %c0_71] : memref<8x2048xbf16, #tpu.memory_space<vmem>>, vector<8x2048xbf16>
    %cst_72 = arith.constant dense<0.000000e+00> : vector<8x256xf32>
    %152 = tpu.matmul %151, %99, %cst_72 {dimension_numbers = #tpu.dot_dimension_numbers<[1], [0], [0], [1], [0, 0, 1, 1], [], []>} : vector<8x2048xbf16>, vector<2048x256xbf16>, vector<8x256xf32> -> vector<8x256xf32>
    %cst_73 = arith.constant dense<0.000000e+00> : vector<256xf32>
    %153 = vector.multi_reduction <add>, %152, %cst_73 [0] : vector<8x256xf32> to vector<256xf32>
    %154 = vector.shape_cast %153 : vector<256xf32> to vector<1x256xf32>
    %cst_74 = arith.constant 8.000000e+00 : f32
    %155 = vector.broadcast %cst_74 : f32 to vector<1x256xf32>
    %156 = arith.divf %154, %155 : vector<1x256xf32>
    %157 = vector.broadcast %156 : vector<1x256xf32> to vector<8x256xf32>
    %158 = arith.subf %152, %157 : vector<8x256xf32>
    %159 = arith.mulf %158, %158 : vector<8x256xf32>
    %cst_75 = arith.constant dense<0.000000e+00> : vector<256xf32>
    %160 = vector.multi_reduction <add>, %159, %cst_75 [0] : vector<8x256xf32> to vector<256xf32>
    %161 = vector.shape_cast %160 : vector<256xf32> to vector<1x256xf32>
    %cst_76 = arith.constant 8.000000e+00 : f32
    %162 = vector.broadcast %cst_76 : f32 to vector<1x256xf32>
    %163 = arith.divf %161, %162 : vector<1x256xf32>
    %164 = vector.broadcast %156 : vector<1x256xf32> to vector<8x256xf32>
    %165 = arith.subf %152, %164 : vector<8x256xf32>
    %cst_77 = arith.constant 9.99999974E-6 : f32
    %166 = vector.broadcast %cst_77 : f32 to vector<1x256xf32>
    %167 = arith.addf %163, %166 : vector<1x256xf32>
    %168 = math.rsqrt %167 : vector<1x256xf32>
    %169 = vector.broadcast %168 : vector<1x256xf32> to vector<8x256xf32>
    %170 = arith.mulf %165, %169 : vector<8x256xf32>
    %c0_78 = arith.constant 0 : index
    %c0_79 = arith.constant 0 : index
    %171 = vector.load %arg8[%c0_78, %c0_79] : memref<1x256xf32, #tpu.memory_space<vmem>>, vector<1x256xf32>
    %172 = vector.broadcast %171 : vector<1x256xf32> to vector<8x256xf32>
    %173 = arith.mulf %170, %172 : vector<8x256xf32>
    %c0_80 = arith.constant 0 : index
    %c0_81 = arith.constant 0 : index
    %174 = vector.load %arg9[%c0_80, %c0_81] : memref<1x256xf32, #tpu.memory_space<vmem>>, vector<1x256xf32>
    %175 = vector.broadcast %174 : vector<1x256xf32> to vector<8x256xf32>
    %176 = arith.addf %173, %175 : vector<8x256xf32>
    %cst_82 = arith.constant 0.000000e+00 : f32
    %177 = vector.broadcast %cst_82 : f32 to vector<8x256xf32>
    %178 = arith.cmpf ogt, %176, %177 : vector<8x256xf32>
    %cst_83 = arith.constant 2.000000e-01 : f32
    %179 = vector.broadcast %cst_83 : f32 to vector<8x256xf32>
    %180 = arith.mulf %179, %176 : vector<8x256xf32>
    %181 = arith.select %178, %176, %180 : vector<8x256xi1>, vector<8x256xf32>
    %c0_i32_84 = arith.constant 0 : i32
    %182 = tpu.memref_slice %arg32[%c0_i32_84] : memref<4x!tpu.dma_semaphore, #tpu.memory_space<semaphore_mem>> -> memref<1x!tpu.dma_semaphore, #tpu.memory_space<semaphore_mem>>
    %183 = tpu.memref_squeeze %182 : memref<1x!tpu.dma_semaphore, #tpu.memory_space<semaphore_mem>> -> memref<!tpu.dma_semaphore, #tpu.memory_space<semaphore_mem>>
    tpu.wait_dma2 semaphore(%183 : memref<!tpu.dma_semaphore, #tpu.memory_space<semaphore_mem>>) src(%arg20 : memref<4096x512xbf16, #tpu.memory_space<any>>) dst(%arg28 : memref<4096x512xbf16, #tpu.memory_space<vmem>>)
    %c0_85 = arith.constant 0 : index
    %c0_86 = arith.constant 0 : index
    %184 = vector.load %arg28[%c0_85, %c0_86] : memref<4096x512xbf16, #tpu.memory_space<vmem>>, vector<4096x512xbf16>
    %c0_87 = arith.constant 0 : index
    %c0_88 = arith.constant 0 : index
    %185 = vector.load %arg10[%c0_87, %c0_88] : memref<128x8xbf16, #tpu.memory_space<vmem>>, vector<128x8xbf16>
    %186 = arith.truncf %181 : vector<8x256xf32> to vector<8x256xbf16>
    %cst_89 = arith.constant dense<0.000000e+00> : vector<128x256xf32>
    %187 = tpu.matmul %185, %186, %cst_89 {dimension_numbers = #tpu.dot_dimension_numbers<[1], [0], [0], [1], [0, 0, 1, 1], [], []>} : vector<128x8xbf16>, vector<8x256xbf16>, vector<128x256xf32> -> vector<128x256xf32>
    %188 = vector.extract_strided_slice %187 {offsets = [0, 0], sizes = [2, 256], strides = [1, 1]} : vector<128x256xf32> to vector<2x256xf32>
    %189 = arith.truncf %188 : vector<2x256xf32> to vector<2x256xbf16>
    %c0_90 = arith.constant 0 : index
    %c0_91 = arith.constant 0 : index
    %190 = vector.load %arg27[%c0_90, %c0_91] : memref<2x4096xbf16, #tpu.memory_space<vmem>>, vector<2x256xbf16>
    tpu.vector_store %arg27[%c0_90, %c0_91], %189 {strides = array<i32>} : memref<2x4096xbf16, #tpu.memory_space<vmem>>, vector<2x256xbf16>,
    %191 = vector.extract_strided_slice %187 {offsets = [8, 0], sizes = [2, 256], strides = [1, 1]} : vector<128x256xf32> to vector<2x256xf32>
    %192 = arith.truncf %191 : vector<2x256xf32> to vector<2x256xbf16>
    %c0_92 = arith.constant 0 : index
    %c256_93 = arith.constant 256 : index
    %193 = vector.load %arg27[%c0_92, %c256_93] : memref<2x4096xbf16, #tpu.memory_space<vmem>>, vector<2x256xbf16>
    tpu.vector_store %arg27[%c0_92, %c256_93], %192 {strides = array<i32>} : memref<2x4096xbf16, #tpu.memory_space<vmem>>, vector<2x256xbf16>,
    %194 = vector.extract_strided_slice %187 {offsets = [16, 0], sizes = [2, 256], strides = [1, 1]} : vector<128x256xf32> to vector<2x256xf32>
    %195 = arith.truncf %194 : vector<2x256xf32> to vector<2x256xbf16>
    %c0_94 = arith.constant 0 : index
    %c512_95 = arith.constant 512 : index
    %196 = vector.load %arg27[%c0_94, %c512_95] : memref<2x4096xbf16, #tpu.memory_space<vmem>>, vector<2x256xbf16>
    tpu.vector_store %arg27[%c0_94, %c512_95], %195 {strides = array<i32>} : memref<2x4096xbf16, #tpu.memory_space<vmem>>, vector<2x256xbf16>,
    %197 = vector.extract_strided_slice %187 {offsets = [24, 0], sizes = [2, 256], strides = [1, 1]} : vector<128x256xf32> to vector<2x256xf32>
    %198 = arith.truncf %197 : vector<2x256xf32> to vector<2x256xbf16>
    %c0_96 = arith.constant 0 : index
    %c768_97 = arith.constant 768 : index
    %199 = vector.load %arg27[%c0_96, %c768_97] : memref<2x4096xbf16, #tpu.memory_space<vmem>>, vector<2x256xbf16>
    tpu.vector_store %arg27[%c0_96, %c768_97], %198 {strides = array<i32>} : memref<2x4096xbf16, #tpu.memory_space<vmem>>, vector<2x256xbf16>,
    %200 = vector.extract_strided_slice %187 {offsets = [32, 0], sizes = [2, 256], strides = [1, 1]} : vector<128x256xf32> to vector<2x256xf32>
    %201 = arith.truncf %200 : vector<2x256xf32> to vector<2x256xbf16>
    %c0_98 = arith.constant 0 : index
    %c1024_99 = arith.constant 1024 : index
    %202 = vector.load %arg27[%c0_98, %c1024_99] : memref<2x4096xbf16, #tpu.memory_space<vmem>>, vector<2x256xbf16>
    tpu.vector_store %arg27[%c0_98, %c1024_99], %201 {strides = array<i32>} : memref<2x4096xbf16, #tpu.memory_space<vmem>>, vector<2x256xbf16>,
    %203 = vector.extract_strided_slice %187 {offsets = [40, 0], sizes = [2, 256], strides = [1, 1]} : vector<128x256xf32> to vector<2x256xf32>
    %204 = arith.truncf %203 : vector<2x256xf32> to vector<2x256xbf16>
    %c0_100 = arith.constant 0 : index
    %c1280_101 = arith.constant 1280 : index
    %205 = vector.load %arg27[%c0_100, %c1280_101] : memref<2x4096xbf16, #tpu.memory_space<vmem>>, vector<2x256xbf16>
    tpu.vector_store %arg27[%c0_100, %c1280_101], %204 {strides = array<i32>} : memref<2x4096xbf16, #tpu.memory_space<vmem>>, vector<2x256xbf16>,
    %206 = vector.extract_strided_slice %187 {offsets = [48, 0], sizes = [2, 256], strides = [1, 1]} : vector<128x256xf32> to vector<2x256xf32>
    %207 = arith.truncf %206 : vector<2x256xf32> to vector<2x256xbf16>
    %c0_102 = arith.constant 0 : index
    %c1536_103 = arith.constant 1536 : index
    %208 = vector.load %arg27[%c0_102, %c1536_103] : memref<2x4096xbf16, #tpu.memory_space<vmem>>, vector<2x256xbf16>
    tpu.vector_store %arg27[%c0_102, %c1536_103], %207 {strides = array<i32>} : memref<2x4096xbf16, #tpu.memory_space<vmem>>, vector<2x256xbf16>,
    %209 = vector.extract_strided_slice %187 {offsets = [56, 0], sizes = [2, 256], strides = [1, 1]} : vector<128x256xf32> to vector<2x256xf32>
    %210 = arith.truncf %209 : vector<2x256xf32> to vector<2x256xbf16>
    %c0_104 = arith.constant 0 : index
    %c1792_105 = arith.constant 1792 : index
    %211 = vector.load %arg27[%c0_104, %c1792_105] : memref<2x4096xbf16, #tpu.memory_space<vmem>>, vector<2x256xbf16>
    tpu.vector_store %arg27[%c0_104, %c1792_105], %210 {strides = array<i32>} : memref<2x4096xbf16, #tpu.memory_space<vmem>>, vector<2x256xbf16>,
    %212 = vector.extract_strided_slice %187 {offsets = [64, 0], sizes = [2, 256], strides = [1, 1]} : vector<128x256xf32> to vector<2x256xf32>
    %213 = arith.truncf %212 : vector<2x256xf32> to vector<2x256xbf16>
    %c0_106 = arith.constant 0 : index
    %c2048 = arith.constant 2048 : index
    %214 = vector.load %arg27[%c0_106, %c2048] : memref<2x4096xbf16, #tpu.memory_space<vmem>>, vector<2x256xbf16>
    tpu.vector_store %arg27[%c0_106, %c2048], %213 {strides = array<i32>} : memref<2x4096xbf16, #tpu.memory_space<vmem>>, vector<2x256xbf16>,
    %215 = vector.extract_strided_slice %187 {offsets = [72, 0], sizes = [2, 256], strides = [1, 1]} : vector<128x256xf32> to vector<2x256xf32>
    %216 = arith.truncf %215 : vector<2x256xf32> to vector<2x256xbf16>
    %c0_107 = arith.constant 0 : index
    %c2304 = arith.constant 2304 : index
    %217 = vector.load %arg27[%c0_107, %c2304] : memref<2x4096xbf16, #tpu.memory_space<vmem>>, vector<2x256xbf16>
    tpu.vector_store %arg27[%c0_107, %c2304], %216 {strides = array<i32>} : memref<2x4096xbf16, #tpu.memory_space<vmem>>, vector<2x256xbf16>,
    %218 = vector.extract_strided_slice %187 {offsets = [80, 0], sizes = [2, 256], strides = [1, 1]} : vector<128x256xf32> to vector<2x256xf32>
    %219 = arith.truncf %218 : vector<2x256xf32> to vector<2x256xbf16>
    %c0_108 = arith.constant 0 : index
    %c2560 = arith.constant 2560 : index
    %220 = vector.load %arg27[%c0_108, %c2560] : memref<2x4096xbf16, #tpu.memory_space<vmem>>, vector<2x256xbf16>
    tpu.vector_store %arg27[%c0_108, %c2560], %219 {strides = array<i32>} : memref<2x4096xbf16, #tpu.memory_space<vmem>>, vector<2x256xbf16>,
    %221 = vector.extract_strided_slice %187 {offsets = [88, 0], sizes = [2, 256], strides = [1, 1]} : vector<128x256xf32> to vector<2x256xf32>
    %222 = arith.truncf %221 : vector<2x256xf32> to vector<2x256xbf16>
    %c0_109 = arith.constant 0 : index
    %c2816 = arith.constant 2816 : index
    %223 = vector.load %arg27[%c0_109, %c2816] : memref<2x4096xbf16, #tpu.memory_space<vmem>>, vector<2x256xbf16>
    tpu.vector_store %arg27[%c0_109, %c2816], %222 {strides = array<i32>} : memref<2x4096xbf16, #tpu.memory_space<vmem>>, vector<2x256xbf16>,
    %224 = vector.extract_strided_slice %187 {offsets = [96, 0], sizes = [2, 256], strides = [1, 1]} : vector<128x256xf32> to vector<2x256xf32>
    %225 = arith.truncf %224 : vector<2x256xf32> to vector<2x256xbf16>
    %c0_110 = arith.constant 0 : index
    %c3072 = arith.constant 3072 : index
    %226 = vector.load %arg27[%c0_110, %c3072] : memref<2x4096xbf16, #tpu.memory_space<vmem>>, vector<2x256xbf16>
    tpu.vector_store %arg27[%c0_110, %c3072], %225 {strides = array<i32>} : memref<2x4096xbf16, #tpu.memory_space<vmem>>, vector<2x256xbf16>,
    %227 = vector.extract_strided_slice %187 {offsets = [104, 0], sizes = [2, 256], strides = [1, 1]} : vector<128x256xf32> to vector<2x256xf32>
    %228 = arith.truncf %227 : vector<2x256xf32> to vector<2x256xbf16>
    %c0_111 = arith.constant 0 : index
    %c3328 = arith.constant 3328 : index
    %229 = vector.load %arg27[%c0_111, %c3328] : memref<2x4096xbf16, #tpu.memory_space<vmem>>, vector<2x256xbf16>
    tpu.vector_store %arg27[%c0_111, %c3328], %228 {strides = array<i32>} : memref<2x4096xbf16, #tpu.memory_space<vmem>>, vector<2x256xbf16>,
    %230 = vector.extract_strided_slice %187 {offsets = [112, 0], sizes = [2, 256], strides = [1, 1]} : vector<128x256xf32> to vector<2x256xf32>
    %231 = arith.truncf %230 : vector<2x256xf32> to vector<2x256xbf16>
    %c0_112 = arith.constant 0 : index
    %c3584 = arith.constant 3584 : index
    %232 = vector.load %arg27[%c0_112, %c3584] : memref<2x4096xbf16, #tpu.memory_space<vmem>>, vector<2x256xbf16>
    tpu.vector_store %arg27[%c0_112, %c3584], %231 {strides = array<i32>} : memref<2x4096xbf16, #tpu.memory_space<vmem>>, vector<2x256xbf16>,
    %233 = vector.extract_strided_slice %187 {offsets = [120, 0], sizes = [2, 256], strides = [1, 1]} : vector<128x256xf32> to vector<2x256xf32>
    %234 = arith.truncf %233 : vector<2x256xf32> to vector<2x256xbf16>
    %c0_113 = arith.constant 0 : index
    %c3840 = arith.constant 3840 : index
    %235 = vector.load %arg27[%c0_113, %c3840] : memref<2x4096xbf16, #tpu.memory_space<vmem>>, vector<2x256xbf16>
    tpu.vector_store %arg27[%c0_113, %c3840], %234 {strides = array<i32>} : memref<2x4096xbf16, #tpu.memory_space<vmem>>, vector<2x256xbf16>,
    %c0_114 = arith.constant 0 : index
    %c0_115 = arith.constant 0 : index
    %236 = vector.load %arg27[%c0_114, %c0_115] : memref<2x4096xbf16, #tpu.memory_space<vmem>>, vector<2x4096xbf16>
    %cst_116 = arith.constant dense<0.000000e+00> : vector<2x512xf32>
    %237 = tpu.matmul %236, %184, %cst_116 {dimension_numbers = #tpu.dot_dimension_numbers<[1], [0], [0], [1], [0, 0, 1, 1], [], []>} : vector<2x4096xbf16>, vector<4096x512xbf16>, vector<2x512xf32> -> vector<2x512xf32>
    %cst_117 = arith.constant dense<0.000000e+00> : vector<512xf32>
    %238 = vector.multi_reduction <add>, %237, %cst_117 [0] : vector<2x512xf32> to vector<512xf32>
    %239 = vector.shape_cast %238 : vector<512xf32> to vector<1x512xf32>
    %cst_118 = arith.constant 2.000000e+00 : f32
    %240 = vector.broadcast %cst_118 : f32 to vector<1x512xf32>
    %241 = arith.divf %239, %240 : vector<1x512xf32>
    %242 = vector.broadcast %241 : vector<1x512xf32> to vector<2x512xf32>
    %243 = arith.subf %237, %242 : vector<2x512xf32>
    %244 = arith.mulf %243, %243 : vector<2x512xf32>
    %cst_119 = arith.constant dense<0.000000e+00> : vector<512xf32>
    %245 = vector.multi_reduction <add>, %244, %cst_119 [0] : vector<2x512xf32> to vector<512xf32>
    %246 = vector.shape_cast %245 : vector<512xf32> to vector<1x512xf32>
    %cst_120 = arith.constant 2.000000e+00 : f32
    %247 = vector.broadcast %cst_120 : f32 to vector<1x512xf32>
    %248 = arith.divf %246, %247 : vector<1x512xf32>
    %249 = vector.broadcast %241 : vector<1x512xf32> to vector<2x512xf32>
    %250 = arith.subf %237, %249 : vector<2x512xf32>
    %cst_121 = arith.constant 9.99999974E-6 : f32
    %251 = vector.broadcast %cst_121 : f32 to vector<1x512xf32>
    %252 = arith.addf %248, %251 : vector<1x512xf32>
    %253 = math.rsqrt %252 : vector<1x512xf32>
    %254 = vector.broadcast %253 : vector<1x512xf32> to vector<2x512xf32>
    %255 = arith.mulf %250, %254 : vector<2x512xf32>
    %c0_122 = arith.constant 0 : index
    %c0_123 = arith.constant 0 : index
    %256 = vector.load %arg11[%c0_122, %c0_123] : memref<1x512xf32, #tpu.memory_space<vmem>>, vector<1x512xf32>
    %257 = vector.broadcast %256 : vector<1x512xf32> to vector<2x512xf32>
    %258 = arith.mulf %255, %257 : vector<2x512xf32>
    %c0_124 = arith.constant 0 : index
    %c0_125 = arith.constant 0 : index
    %259 = vector.load %arg12[%c0_124, %c0_125] : memref<1x512xf32, #tpu.memory_space<vmem>>, vector<1x512xf32>
    %260 = vector.broadcast %259 : vector<1x512xf32> to vector<2x512xf32>
    %261 = arith.addf %258, %260 : vector<2x512xf32>
    %cst_126 = arith.constant 0.000000e+00 : f32
    %262 = vector.broadcast %cst_126 : f32 to vector<2x512xf32>
    %263 = arith.cmpf ogt, %261, %262 : vector<2x512xf32>
    %cst_127 = arith.constant 2.000000e-01 : f32
    %264 = vector.broadcast %cst_127 : f32 to vector<2x512xf32>
    %265 = arith.mulf %264, %261 : vector<2x512xf32>
    %266 = arith.select %263, %261, %265 : vector<2x512xi1>, vector<2x512xf32>
    %c0_128 = arith.constant 0 : index
    %c0_129 = arith.constant 0 : index
    %267 = vector.load %arg13[%c0_128, %c0_129] : memref<2x16xbf16, #tpu.memory_space<vmem>>, vector<2x16xbf16>
    %c0_130 = arith.constant 0 : index
    %c0_131 = arith.constant 0 : index
    %268 = vector.load %arg14[%c0_130, %c0_131] : memref<16x512xbf16, #tpu.memory_space<vmem>>, vector<16x512xbf16>
    %cst_132 = arith.constant dense<0.000000e+00> : vector<2x512xf32>
    %269 = tpu.matmul %267, %268, %cst_132 {dimension_numbers = #tpu.dot_dimension_numbers<[1], [0], [0], [1], [0, 0, 1, 1], [], []>} : vector<2x16xbf16>, vector<16x512xbf16>, vector<2x512xf32> -> vector<2x512xf32>
    %c0_133 = arith.constant 0 : index
    %c0_134 = arith.constant 0 : index
    %270 = vector.load %arg15[%c0_133, %c0_134] : memref<1x512xf32, #tpu.memory_space<vmem>>, vector<1x512xf32>
    %271 = vector.broadcast %270 : vector<1x512xf32> to vector<2x512xf32>
    %272 = arith.addf %269, %271 : vector<2x512xf32>
    %c1_i32_135 = arith.constant 1 : i32
    %273 = tpu.memref_slice %arg32[%c1_i32_135] : memref<4x!tpu.dma_semaphore, #tpu.memory_space<semaphore_mem>> -> memref<1x!tpu.dma_semaphore, #tpu.memory_space<semaphore_mem>>
    %274 = tpu.memref_squeeze %273 : memref<1x!tpu.dma_semaphore, #tpu.memory_space<semaphore_mem>> -> memref<!tpu.dma_semaphore, #tpu.memory_space<semaphore_mem>>
    tpu.wait_dma2 semaphore(%274 : memref<!tpu.dma_semaphore, #tpu.memory_space<semaphore_mem>>) src(%arg21 : memref<512x512xbf16, #tpu.memory_space<any>>) dst(%arg29 : memref<512x512xbf16, #tpu.memory_space<vmem>>)
    %c2_i32_136 = arith.constant 2 : i32
    %275 = tpu.memref_slice %arg32[%c2_i32_136] : memref<4x!tpu.dma_semaphore, #tpu.memory_space<semaphore_mem>> -> memref<1x!tpu.dma_semaphore, #tpu.memory_space<semaphore_mem>>
    %276 = tpu.memref_squeeze %275 : memref<1x!tpu.dma_semaphore, #tpu.memory_space<semaphore_mem>> -> memref<!tpu.dma_semaphore, #tpu.memory_space<semaphore_mem>>
    tpu.wait_dma2 semaphore(%276 : memref<!tpu.dma_semaphore, #tpu.memory_space<semaphore_mem>>) src(%arg22 : memref<512x512xbf16, #tpu.memory_space<any>>) dst(%arg30 : memref<512x512xbf16, #tpu.memory_space<vmem>>)
    %277 = arith.truncf %266 : vector<2x512xf32> to vector<2x512xbf16>
    %c0_137 = arith.constant 0 : index
    %c0_138 = arith.constant 0 : index
    %278 = vector.load %arg29[%c0_137, %c0_138] : memref<512x512xbf16, #tpu.memory_space<vmem>>, vector<512x512xbf16>
    %cst_139 = arith.constant dense<0.000000e+00> : vector<2x512xf32>
    %279 = tpu.matmul %277, %278, %cst_139 {dimension_numbers = #tpu.dot_dimension_numbers<[1], [0], [0], [1], [0, 0, 1, 1], [], []>} : vector<2x512xbf16>, vector<512x512xbf16>, vector<2x512xf32> -> vector<2x512xf32>
    %280 = arith.truncf %272 : vector<2x512xf32> to vector<2x512xbf16>
    %c0_140 = arith.constant 0 : index
    %c0_141 = arith.constant 0 : index
    %281 = vector.load %arg30[%c0_140, %c0_141] : memref<512x512xbf16, #tpu.memory_space<vmem>>, vector<512x512xbf16>
    %cst_142 = arith.constant dense<0.000000e+00> : vector<2x512xf32>
    %282 = tpu.matmul %280, %281, %cst_142 {dimension_numbers = #tpu.dot_dimension_numbers<[1], [0], [0], [1], [0, 0, 1, 1], [], []>} : vector<2x512xbf16>, vector<512x512xbf16>, vector<2x512xf32> -> vector<2x512xf32>
    %283 = arith.addf %279, %282 : vector<2x512xf32>
    %c0_143 = arith.constant 0 : index
    %c0_144 = arith.constant 0 : index
    %284 = vector.load %arg16[%c0_143, %c0_144] : memref<1x512xf32, #tpu.memory_space<vmem>>, vector<1x512xf32>
    %285 = vector.broadcast %284 : vector<1x512xf32> to vector<2x512xf32>
    %286 = arith.addf %283, %285 : vector<2x512xf32>
    %cst_145 = arith.constant 0.000000e+00 : f32
    %287 = vector.broadcast %cst_145 : f32 to vector<2x512xf32>
    %288 = arith.cmpf ogt, %286, %287 : vector<2x512xf32>
    %cst_146 = arith.constant 2.000000e-01 : f32
    %289 = vector.broadcast %cst_146 : f32 to vector<2x512xf32>
    %290 = arith.mulf %289, %286 : vector<2x512xf32>
    %291 = arith.select %288, %286, %290 : vector<2x512xi1>, vector<2x512xf32>
    %c3_i32_147 = arith.constant 3 : i32
    %292 = tpu.memref_slice %arg32[%c3_i32_147] : memref<4x!tpu.dma_semaphore, #tpu.memory_space<semaphore_mem>> -> memref<1x!tpu.dma_semaphore, #tpu.memory_space<semaphore_mem>>
    %293 = tpu.memref_squeeze %292 : memref<1x!tpu.dma_semaphore, #tpu.memory_space<semaphore_mem>> -> memref<!tpu.dma_semaphore, #tpu.memory_space<semaphore_mem>>
    tpu.wait_dma2 semaphore(%293 : memref<!tpu.dma_semaphore, #tpu.memory_space<semaphore_mem>>) src(%arg23 : memref<512x256xbf16, #tpu.memory_space<any>>) dst(%arg31 : memref<512x256xbf16, #tpu.memory_space<vmem>>)
    %294 = arith.truncf %291 : vector<2x512xf32> to vector<2x512xbf16>
    %c0_148 = arith.constant 0 : index
    %c0_149 = arith.constant 0 : index
    %295 = vector.load %arg31[%c0_148, %c0_149] : memref<512x256xbf16, #tpu.memory_space<vmem>>, vector<512x256xbf16>
    %cst_150 = arith.constant dense<0.000000e+00> : vector<2x256xf32>
    %296 = tpu.matmul %294, %295, %cst_150 {dimension_numbers = #tpu.dot_dimension_numbers<[1], [0], [0], [1], [0, 0, 1, 1], [], []>} : vector<2x512xbf16>, vector<512x256xbf16>, vector<2x256xf32> -> vector<2x256xf32>
    %c0_151 = arith.constant 0 : index
    %c0_152 = arith.constant 0 : index
    %297 = vector.load %arg17[%c0_151, %c0_152] : memref<1x256xf32, #tpu.memory_space<vmem>>, vector<1x256xf32>
    %298 = vector.broadcast %297 : vector<1x256xf32> to vector<2x256xf32>
    %299 = arith.addf %296, %298 : vector<2x256xf32>
    %cst_153 = arith.constant 0.000000e+00 : f32
    %300 = vector.broadcast %cst_153 : f32 to vector<2x256xf32>
    %301 = arith.cmpf ogt, %299, %300 : vector<2x256xf32>
    %cst_154 = arith.constant 2.000000e-01 : f32
    %302 = vector.broadcast %cst_154 : f32 to vector<2x256xf32>
    %303 = arith.mulf %302, %299 : vector<2x256xf32>
    %304 = arith.select %301, %299, %303 : vector<2x256xi1>, vector<2x256xf32>
    %305 = arith.truncf %304 : vector<2x256xf32> to vector<2x256xbf16>
    %c0_155 = arith.constant 0 : index
    %c0_156 = arith.constant 0 : index
    %306 = vector.load %arg18[%c0_155, %c0_156] : memref<256x1xbf16, #tpu.memory_space<vmem>>, vector<256x1xbf16>
    %cst_157 = arith.constant dense<0.000000e+00> : vector<2x1xf32>
    %307 = tpu.matmul %305, %306, %cst_157 {dimension_numbers = #tpu.dot_dimension_numbers<[1], [0], [0], [1], [0, 0, 1, 1], [], []>} : vector<2x256xbf16>, vector<256x1xbf16>, vector<2x1xf32> -> vector<2x1xf32>
    %c0_158 = arith.constant 0 : index
    %c0_159 = arith.constant 0 : index
    %308 = vector.load %arg19[%c0_158, %c0_159] : memref<1x1xf32, #tpu.memory_space<vmem>>, vector<1x1xf32>
    %309 = vector.broadcast %308 : vector<1x1xf32> to vector<2x1xf32>
    %310 = arith.addf %307, %309 : vector<2x1xf32>
    %cst_160 = arith.constant 0.000000e+00 : f32
    %311 = vector.broadcast %cst_160 : f32 to vector<2x1xf32>
    %312 = arith.subf %311, %310 : vector<2x1xf32>
    %313 = math.exp %312 : vector<2x1xf32>
    %cst_161 = arith.constant 1.000000e+00 : f32
    %314 = vector.broadcast %cst_161 : f32 to vector<2x1xf32>
    %315 = arith.addf %314, %313 : vector<2x1xf32>
    %cst_162 = arith.constant 1.000000e+00 : f32
    %316 = vector.broadcast %cst_162 : f32 to vector<2x1xf32>
    %317 = arith.divf %316, %315 : vector<2x1xf32>
    %c0_163 = arith.constant 0 : index
    %c0_164 = arith.constant 0 : index
    %318 = vector.load %arg24[%c0_163, %c0_164] : memref<2x1xf32, #tpu.memory_space<vmem>>, vector<2x1xf32>
    tpu.vector_store %arg24[%c0_163, %c0_164], %317 {strides = array<i32>} : memref<2x1xf32, #tpu.memory_space<vmem>>, vector<2x1xf32>,
    return
  }
}

</mosaic_0001>

<bundles_post_ra>
// kernel: discriminator_forward.1
= control target key start
LH: loop header
LB: loop body
LE: loop exit
PB: predicated region body
PF: predicated region fallthrough
CT: control target
= control target key end

     0   :  { %s11655_s0 = inlined_call_operand.vmem [shape: bf16[128,16], index: 0, kind: input, shape index: {}]   ;;  %s11656_s1 = inlined_call_operand.hbm [shape: bf16[16,64], index: 1, kind: input, shape index: {}]   ;;  %s11657_s2 = inlined_call_operand.hbm [shape: bf16[512,128], index: 2, kind: input, shape index: {}]   ;;  %s11658_s3 = inlined_call_operand.hbm [shape: bf16[1024,128], index: 3, kind: input, shape index: {}]   ;;  %s11659_s4 = inlined_call_operand.hbm [shape: f32[1,128], index: 4, kind: input, shape index: {}]   ;;  %s11660_s5 = inlined_call_operand.hbm [shape: f32[1,128], index: 5, kind: input, shape index: {}]   ;;  %s11661_s6 = inlined_call_operand.vmem [shape: bf16[128,32], index: 6, kind: input, shape index: {}]   ;;  %s11662_s7 = inlined_call_operand.hbm [shape: bf16[2048,256], index: 7, kind: input, shape index: {}]   ;;  %s11663_s8 = inlined_call_operand.hbm [shape: f32[1,256], index: 8, kind: input, shape index: {}]   ;;  %s11664_s9 = inlined_call_operand.hbm [shape: f32[1,256], index: 9, kind: input, shape index: {}]   ;;  %s11665_s10 = inlined_call_operand.vmem [shape: bf16[128,8], index: 10, kind: input, shape index: {}]   ;;  %s11666_s11 = inlined_call_operand.hbm [shape: f32[1,512], index: 11, kind: input, shape index: {}]   ;;  %s11667_s12 = inlined_call_operand.hbm [shape: f32[1,512], index: 12, kind: input, shape index: {}]   ;;  %s11668_s13 = inlined_call_operand.vmem [shape: bf16[2,16], index: 13, kind: input, shape index: {}]   ;;  %s11669_s14 = inlined_call_operand.hbm [shape: bf16[16,512], index: 14, kind: input, shape index: {}]   ;;  %s11670_s15 = inlined_call_operand.hbm [shape: f32[1,512], index: 15, kind: input, shape index: {}]   ;;  %s11671_s16 = inlined_call_operand.hbm [shape: f32[1,512], index: 16, kind: input, shape index: {}]   ;;  %s11672_s17 = inlined_call_operand.hbm [shape: f32[1,256], index: 17, kind: input, shape index: {}]   ;;  %s11673_s18 = inlined_call_operand.vmem [shape: bf16[256,1], index: 18, kind: input, shape index: {}]   ;;  %s11674_s19 = inlined_call_operand.<no memory space> [shape: f32[1,1], index: 19, kind: input, shape index: {}]   ;;  %s11675_s20 = inlined_call_operand.hbm [shape: bf16[4096,512], index: 20, kind: input, shape index: {}]   ;;  %s11676_s21 = inlined_call_operand.hbm [shape: bf16[512,512], index: 21, kind: input, shape index: {}]   ;;  %s11677_s22 = inlined_call_operand.hbm [shape: bf16[512,512], index: 22, kind: input, shape index: {}]   ;;  %s11678_s23 = inlined_call_operand.hbm [shape: bf16[512,256], index: 23, kind: input, shape index: {}]   ;;  %s11679_s24 = inlined_call_operand.vmem [shape: f32[2,1], index: 24, kind: output, shape index: {}]  }
   0x1   :  { %11693 = sst [smem:[#allocation53_spill]] %s11655_s0  ;;  %v29_v0 = vstv %s11674_s19 }
   0x2   :  { %11694 = sst [smem:[#allocation54_spill]] %s11656_s1  ;;  %30 = vst [vmem:[#allocation10] sm:$0x1] %v29_v0 }
   0x3   :  { %11695 = sst [smem:[#allocation55_spill]] %s11657_s2 }
   0x4   :  { %11696 = sst [smem:[#allocation56_spill]] %s11658_s3 }
   0x5   :  { %11697 = sst [smem:[#allocation57_spill]] %s11659_s4 }
   0x6   :  { %11698 = sst [smem:[#allocation58_spill]] %s11660_s5 }
   0x7   :  { %11699 = sst [smem:[#allocation59_spill]] %s11661_s6 }
   0x8   :  { %11700 = sst [smem:[#allocation60_spill]] %s11662_s7 }
   0x9   :  { %11701 = sst [smem:[#allocation61_spill]] %s11663_s8 }
   0xa   :  { %11702 = sst [smem:[#allocation62_spill]] %s11679_s24 }
   0xb   :  { %31 = vsyncpa [#allocation12], 0 }
   0xc   :  { %32 = vsyncpa [#allocation14], 0 }
   0xd   :  { %33 = vsyncpa [#allocation17], 0 }
   0xe   :  { %34 = vsyncpa [#allocation20], 0 }
   0xf   :  { %35 = vsyncpa [#allocation23], 0 }
  0x10   :  { %36 = vsyncpa [#allocation26], 0 }
  0x11   :  { %37 = vsyncpa [#allocation29], 0 }
  0x12   :  { %38 = vsyncpa [#allocation32], 0  ;;  %s10666_s27 = smov [#allocation13]   ;;  %s10667_s6 = smov [#allocation16]  }
  0x13   :  { %s58_s28 = sshll.u32 %s10666_s27, 4  ;;  %s83_s2 = sshll.u32 %s10667_s6, 4  ;;  %s59_s28 = int_to_ptr.vmem [resolvable:$true] %s58_s28  ;;  %s10830_s2 = int_to_ptr.vmem [resolvable:$true] %s83_s2 }
  0x14   :  { %s11703_s7 = sld [smem:[#allocation55_spill]] }
  0x1a   :  { %s10334_s19 = scalar_lea.hbm %s11703_s7, 4096 }
  0x1b   :  { %p10335_p0 = scmp.ne.s32.totalorder %s11703_s7, %s10334_s19  ;;  %p10338_p1 = scmp.lt.u32.totalorder %s10334_s19, %s11703_s7 }
  0x1d   :  { %p10340_p2 = pnand %p10338_p1, %p10335_p0 }
  0x1f   :  { %10343 = shalt.err (!%p10340_p2)
}
  0x20   :  { %s10344_s4 = scalar_lea.vmem %s59_s28, 4096  ;;  %p10349_p4 = scmp.lt.s32.totalorder %s59_s28, %s59_s28 }
  0x21   :  { %p10345_p3 = scmp.ne.s32.totalorder %s59_s28, %s10344_s4  ;;  %p10350_p5 = scmp.lt.s32.totalorder %s10344_s4, %s10344_s4 }
  0x23   :  { %p10351_p6 = por %p10350_p5, %p10349_p4 }
  0x25   :  { %p10352_p7 = pnand %p10351_p6, %p10345_p3 }
  0x27   :  { %10355 = shalt.err (!%p10352_p7)
}
  0x28   :  { %s11689_s1 = smov 64   ;;  %s11691_s5 = smov 4  }
  0x29   :  { %64 = dma.hbm_to_vmem [thread:$0]  %s11703_s7, 4096, %s59_s28, [#allocation14], %s11689_s1, %s11689_s1, %s11691_s5  }
  0x2a   :  { %s11704_s0 = sld [smem:[#allocation57_spill]] }
  0x30   :  { %s10356_s19 = scalar_lea.hbm %s11704_s0, 16 }
  0x31   :  { %p10357_p8 = scmp.ne.s32.totalorder %s11704_s0, %s10356_s19  ;;  %p10360_p9 = scmp.lt.u32.totalorder %s10356_s19, %s11704_s0 }
  0x33   :  { %p10362_p10 = pnand %p10360_p9, %p10357_p8 }
  0x35   :  { %10365 = shalt.err (!%p10362_p10)
}
  0x36   :  { %s10366_s4 = scalar_lea.vmem %s10830_s2, 16  ;;  %s10370_s28 = scalar_lea.vmem %s10830_s2, 32 }
  0x37   :  { %p10367_p11 = scmp.ne.s32.totalorder %s10830_s2, %s10366_s4  ;;  %p10371_p12 = scmp.lt.s32.totalorder %s10830_s2, %s10830_s2 }
  0x38   :  { %p10372_p13 = scmp.lt.s32.totalorder %s10370_s28, %s10366_s4 }
  0x3a   :  { %p10373_p0 = por %p10372_p13, %p10371_p12 }
  0x3c   :  { %p10374_p1 = pnand %p10373_p0, %p10367_p11 }
  0x3e   :  { %10377 = shalt.err (!%p10374_p1)
}
  0x3f   :  { %86 = dma.hbm_to_vmem [thread:$0]  %s11704_s0, 16, %s10830_s2, [#allocation17]  }
  0x40   :  { %s10670_s27 = smov [#allocation19]   ;;  %s11705_s30 = sld [smem:[#allocation60_spill]] }
  0x41   :  { %s104_s6 = sshll.u32 %s10670_s27, 4  ;;  %s105_s6 = int_to_ptr.vmem [resolvable:$true] %s104_s6 }
  0x46   :  { %s10378_s3 = scalar_lea.hbm %s11705_s30, 32768 }
  0x47   :  { %p10379_p2 = scmp.ne.s32.totalorder %s11705_s30, %s10378_s3  ;;  %p10382_p3 = scmp.lt.u32.totalorder %s10378_s3, %s11705_s30 }
  0x49   :  { %p10384_p4 = pnand %p10382_p3, %p10379_p2 }
  0x4b   :  { %10387 = shalt.err (!%p10384_p4)
}
  0x4c   :  { %s10388_s1 = scalar_lea.vmem %s105_s6, 32768  ;;  %p10393_p6 = scmp.lt.s32.totalorder %s105_s6, %s105_s6 }
  0x4d   :  { %p10389_p5 = scmp.ne.s32.totalorder %s105_s6, %s10388_s1  ;;  %p10394_p7 = scmp.lt.s32.totalorder %s10388_s1, %s10388_s1 }
  0x4f   :  { %p10395_p8 = por %p10394_p7, %p10393_p6 }
  0x51   :  { %p10396_p9 = pnand %p10395_p8, %p10389_p5 }
  0x53   :  { %10399 = shalt.err (!%p10396_p9)
}
  0x54   :  { %s10671_s2 = smov 128   ;;  %s10672_s0 = smov 8  }
  0x55   :  { %110 = dma.hbm_to_vmem [thread:$0]  %s11705_s30, 32768, %s105_s6, [#allocation20], %s10671_s2, %s10671_s2, %s10672_s0  }
  0x56   :  { %s10673_s27 = smov [#allocation22]   ;;  %s10674_s19 = smov [#allocation25]  }
  0x57   :  { %s127_s29 = sshll.u32 %s10673_s27, 4  ;;  %s149_s3 = sshll.u32 %s10674_s19, 4  ;;  %s128_s29 = int_to_ptr.vmem [resolvable:$true] %s127_s29  ;;  %s150_s3 = int_to_ptr.vmem [resolvable:$true] %s149_s3 }
  0x58   :  { %s10400_s1 = scalar_lea.hbm %s11664_s9, 32 }
  0x59   :  { %p10401_p10 = scmp.ne.s32.totalorder %s11664_s9, %s10400_s1  ;;  %p10404_p11 = scmp.lt.u32.totalorder %s10400_s1, %s11664_s9 }
  0x5b   :  { %p10406_p12 = pnand %p10404_p11, %p10401_p10 }
  0x5d   :  { %10409 = shalt.err (!%p10406_p12)
}
  0x5e   :  { %s10410_s6 = scalar_lea.vmem %s128_s29, 32  ;;  %p10415_p0 = scmp.lt.s32.totalorder %s128_s29, %s128_s29 }
  0x5f   :  { %p10411_p13 = scmp.ne.s32.totalorder %s128_s29, %s10410_s6  ;;  %p10416_p1 = scmp.lt.s32.totalorder %s10410_s6, %s10410_s6 }
  0x61   :  { %p10417_p2 = por %p10416_p1, %p10415_p0 }
  0x63   :  { %p10418_p3 = pnand %p10417_p2, %p10411_p13 }
  0x65   :  { %10421 = shalt.err (!%p10418_p3)
}
  0x66   :  { %130 = dma.hbm_to_vmem [thread:$0]  %s11664_s9, 32, %s128_s29, [#allocation23]  }
  0x67   :  { %s10422_s27 = scalar_lea.hbm %s11667_s12, 64 }
  0x68   :  { %p10423_p4 = scmp.ne.s32.totalorder %s11667_s12, %s10422_s27  ;;  %p10426_p5 = scmp.lt.u32.totalorder %s10422_s27, %s11667_s12 }
  0x6a   :  { %p10428_p6 = pnand %p10426_p5, %p10423_p4 }
  0x6c   :  { %10431 = shalt.err (!%p10428_p6)
}
  0x6d   :  { %s10432_s8 = scalar_lea.vmem %s150_s3, 64  ;;  %p10437_p8 = scmp.lt.s32.totalorder %s150_s3, %s150_s3 }
  0x6e   :  { %p10433_p7 = scmp.ne.s32.totalorder %s150_s3, %s10432_s8  ;;  %p10438_p9 = scmp.lt.s32.totalorder %s10432_s8, %s10432_s8 }
  0x70   :  { %p10439_p10 = por %p10438_p9, %p10437_p8 }
  0x72   :  { %p10440_p11 = pnand %p10439_p10, %p10433_p7 }
  0x74   :  { %10443 = shalt.err (!%p10440_p11)
}
  0x75   :  { %152 = dma.hbm_to_vmem [thread:$0]  %s11667_s12, 64, %s150_s3, [#allocation26]  }
  0x76   :  { %s10675_s1 = smov [#allocation28]   ;;  %s10676_s28 = smov [#allocation11]  }
  0x77   :  { %s173_s4 = sshll.u32 %s10675_s1, 4  ;;  %s46_s6 = sshll.u32 %s10676_s28, 4  ;;  %s174_s4 = int_to_ptr.vmem [resolvable:$true] %s173_s4  ;;  %s47_s6 = int_to_ptr.vmem [resolvable:$true] %s46_s6 }
  0x78   :  { %s10444_s7 = scalar_lea.hbm %s11670_s15, 64 }
  0x79   :  { %p10445_p12 = scmp.ne.s32.totalorder %s11670_s15, %s10444_s7  ;;  %p10448_p13 = scmp.lt.u32.totalorder %s10444_s7, %s11670_s15 }
  0x7b   :  { %p10450_p0 = pnand %p10448_p13, %p10445_p12 }
  0x7d   :  { %10453 = shalt.err (!%p10450_p0)
}
  0x7e   :  { %s10454_s12 = scalar_lea.vmem %s174_s4, 64  ;;  %p10459_p2 = scmp.lt.s32.totalorder %s174_s4, %s174_s4 }
  0x7f   :  { %p10455_p1 = scmp.ne.s32.totalorder %s174_s4, %s10454_s12  ;;  %p10460_p3 = scmp.lt.s32.totalorder %s10454_s12, %s10454_s12 }
  0x81   :  { %p10461_p4 = por %p10460_p3, %p10459_p2 }
  0x83   :  { %p10462_p5 = pnand %p10461_p4, %p10455_p1 }
  0x85   :  { %10465 = shalt.err (!%p10462_p5)
}
  0x86   :  { %176 = dma.hbm_to_vmem [thread:$0]  %s11670_s15, 64, %s174_s4, [#allocation29]  }
  0x87   :  { %s11706_s9 = sld [smem:[#allocation54_spill]] }
  0x8d   :  { %s10466_s29 = scalar_lea.hbm %s11706_s9, 128 }
  0x8e   :  { %p10467_p6 = scmp.ne.s32.totalorder %s11706_s9, %s10466_s29  ;;  %p10470_p7 = scmp.lt.u32.totalorder %s10466_s29, %s11706_s9 }
  0x90   :  { %p10472_p8 = pnand %p10470_p7, %p10467_p6 }
  0x92   :  { %10475 = shalt.err (!%p10472_p8)
}
  0x93   :  { %s10476_s7 = scalar_lea.vmem %s47_s6, 128  ;;  %p10481_p10 = scmp.lt.s32.totalorder %s47_s6, %s47_s6 }
  0x94   :  { %p10477_p9 = scmp.ne.s32.totalorder %s47_s6, %s10476_s7  ;;  %p10482_p11 = scmp.lt.s32.totalorder %s10476_s7, %s10476_s7 }
  0x96   :  { %p10483_p12 = por %p10482_p11, %p10481_p10 }
  0x98   :  { %p10484_p13 = pnand %p10483_p12, %p10477_p9 }
  0x9a   :  { %10487 = shalt.err (!%p10484_p13)
}
  0x9b   :  { %s11707_s15 = smov 4   ;;  %s11708_s4 = smov 64  }
  0x9c   :  { %52 = dma.hbm_to_vmem [thread:$0]  %s11706_s9, 128, %s47_s6, [#allocation12], %s11708_s4, %s11708_s4, %s11707_s15  }
  0x9d   :  { %s10677_s24 = smov [#allocation15]   ;;  %s10678_s12 = smov [#allocation18]  }
  0x9e   :  { %s70_s5 = sshll.u32 %s10677_s24, 4  ;;  %s93_s3 = sshll.u32 %s10678_s12, 4  ;;  %s71_s5 = int_to_ptr.vmem [resolvable:$true] %s70_s5  ;;  %s94_s3 = int_to_ptr.vmem [resolvable:$true] %s93_s3 }
  0x9f   :  { %s11709_s8 = sld [smem:[#allocation56_spill]] }
  0xa5   :  { %s10488_s29 = scalar_lea.hbm %s11709_s8, 8192 }
  0xa6   :  { %p10489_p0 = scmp.ne.s32.totalorder %s11709_s8, %s10488_s29  ;;  %p10492_p1 = scmp.lt.u32.totalorder %s10488_s29, %s11709_s8 }
  0xa8   :  { %p10494_p2 = pnand %p10492_p1, %p10489_p0 }
  0xaa   :  { %10497 = shalt.err (!%p10494_p2)
}
  0xab   :  { %s10498_s6 = scalar_lea.vmem %s71_s5, 8192  ;;  %p10503_p4 = scmp.lt.s32.totalorder %s71_s5, %s71_s5 }
  0xac   :  { %p10499_p3 = scmp.ne.s32.totalorder %s71_s5, %s10498_s6  ;;  %p10504_p5 = scmp.lt.s32.totalorder %s10498_s6, %s10498_s6 }
  0xae   :  { %p10505_p6 = por %p10504_p5, %p10503_p4 }
  0xb0   :  { %p10506_p7 = pnand %p10505_p6, %p10499_p3 }
  0xb2   :  { %10509 = shalt.err (!%p10506_p7)
}
  0xb3   :  { %76 = dma.hbm_to_vmem [thread:$0]  %s11709_s8, 8192, %s71_s5, [#allocation14], %s11708_s4, %s11708_s4, %s11707_s15  }
  0xb4   :  { %s11710_s24 = sld [smem:[#allocation58_spill]] }
  0xba   :  { %s10510_s12 = scalar_lea.hbm %s11710_s24, 16 }
  0xbb   :  { %p10511_p8 = scmp.ne.s32.totalorder %s11710_s24, %s10510_s12  ;;  %p10514_p9 = scmp.lt.u32.totalorder %s10510_s12, %s11710_s24 }
  0xbd   :  { %p10516_p10 = pnand %p10514_p9, %p10511_p8 }
  0xbf   :  { %10519 = shalt.err (!%p10516_p10)
}
  0xc0   :  { %s10520_s28 = scalar_lea.vmem %s94_s3, 16  ;;  %s10524_s30 = scalar_lea.vmem %s94_s3, 32 }
  0xc1   :  { %p10521_p11 = scmp.ne.s32.totalorder %s94_s3, %s10520_s28  ;;  %p10525_p12 = scmp.lt.s32.totalorder %s94_s3, %s94_s3 }
  0xc2   :  { %p10526_p13 = scmp.lt.s32.totalorder %s10524_s30, %s10520_s28 }
  0xc4   :  { %p10527_p0 = por %p10526_p13, %p10525_p12 }
  0xc6   :  { %p10528_p1 = pnand %p10527_p0, %p10521_p11 }
  0xc8   :  { %10531 = shalt.err (!%p10528_p1)
}
  0xc9   :  { %96 = dma.hbm_to_vmem [thread:$0]  %s11710_s24, 16, %s94_s3, [#allocation17]  }
  0xca   :  { %s10679_s0 = smov [#allocation21]   ;;  %s10680_s9 = smov [#allocation24]  }
  0xcb   :  { %s117_s6 = sshll.u32 %s10679_s0, 4  ;;  %s139_s7 = sshll.u32 %s10680_s9, 4  ;;  %s118_s6 = int_to_ptr.vmem [resolvable:$true] %s117_s6  ;;  %s140_s7 = int_to_ptr.vmem [resolvable:$true] %s139_s7 }
  0xcc   :  { %s11711_s12 = sld [smem:[#allocation61_spill]] }
  0xd2   :  { %s10532_s19 = scalar_lea.hbm %s11711_s12, 32 }
  0xd3   :  { %p10533_p2 = scmp.ne.s32.totalorder %s11711_s12, %s10532_s19  ;;  %p10536_p3 = scmp.lt.u32.totalorder %s10532_s19, %s11711_s12 }
  0xd5   :  { %p10538_p4 = pnand %p10536_p3, %p10533_p2 }
  0xd7   :  { %10541 = shalt.err (!%p10538_p4)
}
  0xd8   :  { %s10542_s3 = scalar_lea.vmem %s118_s6, 32  ;;  %p10547_p6 = scmp.lt.s32.totalorder %s118_s6, %s118_s6 }
  0xd9   :  { %p10543_p5 = scmp.ne.s32.totalorder %s118_s6, %s10542_s3  ;;  %p10548_p7 = scmp.lt.s32.totalorder %s10542_s3, %s10542_s3 }
  0xdb   :  { %p10549_p8 = por %p10548_p7, %p10547_p6 }
  0xdd   :  { %p10550_p9 = pnand %p10549_p8, %p10543_p5 }
  0xdf   :  { %10553 = shalt.err (!%p10550_p9)
}
  0xe0   :  { %120 = dma.hbm_to_vmem [thread:$0]  %s11711_s12, 32, %s118_s6, [#allocation20]  }
  0xe1   :  { %s10554_s0 = scalar_lea.hbm %s11666_s11, 64 }
  0xe2   :  { %p10555_p10 = scmp.ne.s32.totalorder %s11666_s11, %s10554_s0  ;;  %p10558_p11 = scmp.lt.u32.totalorder %s10554_s0, %s11666_s11 }
  0xe4   :  { %p10560_p12 = pnand %p10558_p11, %p10555_p10 }
  0xe6   :  { %10563 = shalt.err (!%p10560_p12)
}
  0xe7   :  { %s10564_s25 = scalar_lea.vmem %s140_s7, 64  ;;  %p10569_p0 = scmp.lt.s32.totalorder %s140_s7, %s140_s7 }
  0xe8   :  { %p10565_p13 = scmp.ne.s32.totalorder %s140_s7, %s10564_s25  ;;  %p10570_p1 = scmp.lt.s32.totalorder %s10564_s25, %s10564_s25 }
  0xea   :  { %p10571_p2 = por %p10570_p1, %p10569_p0 }
  0xec   :  { %p10572_p3 = pnand %p10571_p2, %p10565_p13 }
  0xee   :  { %10575 = shalt.err (!%p10572_p3)
}
  0xef   :  { %142 = dma.hbm_to_vmem [thread:$0]  %s11666_s11, 64, %s140_s7, [#allocation23]  }
  0xf0   :  { %s10681_s29 = smov [#allocation27]   ;;  %s10576_s24 = scalar_lea.hbm %s11669_s14, 512 }
  0xf1   :  { %s160_s1 = sshll.u32 %s10681_s29, 4  ;;  %p10577_p4 = scmp.ne.s32.totalorder %s11669_s14, %s10576_s24  ;;  %s161_s1 = int_to_ptr.vmem [resolvable:$true] %s160_s1 }
  0xf2   :  { %p10580_p5 = scmp.lt.u32.totalorder %s10576_s24, %s11669_s14 }
  0xf4   :  { %p10582_p6 = pnand %p10580_p5, %p10577_p4 }
  0xf6   :  { %10585 = shalt.err (!%p10582_p6)
}
  0xf7   :  { %s10586_s9 = scalar_lea.vmem %s161_s1, 512  ;;  %p10591_p8 = scmp.lt.s32.totalorder %s161_s1, %s161_s1 }
  0xf8   :  { %p10587_p7 = scmp.ne.s32.totalorder %s161_s1, %s10586_s9  ;;  %p10592_p9 = scmp.lt.s32.totalorder %s10586_s9, %s10586_s9 }
  0xfa   :  { %p10593_p10 = por %p10592_p9, %p10591_p8 }
  0xfc   :  { %p10594_p11 = pnand %p10593_p10, %p10587_p7 }
  0xfe   :  { %10597 = shalt.err (!%p10594_p11)
}
  0xff   :  { %s10682_s11 = smov 256   ;;  %s10683_s7 = smov 16  }
 0x100   :  { %166 = dma.hbm_to_vmem [thread:$0]  %s11669_s14, 512, %s161_s1, [#allocation26], %s10682_s11, %s10682_s11, %s10683_s7  }
 0x101   :  { %s10684_s19 = smov [#allocation30]   ;;  %s10685_s6 = smov [#allocation31]  }
 0x102   :  { %s183_s25 = sshll.u32 %s10684_s19, 4  ;;  %s193_s12 = sshll.u32 %s10685_s6, 4  ;;  %s184_s25 = int_to_ptr.vmem [resolvable:$true] %s183_s25  ;;  %s194_s12 = int_to_ptr.vmem [resolvable:$true] %s193_s12 }
 0x103   :  { %s10598_s3 = scalar_lea.hbm %s11671_s16, 64 }
 0x104   :  { %p10599_p12 = scmp.ne.s32.totalorder %s11671_s16, %s10598_s3  ;;  %p10602_p13 = scmp.lt.u32.totalorder %s10598_s3, %s11671_s16 }
 0x106   :  { %p10604_p0 = pnand %p10602_p13, %p10599_p12 }
 0x108   :  { %10607 = shalt.err (!%p10604_p0)
}
 0x109   :  { %s10608_s14 = scalar_lea.vmem %s184_s25, 64  ;;  %p10613_p2 = scmp.lt.s32.totalorder %s184_s25, %s184_s25 }
 0x10a   :  { %p10609_p1 = scmp.ne.s32.totalorder %s184_s25, %s10608_s14  ;;  %p10614_p3 = scmp.lt.s32.totalorder %s10608_s14, %s10608_s14 }
 0x10c   :  { %p10615_p4 = por %p10614_p3, %p10613_p2 }
 0x10e   :  { %p10616_p5 = pnand %p10615_p4, %p10609_p1 }
 0x110   :  { %10619 = shalt.err (!%p10616_p5)
}
 0x111   :  { %186 = dma.hbm_to_vmem [thread:$0]  %s11671_s16, 64, %s184_s25, [#allocation29]  }
 0x112   :  { %s10620_s26 = scalar_lea.hbm %s11672_s17, 32 }
 0x113   :  { %p10621_p6 = scmp.ne.s32.totalorder %s11672_s17, %s10620_s26  ;;  %p10624_p7 = scmp.lt.u32.totalorder %s10620_s26, %s11672_s17 }
 0x115   :  { %p10626_p8 = pnand %p10624_p7, %p10621_p6 }
 0x117   :  { %10629 = shalt.err (!%p10626_p8)
}
 0x118   :  { %s10630_s28 = scalar_lea.vmem %s194_s12, 32  ;;  %p10635_p10 = scmp.lt.s32.totalorder %s194_s12, %s194_s12 }
 0x119   :  { %p10631_p9 = scmp.ne.s32.totalorder %s194_s12, %s10630_s28  ;;  %p10636_p11 = scmp.lt.s32.totalorder %s10630_s28, %s10630_s28 }
 0x11b   :  { %p10637_p12 = por %p10636_p11, %p10635_p10 }
 0x11d   :  { %p10638_p13 = pnand %p10637_p12, %p10631_p9 }
 0x11f   :  { %10641 = shalt.err (!%p10638_p13)
}
 0x120   :  { %196 = dma.hbm_to_vmem [thread:$0]  %s11672_s17, 32, %s194_s12, [#allocation32]  }
 0x121   :  { %10642 = dma.done.wait [#allocation12], 128  }
 0x122   :  { %10643 = vsyncadd [#allocation12], 4294967168 }
 0x123   :  { %10644 = dma.done.wait [#allocation14], 12288  }
 0x124   :  { %10645 = vsyncadd [#allocation14], 4294955008 }
 0x125   :  { %10646 = dma.done.wait [#allocation17], 32  }
 0x126   :  { %10647 = vsyncadd [#allocation17], 4294967264 }
 0x127   :  { %10648 = dma.done.wait [#allocation20], 32800  }
 0x128   :  { %10649 = vsyncadd [#allocation20], 4294934496 }
 0x129   :  { %10650 = dma.done.wait [#allocation23], 96  }
 0x12a   :  { %10651 = vsyncadd [#allocation23], 4294967200 }
 0x12b   :  { %10652 = dma.done.wait [#allocation26], 576  }
 0x12c   :  { %10653 = vsyncadd [#allocation26], 4294966720 }
 0x12d   :  { %10654 = dma.done.wait [#allocation29], 128  }
 0x12e   :  { %10655 = vsyncadd [#allocation29], 4294967168 }
 0x12f   :  { %10656 = dma.done.wait [#allocation32], 32  }
 0x130   :  { %10657 = vsyncadd [#allocation32], 4294967264  ;;  %s248_s3 = sld [smem:[#allocation0]]   ;;  %s10686_s24 = smov 512   ;;  %vm448_vm0 = vcmask 130048  }
 0x131   :  { %260 = sst [smem:[#allocation34]] %s10686_s24  ;;  %s10687_s17 = smov [#allocation5]  }
 0x132   :  { %262 = sst [smem:[#allocation34 + $0x1]] %s10686_s24  ;;  %s256_s12 = sshll.u32 %s10687_s17, 4  ;;  %s257_s12 = int_to_ptr.vmem [resolvable:$true] %s256_s12 }
 0x133   :  { %264 = sst [smem:[#allocation34 + $0x2]] %s11707_s15  ;;  %s10688_s30 = smov 2  }
 0x134   :  { %266 = sst [smem:[#allocation34 + $0x3]] %s11708_s4  ;;  %s10689_s14 = smov [#allocation9]  }
 0x135   :  { %268 = sst [smem:[#allocation34 + $0x4]] %s10671_s2  ;;  %s10690_s1 = smov [#allocation33]  }
 0x136   :  { %270 = sst [smem:[#allocation34 + $0x5]] %s10688_s30  ;;  %s8735_s5 = sshll.u32 %s248_s3, 26 }
 0x137   :  { %272 = sst [smem:[#allocation34 + $0x6]] %s10682_s11  ;;  %s11026_s8 = sadd.s32 134217728, %s8735_s5 }
 0x138   :  { %274 = sst [smem:[#allocation34 + $0x7]] %s11708_s4  ;;  %s10691_s7 = smov [#allocation6]  }
 0x139   :  { %276 = sst [smem:[#allocation34 + $0x8]] %s11707_s15  ;;  %s291_s26 = sshll.u32 %s10691_s7, 4  ;;  %s292_s26 = int_to_ptr.vmem [resolvable:$true] %s291_s26 }
 0x13a   :  { %278 = dma.general %s11675_s20, 131072, %s257_s12, %s10689_s14, %s10690_s1, [#allocation34], %s11026_s8, 0  }
 0x13b   :  { %295 = sst [smem:[#allocation36]] %s10686_s24  ;;  %s10692_s20 = smov [#allocation9 + $0x1]  }
 0x13c   :  { %297 = sst [smem:[#allocation36 + $0x1]] %s10686_s24  ;;  %s10693_s27 = smov [#allocation35]  }
 0x13d   :  { %299 = sst [smem:[#allocation36 + $0x2]] %s11707_s15  ;;  %s10694_s29 = smov [#allocation7]  }
 0x13e   :  { %301 = sst [smem:[#allocation36 + $0x3]] %s11708_s4  ;;  %s326_s28 = sshll.u32 %s10694_s29, 4  ;;  %s327_s28 = int_to_ptr.vmem [resolvable:$true] %s326_s28 }
 0x13f   :  { %303 = sst [smem:[#allocation36 + $0x4]] %s10671_s2  ;;  %s10696_s16 = smov [#allocation37]  }
 0x140   :  { %305 = sst [smem:[#allocation36 + $0x5]] %s10688_s30  ;;  %s10699_s12 = smov [#allocation39]  }
 0x141   :  { %307 = sst [smem:[#allocation36 + $0x6]] %s10682_s11 }
 0x142   :  { %309 = sst [smem:[#allocation36 + $0x7]] %s11708_s4 }
 0x143   :  { %311 = sst [smem:[#allocation36 + $0x8]] %s11707_s15 }
 0x144   :  { %313 = dma.general %s11676_s21, 16384, %s292_s26, %s10692_s20, %s10693_s27, [#allocation36], %s11026_s8, 0  }
 0x145   :  { %330 = sst [smem:[#allocation38]] %s10686_s24  ;;  %s10695_s21 = smov [#allocation9 + $0x2]  }
 0x146   :  { %332 = sst [smem:[#allocation38 + $0x1]] %s10686_s24  ;;  %s10697_s24 = smov [#allocation8]  }
 0x147   :  { %334 = sst [smem:[#allocation38 + $0x2]] %s11707_s15  ;;  %s361_s17 = sshll.u32 %s10697_s24, 4  ;;  %s362_s17 = int_to_ptr.vmem [resolvable:$true] %s361_s17 }
 0x148   :  { %336 = sst [smem:[#allocation38 + $0x3]] %s11708_s4 }
 0x149   :  { %338 = sst [smem:[#allocation38 + $0x4]] %s10671_s2 }
 0x14a   :  { %340 = sst [smem:[#allocation38 + $0x5]] %s10688_s30 }
 0x14b   :  { %342 = sst [smem:[#allocation38 + $0x6]] %s10682_s11 }
 0x14c   :  { %344 = sst [smem:[#allocation38 + $0x7]] %s11708_s4 }
 0x14d   :  { %346 = sst [smem:[#allocation38 + $0x8]] %s11707_s15 }
 0x14e   :  { %348 = dma.general %s11677_s22, 16384, %s327_s28, %s10695_s21, %s10696_s16, [#allocation38], %s11026_s8, 0  }
 0x14f   :  { %365 = sst [smem:[#allocation40]] %s10682_s11  ;;  %s10698_s22 = smov [#allocation9 + $0x3]  }
 0x150   :  { %367 = sst [smem:[#allocation40 + $0x1]] %s10682_s11 }
 0x151   :  { %369 = sst [smem:[#allocation40 + $0x2]] %s10688_s30 }
 0x152   :  { %371 = sst [smem:[#allocation40 + $0x3]] %s11708_s4 }
 0x153   :  { %373 = sst [smem:[#allocation40 + $0x4]] %s10671_s2 }
 0x154   :  { %375 = sst [smem:[#allocation40 + $0x5]] %s10688_s30 }
 0x155   :  { %377 = sst [smem:[#allocation40 + $0x6]] %s10671_s2 }
 0x156   :  { %379 = sst [smem:[#allocation40 + $0x7]] %s11708_s4 }
 0x157   :  { %381 = sst [smem:[#allocation40 + $0x8]] %s11707_s15 }
 0x158   :  { %383 = dma.general %s11678_s23, 8192, %s362_s17, %s10698_s22, %s10699_s12, [#allocation40], %s11026_s8, 0  }
 0x159   :  { %v9786_v1 = vld [vmem:[#allocation11] sm:$0xff]   ;;  %s11712_s0 = sld [smem:[#allocation53_spill]]  ;;  %v9795_v10 = vld [vmem:[#allocation13] sm:$0xff]   ;;  %s11713_s16 = sld [smem:[#allocation59_spill]] }
 0x15a   :  { %9478 = vmatprep.subr.bf16.mxu1 %v9786_v1 }
 0x15b   :  { %9479 = vmatpush3.bf16.msra.mxu1 %v9786_v1 }
 0x15f   :  { %v9787_v2 = vld [vmem:[%s11712_s0] sm:$0xff]   ;;  %v9788_v3 = vld [vmem:[%s11712_s0 + $0x8] sm:$0xff]   ;;  %v9789_v4 = vld [vmem:[%s11712_s0 + $0x10] sm:$0xff]  }
 0x160   :  { %9480 = vmatprep.mubr.msk.bf16.mxu1 %vm448_vm0, %v9787_v2  ;;  %v9790_v5 = vld [vmem:[%s11712_s0 + $0x18] sm:$0xff]   ;;  %v9791_v6 = vld [vmem:[%s11712_s0 + $0x20] sm:$0xff]   ;;  %v9792_v7 = vld [vmem:[%s11712_s0 + $0x28] sm:$0xff]  }
 0x161   :  { %9481 = vmatmul.mubr.msk.bf16.vlgmr.msra.gmra.mrb[0].mxu1 %vm448_vm0, %v9788_v3  ;;  %v9793_v8 = vld [vmem:[%s11712_s0 + $0x30] sm:$0xff]   ;;  %v9794_v9 = vld [vmem:[%s11712_s0 + $0x38] sm:$0xff]  }
 0x162   :  { %9484 = vmatprep.mubr.msk.bf16.mxu1 %vm448_vm0, %v9789_v4  ;;  %v9796_v3 = vld [vmem:[#allocation13 + $0x8] sm:$0xff]   ;;  %v9797_v4 = vld [vmem:[#allocation13 + $0x10] sm:$0xff]  }
 0x169   :  { %9485 = vmatmul.mubr.msk.bf16.gmra.mrb[4].mxu1 %vm448_vm0, %v9790_v5  ;;  %v9798_v5 = vld [vmem:[#allocation13 + $0x18] sm:$0xff]  }
 0x16a   :  { %9488 = vmatprep.mubr.msk.bf16.mxu1 %vm448_vm0, %v9791_v6  ;;  %v9799_v6 = vld [vmem:[#allocation13 + $0x20] sm:$0xff]  }
 0x171   :  { %9489 = vmatmul.mubr.msk.bf16.gmra.mrb[8].mxu1 %vm448_vm0, %v9792_v7  ;;  %v9800_v7 = vld [vmem:[#allocation13 + $0x28] sm:$0xff]  }
 0x172   :  { %9492 = vmatprep.mubr.msk.bf16.mxu1 %vm448_vm0, %v9793_v8  ;;  %v9801_v8 = vld [vmem:[#allocation13 + $0x30] sm:$0xff]  }
 0x179   :  { %9493 = vmatmul.mubr.msk.bf16.gmra.mrb[12].mxu1 %vm448_vm0, %v9794_v9  ;;  %v9802_v9 = vld [vmem:[#allocation13 + $0x38] sm:$0xff]  }
 0x17a   :  { %9512 = vmatprep.mubr.bf16.mxu1 %v9795_v10  ;;  %v9803_v10 = vld [vmem:[#allocation13 + $0x40] sm:$0xff]  }
 0x234   :  { %v9482_v11 = vpop.f32.mrb[0].mxu1 }
 0x235   :  { %v588_v12 = vmul.f32 0.2, %v9482_v11  ;;  %v507_v13 = vpop.f32.mrb[1].mxu1  ;;  %vm572_vm1 = vcmp.gt.f32.partialorder %v9482_v11, 0.0 }
 0x236   :  { %v586_v14 = vmul.f32 0.2, %v507_v13  ;;  %v9483_v15 = vpop.f32.mrb[2].mxu1  ;;  %vm570_vm2 = vcmp.gt.f32.partialorder %v507_v13, 0.0 }
 0x237   :  { %vm573_vm3 = vcmp.gt.f32.partialorder %v9483_v15, 0.0  ;;  %v589_v16 = vmul.f32 0.2, %v9483_v15  ;;  %v510_v17 = vpop.f32.mrb[3].mxu1  ;;  %v604_v19 = vsel %vm572_vm1, %v9482_v11, %v588_v12  ;;  %v9804_v11 = vld [vmem:[#allocation13 + $0x48] sm:$0xff]   ;;  %v9805_v12 = vld [vmem:[#allocation13 + $0x50] sm:$0xff]  }
 0x238   :  { %vm571_vm4 = vcmp.gt.f32.partialorder %v510_v17, 0.0  ;;  %v587_v18 = vmul.f32 0.2, %v510_v17  ;;  %v602_v21 = vsel %vm570_vm2, %v507_v13, %v586_v14  ;;  %v9806_v13 = vld [vmem:[#allocation13 + $0x58] sm:$0xff]   ;;  %v9807_v14 = vld [vmem:[#allocation13 + $0x60] sm:$0xff]   ;;  %vm1301_vm2 = vcmask 523264  }
 0x239   :  { %v605_v20 = vsel %vm573_vm3, %v9483_v15, %v589_v16  ;;  %v9808_v15 = vld [vmem:[#allocation13 + $0x68] sm:$0xff]   ;;  %v9809_v16 = vld [vmem:[#allocation13 + $0x70] sm:$0xff]   ;;  %vm1314_vm3 = vcmask 1048064  }
 0x23a   :  { %v603_v22 = vsel %vm571_vm4, %v510_v17, %v587_v18  ;;  %v811_v23 = vpack.c.bf16 %v605_v20, %v604_v19  ;;  %v9810_v17 = vld [vmem:[#allocation13 + $0x78] sm:$0xff]   ;;  %v9811_v18 = vld [vmem:[#allocation13 + $0x80] sm:$0xff]   ;;  %v9812_v19 = vld [vmem:[#allocation13 + $0x88] sm:$0xff]   ;;  %vm2408_vm4 = vcmask 261120  }
 0x23b   :  { %v810_v24 = vpack.c.bf16 %v603_v22, %v602_v21  ;;  %v9813_v20 = vld [vmem:[#allocation13 + $0x90] sm:$0xff]   ;;  %v9814_v21 = vld [vmem:[#allocation13 + $0x98] sm:$0xff]   ;;  %v9815_v22 = vld [vmem:[#allocation13 + $0xa0] sm:$0xff]  }
 0x23c   :  { %v9486_v25 = vpop.f32.mrb[4].mxu1 }
 0x23d   :  { %v592_v26 = vmul.f32 0.2, %v9486_v25  ;;  %v523_v27 = vpop.f32.mrb[5].mxu1  ;;  %9496 = vmatprep.subr.bf16.mxu1 %v810_v24  ;;  %vm576_vm5 = vcmp.gt.f32.partialorder %v9486_v25, 0.0 }
 0x23e   :  { %v590_v28 = vmul.f32 0.2, %v523_v27  ;;  %v9487_v29 = vpop.f32.mrb[6].mxu1  ;;  %9497 = vmatpush3.bf16.msra.mxu1 %v810_v24  ;;  %vm574_vm6 = vcmp.gt.f32.partialorder %v523_v27, 0.0  ;;  %v9817_v24 = vld [vmem:[#allocation13 + $0xb0] sm:$0xff]  }
 0x23f   :  { %vm577_vm7 = vcmp.gt.f32.partialorder %v9487_v29, 0.0  ;;  %v593_v30 = vmul.f32 0.2, %v9487_v29  ;;  %v526_v31 = vpop.f32.mrb[7].mxu1  ;;  %9498 = vmatprep.subr.bf16.mxu1 %v811_v23  ;;  %v608_v33 = vsel %vm576_vm5, %v9486_v25, %v592_v26  ;;  %v9818_v25 = vld [vmem:[#allocation13 + $0xb8] sm:$0xff]   ;;  %v9819_v26 = vld [vmem:[#allocation13 + $0xc0] sm:$0xff]  }
 0x240   :  { %vm575_vm8 = vcmp.gt.f32.partialorder %v526_v31, 0.0  ;;  %v591_v32 = vmul.f32 0.2, %v526_v31  ;;  %v606_v35 = vsel %vm574_vm6, %v523_v27, %v590_v28  ;;  %v9820_v27 = vld [vmem:[#allocation13 + $0xc8] sm:$0xff]   ;;  %v9821_v28 = vld [vmem:[#allocation13 + $0xd0] sm:$0xff]  }
 0x241   :  { %v609_v34 = vsel %vm577_vm7, %v9487_v29, %v593_v30  ;;  %v9822_v29 = vld [vmem:[#allocation13 + $0xd8] sm:$0xff]   ;;  %v9823_v30 = vld [vmem:[#allocation13 + $0xe0] sm:$0xff]  }
 0x242   :  { %v607_v36 = vsel %vm575_vm8, %v526_v31, %v591_v32  ;;  %9499 = vmatpush3.bf16.msra.mxu1 %v811_v23  ;;  %v813_v37 = vpack.c.bf16 %v609_v34, %v608_v33  ;;  %v9816_v23 = vld [vmem:[#allocation13 + $0xa8] sm:$0xff]   ;;  %v9825_v32 = vld [vmem:[#allocation13 + $0xf0] sm:$0xff]   ;;  %v9826_v33 = vld [vmem:[#allocation13 + $0xf8] sm:$0xff]  }
 0x243   :  { %v812_v38 = vpack.c.bf16 %v607_v36, %v606_v35  ;;  %v9824_v31 = vld [vmem:[#allocation13 + $0xe8] sm:$0xff]   ;;  %v9827_v34 = vld [vmem:[#allocation15 + $0x40] sm:$0xff]  }
 0x244   :  { %v9490_v39 = vpop.f32.mrb[8].mxu1  ;;  %v9828_v35 = vld [vmem:[#allocation15] sm:$0xff]   ;;  %9334 = vmatprep.subr.bf16.mxu0 %v9827_v34  ;;  %v9829_v36 = vld [vmem:[#allocation15 + $0x48] sm:$0xff]  }
 0x245   :  { %v596_v40 = vmul.f32 0.2, %v9490_v39  ;;  %v539_v41 = vpop.f32.mrb[9].mxu1  ;;  %9500 = vmatprep.subr.bf16.mxu1 %v812_v38  ;;  %vm580_vm9 = vcmp.gt.f32.partialorder %v9490_v39, 0.0  ;;  %9335 = vmatpush3.bf16.msra.mxu0 %v9828_v35 }
 0x246   :  { %v594_v42 = vmul.f32 0.2, %v539_v41  ;;  %v9491_v43 = vpop.f32.mrb[10].mxu1  ;;  %9501 = vmatpush3.bf16.msra.mxu1 %v812_v38  ;;  %vm578_vm10 = vcmp.gt.f32.partialorder %v539_v41, 0.0  ;;  %9336 = vmatprep.subr.bf16.mxu0 %v9829_v36 }
 0x247   :  { %vm581_vm11 = vcmp.gt.f32.partialorder %v9491_v43, 0.0  ;;  %v597_v44 = vmul.f32 0.2, %v9491_v43  ;;  %v542_v45 = vpop.f32.mrb[11].mxu1  ;;  %9502 = vmatprep.subr.bf16.mxu1 %v813_v37  ;;  %v612_v47 = vsel %vm580_vm9, %v9490_v39, %v596_v40 }
 0x248   :  { %vm579_vm12 = vcmp.gt.f32.partialorder %v542_v45, 0.0  ;;  %v595_v46 = vmul.f32 0.2, %v542_v45  ;;  %v610_v49 = vsel %vm578_vm10, %v539_v41, %v594_v42  ;;  %v9831_v41 = vld [vmem:[#allocation15 + $0x50] sm:$0xff]  }
 0x249   :  { %v613_v48 = vsel %vm581_vm11, %v9491_v43, %v597_v44  ;;  %v9832_v42 = vld [vmem:[#allocation15 + $0x10] sm:$0xff]   ;;  %v9833_v43 = vld [vmem:[#allocation15 + $0x58] sm:$0xff]  }
 0x24a   :  { %v611_v50 = vsel %vm579_vm12, %v542_v45, %v595_v46  ;;  %9503 = vmatpush3.bf16.msra.mxu1 %v813_v37  ;;  %v815_v51 = vpack.c.bf16 %v613_v48, %v612_v47  ;;  %v9830_v37 = vld [vmem:[#allocation15 + $0x8] sm:$0xff]   ;;  %v9834_v47 = vld [vmem:[#allocation15 + $0x18] sm:$0xff]   ;;  %v9835_v48 = vld [vmem:[#allocation15 + $0x60] sm:$0xff]  }
 0x24b   :  { %v814_v52 = vpack.c.bf16 %v611_v50, %v610_v49  ;;  %9337 = vmatpush3.bf16.msra.mxu0 %v9830_v37 }
 0x24c   :  { %v9494_v53 = vpop.f32.mrb[12].mxu1  ;;  %9338 = vmatprep.subr.bf16.mxu0 %v9831_v41 }
 0x24d   :  { %v600_v54 = vmul.f32 0.2, %v9494_v53  ;;  %v555_v55 = vpop.f32.mrb[13].mxu1  ;;  %9504 = vmatprep.subr.bf16.mxu1 %v814_v52  ;;  %vm584_vm13 = vcmp.gt.f32.partialorder %v9494_v53, 0.0 }
 0x24e   :  { %v598_v56 = vmul.f32 0.2, %v555_v55  ;;  %v9495_v57 = vpop.f32.mrb[14].mxu1  ;;  %9505 = vmatpush3.bf16.msra.mxu1 %v814_v52  ;;  %vm582_vm14 = vcmp.gt.f32.partialorder %v555_v55, 0.0 }
 0x24f   :  { %vm585_vm15 = vcmp.gt.f32.partialorder %v9495_v57, 0.0  ;;  %v601_v58 = vmul.f32 0.2, %v9495_v57  ;;  %v558_v59 = vpop.f32.mrb[15].mxu1  ;;  %9506 = vmatprep.subr.bf16.mxu1 %v815_v51  ;;  %v616_v61 = vsel %vm584_vm13, %v9494_v53, %v600_v54  ;;  %9339 = vmatpush3.bf16.msra.mxu0 %v9832_v42 }
 0x250   :  { %vm583_vm1 = vcmp.gt.f32.partialorder %v558_v59, 0.0  ;;  %v599_v60 = vmul.f32 0.2, %v558_v59  ;;  %v614_v63 = vsel %vm582_vm14, %v555_v55, %v598_v56  ;;  %9340 = vmatprep.subr.bf16.mxu0 %v9833_v43  ;;  %v9837_v56 = vld [vmem:[#allocation15 + $0x68] sm:$0xff]  }
 0x251   :  { %v617_v62 = vsel %vm585_vm15, %v9495_v57, %v601_v58  ;;  %v9838_v57 = vld [vmem:[#allocation15 + $0x28] sm:$0xff]  }
 0x252   :  { %v615_v0 = vsel %vm583_vm1, %v558_v59, %v599_v60  ;;  %9507 = vmatpush3.bf16.msra.mxu1 %v815_v51  ;;  %v817_v1 = vpack.c.bf16 %v617_v62, %v616_v61  ;;  %v9836_v51 = vld [vmem:[#allocation15 + $0x20] sm:$0xff]   ;;  %v9839_v61 = vld [vmem:[#allocation15 + $0x70] sm:$0xff]  }
 0x253   :  { %v816_v2 = vpack.c.bf16 %v615_v0, %v614_v63  ;;  %9341 = vmatpush3.bf16.msra.mxu0 %v9834_v47  ;;  %v9840_v0 = vld [vmem:[#allocation15 + $0x30] sm:$0xff]  }
 0x254   :  { %9342 = vmatprep.subr.bf16.mxu0 %v9835_v48 }
 0x255   :  { %9508 = vmatprep.subr.bf16.mxu1 %v816_v2 }
 0x256   :  { %9509 = vmatpush3.bf16.msra.mxu1 %v816_v2  ;;  %v9841_v2 = vld [vmem:[#allocation15 + $0x78] sm:$0xff]  }
 0x257   :  { %9510 = vmatprep.subr.bf16.mxu1 %v817_v1  ;;  %9343 = vmatpush3.bf16.msra.mxu0 %v9836_v51 }
 0x258   :  { %9344 = vmatprep.subr.bf16.mxu0 %v9837_v56 }
 0x25a   :  { %9511 = vmatpush3.bf16.msra.mxu1 %v817_v1 }
 0x25b   :  { %9345 = vmatpush3.bf16.msra.mxu0 %v9838_v57 }
 0x25c   :  { %9346 = vmatprep.subr.bf16.mxu0 %v9839_v61 }
 0x25d   :  { %9513 = vmatmul.mubr.bf16.vlgmr.msra.gmra.mrb[16].mxu1 %v9796_v3  ;;  %v9842_v3 = vld [vmem:[#allocation15 + $0x38] sm:$0xff]  }
 0x25e   :  { %9516 = vmatprep.mubr.bf16.mxu1 %v9797_v4 }
 0x25f   :  { %9347 = vmatpush3.bf16.msra.mxu0 %v9840_v0 }
 0x260   :  { %9348 = vmatprep.subr.bf16.mxu0 %v9841_v2 }
 0x263   :  { %9349 = vmatpush3.bf16.msra.mxu0 %v9842_v3 }
 0x265   :  { %9517 = vmatmul.mubr.bf16.gmra.mrb[20].mxu1 %v9798_v5 }
 0x266   :  { %9520 = vmatprep.mubr.bf16.mxu1 %v9799_v6  ;;  %v9843_v6 = vld [vmem:[#allocation15 + $0xc0] sm:$0xff]  }
 0x267   :  { %9362 = vmatprep.subr.bf16.mxu0 %v9843_v6 }
 0x26d   :  { %9521 = vmatmul.mubr.bf16.gmra.mrb[24].mxu1 %v9800_v7 }
 0x26e   :  { %9524 = vmatprep.mubr.bf16.mxu1 %v9801_v8 }
 0x275   :  { %9525 = vmatmul.mubr.bf16.gmra.mrb[28].mxu1 %v9802_v9 }
 0x276   :  { %9528 = vmatprep.mubr.bf16.mxu1 %v9803_v10 }
 0x27d   :  { %9529 = vmatmul.mubr.bf16.gmra.mrb[32].mxu1 %v9804_v11 }
 0x27e   :  { %9532 = vmatprep.mubr.bf16.mxu1 %v9805_v12 }
 0x285   :  { %9533 = vmatmul.mubr.bf16.gmra.mrb[36].mxu1 %v9806_v13 }
 0x286   :  { %9536 = vmatprep.mubr.bf16.mxu1 %v9807_v14 }
 0x28d   :  { %9537 = vmatmul.mubr.bf16.gmra.mrb[40].mxu1 %v9808_v15 }
 0x28e   :  { %9540 = vmatprep.mubr.bf16.mxu1 %v9809_v16 }
 0x295   :  { %9541 = vmatmul.mubr.bf16.gmra.mrb[44].mxu1 %v9810_v17 }
 0x296   :  { %9544 = vmatprep.mubr.bf16.mxu1 %v9811_v18 }
 0x29d   :  { %9545 = vmatmul.mubr.bf16.gmra.mrb[48].mxu1 %v9812_v19 }
 0x29e   :  { %9548 = vmatprep.mubr.bf16.mxu1 %v9813_v20 }
 0x2a5   :  { %9549 = vmatmul.mubr.bf16.gmra.mrb[52].mxu1 %v9814_v21 }
 0x2a6   :  { %9552 = vmatprep.mubr.bf16.mxu1 %v9815_v22 }
 0x2ad   :  { %9553 = vmatmul.mubr.bf16.gmra.mrb[56].mxu1 %v9816_v23 }
 0x2ae   :  { %9556 = vmatprep.mubr.bf16.mxu1 %v9817_v24 }
 0x2b5   :  { %9557 = vmatmul.mubr.bf16.gmra.mrb[60].mxu1 %v9818_v25 }
 0x2b6   :  { %9560 = vmatprep.mubr.bf16.mxu1 %v9819_v26 }
 0x2bd   :  { %9561 = vmatmul.mubr.bf16.gmra.mrb[64].mxu1 %v9820_v27 }
 0x2be   :  { %9564 = vmatprep.mubr.bf16.mxu1 %v9821_v28 }
 0x2c5   :  { %9565 = vmatmul.mubr.bf16.gmra.mrb[68].mxu1 %v9822_v29 }
 0x2c6   :  { %9568 = vmatprep.mubr.bf16.mxu1 %v9823_v30 }
 0x2cd   :  { %9569 = vmatmul.mubr.bf16.gmra.mrb[72].mxu1 %v9824_v31 }
 0x2ce   :  { %9572 = vmatprep.mubr.bf16.mxu1 %v9825_v32 }
 0x2d5   :  { %9573 = vmatmul.mubr.bf16.gmra.mrb[76].mxu1 %v9826_v33 }
 0x330   :  { %v9514_v38 = vpop.f32.mrb[16].mxu1 }
 0x331   :  { %v1044_v39 = vpop.f32.mrb[17].mxu1 }
 0x332   :  { %v9515_v40 = vpop.f32.mrb[18].mxu1 }
 0x333   :  { %v1300_v44 = vpack.c.bf16 %v9515_v40, %v9514_v38  ;;  %v1047_v45 = vpop.f32.mrb[19].mxu1 }
 0x334   :  { %v1299_v46 = vpack.c.bf16 %v1047_v45, %v1044_v39 }
 0x335   :  { %1303 = vst.msk [vmem:[#allocation2 + $0x40] sm:$0xff] %vm1301_vm2, %v1300_v44 }
 0x336   :  { %1302 = vst.msk [vmem:[#allocation2] sm:$0xff] %vm1301_vm2, %v1299_v46 }
 0x338   :  { %v9518_v49 = vpop.f32.mrb[20].mxu1 }
 0x339   :  { %v1060_v50 = vpop.f32.mrb[21].mxu1 }
 0x33a   :  { %v9519_v52 = vpop.f32.mrb[22].mxu1 }
 0x33b   :  { %v1305_v53 = vpack.c.bf16 %v9519_v52, %v9518_v49  ;;  %v1063_v54 = vpop.f32.mrb[23].mxu1 }
 0x33c   :  { %v1304_v55 = vpack.c.bf16 %v1063_v54, %v1060_v50 }
 0x340   :  { %v9522_v58 = vpop.f32.mrb[24].mxu1 }
 0x341   :  { %v1076_v59 = vpop.f32.mrb[25].mxu1 }
 0x342   :  { %v9523_v60 = vpop.f32.mrb[26].mxu1 }
 0x343   :  { %v1318_v62 = vpack.c.bf16 %v9523_v60, %v9522_v58  ;;  %v1079_v63 = vpop.f32.mrb[27].mxu1 }
 0x344   :  { %v1317_v1 = vpack.c.bf16 %v1079_v63, %v1076_v59 }
 0x345   :  { %1320 = vst.msk [vmem:[#allocation2 + $0x48] sm:$0xff] %vm1301_vm2, %v1318_v62 }
 0x346   :  { %1319 = vst.msk [vmem:[#allocation2 + $0x8] sm:$0xff] %vm1301_vm2, %v1317_v1 }
 0x348   :  { %v9526_v4 = vpop.f32.mrb[28].mxu1 }
 0x349   :  { %v1092_v5 = vpop.f32.mrb[29].mxu1 }
 0x34a   :  { %v9527_v7 = vpop.f32.mrb[30].mxu1 }
 0x34b   :  { %v1095_v8 = vpop.f32.mrb[31].mxu1  ;;  %v1322_v9 = vpack.c.bf16 %v9527_v7, %v9526_v4 }
 0x34c   :  { %v1321_v10 = vpack.c.bf16 %v1095_v8, %v1092_v5 }
 0x34d   :  { %1327 = vrot.lane.b32.xlu1 %v1322_v9, %s11708_s4 }
 0x34e   :  { %1325 = vrot.lane.b32.xlu0 %v1321_v10, %s11708_s4 }
 0x350   :  { %v9530_v11 = vpop.f32.mrb[32].mxu1 }
 0x351   :  { %1310 = vrot.lane.b32.xlu1 %v1305_v53, %s11708_s4  ;;  %v1108_v12 = vpop.f32.mrb[33].mxu1 }
 0x352   :  { %1308 = vrot.lane.b32.xlu0 %v1304_v55, %s11708_s4  ;;  %v9531_v13 = vpop.f32.mrb[34].mxu1 }
 0x353   :  { %v1334_v14 = vpack.c.bf16 %v9531_v13, %v9530_v11  ;;  %v1111_v15 = vpop.f32.mrb[35].mxu1 }
 0x354   :  { %v1333_v16 = vpack.c.bf16 %v1111_v15, %v1108_v12 }
 0x355   :  { %1336 = vst.msk [vmem:[#allocation2 + $0x50] sm:$0xff] %vm1301_vm2, %v1334_v14 }
 0x356   :  { %1335 = vst.msk [vmem:[#allocation2 + $0x10] sm:$0xff] %vm1301_vm2, %v1333_v16 }
 0x358   :  { %v9534_v17 = vpop.f32.mrb[36].mxu1 }
 0x359   :  { %v1124_v18 = vpop.f32.mrb[37].mxu1 }
 0x35a   :  { %v9535_v19 = vpop.f32.mrb[38].mxu1 }
 0x35b   :  { %v1338_v20 = vpack.c.bf16 %v9535_v19, %v9534_v17  ;;  %v1127_v21 = vpop.f32.mrb[39].mxu1 }
 0x35c   :  { %v1337_v22 = vpack.c.bf16 %v1127_v21, %v1124_v18 }
 0x35e   :  { %1341 = vrot.lane.b32.xlu1 %v1337_v22, %s11708_s4 }
 0x360   :  { %v9538_v23 = vpop.f32.mrb[40].mxu1 }
 0x361   :  { %v1140_v24 = vpop.f32.mrb[41].mxu1 }
 0x362   :  { %1343 = vrot.lane.b32.xlu1 %v1338_v20, %s11708_s4  ;;  %v9539_v25 = vpop.f32.mrb[42].mxu1 }
 0x363   :  { %v1350_v26 = vpack.c.bf16 %v9539_v25, %v9538_v23  ;;  %v1143_v27 = vpop.f32.mrb[43].mxu1  ;;  %v9845_v25 = vld [vmem:[#allocation15 + $0xc8] sm:$0xff]  }
 0x364   :  { %v1349_v28 = vpack.c.bf16 %v1143_v27, %v1140_v24  ;;  %v9844_v24 = vld [vmem:[#allocation15 + $0x80] sm:$0xff]  }
 0x365   :  { %1352 = vst.msk [vmem:[#allocation2 + $0x58] sm:$0xff] %vm1301_vm2, %v1350_v26 }
 0x366   :  { %1351 = vst.msk [vmem:[#allocation2 + $0x18] sm:$0xff] %vm1301_vm2, %v1349_v28  ;;  %v9846_v28 = vld [vmem:[#allocation15 + $0x88] sm:$0xff]  }
 0x368   :  { %v9542_v29 = vpop.f32.mrb[44].mxu1 }
 0x369   :  { %v1156_v30 = vpop.f32.mrb[45].mxu1 }
 0x36a   :  { %v9543_v31 = vpop.f32.mrb[46].mxu1 }
 0x36b   :  { %v1354_v32 = vpack.c.bf16 %v9543_v31, %v9542_v29  ;;  %v1159_v33 = vpop.f32.mrb[47].mxu1  ;;  %v9847_v29 = vld [vmem:[#allocation15 + $0xd0] sm:$0xff]  }
 0x36c   :  { %v1353_v34 = vpack.c.bf16 %v1159_v33, %v1156_v30  ;;  %v9848_v31 = vld [vmem:[#allocation15 + $0x90] sm:$0xff]  }
 0x36e   :  { %1357 = vrot.lane.b32.xlu0 %v1353_v34, %s11708_s4 }
 0x370   :  { %v9546_v35 = vpop.f32.mrb[48].mxu1 }
 0x371   :  { %v1172_v36 = vpop.f32.mrb[49].mxu1 }
 0x372   :  { %1359 = vrot.lane.b32.xlu0 %v1354_v32, %s11708_s4  ;;  %v9547_v37 = vpop.f32.mrb[50].mxu1  ;;  %v9849_v32 = vld [vmem:[#allocation15 + $0xd8] sm:$0xff]  }
 0x373   :  { %v1366_v38 = vpack.c.bf16 %v9547_v37, %v9546_v35  ;;  %v1175_v39 = vpop.f32.mrb[51].mxu1  ;;  %v9850_v35 = vld [vmem:[#allocation15 + $0x98] sm:$0xff]   ;;  %v9852_v37 = vld [vmem:[#allocation15 + $0xa0] sm:$0xff]  }
 0x374   :  { %v1365_v40 = vpack.c.bf16 %v1175_v39, %v1172_v36  ;;  %v9851_v36 = vld [vmem:[#allocation15 + $0xe0] sm:$0xff]   ;;  %v9854_v39 = vld [vmem:[#allocation15 + $0xa8] sm:$0xff]  }
 0x375   :  { %1368 = vst.msk [vmem:[#allocation2 + $0x60] sm:$0xff] %vm1301_vm2, %v1366_v38  ;;  %v9853_v38 = vld [vmem:[#allocation15 + $0xe8] sm:$0xff]  }
 0x376   :  { %1367 = vst.msk [vmem:[#allocation2 + $0x20] sm:$0xff] %vm1301_vm2, %v1365_v40  ;;  %v9855_v40 = vld [vmem:[#allocation15 + $0xf0] sm:$0xff]  }
 0x378   :  { %v9550_v41 = vpop.f32.mrb[52].mxu1 }
 0x379   :  { %v1188_v42 = vpop.f32.mrb[53].mxu1 }
 0x37a   :  { %v9551_v43 = vpop.f32.mrb[54].mxu1 }
 0x37b   :  { %v1370_v44 = vpack.c.bf16 %v9551_v43, %v9550_v41  ;;  %v1191_v45 = vpop.f32.mrb[55].mxu1  ;;  %v9857_v43 = vld [vmem:[#allocation15 + $0xf8] sm:$0xff]  }
 0x37c   :  { %v1369_v46 = vpack.c.bf16 %v1191_v45, %v1188_v42  ;;  %v9856_v42 = vld [vmem:[#allocation15 + $0xb0] sm:$0xff]   ;;  %v9858_v45 = vld [vmem:[#allocation15 + $0xb8] sm:$0xff]  }
 0x37e   :  { %1373 = vrot.lane.b32.xlu1 %v1369_v46, %s11708_s4  ;;  %v9859_v46 = vld [vmem:[#allocation15 + $0x140] sm:$0xff]  }
 0x380   :  { %v9554_v47 = vpop.f32.mrb[56].mxu1 }
 0x381   :  { %v1204_v48 = vpop.f32.mrb[57].mxu1 }
 0x382   :  { %1375 = vrot.lane.b32.xlu1 %v1370_v44, %s11708_s4  ;;  %v9555_v49 = vpop.f32.mrb[58].mxu1 }
 0x383   :  { %v1382_v50 = vpack.c.bf16 %v9555_v49, %v9554_v47  ;;  %v1207_v51 = vpop.f32.mrb[59].mxu1  ;;  %v9861_v49 = vld [vmem:[#allocation15 + $0x148] sm:$0xff]  }
 0x384   :  { %v1381_v52 = vpack.c.bf16 %v1207_v51, %v1204_v48  ;;  %v9860_v48 = vld [vmem:[#allocation15 + $0x100] sm:$0xff]  }
 0x385   :  { %1384 = vst.msk [vmem:[#allocation2 + $0x68] sm:$0xff] %vm1301_vm2, %v1382_v50 }
 0x386   :  { %1383 = vst.msk [vmem:[#allocation2 + $0x28] sm:$0xff] %vm1301_vm2, %v1381_v52  ;;  %v9862_v52 = vld [vmem:[#allocation15 + $0x108] sm:$0xff]  }
 0x388   :  { %v9558_v53 = vpop.f32.mrb[60].mxu1 }
 0x389   :  { %v1220_v54 = vpop.f32.mrb[61].mxu1 }
 0x38a   :  { %v9559_v55 = vpop.f32.mrb[62].mxu1 }
 0x38b   :  { %v1386_v56 = vpack.c.bf16 %v9559_v55, %v9558_v53  ;;  %v1223_v57 = vpop.f32.mrb[63].mxu1  ;;  %v9863_v53 = vld [vmem:[#allocation15 + $0x150] sm:$0xff]  }
 0x38c   :  { %v1385_v58 = vpack.c.bf16 %v1223_v57, %v1220_v54  ;;  %v9864_v55 = vld [vmem:[#allocation15 + $0x110] sm:$0xff]  }
 0x38e   :  { %1389 = vrot.lane.b32.xlu0 %v1385_v58, %s11708_s4 }
 0x390   :  { %v9562_v59 = vpop.f32.mrb[64].mxu1 }
 0x391   :  { %v1236_v60 = vpop.f32.mrb[65].mxu1 }
 0x392   :  { %1391 = vrot.lane.b32.xlu0 %v1386_v56, %s11708_s4  ;;  %v9563_v61 = vpop.f32.mrb[66].mxu1  ;;  %v9865_v56 = vld [vmem:[#allocation15 + $0x158] sm:$0xff]  }
 0x393   :  { %v1398_v62 = vpack.c.bf16 %v9563_v61, %v9562_v59  ;;  %v1239_v63 = vpop.f32.mrb[67].mxu1  ;;  %v9866_v59 = vld [vmem:[#allocation15 + $0x118] sm:$0xff]   ;;  %v9868_v61 = vld [vmem:[#allocation15 + $0x120] sm:$0xff]  }
 0x394   :  { %v1397_v0 = vpack.c.bf16 %v1239_v63, %v1236_v60  ;;  %v9867_v60 = vld [vmem:[#allocation15 + $0x160] sm:$0xff]   ;;  %v9870_v63 = vld [vmem:[#allocation15 + $0x128] sm:$0xff]  }
 0x395   :  { %1400 = vst.msk [vmem:[#allocation2 + $0x70] sm:$0xff] %vm1301_vm2, %v1398_v62  ;;  %v9869_v62 = vld [vmem:[#allocation15 + $0x168] sm:$0xff]  }
 0x396   :  { %1399 = vst.msk [vmem:[#allocation2 + $0x30] sm:$0xff] %vm1301_vm2, %v1397_v0  ;;  %v9871_v0 = vld [vmem:[#allocation15 + $0x170] sm:$0xff]  }
 0x398   :  { %v9566_v1 = vpop.f32.mrb[68].mxu1 }
 0x399   :  { %v1252_v2 = vpop.f32.mrb[69].mxu1 }
 0x39a   :  { %v9567_v3 = vpop.f32.mrb[70].mxu1 }
 0x39b   :  { %v1402_v4 = vpack.c.bf16 %v9567_v3, %v9566_v1  ;;  %v1255_v5 = vpop.f32.mrb[71].mxu1  ;;  %v9873_v3 = vld [vmem:[#allocation15 + $0x178] sm:$0xff]  }
 0x39c   :  { %v1401_v6 = vpack.c.bf16 %v1255_v5, %v1252_v2  ;;  %v9872_v2 = vld [vmem:[#allocation15 + $0x130] sm:$0xff]   ;;  %v9874_v5 = vld [vmem:[#allocation15 + $0x138] sm:$0xff]  }
 0x39e   :  { %1405 = vrot.lane.b32.xlu1 %v1401_v6, %s11708_s4  ;;  %v9875_v6 = vld [vmem:[#allocation15 + $0x1c0] sm:$0xff]  }
 0x3a0   :  { %v9570_v7 = vpop.f32.mrb[72].mxu1 }
 0x3a1   :  { %v1268_v8 = vpop.f32.mrb[73].mxu1 }
 0x3a2   :  { %1407 = vrot.lane.b32.xlu1 %v1402_v4, %s11708_s4  ;;  %v9571_v9 = vpop.f32.mrb[74].mxu1 }
 0x3a3   :  { %v1414_v10 = vpack.c.bf16 %v9571_v9, %v9570_v7  ;;  %v1271_v11 = vpop.f32.mrb[75].mxu1  ;;  %v9877_v9 = vld [vmem:[#allocation15 + $0x1c8] sm:$0xff]  }
 0x3a4   :  { %v1413_v12 = vpack.c.bf16 %v1271_v11, %v1268_v8  ;;  %v9876_v8 = vld [vmem:[#allocation15 + $0x180] sm:$0xff]  }
 0x3a5   :  { %1416 = vst.msk [vmem:[#allocation2 + $0x78] sm:$0xff] %vm1301_vm2, %v1414_v10 }
 0x3a6   :  { %1415 = vst.msk [vmem:[#allocation2 + $0x38] sm:$0xff] %vm1301_vm2, %v1413_v12  ;;  %v9878_v12 = vld [vmem:[#allocation15 + $0x188] sm:$0xff]  }
 0x3a8   :  { %v9574_v13 = vpop.f32.mrb[76].mxu1 }
 0x3a9   :  { %v1284_v14 = vpop.f32.mrb[77].mxu1 }
 0x3aa   :  { %v9575_v15 = vpop.f32.mrb[78].mxu1 }
 0x3ab   :  { %v1418_v16 = vpack.c.bf16 %v9575_v15, %v9574_v13  ;;  %v1287_v17 = vpop.f32.mrb[79].mxu1  ;;  %v9879_v13 = vld [vmem:[#allocation15 + $0x1d0] sm:$0xff]  }
 0x3ac   :  { %v1417_v18 = vpack.c.bf16 %v1287_v17, %v1284_v14  ;;  %v9880_v15 = vld [vmem:[#allocation15 + $0x190] sm:$0xff]  }
 0x3ae   :  { %1421 = vrot.lane.b32.xlu0 %v1417_v18, %s11708_s4 }
 0x3b2   :  { %1423 = vrot.lane.b32.xlu0 %v1418_v16, %s11708_s4  ;;  %v9881_v16 = vld [vmem:[#allocation15 + $0x1d8] sm:$0xff]  }
 0x3bf   :  { %v1328_v19 = vpop.permute.xlu1 %1327 }
 0x3c0   :  { %1332 = vst.msk [vmem:[#allocation2 + $0x48] sm:$0xff] %vm1314_vm3, %v1328_v19  ;;  %v1326_v20 = vpop.permute.xlu0 %1325  ;;  %v9882_v19 = vld [vmem:[#allocation15 + $0x198] sm:$0xff]  }
 0x3c1   :  { %1331 = vst.msk [vmem:[#allocation2 + $0x8] sm:$0xff] %vm1314_vm3, %v1326_v20  ;;  %v9883_v20 = vld [vmem:[#allocation15 + $0x1e0] sm:$0xff]  }
 0x3c3   :  { %v1311_v21 = vpop.permute.xlu1 %1310 }
 0x3c4   :  { %1316 = vst.msk [vmem:[#allocation2 + $0x40] sm:$0xff] %vm1314_vm3, %v1311_v21  ;;  %v1309_v22 = vpop.permute.xlu0 %1308  ;;  %v9884_v21 = vld [vmem:[#allocation15 + $0x1a0] sm:$0xff]  }
 0x3c5   :  { %1315 = vst.msk [vmem:[#allocation2] sm:$0xff] %vm1314_vm3, %v1309_v22  ;;  %v9885_v22 = vld [vmem:[#allocation15 + $0x1e8] sm:$0xff]  }
 0x3c7   :  { %v1438_v27 = vld [vmem:[#allocation2 + $0x48] sm:$0xff] }
 0x3c8   :  { %v1430_v23 = vld [vmem:[#allocation2 + $0x8] sm:$0xff] }
 0x3c9   :  { %1861 = vmatprep.mubr.bf16.mxu0 %v1430_v23  ;;  %v9886_v23 = vld [vmem:[#allocation15 + $0x1a8] sm:$0xff]  }
 0x3cb   :  { %v1437_v34 = vld [vmem:[#allocation2 + $0x40] sm:$0xff] }
 0x3cc   :  { %v1429_v26 = vld [vmem:[#allocation2] sm:$0xff] }
 0x3cd   :  { %1862 = vmatmul.mubr.bf16.vlgmr.msra.gmra.mrb[0].mxu0 %v1429_v26  ;;  %v9888_v26 = vld [vmem:[#allocation15 + $0x1b0] sm:$0xff]  }
 0x3ce   :  { %9363 = vmatpush3.bf16.msra.mxu0 %v9844_v24  ;;  %1869 = vmatprep.mubr.bf16.mxu0 %v1438_v27  ;;  %v9887_v24 = vld [vmem:[#allocation15 + $0x1f0] sm:$0xff]   ;;  %v9889_v27 = vld [vmem:[#allocation15 + $0x1f8] sm:$0xff]  }
 0x3cf   :  { %9364 = vmatprep.subr.bf16.mxu0 %v9845_v25 }
 0x3d0   :  { %v1342_v30 = vpop.permute.xlu1 %1341 }
 0x3d1   :  { %1347 = vst.msk [vmem:[#allocation2 + $0x10] sm:$0xff] %vm1314_vm3, %v1342_v30 }
 0x3d2   :  { %9365 = vmatpush3.bf16.msra.mxu0 %v9846_v28 }
 0x3d3   :  { %9366 = vmatprep.subr.bf16.mxu0 %v9847_v29  ;;  %v9890_v29 = vld [vmem:[#allocation15 + $0x1b8] sm:$0xff]  }
 0x3d4   :  { %v1344_v33 = vpop.permute.xlu1 %1343 }
 0x3d5   :  { %1348 = vst.msk [vmem:[#allocation2 + $0x50] sm:$0xff] %vm1314_vm3, %v1344_v33  ;;  %1870 = vmatmul.mubr.bf16.gmra.mrb[4].mxu0 %v1437_v34 }
 0x3d6   :  { %9367 = vmatpush3.bf16.msra.mxu0 %v9848_v31 }
 0x3d7   :  { %9368 = vmatprep.subr.bf16.mxu0 %v9849_v32 }
 0x3d8   :  { %v1431_v50 = vld [vmem:[#allocation2 + $0x10] sm:$0xff] }
 0x3da   :  { %9369 = vmatpush3.bf16.msra.mxu0 %v9850_v35 }
 0x3db   :  { %9370 = vmatprep.subr.bf16.mxu0 %v9851_v36 }
 0x3dc   :  { %v1439_v57 = vld [vmem:[#allocation2 + $0x50] sm:$0xff] }
 0x3de   :  { %9371 = vmatpush3.bf16.msra.mxu0 %v9852_v37 }
 0x3df   :  { %9372 = vmatprep.subr.bf16.mxu0 %v9853_v38 }
 0x3e0   :  { %v1358_v41 = vpop.permute.xlu0 %1357 }
 0x3e1   :  { %1363 = vst.msk [vmem:[#allocation2 + $0x18] sm:$0xff] %vm1314_vm3, %v1358_v41 }
 0x3e2   :  { %9373 = vmatpush3.bf16.msra.mxu0 %v9854_v39 }
 0x3e3   :  { %9374 = vmatprep.subr.bf16.mxu0 %v9855_v40 }
 0x3e4   :  { %v1360_v44 = vpop.permute.xlu0 %1359 }
 0x3e5   :  { %1364 = vst.msk [vmem:[#allocation2 + $0x58] sm:$0xff] %vm1314_vm3, %v1360_v44 }
 0x3e6   :  { %9375 = vmatpush3.bf16.msra.mxu0 %v9856_v42 }
 0x3e7   :  { %9376 = vmatprep.subr.bf16.mxu0 %v9857_v43 }
 0x3e8   :  { %v1432_v47 = vld [vmem:[#allocation2 + $0x18] sm:$0xff] }
 0x3e9   :  { %1910 = vmatprep.mubr.bf16.mxu0 %v1432_v47 }
 0x3ea   :  { %9377 = vmatpush3.bf16.msra.mxu0 %v9858_v45 }
 0x3eb   :  { %9390 = vmatprep.subr.bf16.mxu0 %v9859_v46 }
 0x3ec   :  { %v1440_v51 = vld [vmem:[#allocation2 + $0x58] sm:$0xff] }
 0x3ed   :  { %1911 = vmatmul.mubr.bf16.vlgmr.msra.gmra.mrb[8].mxu0 %v1431_v50 }
 0x3ee   :  { %1918 = vmatprep.mubr.bf16.mxu0 %v1440_v51  ;;  %9391 = vmatpush3.bf16.msra.mxu0 %v9860_v48 }
 0x3ef   :  { %9392 = vmatprep.subr.bf16.mxu0 %v9861_v49 }
 0x3f0   :  { %v1374_v54 = vpop.permute.xlu1 %1373 }
 0x3f1   :  { %1379 = vst.msk [vmem:[#allocation2 + $0x20] sm:$0xff] %vm1314_vm3, %v1374_v54 }
 0x3f2   :  { %9393 = vmatpush3.bf16.msra.mxu0 %v9862_v52 }
 0x3f3   :  { %9394 = vmatprep.subr.bf16.mxu0 %v9863_v53 }
 0x3f4   :  { %v1376_v58 = vpop.permute.xlu1 %1375 }
 0x3f5   :  { %1919 = vmatmul.mubr.bf16.gmra.mrb[12].mxu0 %v1439_v57  ;;  %1380 = vst.msk [vmem:[#allocation2 + $0x60] sm:$0xff] %vm1314_vm3, %v1376_v58 }
 0x3f6   :  { %9395 = vmatpush3.bf16.msra.mxu0 %v9864_v55 }
 0x3f7   :  { %9396 = vmatprep.subr.bf16.mxu0 %v9865_v56 }
 0x3f8   :  { %v1433_v10 = vld [vmem:[#allocation2 + $0x20] sm:$0xff] }
 0x3fa   :  { %9397 = vmatpush3.bf16.msra.mxu0 %v9866_v59 }
 0x3fb   :  { %9398 = vmatprep.subr.bf16.mxu0 %v9867_v60 }
 0x3fc   :  { %v1441_v17 = vld [vmem:[#allocation2 + $0x60] sm:$0xff] }
 0x3fe   :  { %9399 = vmatpush3.bf16.msra.mxu0 %v9868_v61 }
 0x3ff   :  { %9400 = vmatprep.subr.bf16.mxu0 %v9869_v62  ;;  %v9891_v62 = vld [vmem:[%s11713_s16] sm:$0xff]  }
 0x400   :  { %v1390_v1 = vpop.permute.xlu0 %1389 }
 0x401   :  { %1395 = vst.msk [vmem:[#allocation2 + $0x28] sm:$0xff] %vm1314_vm3, %v1390_v1  ;;  %v9898_v1 = vld [vmem:[#allocation19 + $0x14] ss:$8 sps:$4 sm:$0xff]  }
 0x402   :  { %9401 = vmatpush3.bf16.msra.mxu0 %v9870_v63  ;;  %v9893_v63 = vld [vmem:[#allocation19] ss:$8 sps:$4 sm:$0xff]  }
 0x403   :  { %9402 = vmatprep.subr.bf16.mxu0 %v9871_v0  ;;  %v9895_v0 = vld [vmem:[#allocation19 + $0x4] ss:$8 sps:$4 sm:$0xff]  }
 0x404   :  { %v1392_v4 = vpop.permute.xlu0 %1391  ;;  %3906 = vmatprep.subr.bf16.mxu1 %v9895_v0 }
 0x405   :  { %1396 = vst.msk [vmem:[#allocation2 + $0x68] sm:$0xff] %vm1314_vm3, %v1392_v4  ;;  %3907 = vmatpush1.bf16.msra.mxu1 %v9893_v63  ;;  %v9899_v4 = vld [vmem:[#allocation19 + $0x20] ss:$8 sps:$4 sm:$0xff]  }
 0x406   :  { %9403 = vmatpush3.bf16.msra.mxu0 %v9872_v2  ;;  %v9896_v2 = vld [vmem:[#allocation19 + $0x10] ss:$8 sps:$4 sm:$0xff]   ;;  %3908 = vmatprep.subr.bf16.mxu1 %v9898_v1 }
 0x407   :  { %9404 = vmatprep.subr.bf16.mxu0 %v9873_v3  ;;  %v9901_v3 = vld [vmem:[#allocation19 + $0x24] ss:$8 sps:$4 sm:$0xff]  }
 0x408   :  { %v1434_v7 = vld [vmem:[#allocation2 + $0x28] sm:$0xff] }
 0x409   :  { %1959 = vmatprep.mubr.bf16.mxu0 %v1434_v7  ;;  %3909 = vmatpush1.bf16.msra.mxu1 %v9896_v2 }
 0x40a   :  { %9405 = vmatpush3.bf16.msra.mxu0 %v9874_v5  ;;  %3910 = vmatprep.subr.bf16.mxu1 %v9901_v3 }
 0x40b   :  { %9418 = vmatprep.subr.bf16.mxu0 %v9875_v6  ;;  %v9904_v6 = vld [vmem:[#allocation19 + $0x34] ss:$8 sps:$4 sm:$0xff]  }
 0x40c   :  { %v1442_v11 = vld [vmem:[#allocation2 + $0x68] sm:$0xff] }
 0x40d   :  { %1960 = vmatmul.mubr.bf16.vlgmr.msra.gmra.mrb[16].mxu0 %v1433_v10  ;;  %3911 = vmatpush1.bf16.msra.mxu1 %v9899_v4 }
 0x40e   :  { %1967 = vmatprep.mubr.bf16.mxu0 %v1442_v11  ;;  %9419 = vmatpush3.bf16.msra.mxu0 %v9876_v8  ;;  %v9902_v11 = vld [vmem:[#allocation19 + $0x30] ss:$8 sps:$4 sm:$0xff]  }
 0x40f   :  { %9420 = vmatprep.subr.bf16.mxu0 %v9877_v9  ;;  %3912 = vmatprep.subr.bf16.mxu1 %v9904_v6 }
 0x410   :  { %v1406_v14 = vpop.permute.xlu1 %1405 }
 0x411   :  { %1411 = vst.msk [vmem:[#allocation2 + $0x30] sm:$0xff] %vm1314_vm3, %v1406_v14  ;;  %v9909_v14 = vld [vmem:[#allocation19 + $0x44] ss:$8 sps:$4 sm:$0xff]   ;;  %3913 = vmatpush1.bf16.msra.mxu1 %v9902_v11 }
 0x412   :  { %9421 = vmatpush3.bf16.msra.mxu0 %v9878_v12  ;;  %3914 = vmatprep.subr.bf16.mxu1 %v9909_v14 }
 0x413   :  { %9422 = vmatprep.subr.bf16.mxu0 %v9879_v13 }
 0x414   :  { %v1408_v18 = vpop.permute.xlu1 %1407 }
 0x415   :  { %1968 = vmatmul.mubr.bf16.gmra.mrb[20].mxu0 %v1441_v17  ;;  %1412 = vst.msk [vmem:[#allocation2 + $0x70] sm:$0xff] %vm1314_vm3, %v1408_v18  ;;  %v9912_v18 = vld [vmem:[#allocation19 + $0x54] ss:$8 sps:$4 sm:$0xff]  }
 0x416   :  { %9423 = vmatpush3.bf16.msra.mxu0 %v9880_v15 }
 0x417   :  { %9424 = vmatprep.subr.bf16.mxu0 %v9881_v16  ;;  %v9907_v16 = vld [vmem:[#allocation19 + $0x40] ss:$8 sps:$4 sm:$0xff]  }
 0x418   :  { %v1435_v31 = vld [vmem:[#allocation2 + $0x30] sm:$0xff]  ;;  %3915 = vmatpush1.bf16.msra.mxu1 %v9907_v16 }
 0x419   :  { %3916 = vmatprep.subr.bf16.mxu1 %v9912_v18 }
 0x41a   :  { %9425 = vmatpush3.bf16.msra.mxu0 %v9882_v19 }
 0x41b   :  { %9426 = vmatprep.subr.bf16.mxu0 %v9883_v20 }
 0x41c   :  { %v1443_v33 = vld [vmem:[#allocation2 + $0x70] sm:$0xff] }
 0x41e   :  { %9427 = vmatpush3.bf16.msra.mxu0 %v9884_v21 }
 0x41f   :  { %9428 = vmatprep.subr.bf16.mxu0 %v9885_v22 }
 0x420   :  { %v1422_v25 = vpop.permute.xlu0 %1421 }
 0x421   :  { %1427 = vst.msk [vmem:[#allocation2 + $0x38] sm:$0xff] %vm1314_vm3, %v1422_v25 }
 0x422   :  { %9429 = vmatpush3.bf16.msra.mxu0 %v9886_v23  ;;  %v9910_v23 = vld [vmem:[#allocation19 + $0x50] ss:$8 sps:$4 sm:$0xff]  }
 0x423   :  { %9430 = vmatprep.subr.bf16.mxu0 %v9887_v24  ;;  %3917 = vmatpush1.bf16.msra.mxu1 %v9910_v23 }
 0x424   :  { %v1424_v28 = vpop.permute.xlu0 %1423 }
 0x425   :  { %1428 = vst.msk [vmem:[#allocation2 + $0x78] sm:$0xff] %vm1314_vm3, %v1424_v28  ;;  %v9913_v28 = vld [vmem:[#allocation19 + $0x60] ss:$8 sps:$4 sm:$0xff]  }
 0x426   :  { %9431 = vmatpush3.bf16.msra.mxu0 %v9888_v26  ;;  %v9915_v26 = vld [vmem:[#allocation19 + $0x64] ss:$8 sps:$4 sm:$0xff]  }
 0x427   :  { %9432 = vmatprep.subr.bf16.mxu0 %v9889_v27  ;;  %3918 = vmatprep.subr.bf16.mxu1 %v9915_v26 }
 0x428   :  { %v1436_v30 = vld [vmem:[#allocation2 + $0x38] sm:$0xff]  ;;  %3919 = vmatpush1.bf16.msra.mxu1 %v9913_v28 }
 0x429   :  { %2008 = vmatprep.mubr.bf16.mxu0 %v1436_v30  ;;  %v9916_v30 = vld [vmem:[#allocation19 + $0x70] ss:$8 sps:$4 sm:$0xff]  }
 0x42a   :  { %9433 = vmatpush3.bf16.msra.mxu0 %v9890_v29  ;;  %v9918_v29 = vld [vmem:[#allocation19 + $0x74] ss:$8 sps:$4 sm:$0xff]  }
 0x42b   :  { %3920 = vmatprep.subr.bf16.mxu1 %v9918_v29 }
 0x42c   :  { %v1444_v32 = vld [vmem:[#allocation2 + $0x78] sm:$0xff]  ;;  %3921 = vmatpush1.bf16.msra.mxu1 %v9916_v30 }
 0x42d   :  { %2009 = vmatmul.mubr.bf16.vlgmr.msra.gmra.mrb[24].mxu0 %v1435_v31  ;;  %v9921_v31 = vld [vmem:[#allocation19 + $0x84] ss:$8 sps:$4 sm:$0xff]  }
 0x42e   :  { %2016 = vmatprep.mubr.bf16.mxu0 %v1444_v32  ;;  %v9919_v32 = vld [vmem:[#allocation19 + $0x80] ss:$8 sps:$4 sm:$0xff]   ;;  %3922 = vmatprep.subr.bf16.mxu1 %v9921_v31 }
 0x430   :  { %3923 = vmatpush1.bf16.msra.mxu1 %v9919_v32  ;;  %v8857_v32 = vld [vmem:[#allocation18] ss:$0 sm:$0xff] }
 0x435   :  { %2017 = vmatmul.mubr.bf16.gmra.mrb[28].mxu0 %v1443_v33  ;;  %v9924_v33 = vld [vmem:[#allocation19 + $0x94] ss:$8 sps:$4 sm:$0xff]  }
 0x436   :  { %9580 = vmatprep.mubr.msk.bf16.mxu0 %vm2408_vm4, %v9891_v62  ;;  %3924 = vmatprep.subr.bf16.mxu1 %v9924_v33  ;;  %v9937_v62 = vld [vmem:[#allocation19 + $0xe0] ss:$8 sps:$4 sm:$0xff]  }
 0x4a0   :  { %v9350_v34 = vpop.f32.mrb[0].mxu0 }
 0x4a1   :  { %v9351_v35 = vpop.f32.mrb[1].mxu0 }
 0x4a2   :  { %v9352_v36 = vadd.f32 %v9351_v35, %v9350_v34  ;;  %v9353_v37 = vpop.f32.mrb[2].mxu0  ;;  %v9922_v34 = vld [vmem:[#allocation19 + $0x90] ss:$8 sps:$4 sm:$0xff]   ;;  %v9927_v35 = vld [vmem:[#allocation19 + $0xa4] ss:$8 sps:$4 sm:$0xff]  }
 0x4a3   :  { %v9354_v38 = vpop.f32.mrb[3].mxu0  ;;  %3925 = vmatpush1.bf16.msra.mxu1 %v9922_v34 }
 0x4a4   :  { %v9355_v39 = vadd.f32 %v9354_v38, %v9353_v37  ;;  %3926 = vmatprep.subr.bf16.mxu1 %v9927_v35  ;;  %v9930_v38 = vld [vmem:[#allocation19 + $0xb4] ss:$8 sps:$4 sm:$0xff]  }
 0x4a8   :  { %v9356_v40 = vpop.f32.mrb[4].mxu0 }
 0x4a9   :  { %v9357_v41 = vpop.f32.mrb[5].mxu0 }
 0x4aa   :  { %v9358_v42 = vadd.f32 %v9357_v41, %v9356_v40  ;;  %v9359_v43 = vpop.f32.mrb[6].mxu0 }
 0x4ab   :  { %v9360_v44 = vpop.f32.mrb[7].mxu0 }
 0x4ac   :  { %v9361_v45 = vadd.f32 %v9360_v44, %v9359_v43  ;;  %v9928_v43 = vld [vmem:[#allocation19 + $0xb0] ss:$8 sps:$4 sm:$0xff]  }
 0x4c0   :  { %v9378_v46 = vpop.f32.mrb[8].mxu0 }
 0x4c1   :  { %v9379_v47 = vpop.f32.mrb[9].mxu0 }
 0x4c2   :  { %v9380_v48 = vadd.f32 %v9379_v47, %v9378_v46  ;;  %v9381_v49 = vpop.f32.mrb[10].mxu0  ;;  %v9933_v46 = vld [vmem:[#allocation19 + $0xc4] ss:$8 sps:$4 sm:$0xff]  }
 0x4c3   :  { %v9382_v50 = vpop.f32.mrb[11].mxu0 }
 0x4c4   :  { %v1913_v51 = vadd.f32 %v9380_v48, %v9352_v36  ;;  %v9383_v52 = vadd.f32 %v9382_v50, %v9381_v49  ;;  %v9925_v36 = vld [vmem:[#allocation19 + $0xa0] ss:$8 sps:$4 sm:$0xff]  }
 0x4c5   :  { %3927 = vmatpush1.bf16.msra.mxu1 %v9925_v36  ;;  %v9931_v48 = vld [vmem:[#allocation19 + $0xc0] ss:$8 sps:$4 sm:$0xff]  }
 0x4c6   :  { %v1916_v53 = vadd.f32 %v9383_v52, %v9355_v39  ;;  %3928 = vmatprep.subr.bf16.mxu1 %v9930_v38 }
 0x4c8   :  { %v9384_v54 = vpop.f32.mrb[12].mxu0 }
 0x4c9   :  { %v9385_v55 = vpop.f32.mrb[13].mxu0  ;;  %3929 = vmatpush1.bf16.msra.mxu1 %v9928_v43 }
 0x4ca   :  { %v9386_v56 = vadd.f32 %v9385_v55, %v9384_v54  ;;  %v9387_v57 = vpop.f32.mrb[14].mxu0  ;;  %3930 = vmatprep.subr.bf16.mxu1 %v9933_v46 }
 0x4cb   :  { %v9388_v58 = vpop.f32.mrb[15].mxu0 }
 0x4cc   :  { %v1921_v59 = vadd.f32 %v9386_v56, %v9358_v42  ;;  %v9389_v60 = vadd.f32 %v9388_v58, %v9387_v57  ;;  %v9934_v56 = vld [vmem:[#allocation19 + $0xd0] ss:$8 sps:$4 sm:$0xff]  }
 0x4cd   :  { %3931 = vmatpush1.bf16.msra.mxu1 %v9931_v48 }
 0x4ce   :  { %v1924_v61 = vadd.f32 %v9389_v60, %v9361_v45 }
 0x4e0   :  { %v9406_v5 = vpop.f32.mrb[16].mxu0 }
 0x4e1   :  { %v9407_v7 = vpop.f32.mrb[17].mxu0 }
 0x4e2   :  { %v9408_v8 = vadd.f32 %v9407_v7, %v9406_v5  ;;  %v9409_v9 = vpop.f32.mrb[18].mxu0 }
 0x4e3   :  { %v9410_v10 = vpop.f32.mrb[19].mxu0 }
 0x4e4   :  { %v1962_v12 = vadd.f32 %v9408_v8, %v1913_v51  ;;  %v9411_v13 = vadd.f32 %v9410_v10, %v9409_v9  ;;  %v9936_v51 = vld [vmem:[#allocation19 + $0xd4] ss:$8 sps:$4 sm:$0xff]  }
 0x4e5   :  { %3932 = vmatprep.subr.bf16.mxu1 %v9936_v51  ;;  %v9892_v51 = vld [vmem:[%s11713_s16 + $0x8] sm:$0xff]  }
 0x4e6   :  { %v1965_v15 = vadd.f32 %v9411_v13, %v1916_v53  ;;  %3933 = vmatpush1.bf16.msra.mxu1 %v9934_v56  ;;  %v9945_v56 = vld [vmem:[#allocation19 + $0x104] ss:$8 sps:$4 sm:$0xff]  }
 0x4e8   :  { %v9412_v17 = vpop.f32.mrb[20].mxu0 }
 0x4e9   :  { %v9413_v19 = vpop.f32.mrb[21].mxu0 }
 0x4ea   :  { %v9414_v20 = vadd.f32 %v9413_v19, %v9412_v17  ;;  %v9415_v21 = vpop.f32.mrb[22].mxu0 }
 0x4eb   :  { %v9416_v22 = vpop.f32.mrb[23].mxu0 }
 0x4ec   :  { %v1970_v24 = vadd.f32 %v9414_v20, %v1921_v59  ;;  %v9417_v25 = vadd.f32 %v9416_v22, %v9415_v21  ;;  %v9939_v59 = vld [vmem:[#allocation19 + $0xe4] ss:$8 sps:$4 sm:$0xff]  }
 0x4ed   :  { %3934 = vmatprep.subr.bf16.mxu1 %v9939_v59 }
 0x4ee   :  { %v1973_v27 = vadd.f32 %v9417_v25, %v1924_v61  ;;  %3935 = vmatpush1.bf16.msra.mxu1 %v9937_v62 }
 0x500   :  { %v9434_v37 = vpop.f32.mrb[24].mxu0 }
 0x501   :  { %v9435_v39 = vpop.f32.mrb[25].mxu0 }
 0x502   :  { %v9436_v40 = vadd.f32 %v9435_v39, %v9434_v37  ;;  %v9437_v41 = vpop.f32.mrb[26].mxu0 }
 0x503   :  { %v9438_v42 = vpop.f32.mrb[27].mxu0 }
 0x504   :  { %v2011_v44 = vadd.f32 %v9436_v40, %v1962_v12  ;;  %v9439_v45 = vadd.f32 %v9438_v42, %v9437_v41 }
 0x506   :  { %v2014_v47 = vadd.f32 %v9439_v45, %v1965_v15 }
 0x508   :  { %v2025_v49 = vadd.f32 %v2014_v47, %v2011_v44  ;;  %v9440_v50 = vpop.f32.mrb[28].mxu0 }
 0x509   :  { %v9441_v52 = vpop.f32.mrb[29].mxu0 }
 0x50a   :  { %v9442_v53 = vadd.f32 %v9441_v52, %v9440_v50  ;;  %v9443_v54 = vpop.f32.mrb[30].mxu0  ;;  %v9905_v52 = vld [vmem:[%s11713_s16 + $0x10] sm:$0xff]  }
 0x50b   :  { %v9444_v55 = vpop.f32.mrb[31].mxu0 }
 0x50c   :  { %v2019_v57 = vadd.f32 %v9442_v53, %v1970_v24  ;;  %v9445_v58 = vadd.f32 %v9444_v55, %v9443_v54  ;;  %v9906_v53 = vld [vmem:[%s11713_s16 + $0x18] sm:$0xff]   ;;  %v9942_v54 = vld [vmem:[#allocation19 + $0xf4] ss:$8 sps:$4 sm:$0xff]  }
 0x50d   :  { %v9940_v55 = vld [vmem:[#allocation19 + $0xf0] ss:$8 sps:$4 sm:$0xff]   ;;  %3936 = vmatprep.subr.bf16.mxu1 %v9942_v54  ;;  %v10011_v54 = vld [vmem:[#allocation19 + $0x260] ss:$8 sps:$4 sm:$0xff]  }
 0x50e   :  { %v2026_v60 = vadd.f32 %v2025_v49, %v2019_v57  ;;  %v2022_v61 = vadd.f32 %v9445_v58, %v1973_v27  ;;  %v8856_v27 = vld [vmem:[#allocation16] ss:$0 sm:$0xff]  ;;  %3937 = vmatpush1.bf16.msra.mxu1 %v9940_v55 }
 0x50f   :  { %3947 = vmatprep.subr.bf16.mxu1 %v9945_v56  ;;  %v9974_v58 = vld [vmem:[%s11713_s16 + $0x28] sm:$0xff]  }
 0x510   :  { %v2027_v63 = vadd.f32 %v2026_v60, %v2022_v61  ;;  %v10016_v55 = vld [vmem:[#allocation19 + $0x274] ss:$8 sps:$4 sm:$0xff]   ;;  %v10014_v56 = vld [vmem:[#allocation19 + $0x270] ss:$8 sps:$4 sm:$0xff]  }
 0x512   :  { %v2028_v0 = vrot.slane %v2027_v63, 4 }
 0x514   :  { %v2029_v1 = vadd.f32 %v2028_v0, %v2027_v63  ;;  %v9943_v0 = vld [vmem:[#allocation19 + $0x100] ss:$8 sps:$4 sm:$0xff]  }
 0x516   :  { %v2030_v2 = vrot.slane %v2029_v1, 2 }
 0x518   :  { %v2031_v3 = vadd.f32 %v2030_v2, %v2029_v1  ;;  %v9948_v2 = vld [vmem:[#allocation19 + $0x114] ss:$8 sps:$4 sm:$0xff]  }
 0x51a   :  { %v2032_v4 = vrot.slane %v2031_v3, 1 }
 0x51c   :  { %v2033_v5 = vadd.f32 %v2032_v4, %v2031_v3  ;;  %v9946_v4 = vld [vmem:[#allocation19 + $0x110] ss:$8 sps:$4 sm:$0xff]  }
 0x51e   :  { %v2035_v6 = vmul.f32 0.03125, %v2033_v5 }
 0x520   :  { %v2036_v7 = vsub.f32 %v2011_v44, %v2035_v6  ;;  %v2037_v8 = vsub.f32 %v2014_v47, %v2035_v6  ;;  %v2038_v9 = vsub.f32 %v2019_v57, %v2035_v6  ;;  %v2039_v10 = vsub.f32 %v2022_v61, %v2035_v6  ;;  %v9973_v57 = vld [vmem:[%s11713_s16 + $0x20] sm:$0xff]   ;;  %v9951_v6 = vld [vmem:[#allocation19 + $0x124] ss:$8 sps:$4 sm:$0xff]  }
 0x522   :  { %v2040_v11 = vmul.f32 %v2036_v7, %v2036_v7  ;;  %v2041_v12 = vmul.f32 %v2037_v8, %v2037_v8  ;;  %v2042_v13 = vmul.f32 %v2038_v9, %v2038_v9  ;;  %v2043_v15 = vmul.f32 %v2039_v10, %v2039_v10 }
 0x524   :  { %v2044_v14 = vadd.f32 %v2041_v12, %v2040_v11  ;;  %v9954_v11 = vld [vmem:[#allocation19 + $0x134] ss:$8 sps:$4 sm:$0xff]   ;;  %v9952_v12 = vld [vmem:[#allocation19 + $0x130] ss:$8 sps:$4 sm:$0xff]  }
 0x526   :  { %v2045_v16 = vadd.f32 %v2044_v14, %v2042_v13  ;;  %v9957_v13 = vld [vmem:[#allocation19 + $0x144] ss:$8 sps:$4 sm:$0xff]   ;;  %v9955_v14 = vld [vmem:[#allocation19 + $0x140] ss:$8 sps:$4 sm:$0xff]  }
 0x528   :  { %v2046_v17 = vadd.f32 %v2045_v16, %v2043_v15  ;;  %v9960_v15 = vld [vmem:[#allocation19 + $0x154] ss:$8 sps:$4 sm:$0xff]   ;;  %v9958_v16 = vld [vmem:[#allocation19 + $0x150] ss:$8 sps:$4 sm:$0xff]  }
 0x52a   :  { %v2047_v18 = vrot.slane %v2046_v17, 4 }
 0x52c   :  { %v2048_v19 = vadd.f32 %v2047_v18, %v2046_v17  ;;  %v9963_v17 = vld [vmem:[#allocation19 + $0x164] ss:$8 sps:$4 sm:$0xff]   ;;  %v9961_v18 = vld [vmem:[#allocation19 + $0x160] ss:$8 sps:$4 sm:$0xff]  }
 0x52e   :  { %v2049_v20 = vrot.slane %v2048_v19, 2 }
 0x530   :  { %v2050_v21 = vadd.f32 %v2049_v20, %v2048_v19  ;;  %v9966_v19 = vld [vmem:[#allocation19 + $0x174] ss:$8 sps:$4 sm:$0xff]   ;;  %v9964_v20 = vld [vmem:[#allocation19 + $0x170] ss:$8 sps:$4 sm:$0xff]  }
 0x532   :  { %v2051_v22 = vrot.slane %v2050_v21, 1 }
 0x534   :  { %v2052_v23 = vadd.f32 %v2051_v22, %v2050_v21  ;;  %v9969_v21 = vld [vmem:[#allocation19 + $0x184] ss:$8 sps:$4 sm:$0xff]   ;;  %v9967_v22 = vld [vmem:[#allocation19 + $0x180] ss:$8 sps:$4 sm:$0xff]  }
 0x536   :  { %v2053_v24 = vmul.f32 0.03125, %v2052_v23  ;;  %v9972_v23 = vld [vmem:[#allocation19 + $0x194] ss:$8 sps:$4 sm:$0xff]  }
 0x538   :  { %v2054_v25 = vadd.f32 1e-05, %v2053_v24  ;;  %v9970_v24 = vld [vmem:[#allocation19 + $0x190] ss:$8 sps:$4 sm:$0xff]  }
 0x53a   :  { %10283 = vrsqrt.f32 %v2054_v25  ;;  %v10071_v25 = vld [vmem:[%s11713_s16 + $0x30] sm:$0xff]  }
 0x544   :  { %v10284_v26 = vpop.eup %10283 }
 0x545   :  { %v2059_v28 = vmul.f32 %v10284_v26, %v2039_v10  ;;  %v2056_v29 = vmul.f32 %v10284_v26, %v2036_v7  ;;  %v2057_v30 = vmul.f32 %v10284_v26, %v2037_v8  ;;  %v2058_v31 = vmul.f32 %v10284_v26, %v2038_v9  ;;  %v9949_v10 = vld [vmem:[#allocation19 + $0x120] ss:$8 sps:$4 sm:$0xff]   ;;  %v9977_v26 = vld [vmem:[#allocation19 + $0x1a4] ss:$8 sps:$4 sm:$0xff]  }
 0x547   :  { %v2070_v33 = vmul.f32 %v8856_v27, %v2059_v28  ;;  %v2067_v34 = vmul.f32 %v8856_v27, %v2056_v29  ;;  %v2068_v35 = vmul.f32 %v8856_v27, %v2057_v30  ;;  %v2069_v36 = vmul.f32 %v8856_v27, %v2058_v31  ;;  %v10072_v27 = vld [vmem:[%s11713_s16 + $0x38] sm:$0xff]   ;;  %v9980_v29 = vld [vmem:[#allocation19 + $0x1b4] ss:$8 sps:$4 sm:$0xff]  }
 0x548   :  { %v9975_v28 = vld [vmem:[#allocation19 + $0x1a0] ss:$8 sps:$4 sm:$0xff]   ;;  %v9978_v30 = vld [vmem:[#allocation19 + $0x1b0] ss:$8 sps:$4 sm:$0xff]   ;;  %v9983_v31 = vld [vmem:[#allocation19 + $0x1c4] ss:$8 sps:$4 sm:$0xff]  }
 0x549   :  { %v2078_v37 = vadd.f32 %v8857_v32, %v2067_v34  ;;  %v2079_v38 = vadd.f32 %v8857_v32, %v2068_v35  ;;  %v2080_v39 = vadd.f32 %v8857_v32, %v2069_v36  ;;  %v2081_v40 = vadd.f32 %v8857_v32, %v2070_v33  ;;  %v9981_v32 = vld [vmem:[#allocation19 + $0x1c0] ss:$8 sps:$4 sm:$0xff]   ;;  %v9986_v33 = vld [vmem:[#allocation19 + $0x1d4] ss:$8 sps:$4 sm:$0xff]   ;;  %v9984_v34 = vld [vmem:[#allocation19 + $0x1d0] ss:$8 sps:$4 sm:$0xff]  }
 0x54a   :  { %v9989_v35 = vld [vmem:[#allocation19 + $0x1e4] ss:$8 sps:$4 sm:$0xff]   ;;  %v9987_v36 = vld [vmem:[#allocation19 + $0x1e0] ss:$8 sps:$4 sm:$0xff]  }
 0x54b   :  { %vm2082_vm5 = vcmp.gt.f32.partialorder %v2078_v37, 0.0  ;;  %vm2083_vm6 = vcmp.gt.f32.partialorder %v2079_v38, 0.0  ;;  %v2086_v41 = vmul.f32 0.2, %v2078_v37  ;;  %v2087_v42 = vmul.f32 0.2, %v2079_v38 }
 0x54c   :  { %vm2084_vm7 = vcmp.gt.f32.partialorder %v2080_v39, 0.0  ;;  %vm2085_vm8 = vcmp.gt.f32.partialorder %v2081_v40, 0.0  ;;  %v2088_v43 = vmul.f32 0.2, %v2080_v39  ;;  %v2089_v44 = vmul.f32 0.2, %v2081_v40 }
 0x54d   :  { %v2090_v45 = vsel %vm2082_vm5, %v2078_v37, %v2086_v41  ;;  %v2091_v46 = vsel %vm2083_vm6, %v2079_v38, %v2087_v42  ;;  %v9992_v37 = vld [vmem:[#allocation19 + $0x1f4] ss:$8 sps:$4 sm:$0xff]   ;;  %v9990_v38 = vld [vmem:[#allocation19 + $0x1f0] ss:$8 sps:$4 sm:$0xff]  }
 0x54e   :  { %v2366_v47 = vpack.c.bf16 %v2091_v46, %v2090_v45  ;;  %v2092_v48 = vsel %vm2084_vm7, %v2080_v39, %v2088_v43  ;;  %v2093_v49 = vsel %vm2085_vm8, %v2081_v40, %v2089_v44  ;;  %v9995_v39 = vld [vmem:[#allocation19 + $0x204] ss:$8 sps:$4 sm:$0xff]   ;;  %v9993_v40 = vld [vmem:[#allocation19 + $0x200] ss:$8 sps:$4 sm:$0xff]   ;;  %v9998_v43 = vld [vmem:[#allocation19 + $0x214] ss:$8 sps:$4 sm:$0xff]  }
 0x54f   :  { %v2367_v50 = vpack.c.bf16 %v2093_v49, %v2092_v48  ;;  %v9996_v44 = vld [vmem:[#allocation19 + $0x210] ss:$8 sps:$4 sm:$0xff]   ;;  %v10001_v45 = vld [vmem:[#allocation19 + $0x224] ss:$8 sps:$4 sm:$0xff]   ;;  %v9999_v46 = vld [vmem:[#allocation19 + $0x220] ss:$8 sps:$4 sm:$0xff]  }
 0x550   :  { %9576 = vmatprep.subr.bf16.mxu0 %v2366_v47  ;;  %v10002_v48 = vld [vmem:[#allocation19 + $0x230] ss:$8 sps:$4 sm:$0xff]   ;;  %v10007_v49 = vld [vmem:[#allocation19 + $0x244] ss:$8 sps:$4 sm:$0xff]  }
 0x551   :  { %9577 = vmatpush3.bf16.msra.mxu0 %v2366_v47  ;;  %v10004_v47 = vld [vmem:[#allocation19 + $0x234] ss:$8 sps:$4 sm:$0xff]  }
 0x552   :  { %9578 = vmatprep.subr.bf16.mxu0 %v2367_v50 }
 0x555   :  { %9579 = vmatpush3.bf16.msra.mxu0 %v2367_v50  ;;  %v10005_v50 = vld [vmem:[#allocation19 + $0x240] ss:$8 sps:$4 sm:$0xff]  }
 0x558   :  { %9581 = vmatmul.mubr.msk.bf16.vlgmr.msra.gmra.mrb[32].mxu0 %vm2408_vm4, %v9892_v51  ;;  %v10010_v51 = vld [vmem:[#allocation19 + $0x254] ss:$8 sps:$4 sm:$0xff]  }
 0x559   :  { %9584 = vmatprep.mubr.msk.bf16.mxu0 %vm2408_vm4, %v9905_v52  ;;  %v10008_v52 = vld [vmem:[#allocation19 + $0x250] ss:$8 sps:$4 sm:$0xff]  }
 0x560   :  { %9585 = vmatmul.mubr.msk.bf16.gmra.mrb[36].mxu0 %vm2408_vm4, %v9906_v53  ;;  %v10013_v53 = vld [vmem:[#allocation19 + $0x264] ss:$8 sps:$4 sm:$0xff]  }
 0x561   :  { %9588 = vmatprep.mubr.msk.bf16.mxu0 %vm2408_vm4, %v9973_v57  ;;  %v10019_v57 = vld [vmem:[#allocation19 + $0x284] ss:$8 sps:$4 sm:$0xff]  }
 0x568   :  { %9589 = vmatmul.mubr.msk.bf16.gmra.mrb[40].mxu0 %vm2408_vm4, %v9974_v58  ;;  %v10017_v58 = vld [vmem:[#allocation19 + $0x280] ss:$8 sps:$4 sm:$0xff]  }
 0x569   :  { %9592 = vmatprep.mubr.msk.bf16.mxu0 %vm2408_vm4, %v10071_v25  ;;  %v10050_v25 = vld [vmem:[#allocation19 + $0x330] ss:$8 sps:$4 sm:$0xff]  }
 0x570   :  { %9593 = vmatmul.mubr.msk.bf16.gmra.mrb[44].mxu0 %vm2408_vm4, %v10072_v27  ;;  %v10058_v27 = vld [vmem:[#allocation19 + $0x354] ss:$8 sps:$4 sm:$0xff]  }
 0x62b   :  { %v11177_v59 = vpop.f32.mrb[32].mxu0 }
 0x62c   :  { %v2467_v60 = vpop.f32.mrb[33].mxu0  ;;  %v9271_v42 = vpack.c.bf16 %v11177_v59, %v11177_v59  ;;  %v10022_v59 = vld [vmem:[#allocation19 + $0x294] ss:$8 sps:$4 sm:$0xff]  }
 0x62d   :  { %v9583_v61 = vpop.f32.mrb[34].mxu0  ;;  %v9269_v1 = vpack.c.bf16 %v2467_v60, %v2467_v60  ;;  %v10020_v60 = vld [vmem:[#allocation19 + $0x290] ss:$8 sps:$4 sm:$0xff]  }
 0x62e   :  { %v2470_v62 = vpop.f32.mrb[35].mxu0  ;;  %v9272_v3 = vpack.c.bf16 %v9583_v61, %v9583_v61  ;;  %v10025_v61 = vld [vmem:[#allocation19 + $0x2a4] ss:$8 sps:$4 sm:$0xff]  }
 0x62f   :  { %v9270_v63 = vpack.c.bf16 %v2470_v62, %v2470_v62  ;;  %v10023_v62 = vld [vmem:[#allocation19 + $0x2a0] ss:$8 sps:$4 sm:$0xff]  }
 0x631   :  { %3938 = vmatprep.mubr.bf16.mxu1 %v9270_v63  ;;  %v10028_v63 = vld [vmem:[#allocation19 + $0x2b4] ss:$8 sps:$4 sm:$0xff]  }
 0x632   :  { %3939 = vmatmul.mubr.bf16.vlgmr.msra.gmra.mrb[80].mxu1 %v9269_v1  ;;  %v10031_v1 = vld [vmem:[#allocation19 + $0x2c4] ss:$8 sps:$4 sm:$0xff]  }
 0x633   :  { %3948 = vmatpush1.bf16.msra.mxu1 %v9943_v0  ;;  %3979 = vmatprep.mubr.bf16.mxu1 %v9272_v3  ;;  %v11179_v5 = vpop.f32.mrb[36].mxu0  ;;  %v10026_v0 = vld [vmem:[#allocation19 + $0x2b0] ss:$8 sps:$4 sm:$0xff]   ;;  %v10034_v3 = vld [vmem:[#allocation19 + $0x2d4] ss:$8 sps:$4 sm:$0xff]  }
 0x634   :  { %3949 = vmatprep.subr.bf16.mxu1 %v9948_v2  ;;  %v11181_v7 = vpop.f32.mrb[37].mxu0  ;;  %v10029_v2 = vld [vmem:[#allocation19 + $0x2c0] ss:$8 sps:$4 sm:$0xff]  }
 0x635   :  { %v11183_v8 = vpop.f32.mrb[38].mxu0 }
 0x636   :  { %v11185_v9 = vpop.f32.mrb[39].mxu0 }
 0x637   :  { %3950 = vmatpush1.bf16.msra.mxu1 %v9946_v4  ;;  %v9274_v41 = vpack.c.bf16 %v11185_v9, %v11185_v9  ;;  %v10032_v4 = vld [vmem:[#allocation19 + $0x2d0] ss:$8 sps:$4 sm:$0xff]   ;;  %v10035_v9 = vld [vmem:[#allocation19 + $0x2e0] ss:$8 sps:$4 sm:$0xff]  }
 0x638   :  { %3951 = vmatprep.subr.bf16.mxu1 %v9951_v6  ;;  %v10037_v6 = vld [vmem:[#allocation19 + $0x2e4] ss:$8 sps:$4 sm:$0xff]  }
 0x63b   :  { %3952 = vmatpush1.bf16.msra.mxu1 %v9949_v10  ;;  %v10040_v10 = vld [vmem:[#allocation19 + $0x2f4] ss:$8 sps:$4 sm:$0xff]  }
 0x63c   :  { %3953 = vmatprep.subr.bf16.mxu1 %v9954_v11  ;;  %v11199_v11 = vpop.f32.mrb[40].mxu0 }
 0x63f   :  { %3954 = vmatpush1.bf16.msra.mxu1 %v9952_v12  ;;  %v11201_v12 = vpop.f32.mrb[41].mxu0 }
 0x640   :  { %3955 = vmatprep.subr.bf16.mxu1 %v9957_v13  ;;  %v10038_v13 = vld [vmem:[#allocation19 + $0x2f0] ss:$8 sps:$4 sm:$0xff]  }
 0x643   :  { %3956 = vmatpush1.bf16.msra.mxu1 %v9955_v14  ;;  %v11203_v14 = vpop.f32.mrb[42].mxu0 }
 0x644   :  { %3957 = vmatprep.subr.bf16.mxu1 %v9960_v15  ;;  %v10043_v15 = vld [vmem:[#allocation19 + $0x304] ss:$8 sps:$4 sm:$0xff]  }
 0x647   :  { %3958 = vmatpush1.bf16.msra.mxu1 %v9958_v16  ;;  %v11205_v16 = vpop.f32.mrb[43].mxu0 }
 0x648   :  { %3959 = vmatprep.subr.bf16.mxu1 %v9963_v17  ;;  %v10041_v17 = vld [vmem:[#allocation19 + $0x300] ss:$8 sps:$4 sm:$0xff]  }
 0x64b   :  { %3960 = vmatpush1.bf16.msra.mxu1 %v9961_v18  ;;  %v9273_v18 = vpack.c.bf16 %v11181_v7, %v11181_v7  ;;  %v10053_v7 = vld [vmem:[#allocation19 + $0x340] ss:$8 sps:$4 sm:$0xff]  }
 0x64c   :  { %3961 = vmatprep.subr.bf16.mxu1 %v9966_v19  ;;  %v10046_v19 = vld [vmem:[#allocation19 + $0x314] ss:$8 sps:$4 sm:$0xff]  }
 0x64f   :  { %3962 = vmatpush1.bf16.msra.mxu1 %v9964_v20  ;;  %v9276_v20 = vpack.c.bf16 %v11183_v8, %v11183_v8  ;;  %v10056_v8 = vld [vmem:[#allocation19 + $0x350] ss:$8 sps:$4 sm:$0xff]  }
 0x650   :  { %3963 = vmatprep.subr.bf16.mxu1 %v9969_v21  ;;  %v10044_v21 = vld [vmem:[#allocation19 + $0x310] ss:$8 sps:$4 sm:$0xff]  }
 0x653   :  { %3964 = vmatpush1.bf16.msra.mxu1 %v9967_v22  ;;  %v10049_v22 = vld [vmem:[#allocation19 + $0x324] ss:$8 sps:$4 sm:$0xff]  }
 0x654   :  { %3965 = vmatprep.subr.bf16.mxu1 %v9972_v23  ;;  %v10047_v23 = vld [vmem:[#allocation19 + $0x320] ss:$8 sps:$4 sm:$0xff]  }
 0x657   :  { %3966 = vmatpush1.bf16.msra.mxu1 %v9970_v24  ;;  %v10052_v24 = vld [vmem:[#allocation19 + $0x334] ss:$8 sps:$4 sm:$0xff]  }
 0x658   :  { %3967 = vmatprep.subr.bf16.mxu1 %v9977_v26  ;;  %v10055_v26 = vld [vmem:[#allocation19 + $0x344] ss:$8 sps:$4 sm:$0xff]  }
 0x65b   :  { %3968 = vmatpush1.bf16.msra.mxu1 %v9975_v28  ;;  %v10061_v28 = vld [vmem:[#allocation19 + $0x364] ss:$8 sps:$4 sm:$0xff]  }
 0x65c   :  { %3969 = vmatprep.subr.bf16.mxu1 %v9980_v29  ;;  %v10059_v29 = vld [vmem:[#allocation19 + $0x360] ss:$8 sps:$4 sm:$0xff]  }
 0x65f   :  { %3970 = vmatpush1.bf16.msra.mxu1 %v9978_v30  ;;  %v10064_v30 = vld [vmem:[#allocation19 + $0x374] ss:$8 sps:$4 sm:$0xff]  }
 0x660   :  { %3971 = vmatprep.subr.bf16.mxu1 %v9983_v31  ;;  %v10062_v31 = vld [vmem:[#allocation19 + $0x370] ss:$8 sps:$4 sm:$0xff]  }
 0x663   :  { %3972 = vmatpush1.bf16.msra.mxu1 %v9981_v32  ;;  %v10067_v32 = vld [vmem:[#allocation19 + $0x384] ss:$8 sps:$4 sm:$0xff]  }
 0x664   :  { %3973 = vmatprep.subr.bf16.mxu1 %v9986_v33  ;;  %v10065_v33 = vld [vmem:[#allocation19 + $0x380] ss:$8 sps:$4 sm:$0xff]  }
 0x667   :  { %3974 = vmatpush1.bf16.msra.mxu1 %v9984_v34  ;;  %v10070_v34 = vld [vmem:[#allocation19 + $0x394] ss:$8 sps:$4 sm:$0xff]  }
 0x668   :  { %3975 = vmatprep.subr.bf16.mxu1 %v9989_v35  ;;  %v10068_v35 = vld [vmem:[#allocation19 + $0x390] ss:$8 sps:$4 sm:$0xff]  }
 0x66b   :  { %3976 = vmatpush1.bf16.msra.mxu1 %v9987_v36  ;;  %v10075_v36 = vld [vmem:[#allocation19 + $0x3a4] ss:$8 sps:$4 sm:$0xff]  }
 0x66c   :  { %3977 = vmatprep.subr.bf16.mxu1 %v9992_v37  ;;  %v10073_v37 = vld [vmem:[#allocation19 + $0x3a0] ss:$8 sps:$4 sm:$0xff]  }
 0x66f   :  { %3978 = vmatpush1.bf16.msra.mxu1 %v9990_v38  ;;  %v10078_v38 = vld [vmem:[#allocation19 + $0x3b4] ss:$8 sps:$4 sm:$0xff]  }
 0x670   :  { %3988 = vmatprep.subr.bf16.mxu1 %v9995_v39  ;;  %v10076_v39 = vld [vmem:[#allocation19 + $0x3b0] ss:$8 sps:$4 sm:$0xff]  }
 0x672   :  { %3980 = vmatmul.mubr.bf16.vlgmr.msra.gmra.mrb[80].mxu1 %v9271_v42  ;;  %v10084_v42 = vld [vmem:[#allocation19 + $0x3d4] ss:$8 sps:$4 sm:$0xff]  }
 0x673   :  { %3989 = vmatpush1.bf16.msra.mxu1 %v9993_v40  ;;  %4020 = vmatprep.mubr.bf16.mxu1 %v9274_v41  ;;  %v10081_v40 = vld [vmem:[#allocation19 + $0x3c4] ss:$8 sps:$4 sm:$0xff]   ;;  %v10079_v41 = vld [vmem:[#allocation19 + $0x3c0] ss:$8 sps:$4 sm:$0xff]  }
 0x674   :  { %3990 = vmatprep.subr.bf16.mxu1 %v9998_v43  ;;  %v10082_v43 = vld [vmem:[#allocation19 + $0x3d0] ss:$8 sps:$4 sm:$0xff]  }
 0x677   :  { %3991 = vmatpush1.bf16.msra.mxu1 %v9996_v44  ;;  %v10087_v44 = vld [vmem:[#allocation19 + $0x3e4] ss:$8 sps:$4 sm:$0xff]  }
 0x678   :  { %3992 = vmatprep.subr.bf16.mxu1 %v10001_v45  ;;  %v10085_v45 = vld [vmem:[#allocation19 + $0x3e0] ss:$8 sps:$4 sm:$0xff]  }
 0x67b   :  { %3993 = vmatpush1.bf16.msra.mxu1 %v9999_v46  ;;  %v10090_v46 = vld [vmem:[#allocation19 + $0x3f4] ss:$8 sps:$4 sm:$0xff]  }
 0x67c   :  { %3994 = vmatprep.subr.bf16.mxu1 %v10004_v47  ;;  %v10088_v47 = vld [vmem:[#allocation19 + $0x3f0] ss:$8 sps:$4 sm:$0xff]  }
 0x67f   :  { %3995 = vmatpush1.bf16.msra.mxu1 %v10002_v48  ;;  %v10093_v48 = vld [vmem:[#allocation19 + $0x404] ss:$8 sps:$4 sm:$0xff]  }
 0x680   :  { %3996 = vmatprep.subr.bf16.mxu1 %v10007_v49  ;;  %v10091_v49 = vld [vmem:[#allocation19 + $0x400] ss:$8 sps:$4 sm:$0xff]  }
 0x683   :  { %3997 = vmatpush1.bf16.msra.mxu1 %v10005_v50  ;;  %v9278_v50 = vpack.c.bf16 %v11205_v16, %v11205_v16  ;;  %v10127_v16 = vld [vmem:[#allocation19 + $0x4c0] ss:$8 sps:$4 sm:$0xff]  }
 0x684   :  { %3998 = vmatprep.subr.bf16.mxu1 %v10010_v51  ;;  %v9275_v51 = vpack.c.bf16 %v11179_v5, %v11179_v5  ;;  %v10108_v5 = vld [vmem:[#allocation19 + $0x454] ss:$8 sps:$4 sm:$0xff]  }
 0x687   :  { %3999 = vmatpush1.bf16.msra.mxu1 %v10008_v52  ;;  %v10096_v52 = vld [vmem:[#allocation19 + $0x414] ss:$8 sps:$4 sm:$0xff]  }
 0x688   :  { %4000 = vmatprep.subr.bf16.mxu1 %v10013_v53  ;;  %v10094_v53 = vld [vmem:[#allocation19 + $0x410] ss:$8 sps:$4 sm:$0xff]  }
 0x68b   :  { %4001 = vmatpush1.bf16.msra.mxu1 %v10011_v54  ;;  %v10099_v54 = vld [vmem:[#allocation19 + $0x424] ss:$8 sps:$4 sm:$0xff]  }
 0x68c   :  { %4002 = vmatprep.subr.bf16.mxu1 %v10016_v55  ;;  %v10097_v55 = vld [vmem:[#allocation19 + $0x420] ss:$8 sps:$4 sm:$0xff]  }
 0x68f   :  { %4003 = vmatpush1.bf16.msra.mxu1 %v10014_v56  ;;  %v10102_v56 = vld [vmem:[#allocation19 + $0x434] ss:$8 sps:$4 sm:$0xff]  }
 0x690   :  { %4004 = vmatprep.subr.bf16.mxu1 %v10019_v57  ;;  %v10100_v57 = vld [vmem:[#allocation19 + $0x430] ss:$8 sps:$4 sm:$0xff]  }
 0x693   :  { %4005 = vmatpush1.bf16.msra.mxu1 %v10017_v58  ;;  %v10105_v58 = vld [vmem:[#allocation19 + $0x444] ss:$8 sps:$4 sm:$0xff]  }
 0x694   :  { %4006 = vmatprep.subr.bf16.mxu1 %v10022_v59  ;;  %v10103_v59 = vld [vmem:[#allocation19 + $0x440] ss:$8 sps:$4 sm:$0xff]  }
 0x697   :  { %4007 = vmatpush1.bf16.msra.mxu1 %v10020_v60  ;;  %v10106_v60 = vld [vmem:[#allocation19 + $0x450] ss:$8 sps:$4 sm:$0xff]  }
 0x698   :  { %4008 = vmatprep.subr.bf16.mxu1 %v10025_v61  ;;  %v10111_v61 = vld [vmem:[#allocation19 + $0x464] ss:$8 sps:$4 sm:$0xff]  }
 0x69b   :  { %4009 = vmatpush1.bf16.msra.mxu1 %v10023_v62  ;;  %v10109_v62 = vld [vmem:[#allocation19 + $0x460] ss:$8 sps:$4 sm:$0xff]  }
 0x69c   :  { %4010 = vmatprep.subr.bf16.mxu1 %v10028_v63  ;;  %v10114_v63 = vld [vmem:[#allocation19 + $0x474] ss:$8 sps:$4 sm:$0xff]  }
 0x69f   :  { %4011 = vmatpush1.bf16.msra.mxu1 %v10026_v0  ;;  %v10112_v0 = vld [vmem:[#allocation19 + $0x470] ss:$8 sps:$4 sm:$0xff]  }
 0x6a0   :  { %4012 = vmatprep.subr.bf16.mxu1 %v10031_v1  ;;  %v10117_v1 = vld [vmem:[#allocation19 + $0x484] ss:$8 sps:$4 sm:$0xff]  }
 0x6a3   :  { %4013 = vmatpush1.bf16.msra.mxu1 %v10029_v2  ;;  %v10115_v2 = vld [vmem:[#allocation19 + $0x480] ss:$8 sps:$4 sm:$0xff]  }
 0x6a4   :  { %4014 = vmatprep.subr.bf16.mxu1 %v10034_v3  ;;  %v10120_v3 = vld [vmem:[#allocation19 + $0x494] ss:$8 sps:$4 sm:$0xff]  }
 0x6a7   :  { %4015 = vmatpush1.bf16.msra.mxu1 %v10032_v4  ;;  %v10118_v4 = vld [vmem:[#allocation19 + $0x490] ss:$8 sps:$4 sm:$0xff]  }
 0x6a8   :  { %4016 = vmatprep.subr.bf16.mxu1 %v10037_v6  ;;  %v10123_v6 = vld [vmem:[#allocation19 + $0x4a4] ss:$8 sps:$4 sm:$0xff]  }
 0x6ab   :  { %4017 = vmatpush1.bf16.msra.mxu1 %v10035_v9  ;;  %v10121_v9 = vld [vmem:[#allocation19 + $0x4a0] ss:$8 sps:$4 sm:$0xff]  }
 0x6ac   :  { %4018 = vmatprep.subr.bf16.mxu1 %v10040_v10  ;;  %v10126_v10 = vld [vmem:[#allocation19 + $0x4b4] ss:$8 sps:$4 sm:$0xff]  }
 0x6af   :  { %4019 = vmatpush1.bf16.msra.mxu1 %v10038_v13  ;;  %v10124_v13 = vld [vmem:[#allocation19 + $0x4b0] ss:$8 sps:$4 sm:$0xff]  }
 0x6b0   :  { %4029 = vmatprep.subr.bf16.mxu1 %v10043_v15  ;;  %v10129_v15 = vld [vmem:[#allocation19 + $0x4c4] ss:$8 sps:$4 sm:$0xff]  }
 0x6b2   :  { %4021 = vmatmul.mubr.bf16.vlgmr.msra.gmra.mrb[80].mxu1 %v9273_v18  ;;  %v10130_v18 = vld [vmem:[#allocation19 + $0x4d0] ss:$8 sps:$4 sm:$0xff]  }
 0x6b3   :  { %4030 = vmatpush1.bf16.msra.mxu1 %v10041_v17  ;;  %4061 = vmatprep.mubr.bf16.mxu1 %v9276_v20  ;;  %v10132_v17 = vld [vmem:[#allocation19 + $0x4d4] ss:$8 sps:$4 sm:$0xff]   ;;  %v10133_v20 = vld [vmem:[#allocation19 + $0x4e0] ss:$8 sps:$4 sm:$0xff]  }
 0x6b4   :  { %4031 = vmatprep.subr.bf16.mxu1 %v10046_v19  ;;  %v10135_v19 = vld [vmem:[#allocation19 + $0x4e4] ss:$8 sps:$4 sm:$0xff]  }
 0x6b7   :  { %4032 = vmatpush1.bf16.msra.mxu1 %v10044_v21  ;;  %v10138_v21 = vld [vmem:[#allocation19 + $0x4f4] ss:$8 sps:$4 sm:$0xff]  }
 0x6b8   :  { %4033 = vmatprep.subr.bf16.mxu1 %v10049_v22  ;;  %v11215_v22 = vpop.f32.mrb[44].mxu0 }
 0x6bb   :  { %4034 = vmatpush1.bf16.msra.mxu1 %v10047_v23  ;;  %v11217_v23 = vpop.f32.mrb[45].mxu0 }
 0x6bc   :  { %4035 = vmatprep.subr.bf16.mxu1 %v10052_v24  ;;  %v10136_v24 = vld [vmem:[#allocation19 + $0x4f0] ss:$8 sps:$4 sm:$0xff]  }
 0x6bf   :  { %4036 = vmatpush1.bf16.msra.mxu1 %v10050_v25  ;;  %v11219_v25 = vpop.f32.mrb[46].mxu0 }
 0x6c0   :  { %4037 = vmatprep.subr.bf16.mxu1 %v10055_v26  ;;  %v10141_v26 = vld [vmem:[#allocation19 + $0x504] ss:$8 sps:$4 sm:$0xff]  }
 0x6c3   :  { %4038 = vmatpush1.bf16.msra.mxu1 %v10053_v7  ;;  %v11221_v7 = vpop.f32.mrb[47].mxu0 }
 0x6c4   :  { %4039 = vmatprep.subr.bf16.mxu1 %v10058_v27  ;;  %v10139_v27 = vld [vmem:[#allocation19 + $0x500] ss:$8 sps:$4 sm:$0xff]  }
 0x6c7   :  { %4040 = vmatpush1.bf16.msra.mxu1 %v10056_v8  ;;  %v9277_v8 = vpack.c.bf16 %v11201_v12, %v11201_v12  ;;  %v10151_v12 = vld [vmem:[#allocation19 + $0x540] ss:$8 sps:$4 sm:$0xff]  }
 0x6c8   :  { %4041 = vmatprep.subr.bf16.mxu1 %v10061_v28  ;;  %v10144_v28 = vld [vmem:[#allocation19 + $0x514] ss:$8 sps:$4 sm:$0xff]  }
 0x6cb   :  { %4042 = vmatpush1.bf16.msra.mxu1 %v10059_v29  ;;  %v9280_v29 = vpack.c.bf16 %v11203_v14, %v11203_v14  ;;  %v10154_v14 = vld [vmem:[#allocation19 + $0x550] ss:$8 sps:$4 sm:$0xff]  }
 0x6cc   :  { %4043 = vmatprep.subr.bf16.mxu1 %v10064_v30  ;;  %v10142_v30 = vld [vmem:[#allocation19 + $0x510] ss:$8 sps:$4 sm:$0xff]  }
 0x6cf   :  { %4044 = vmatpush1.bf16.msra.mxu1 %v10062_v31  ;;  %v10147_v31 = vld [vmem:[#allocation19 + $0x524] ss:$8 sps:$4 sm:$0xff]  }
 0x6d0   :  { %4045 = vmatprep.subr.bf16.mxu1 %v10067_v32  ;;  %v10145_v32 = vld [vmem:[#allocation19 + $0x520] ss:$8 sps:$4 sm:$0xff]  }
 0x6d3   :  { %4046 = vmatpush1.bf16.msra.mxu1 %v10065_v33  ;;  %v10150_v33 = vld [vmem:[#allocation19 + $0x534] ss:$8 sps:$4 sm:$0xff]  }
 0x6d4   :  { %4047 = vmatprep.subr.bf16.mxu1 %v10070_v34  ;;  %v10148_v34 = vld [vmem:[#allocation19 + $0x530] ss:$8 sps:$4 sm:$0xff]  }
 0x6d7   :  { %4048 = vmatpush1.bf16.msra.mxu1 %v10068_v35  ;;  %v10153_v35 = vld [vmem:[#allocation19 + $0x544] ss:$8 sps:$4 sm:$0xff]  }
 0x6d8   :  { %4049 = vmatprep.subr.bf16.mxu1 %v10075_v36  ;;  %v10156_v36 = vld [vmem:[#allocation19 + $0x554] ss:$8 sps:$4 sm:$0xff]  }
 0x6db   :  { %4050 = vmatpush1.bf16.msra.mxu1 %v10073_v37  ;;  %v10159_v37 = vld [vmem:[#allocation19 + $0x564] ss:$8 sps:$4 sm:$0xff]  }
 0x6dc   :  { %4051 = vmatprep.subr.bf16.mxu1 %v10078_v38  ;;  %v10157_v38 = vld [vmem:[#allocation19 + $0x560] ss:$8 sps:$4 sm:$0xff]  }
 0x6df   :  { %4052 = vmatpush1.bf16.msra.mxu1 %v10076_v39  ;;  %v10162_v39 = vld [vmem:[#allocation19 + $0x574] ss:$8 sps:$4 sm:$0xff]  }
 0x6e0   :  { %4053 = vmatprep.subr.bf16.mxu1 %v10081_v40  ;;  %v10160_v40 = vld [vmem:[#allocation19 + $0x570] ss:$8 sps:$4 sm:$0xff]  }
 0x6e3   :  { %4054 = vmatpush1.bf16.msra.mxu1 %v10079_v41  ;;  %v10165_v41 = vld [vmem:[#allocation19 + $0x584] ss:$8 sps:$4 sm:$0xff]  }
 0x6e4   :  { %4055 = vmatprep.subr.bf16.mxu1 %v10084_v42  ;;  %v10163_v42 = vld [vmem:[#allocation19 + $0x580] ss:$8 sps:$4 sm:$0xff]  }
 0x6e7   :  { %4056 = vmatpush1.bf16.msra.mxu1 %v10082_v43  ;;  %v10168_v43 = vld [vmem:[#allocation19 + $0x594] ss:$8 sps:$4 sm:$0xff]  }
 0x6e8   :  { %4057 = vmatprep.subr.bf16.mxu1 %v10087_v44  ;;  %v10166_v44 = vld [vmem:[#allocation19 + $0x590] ss:$8 sps:$4 sm:$0xff]  }
 0x6eb   :  { %4058 = vmatpush1.bf16.msra.mxu1 %v10085_v45  ;;  %v10171_v45 = vld [vmem:[#allocation19 + $0x5a4] ss:$8 sps:$4 sm:$0xff]  }
 0x6ec   :  { %4059 = vmatprep.subr.bf16.mxu1 %v10090_v46  ;;  %v10169_v46 = vld [vmem:[#allocation19 + $0x5a0] ss:$8 sps:$4 sm:$0xff]  }
 0x6ef   :  { %4060 = vmatpush1.bf16.msra.mxu1 %v10088_v47  ;;  %v10174_v47 = vld [vmem:[#allocation19 + $0x5b4] ss:$8 sps:$4 sm:$0xff]  }
 0x6f0   :  { %4070 = vmatprep.subr.bf16.mxu1 %v10093_v48  ;;  %v10172_v48 = vld [vmem:[#allocation19 + $0x5b0] ss:$8 sps:$4 sm:$0xff]  }
 0x6f2   :  { %4062 = vmatmul.mubr.bf16.vlgmr.msra.gmra.mrb[80].mxu1 %v9275_v51  ;;  %v10180_v51 = vld [vmem:[#allocation19 + $0x5d4] ss:$8 sps:$4 sm:$0xff]  }
 0x6f3   :  { %4071 = vmatpush1.bf16.msra.mxu1 %v10091_v49  ;;  %4102 = vmatprep.mubr.bf16.mxu1 %v9278_v50  ;;  %v10177_v49 = vld [vmem:[#allocation19 + $0x5c4] ss:$8 sps:$4 sm:$0xff]   ;;  %v10175_v50 = vld [vmem:[#allocation19 + $0x5c0] ss:$8 sps:$4 sm:$0xff]  }
 0x6f4   :  { %4072 = vmatprep.subr.bf16.mxu1 %v10096_v52  ;;  %v10178_v52 = vld [vmem:[#allocation19 + $0x5d0] ss:$8 sps:$4 sm:$0xff]  }
 0x6f7   :  { %4073 = vmatpush1.bf16.msra.mxu1 %v10094_v53  ;;  %v10183_v53 = vld [vmem:[#allocation19 + $0x5e4] ss:$8 sps:$4 sm:$0xff]  }
 0x6f8   :  { %4074 = vmatprep.subr.bf16.mxu1 %v10099_v54  ;;  %v10181_v54 = vld [vmem:[#allocation19 + $0x5e0] ss:$8 sps:$4 sm:$0xff]  }
 0x6fb   :  { %4075 = vmatpush1.bf16.msra.mxu1 %v10097_v55  ;;  %v10186_v55 = vld [vmem:[#allocation19 + $0x5f4] ss:$8 sps:$4 sm:$0xff]  }
 0x6fc   :  { %4076 = vmatprep.subr.bf16.mxu1 %v10102_v56  ;;  %v10184_v56 = vld [vmem:[#allocation19 + $0x5f0] ss:$8 sps:$4 sm:$0xff]  }
 0x6ff   :  { %4077 = vmatpush1.bf16.msra.mxu1 %v10100_v57  ;;  %v10189_v57 = vld [vmem:[#allocation19 + $0x604] ss:$8 sps:$4 sm:$0xff]  }
 0x700   :  { %4078 = vmatprep.subr.bf16.mxu1 %v10105_v58  ;;  %v10187_v58 = vld [vmem:[#allocation19 + $0x600] ss:$8 sps:$4 sm:$0xff]  }
 0x703   :  { %4079 = vmatpush1.bf16.msra.mxu1 %v10103_v59  ;;  %v9282_v59 = vpack.c.bf16 %v11221_v7, %v11221_v7  ;;  %v10223_v7 = vld [vmem:[#allocation19 + $0x6c0] ss:$8 sps:$4 sm:$0xff]  }
 0x704   :  { %4080 = vmatprep.subr.bf16.mxu1 %v10108_v5  ;;  %v9279_v5 = vpack.c.bf16 %v11199_v11, %v11199_v11  ;;  %v10204_v11 = vld [vmem:[#allocation19 + $0x654] ss:$8 sps:$4 sm:$0xff]  }
 0x707   :  { %4081 = vmatpush1.bf16.msra.mxu1 %v10106_v60  ;;  %v10192_v60 = vld [vmem:[#allocation19 + $0x614] ss:$8 sps:$4 sm:$0xff]  }
 0x708   :  { %4082 = vmatprep.subr.bf16.mxu1 %v10111_v61  ;;  %v10190_v61 = vld [vmem:[#allocation19 + $0x610] ss:$8 sps:$4 sm:$0xff]  }
 0x70b   :  { %4083 = vmatpush1.bf16.msra.mxu1 %v10109_v62  ;;  %v10195_v62 = vld [vmem:[#allocation19 + $0x624] ss:$8 sps:$4 sm:$0xff]  }
 0x70c   :  { %4084 = vmatprep.subr.bf16.mxu1 %v10114_v63  ;;  %v10193_v63 = vld [vmem:[#allocation19 + $0x620] ss:$8 sps:$4 sm:$0xff]  }
 0x70f   :  { %4085 = vmatpush1.bf16.msra.mxu1 %v10112_v0  ;;  %v10198_v0 = vld [vmem:[#allocation19 + $0x634] ss:$8 sps:$4 sm:$0xff]  }
 0x710   :  { %4086 = vmatprep.subr.bf16.mxu1 %v10117_v1  ;;  %v10196_v1 = vld [vmem:[#allocation19 + $0x630] ss:$8 sps:$4 sm:$0xff]  }
 0x713   :  { %4087 = vmatpush1.bf16.msra.mxu1 %v10115_v2  ;;  %v10201_v2 = vld [vmem:[#allocation19 + $0x644] ss:$8 sps:$4 sm:$0xff]  }
 0x714   :  { %4088 = vmatprep.subr.bf16.mxu1 %v10120_v3  ;;  %v10199_v3 = vld [vmem:[#allocation19 + $0x640] ss:$8 sps:$4 sm:$0xff]  }
 0x717   :  { %4089 = vmatpush1.bf16.msra.mxu1 %v10118_v4  ;;  %v10202_v4 = vld [vmem:[#allocation19 + $0x650] ss:$8 sps:$4 sm:$0xff]  }
 0x718   :  { %4090 = vmatprep.subr.bf16.mxu1 %v10123_v6  ;;  %v10207_v6 = vld [vmem:[#allocation19 + $0x664] ss:$8 sps:$4 sm:$0xff]  }
 0x71b   :  { %4091 = vmatpush1.bf16.msra.mxu1 %v10121_v9  ;;  %v10205_v9 = vld [vmem:[#allocation19 + $0x660] ss:$8 sps:$4 sm:$0xff]  }
 0x71c   :  { %4092 = vmatprep.subr.bf16.mxu1 %v10126_v10  ;;  %v10210_v10 = vld [vmem:[#allocation19 + $0x674] ss:$8 sps:$4 sm:$0xff]  }
 0x71f   :  { %4093 = vmatpush1.bf16.msra.mxu1 %v10124_v13  ;;  %v10208_v13 = vld [vmem:[#allocation19 + $0x670] ss:$8 sps:$4 sm:$0xff]  }
 0x720   :  { %4094 = vmatprep.subr.bf16.mxu1 %v10129_v15  ;;  %v10213_v15 = vld [vmem:[#allocation19 + $0x684] ss:$8 sps:$4 sm:$0xff]  }
 0x723   :  { %4095 = vmatpush1.bf16.msra.mxu1 %v10127_v16  ;;  %v10211_v16 = vld [vmem:[#allocation19 + $0x680] ss:$8 sps:$4 sm:$0xff]  }
 0x724   :  { %4096 = vmatprep.subr.bf16.mxu1 %v10132_v17  ;;  %v10216_v17 = vld [vmem:[#allocation19 + $0x694] ss:$8 sps:$4 sm:$0xff]  }
 0x727   :  { %4097 = vmatpush1.bf16.msra.mxu1 %v10130_v18  ;;  %v10214_v18 = vld [vmem:[#allocation19 + $0x690] ss:$8 sps:$4 sm:$0xff]  }
 0x728   :  { %4098 = vmatprep.subr.bf16.mxu1 %v10135_v19  ;;  %v10219_v19 = vld [vmem:[#allocation19 + $0x6a4] ss:$8 sps:$4 sm:$0xff]  }
 0x72b   :  { %4099 = vmatpush1.bf16.msra.mxu1 %v10133_v20  ;;  %v10217_v20 = vld [vmem:[#allocation19 + $0x6a0] ss:$8 sps:$4 sm:$0xff]  }
 0x72c   :  { %4100 = vmatprep.subr.bf16.mxu1 %v10138_v21  ;;  %v10222_v21 = vld [vmem:[#allocation19 + $0x6b4] ss:$8 sps:$4 sm:$0xff]  }
 0x72f   :  { %4101 = vmatpush1.bf16.msra.mxu1 %v10136_v24  ;;  %v10220_v24 = vld [vmem:[#allocation19 + $0x6b0] ss:$8 sps:$4 sm:$0xff]  }
 0x730   :  { %4111 = vmatprep.subr.bf16.mxu1 %v10141_v26  ;;  %v10225_v26 = vld [vmem:[#allocation19 + $0x6c4] ss:$8 sps:$4 sm:$0xff]  }
 0x732   :  { %4103 = vmatmul.mubr.bf16.vlgmr.msra.gmra.mrb[80].mxu1 %v9277_v8  ;;  %v10226_v8 = vld [vmem:[#allocation19 + $0x6d0] ss:$8 sps:$4 sm:$0xff]  }
 0x733   :  { %4112 = vmatpush1.bf16.msra.mxu1 %v10139_v27  ;;  %4143 = vmatprep.mubr.bf16.mxu1 %v9280_v29  ;;  %v10228_v27 = vld [vmem:[#allocation19 + $0x6d4] ss:$8 sps:$4 sm:$0xff]   ;;  %v10229_v29 = vld [vmem:[#allocation19 + $0x6e0] ss:$8 sps:$4 sm:$0xff]  }
 0x734   :  { %4113 = vmatprep.subr.bf16.mxu1 %v10144_v28  ;;  %v10231_v28 = vld [vmem:[#allocation19 + $0x6e4] ss:$8 sps:$4 sm:$0xff]  }
 0x737   :  { %4114 = vmatpush1.bf16.msra.mxu1 %v10142_v30  ;;  %v10234_v30 = vld [vmem:[#allocation19 + $0x6f4] ss:$8 sps:$4 sm:$0xff]  }
 0x738   :  { %4115 = vmatprep.subr.bf16.mxu1 %v10147_v31  ;;  %v10232_v31 = vld [vmem:[#allocation19 + $0x6f0] ss:$8 sps:$4 sm:$0xff]  }
 0x73b   :  { %4116 = vmatpush1.bf16.msra.mxu1 %v10145_v32  ;;  %v10237_v32 = vld [vmem:[#allocation19 + $0x704] ss:$8 sps:$4 sm:$0xff]  }
 0x73c   :  { %4117 = vmatprep.subr.bf16.mxu1 %v10150_v33  ;;  %v10235_v33 = vld [vmem:[#allocation19 + $0x700] ss:$8 sps:$4 sm:$0xff]  }
 0x73f   :  { %4118 = vmatpush1.bf16.msra.mxu1 %v10148_v34  ;;  %v9281_v34 = vpack.c.bf16 %v11217_v23, %v11217_v23  ;;  %v10247_v23 = vld [vmem:[#allocation19 + $0x740] ss:$8 sps:$4 sm:$0xff]  }
 0x740   :  { %4119 = vmatprep.subr.bf16.mxu1 %v10153_v35  ;;  %v10240_v35 = vld [vmem:[#allocation19 + $0x714] ss:$8 sps:$4 sm:$0xff]  }
 0x743   :  { %4120 = vmatpush1.bf16.msra.mxu1 %v10151_v12  ;;  %v9284_v12 = vpack.c.bf16 %v11219_v25, %v11219_v25  ;;  %v10250_v25 = vld [vmem:[#allocation19 + $0x750] ss:$8 sps:$4 sm:$0xff]  }
 0x744   :  { %4121 = vmatprep.subr.bf16.mxu1 %v10156_v36  ;;  %v10238_v36 = vld [vmem:[#allocation19 + $0x710] ss:$8 sps:$4 sm:$0xff]  }
 0x747   :  { %4122 = vmatpush1.bf16.msra.mxu1 %v10154_v14  ;;  %v10243_v14 = vld [vmem:[#allocation19 + $0x724] ss:$8 sps:$4 sm:$0xff]  }
 0x748   :  { %4123 = vmatprep.subr.bf16.mxu1 %v10159_v37  ;;  %v10241_v37 = vld [vmem:[#allocation19 + $0x720] ss:$8 sps:$4 sm:$0xff]  }
 0x74b   :  { %4124 = vmatpush1.bf16.msra.mxu1 %v10157_v38  ;;  %v10246_v38 = vld [vmem:[#allocation19 + $0x734] ss:$8 sps:$4 sm:$0xff]  }
 0x74c   :  { %4125 = vmatprep.subr.bf16.mxu1 %v10162_v39  ;;  %v10244_v39 = vld [vmem:[#allocation19 + $0x730] ss:$8 sps:$4 sm:$0xff]  }
 0x74f   :  { %4126 = vmatpush1.bf16.msra.mxu1 %v10160_v40  ;;  %v10249_v40 = vld [vmem:[#allocation19 + $0x744] ss:$8 sps:$4 sm:$0xff]  }
 0x750   :  { %4127 = vmatprep.subr.bf16.mxu1 %v10165_v41  ;;  %v10252_v41 = vld [vmem:[#allocation19 + $0x754] ss:$8 sps:$4 sm:$0xff]  }
 0x753   :  { %4128 = vmatpush1.bf16.msra.mxu1 %v10163_v42  ;;  %v10255_v42 = vld [vmem:[#allocation19 + $0x764] ss:$8 sps:$4 sm:$0xff]  }
 0x754   :  { %4129 = vmatprep.subr.bf16.mxu1 %v10168_v43  ;;  %v10253_v43 = vld [vmem:[#allocation19 + $0x760] ss:$8 sps:$4 sm:$0xff]  }
 0x757   :  { %4130 = vmatpush1.bf16.msra.mxu1 %v10166_v44  ;;  %v10258_v44 = vld [vmem:[#allocation19 + $0x774] ss:$8 sps:$4 sm:$0xff]  }
 0x758   :  { %4131 = vmatprep.subr.bf16.mxu1 %v10171_v45  ;;  %v10256_v45 = vld [vmem:[#allocation19 + $0x770] ss:$8 sps:$4 sm:$0xff]  }
 0x75b   :  { %4132 = vmatpush1.bf16.msra.mxu1 %v10169_v46  ;;  %v10261_v46 = vld [vmem:[#allocation19 + $0x784] ss:$8 sps:$4 sm:$0xff]  }
 0x75c   :  { %4133 = vmatprep.subr.bf16.mxu1 %v10174_v47  ;;  %v10259_v47 = vld [vmem:[#allocation19 + $0x780] ss:$8 sps:$4 sm:$0xff]  }
 0x75f   :  { %4134 = vmatpush1.bf16.msra.mxu1 %v10172_v48  ;;  %v10264_v48 = vld [vmem:[#allocation19 + $0x794] ss:$8 sps:$4 sm:$0xff]  }
 0x760   :  { %4135 = vmatprep.subr.bf16.mxu1 %v10177_v49  ;;  %v10262_v49 = vld [vmem:[#allocation19 + $0x790] ss:$8 sps:$4 sm:$0xff]  }
 0x763   :  { %4136 = vmatpush1.bf16.msra.mxu1 %v10175_v50  ;;  %v10267_v50 = vld [vmem:[#allocation19 + $0x7a4] ss:$8 sps:$4 sm:$0xff]  }
 0x764   :  { %4137 = vmatprep.subr.bf16.mxu1 %v10180_v51  ;;  %v10265_v51 = vld [vmem:[#allocation19 + $0x7a0] ss:$8 sps:$4 sm:$0xff]  }
 0x767   :  { %4138 = vmatpush1.bf16.msra.mxu1 %v10178_v52  ;;  %v10270_v52 = vld [vmem:[#allocation19 + $0x7b4] ss:$8 sps:$4 sm:$0xff]  }
 0x768   :  { %4139 = vmatprep.subr.bf16.mxu1 %v10183_v53  ;;  %v10268_v53 = vld [vmem:[#allocation19 + $0x7b0] ss:$8 sps:$4 sm:$0xff]  }
 0x76b   :  { %4140 = vmatpush1.bf16.msra.mxu1 %v10181_v54  ;;  %v10273_v54 = vld [vmem:[#allocation19 + $0x7c4] ss:$8 sps:$4 sm:$0xff]  }
 0x76c   :  { %4141 = vmatprep.subr.bf16.mxu1 %v10186_v55  ;;  %v10271_v55 = vld [vmem:[#allocation19 + $0x7c0] ss:$8 sps:$4 sm:$0xff]  }
 0x76f   :  { %4142 = vmatpush1.bf16.msra.mxu1 %v10184_v56  ;;  %v10276_v56 = vld [vmem:[#allocation19 + $0x7d4] ss:$8 sps:$4 sm:$0xff]  }
 0x770   :  { %4152 = vmatprep.subr.bf16.mxu1 %v10189_v57  ;;  %v10274_v57 = vld [vmem:[#allocation19 + $0x7d0] ss:$8 sps:$4 sm:$0xff]  }
 0x772   :  { %4144 = vmatmul.mubr.bf16.vlgmr.msra.gmra.mrb[80].mxu1 %v9279_v5  ;;  %v10282_v5 = vld [vmem:[#allocation19 + $0x7f4] ss:$8 sps:$4 sm:$0xff]  }
 0x773   :  { %4153 = vmatpush1.bf16.msra.mxu1 %v10187_v58  ;;  %4184 = vmatprep.mubr.bf16.mxu1 %v9282_v59  ;;  %v10279_v58 = vld [vmem:[#allocation19 + $0x7e4] ss:$8 sps:$4 sm:$0xff]   ;;  %v10277_v59 = vld [vmem:[#allocation19 + $0x7e0] ss:$8 sps:$4 sm:$0xff]  }
 0x774   :  { %4154 = vmatprep.subr.bf16.mxu1 %v10192_v60  ;;  %v10280_v60 = vld [vmem:[#allocation19 + $0x7f0] ss:$8 sps:$4 sm:$0xff]  }
 0x777   :  { %4155 = vmatpush1.bf16.msra.mxu1 %v10190_v61  ;;  %v9283_v61 = vpack.c.bf16 %v11215_v22, %v11215_v22 }
 0x778   :  { %4156 = vmatprep.subr.bf16.mxu1 %v10195_v62 }
 0x77b   :  { %4157 = vmatpush1.bf16.msra.mxu1 %v10193_v63 }
 0x77c   :  { %4158 = vmatprep.subr.bf16.mxu1 %v10198_v0 }
 0x77f   :  { %4159 = vmatpush1.bf16.msra.mxu1 %v10196_v1 }
 0x780   :  { %4160 = vmatprep.subr.bf16.mxu1 %v10201_v2 }
 0x783   :  { %4161 = vmatpush1.bf16.msra.mxu1 %v10199_v3 }
 0x784   :  { %4162 = vmatprep.subr.bf16.mxu1 %v10204_v11 }
 0x787   :  { %4163 = vmatpush1.bf16.msra.mxu1 %v10202_v4 }
 0x788   :  { %4164 = vmatprep.subr.bf16.mxu1 %v10207_v6 }
 0x78b   :  { %4165 = vmatpush1.bf16.msra.mxu1 %v10205_v9 }
 0x78c   :  { %4166 = vmatprep.subr.bf16.mxu1 %v10210_v10 }
 0x78f   :  { %4167 = vmatpush1.bf16.msra.mxu1 %v10208_v13 }
 0x790   :  { %4168 = vmatprep.subr.bf16.mxu1 %v10213_v15 }
 0x793   :  { %4169 = vmatpush1.bf16.msra.mxu1 %v10211_v16 }
 0x794   :  { %4170 = vmatprep.subr.bf16.mxu1 %v10216_v17 }
 0x797   :  { %4171 = vmatpush1.bf16.msra.mxu1 %v10214_v18 }
 0x798   :  { %4172 = vmatprep.subr.bf16.mxu1 %v10219_v19 }
 0x79b   :  { %4173 = vmatpush1.bf16.msra.mxu1 %v10217_v20 }
 0x79c   :  { %4174 = vmatprep.subr.bf16.mxu1 %v10222_v21 }
 0x79f   :  { %4175 = vmatpush1.bf16.msra.mxu1 %v10220_v24 }
 0x7a0   :  { %4176 = vmatprep.subr.bf16.mxu1 %v10225_v26 }
 0x7a3   :  { %4177 = vmatpush1.bf16.msra.mxu1 %v10223_v7 }
 0x7a4   :  { %4178 = vmatprep.subr.bf16.mxu1 %v10228_v27 }
 0x7a7   :  { %4179 = vmatpush1.bf16.msra.mxu1 %v10226_v8 }
 0x7a8   :  { %4180 = vmatprep.subr.bf16.mxu1 %v10231_v28 }
 0x7ab   :  { %4181 = vmatpush1.bf16.msra.mxu1 %v10229_v29 }
 0x7ac   :  { %4182 = vmatprep.subr.bf16.mxu1 %v10234_v30 }
 0x7af   :  { %4183 = vmatpush1.bf16.msra.mxu1 %v10232_v31 }
 0x7b0   :  { %4193 = vmatprep.subr.bf16.mxu1 %v10237_v32 }
 0x7b2   :  { %4185 = vmatmul.mubr.bf16.vlgmr.msra.gmra.mrb[80].mxu1 %v9281_v34 }
 0x7b3   :  { %4194 = vmatpush1.bf16.msra.mxu1 %v10235_v33  ;;  %4225 = vmatprep.mubr.bf16.mxu1 %v9284_v12 }
 0x7b4   :  { %4195 = vmatprep.subr.bf16.mxu1 %v10240_v35 }
 0x7b7   :  { %4196 = vmatpush1.bf16.msra.mxu1 %v10238_v36 }
 0x7b8   :  { %4197 = vmatprep.subr.bf16.mxu1 %v10243_v14  ;;  %v4275_v14 = vlaneseq }
 0x7bb   :  { %4198 = vmatpush1.bf16.msra.mxu1 %v10241_v37 }
 0x7bc   :  { %4199 = vmatprep.subr.bf16.mxu1 %v10246_v38 }
 0x7bf   :  { %4200 = vmatpush1.bf16.msra.mxu1 %v10244_v39 }
 0x7c0   :  { %4201 = vmatprep.subr.bf16.mxu1 %v10249_v40  ;;  %v11237_v40 = vshrl.u32 %v4275_v14, 7 }
 0x7c3   :  { %4202 = vmatpush1.bf16.msra.mxu1 %v10247_v23  ;;  %v11240_v23 = vsub.s32 0, %v11237_v40 }
 0x7c4   :  { %4203 = vmatprep.subr.bf16.mxu1 %v10252_v41  ;;  %v4273_v41 = vld [vmem:[#allocation21] sm:$0x3] }
 0x7c7   :  { %4204 = vmatpush1.bf16.msra.mxu1 %v10250_v25  ;;  %v11243_v25 = vsub.s32 1, %v11237_v40 }
 0x7c8   :  { %4205 = vmatprep.subr.bf16.mxu1 %v10255_v42  ;;  %v4287_v42 = vld [vmem:[#allocation22] sm:$0x3] }
 0x7cb   :  { %4206 = vmatpush1.bf16.msra.mxu1 %v10253_v43  ;;  %v4278_v43 = vrot.slane %v4273_v41, %v11240_v23 }
 0x7cc   :  { %4207 = vmatprep.subr.bf16.mxu1 %v10258_v44 }
 0x7cf   :  { %4208 = vmatpush1.bf16.msra.mxu1 %v10256_v45  ;;  %v4282_v45 = vrot.slane %v4273_v41, %v11243_v25 }
 0x7d0   :  { %4209 = vmatprep.subr.bf16.mxu1 %v10261_v46 }
 0x7d3   :  { %4210 = vmatpush1.bf16.msra.mxu1 %v10259_v47 }
 0x7d4   :  { %4211 = vmatprep.subr.bf16.mxu1 %v10264_v48  ;;  %v4292_v48 = vrot.slane %v4287_v42, %v11240_v23 }
 0x7d7   :  { %4212 = vmatpush1.bf16.msra.mxu1 %v10262_v49 }
 0x7d8   :  { %4213 = vmatprep.subr.bf16.mxu1 %v10267_v50  ;;  %v4296_v50 = vrot.slane %v4287_v42, %v11243_v25 }
 0x7db   :  { %4214 = vmatpush1.bf16.msra.mxu1 %v10265_v51 }
 0x7dc   :  { %4215 = vmatprep.subr.bf16.mxu1 %v10270_v52 }
 0x7df   :  { %4216 = vmatpush1.bf16.msra.mxu1 %v10268_v53 }
 0x7e0   :  { %4217 = vmatprep.subr.bf16.mxu1 %v10273_v54 }
 0x7e3   :  { %4218 = vmatpush1.bf16.msra.mxu1 %v10271_v55 }
 0x7e4   :  { %4219 = vmatprep.subr.bf16.mxu1 %v10276_v56 }
 0x7e7   :  { %4220 = vmatpush1.bf16.msra.mxu1 %v10274_v57 }
 0x7e8   :  { %4221 = vmatprep.subr.bf16.mxu1 %v10279_v58 }
 0x7eb   :  { %4222 = vmatpush1.bf16.msra.mxu1 %v10277_v59 }
 0x7ec   :  { %4223 = vmatprep.subr.bf16.mxu1 %v10282_v5 }
 0x7ef   :  { %4224 = vmatpush1.bf16.msra.mxu1 %v10280_v60 }
 0x7f2   :  { %4226 = vmatmul.mubr.bf16.vlgmr.msra.gmra.mrb[80].mxu1 %v9283_v61 }
 0x8c5   :  { %v4227_v62 = vpop.f32.mrb[80].mxu1 }
 0x8c6   :  { %v4234_v63 = vrot.slane %v4227_v62, 4  ;;  %v4229_v0 = vpop.f32.mrb[81].mxu1 }
 0x8c7   :  { %v4240_v1 = vrot.slane %v4229_v0, 4  ;;  %v4231_v2 = vpop.f32.mrb[82].mxu1 }
 0x8c8   :  { %v4235_v3 = vadd.f32 %v4234_v63, %v4227_v62  ;;  %v4232_v11 = vpop.f32.mrb[83].mxu1 }
 0x8c9   :  { %v4241_v4 = vadd.f32 %v4240_v1, %v4229_v0 }
 0x8ca   :  { %v4236_v6 = vrot.slane %v4235_v3, 2 }
 0x8cb   :  { %v4242_v9 = vrot.slane %v4241_v4, 2 }
 0x8cc   :  { %v4237_v10 = vadd.f32 %v4236_v6, %v4235_v3 }
 0x8cd   :  { %v4243_v13 = vadd.f32 %v4242_v9, %v4241_v4 }
 0x8ce   :  { %v4238_v15 = vrot.slane %v4237_v10, 1 }
 0x8cf   :  { %v4244_v16 = vrot.slane %v4243_v13, 1 }
 0x8d0   :  { %v4239_v17 = vadd.f32 %v4238_v15, %v4237_v10 }
 0x8d1   :  { %v4245_v18 = vadd.f32 %v4244_v16, %v4243_v13 }
 0x8d2   :  { %v4247_v19 = vmul.f32 0.125, %v4239_v17 }
 0x8d3   :  { %v4248_v20 = vmul.f32 0.125, %v4245_v18 }
 0x8d4   :  { %v4249_v22 = vsub.f32 %v4227_v62, %v4247_v19 }
 0x8d5   :  { %v4250_v21 = vsub.f32 %v4229_v0, %v4248_v20 }
 0x8d6   :  { %v4251_v24 = vmul.f32 %v4249_v22, %v4249_v22 }
 0x8d7   :  { %v4252_v26 = vmul.f32 %v4250_v21, %v4250_v21 }
 0x8d8   :  { %v4253_v7 = vrot.slane %v4251_v24, 4 }
 0x8d9   :  { %v4259_v27 = vrot.slane %v4252_v26, 4 }
 0x8da   :  { %v4254_v8 = vadd.f32 %v4253_v7, %v4251_v24 }
 0x8db   :  { %v4260_v28 = vadd.f32 %v4259_v27, %v4252_v26 }
 0x8dc   :  { %v4255_v29 = vrot.slane %v4254_v8, 2 }
 0x8dd   :  { %v4261_v30 = vrot.slane %v4260_v28, 2 }
 0x8de   :  { %v4256_v31 = vadd.f32 %v4255_v29, %v4254_v8 }
 0x8df   :  { %v4262_v32 = vadd.f32 %v4261_v30, %v4260_v28 }
 0x8e0   :  { %v4257_v33 = vrot.slane %v4256_v31, 1 }
 0x8e1   :  { %v4263_v34 = vrot.slane %v4262_v32, 1 }
 0x8e2   :  { %v4258_v35 = vadd.f32 %v4257_v33, %v4256_v31 }
 0x8e3   :  { %v4264_v12 = vadd.f32 %v4263_v34, %v4262_v32 }
 0x8e4   :  { %v4265_v36 = vmul.f32 0.125, %v4258_v35 }
 0x8e5   :  { %v4266_v37 = vmul.f32 0.125, %v4264_v12 }
 0x8e6   :  { %v4267_v38 = vadd.f32 1e-05, %v4265_v36 }
 0x8e7   :  { %v4268_v39 = vadd.f32 1e-05, %v4266_v37 }
 0x8e8   :  { %10285 = vrsqrt.f32 %v4267_v38 }
 0x8e9   :  { %10287 = vrsqrt.f32 %v4268_v39 }
 0x8f2   :  { %v10286_v44 = vpop.eup %10285 }
 0x8f3   :  { %v10288_v46 = vpop.eup %10287  ;;  %v4271_v47 = vmul.f32 %v10286_v44, %v4249_v22 }
 0x8f4   :  { %v4272_v49 = vmul.f32 %v10288_v46, %v4250_v21 }
 0x8f5   :  { %v4285_v51 = vmul.f32 %v4278_v43, %v4271_v47 }
 0x8f6   :  { %v4286_v52 = vmul.f32 %v4282_v45, %v4272_v49 }
 0x8f7   :  { %v4299_v53 = vadd.f32 %v4292_v48, %v4285_v51 }
 0x8f8   :  { %v4300_v54 = vadd.f32 %v4296_v50, %v4286_v52 }
 0x8f9   :  { %vm4301_vm9 = vcmp.gt.f32.partialorder %v4299_v53, 0.0  ;;  %v4303_v55 = vmul.f32 0.2, %v4299_v53 }
 0x8fa   :  { %vm4302_vm10 = vcmp.gt.f32.partialorder %v4300_v54, 0.0  ;;  %v4304_v56 = vmul.f32 0.2, %v4300_v54 }
 0x8fb   :  { %v4305_v57 = vsel %vm4301_vm9, %v4299_v53, %v4303_v55 }
 0x8fc   :  { %v4306_v58 = vsel %vm4302_vm10, %v4300_v54, %v4304_v56 }
 0x8fd   :  { %10658 = dma.done.wait [#allocation9], 131072 }
 0x8fe   :  { %10659 = vsyncadd [#allocation9], 4294836224  ;;  %v5352_v59 = vpack.c.bf16 %v4306_v58, %v4306_v58  ;;  %vm5418_vm11 = vcmask 1043456   ;;  %v5351_v5 = vpack.c.bf16 %v4305_v57, %v4305_v57  ;;  %v10700_v60 = vmov 0   ;;  %v10289_v62 = vld [vmem:[%s11665_s10] sm:$0xff]   ;;  %v4312_v63 = vld [vmem:[#allocation5 + $0x8] sm:$0xff] }
 0x8ff   :  { %5457 = vmatprep.mubr.bf16.mxu1 %v10700_v60  ;;  %vm5393_vm12 = vcmask 64512   ;;  %v4314_v0 = vld [vmem:[#allocation5 + $0x18] sm:$0xff]  ;;  %v4311_v1 = vld [vmem:[#allocation5] sm:$0xff]  ;;  %6110 = vmatprep.subr.bf16.mxu0 %v4312_v63  ;;  %v4313_v2 = vld [vmem:[#allocation5 + $0x10] sm:$0xff]  ;;  %vm7422_vm13 = vcmask 1041408  }
 0x900   :  { %9154 = vmatprep.subr.msk.bf16.mxu1 %vm5418_vm11, %v5352_v59  ;;  %v5420_v61 = vsel %vm5418_vm11, %v5351_v5, 0  ;;  %v4316_v3 = vld [vmem:[#allocation5 + $0x28] sm:$0xff]  ;;  %v4318_v11 = vld [vmem:[#allocation5 + $0x38] sm:$0xff]  ;;  %6111 = vmatpush1.bf16.msra.mxu0 %v4311_v1  ;;  %v4315_v4 = vld [vmem:[#allocation5 + $0x20] sm:$0xff] }
 0x901   :  { %5426 = vmatpush1.bf16.msra.mxu1 %v5420_v61  ;;  %6112 = vmatprep.subr.bf16.mxu0 %v4316_v3  ;;  %v10290_v6 = vld [vmem:[%s11665_s10 + $0x8] sm:$0xff]   ;;  %v4317_v9 = vld [vmem:[#allocation5 + $0x30] sm:$0xff]  ;;  %v4322_v13 = vld [vmem:[#allocation5 + $0x58] sm:$0xff] }
 0x902   :  { %6766 = vmatprep.subr.bf16.mxu1 %v4314_v0  ;;  %v4320_v10 = vld [vmem:[#allocation5 + $0x48] sm:$0xff]  ;;  %v4319_v15 = vld [vmem:[#allocation5 + $0x40] sm:$0xff]  ;;  %v4321_v16 = vld [vmem:[#allocation5 + $0x50] sm:$0xff] }
 0x903   :  { %v4324_v17 = vld [vmem:[#allocation5 + $0x68] sm:$0xff]  ;;  %v4326_v18 = vld [vmem:[#allocation5 + $0x78] sm:$0xff]  ;;  %v4323_v19 = vld [vmem:[#allocation5 + $0x60] sm:$0xff] }
 0x904   :  { %9155 = vmatmul.mubr.msk.bf16.vlgmr.msra.gmra.mrb[84].mxu1 %vm5393_vm12, %v10289_v62  ;;  %6113 = vmatpush1.bf16.msra.mxu0 %v4315_v4  ;;  %v10291_v20 = vld [vmem:[%s11665_s10 + $0x10] sm:$0xff]   ;;  %v4328_v21 = vld [vmem:[#allocation5 + $0x88] sm:$0xff]  ;;  %v4330_v24 = vld [vmem:[#allocation5 + $0x98] sm:$0xff] }
 0x905   :  { %5467 = vmatprep.mubr.bf16.mxu1 %v10700_v60  ;;  %6767 = vmatpush1.bf16.msra.mxu1 %v4313_v2  ;;  %v4325_v22 = vld [vmem:[#allocation5 + $0x70] sm:$0xff]  ;;  %v4327_v26 = vld [vmem:[#allocation5 + $0x80] sm:$0xff]  ;;  %v4332_v27 = vld [vmem:[#allocation5 + $0xa8] sm:$0xff] }
 0x906   :  { %6768 = vmatprep.subr.bf16.mxu1 %v4318_v11  ;;  %6114 = vmatprep.subr.bf16.mxu0 %v4320_v10  ;;  %v4329_v7 = vld [vmem:[#allocation5 + $0x90] sm:$0xff]  ;;  %v4334_v8 = vld [vmem:[#allocation5 + $0xb8] sm:$0xff]  ;;  %v4331_v28 = vld [vmem:[#allocation5 + $0xa0] sm:$0xff] }
 0x907   :  { %v10292_v29 = vld [vmem:[%s11665_s10 + $0x18] sm:$0xff]   ;;  %v4333_v30 = vld [vmem:[#allocation5 + $0xb0] sm:$0xff]  ;;  %v4336_v31 = vld [vmem:[#allocation5 + $0xc8] sm:$0xff] }
 0x908   :  { %6115 = vmatpush1.bf16.msra.mxu0 %v4319_v15  ;;  %v4338_v32 = vld [vmem:[#allocation5 + $0xd8] sm:$0xff]  ;;  %v4335_v33 = vld [vmem:[#allocation5 + $0xc0] sm:$0xff]  ;;  %v4337_v34 = vld [vmem:[#allocation5 + $0xd0] sm:$0xff] }
 0x909   :  { %6769 = vmatpush1.bf16.msra.mxu1 %v4317_v9  ;;  %6116 = vmatprep.subr.bf16.mxu0 %v4324_v17  ;;  %v4340_v35 = vld [vmem:[#allocation5 + $0xe8] sm:$0xff]  ;;  %v4342_v12 = vld [vmem:[#allocation5 + $0xf8] sm:$0xff]  ;;  %v4339_v36 = vld [vmem:[#allocation5 + $0xe0] sm:$0xff]  ;;  %v10701_v17 = vmov 1966171168  }
 0x90a   :  { %6770 = vmatprep.subr.bf16.mxu1 %v4322_v13  ;;  %v10293_v14 = vld [vmem:[%s11665_s10 + $0x20] sm:$0xff]   ;;  %v4341_v37 = vld [vmem:[#allocation5 + $0xf0] sm:$0xff]  ;;  %v4344_v38 = vld [vmem:[#allocation5 + $0x108] sm:$0xff] }
 0x90b   :  { %v4346_v39 = vld [vmem:[#allocation5 + $0x118] sm:$0xff]  ;;  %v4343_v41 = vld [vmem:[#allocation5 + $0x100] sm:$0xff]  ;;  %v4345_v42 = vld [vmem:[#allocation5 + $0x110] sm:$0xff] }
 0x90c   :  { %9156 = vmatmul.mubr.msk.bf16.gmra.mrb[88].mxu1 %vm5393_vm12, %v10290_v6  ;;  %6117 = vmatpush1.bf16.msra.mxu0 %v4323_v19  ;;  %v10294_v43 = vld [vmem:[%s11665_s10 + $0x28] sm:$0xff]   ;;  %v4350_v45 = vld [vmem:[#allocation5 + $0x138] sm:$0xff]  ;;  %v4347_v46 = vld [vmem:[#allocation5 + $0x120] sm:$0xff] }
 0x90d   :  { %5477 = vmatprep.mubr.bf16.mxu1 %v10700_v60  ;;  %6771 = vmatpush1.bf16.msra.mxu1 %v4321_v16  ;;  %v4348_v44 = vld [vmem:[#allocation5 + $0x128] sm:$0xff]  ;;  %v4349_v47 = vld [vmem:[#allocation5 + $0x130] sm:$0xff]  ;;  %v4354_v50 = vld [vmem:[#allocation5 + $0x158] sm:$0xff] }
 0x90e   :  { %6772 = vmatprep.subr.bf16.mxu1 %v4326_v18  ;;  %6118 = vmatprep.subr.bf16.mxu0 %v4328_v21  ;;  %v10295_v48 = vld [vmem:[%s11665_s10 + $0x30] sm:$0xff]   ;;  %v4352_v49 = vld [vmem:[#allocation5 + $0x148] sm:$0xff]  ;;  %v4351_v51 = vld [vmem:[#allocation5 + $0x140] sm:$0xff]  ;;  %v5544_v18 = vunpack.c.l.s4 %v10701_v17 }
 0x90f   :  { %v4353_v52 = vld [vmem:[#allocation5 + $0x150] sm:$0xff]  ;;  %v4356_v53 = vld [vmem:[#allocation5 + $0x168] sm:$0xff]  ;;  %v4358_v54 = vld [vmem:[#allocation5 + $0x178] sm:$0xff] }
 0x910   :  { %6119 = vmatpush1.bf16.msra.mxu0 %v4327_v26  ;;  %v4355_v55 = vld [vmem:[#allocation5 + $0x160] sm:$0xff]  ;;  %v4357_v56 = vld [vmem:[#allocation5 + $0x170] sm:$0xff]  ;;  %v10296_v57 = vld [vmem:[%s11665_s10 + $0x38] sm:$0xff]   ;;  %v5545_v19 = vunpack.c.0.s8 %v5544_v18 }
 0x911   :  { %6773 = vmatpush1.bf16.msra.mxu1 %v4325_v22  ;;  %6120 = vmatprep.subr.bf16.mxu0 %v4332_v27  ;;  %v4360_v58 = vld [vmem:[#allocation5 + $0x188] sm:$0xff]  ;;  %v4362_v59 = vld [vmem:[#allocation5 + $0x198] sm:$0xff]  ;;  %v4359_v5 = vld [vmem:[#allocation5 + $0x180] sm:$0xff] }
 0x912   :  { %6774 = vmatprep.subr.bf16.mxu1 %v4330_v24  ;;  %v4361_v61 = vld [vmem:[#allocation5 + $0x190] sm:$0xff]  ;;  %v4364_v62 = vld [vmem:[#allocation5 + $0x1a8] sm:$0xff]  ;;  %v4366_v63 = vld [vmem:[#allocation5 + $0x1b8] sm:$0xff]  ;;  %v11290_v22 = vsub.s32 %v5545_v19, %v11237_v40 }
 0x913   :  { %v4363_v0 = vld [vmem:[#allocation5 + $0x1a0] sm:$0xff]  ;;  %v4365_v1 = vld [vmem:[#allocation5 + $0x1b0] sm:$0xff]  ;;  %v4368_v2 = vld [vmem:[#allocation5 + $0x1c8] sm:$0xff] }
 0x914   :  { %9157 = vmatmul.mubr.msk.bf16.gmra.mrb[92].mxu1 %vm5393_vm12, %v10291_v20  ;;  %6121 = vmatpush1.bf16.msra.mxu0 %v4331_v28  ;;  %v4370_v3 = vld [vmem:[#allocation5 + $0x1d8] sm:$0xff]  ;;  %v4367_v11 = vld [vmem:[#allocation5 + $0x1c0] sm:$0xff]  ;;  %v4369_v4 = vld [vmem:[#allocation5 + $0x1d0] sm:$0xff] }
 0x915   :  { %5487 = vmatprep.mubr.bf16.mxu1 %v10700_v60  ;;  %6775 = vmatpush1.bf16.msra.mxu1 %v4329_v7  ;;  %v4372_v6 = vld [vmem:[#allocation5 + $0x1e8] sm:$0xff]  ;;  %v4374_v9 = vld [vmem:[#allocation5 + $0x1f8] sm:$0xff]  ;;  %v4371_v10 = vld [vmem:[#allocation5 + $0x1e0] sm:$0xff] }
 0x916   :  { %6776 = vmatprep.subr.bf16.mxu1 %v4334_v8  ;;  %6122 = vmatprep.subr.bf16.mxu0 %v4336_v31  ;;  %v4373_v13 = vld [vmem:[#allocation5 + $0x1f0] sm:$0xff]  ;;  %v4376_v15 = vld [vmem:[#allocation5 + $0x208] sm:$0xff]  ;;  %v4378_v16 = vld [vmem:[#allocation5 + $0x218] sm:$0xff] }
 0x917   :  { %v4409_v17 = vld [vmem:[#allocation5 + $0x310] sm:$0xff]  ;;  %v4412_v19 = vld [vmem:[#allocation5 + $0x328] sm:$0xff] }
 0x918   :  { %6123 = vmatpush1.bf16.msra.mxu0 %v4335_v33 }
 0x919   :  { %6777 = vmatpush1.bf16.msra.mxu1 %v4333_v30  ;;  %6124 = vmatprep.subr.bf16.mxu0 %v4340_v35 }
 0x91a   :  { %6778 = vmatprep.subr.bf16.mxu1 %v4338_v32 }
 0x91c   :  { %9158 = vmatmul.mubr.msk.bf16.gmra.mrb[96].mxu1 %vm5393_vm12, %v10292_v29  ;;  %6125 = vmatpush1.bf16.msra.mxu0 %v4339_v36 }
 0x91d   :  { %5497 = vmatprep.mubr.bf16.mxu1 %v10700_v60  ;;  %6779 = vmatpush1.bf16.msra.mxu1 %v4337_v34 }
 0x91e   :  { %6780 = vmatprep.subr.bf16.mxu1 %v4342_v12  ;;  %6126 = vmatprep.subr.bf16.mxu0 %v4344_v38 }
 0x920   :  { %6127 = vmatpush1.bf16.msra.mxu0 %v4343_v41  ;;  %v4375_v41 = vld [vmem:[#allocation5 + $0x200] sm:$0xff] }
 0x921   :  { %6781 = vmatpush1.bf16.msra.mxu1 %v4341_v37  ;;  %6128 = vmatprep.subr.bf16.mxu0 %v4348_v44  ;;  %v4380_v44 = vld [vmem:[#allocation5 + $0x228] sm:$0xff] }
 0x922   :  { %6782 = vmatprep.subr.bf16.mxu1 %v4346_v39 }
 0x924   :  { %9159 = vmatmul.mubr.msk.bf16.gmra.mrb[100].mxu1 %vm5393_vm12, %v10293_v14  ;;  %6129 = vmatpush1.bf16.msra.mxu0 %v4347_v46  ;;  %v4379_v46 = vld [vmem:[#allocation5 + $0x220] sm:$0xff] }
 0x925   :  { %5507 = vmatprep.mubr.bf16.mxu1 %v10700_v60  ;;  %6783 = vmatpush1.bf16.msra.mxu1 %v4345_v42  ;;  %v4377_v42 = vld [vmem:[#allocation5 + $0x210] sm:$0xff] }
 0x926   :  { %6784 = vmatprep.subr.bf16.mxu1 %v4350_v45  ;;  %6130 = vmatprep.subr.bf16.mxu0 %v4352_v49  ;;  %v4382_v45 = vld [vmem:[#allocation5 + $0x238] sm:$0xff] }
 0x927   :  { %v4386_v49 = vld [vmem:[#allocation5 + $0x258] sm:$0xff] }
 0x928   :  { %6131 = vmatpush1.bf16.msra.mxu0 %v4351_v51  ;;  %v4385_v51 = vld [vmem:[#allocation5 + $0x250] sm:$0xff] }
 0x929   :  { %6785 = vmatpush1.bf16.msra.mxu1 %v4349_v47  ;;  %6132 = vmatprep.subr.bf16.mxu0 %v4356_v53  ;;  %v4381_v47 = vld [vmem:[#allocation5 + $0x230] sm:$0xff]  ;;  %v4390_v53 = vld [vmem:[#allocation5 + $0x278] sm:$0xff] }
 0x92a   :  { %6786 = vmatprep.subr.bf16.mxu1 %v4354_v50  ;;  %v4383_v50 = vld [vmem:[#allocation5 + $0x240] sm:$0xff] }
 0x92c   :  { %9160 = vmatmul.mubr.msk.bf16.gmra.mrb[104].mxu1 %vm5393_vm12, %v10294_v43  ;;  %6133 = vmatpush1.bf16.msra.mxu0 %v4355_v55  ;;  %v4389_v55 = vld [vmem:[#allocation5 + $0x270] sm:$0xff] }
 0x92d   :  { %5517 = vmatprep.mubr.bf16.mxu1 %v10700_v60  ;;  %6787 = vmatpush1.bf16.msra.mxu1 %v4353_v52  ;;  %v4388_v52 = vld [vmem:[#allocation5 + $0x268] sm:$0xff] }
 0x92e   :  { %6788 = vmatprep.subr.bf16.mxu1 %v4358_v54  ;;  %6134 = vmatprep.subr.bf16.mxu0 %v4360_v58  ;;  %v4387_v54 = vld [vmem:[#allocation5 + $0x260] sm:$0xff] }
 0x92f   :  { %v4391_v58 = vld [vmem:[#allocation5 + $0x280] sm:$0xff] }
 0x930   :  { %6135 = vmatpush1.bf16.msra.mxu0 %v4359_v5  ;;  %v4396_v5 = vld [vmem:[#allocation5 + $0x2a8] sm:$0xff] }
 0x931   :  { %6789 = vmatpush1.bf16.msra.mxu1 %v4357_v56  ;;  %6136 = vmatprep.subr.bf16.mxu0 %v4364_v62  ;;  %v4392_v56 = vld [vmem:[#allocation5 + $0x288] sm:$0xff]  ;;  %v4395_v62 = vld [vmem:[#allocation5 + $0x2a0] sm:$0xff] }
 0x932   :  { %6790 = vmatprep.subr.bf16.mxu1 %v4362_v59  ;;  %v4393_v59 = vld [vmem:[#allocation5 + $0x290] sm:$0xff] }
 0x934   :  { %9161 = vmatmul.mubr.msk.bf16.gmra.mrb[108].mxu1 %vm5393_vm12, %v10295_v48  ;;  %6137 = vmatpush1.bf16.msra.mxu0 %v4363_v0  ;;  %v4384_v48 = vld [vmem:[#allocation5 + $0x248] sm:$0xff] }
 0x935   :  { %5527 = vmatprep.mubr.bf16.mxu1 %v10700_v60  ;;  %6791 = vmatpush1.bf16.msra.mxu1 %v4361_v61  ;;  %v4398_v61 = vld [vmem:[#allocation5 + $0x2b8] sm:$0xff]  ;;  %v4400_v0 = vld [vmem:[#allocation5 + $0x2c8] sm:$0xff] }
 0x936   :  { %6792 = vmatprep.subr.bf16.mxu1 %v4366_v63  ;;  %6138 = vmatprep.subr.bf16.mxu0 %v4368_v2  ;;  %v4397_v63 = vld [vmem:[#allocation5 + $0x2b0] sm:$0xff]  ;;  %v4399_v2 = vld [vmem:[#allocation5 + $0x2c0] sm:$0xff] }
 0x938   :  { %6139 = vmatpush1.bf16.msra.mxu0 %v4367_v11  ;;  %v4404_v11 = vld [vmem:[#allocation5 + $0x2e8] sm:$0xff] }
 0x939   :  { %6793 = vmatpush1.bf16.msra.mxu1 %v4365_v1  ;;  %6140 = vmatprep.subr.bf16.mxu0 %v4372_v6  ;;  %v4402_v1 = vld [vmem:[#allocation5 + $0x2d8] sm:$0xff]  ;;  %v4403_v6 = vld [vmem:[#allocation5 + $0x2e0] sm:$0xff] }
 0x93a   :  { %6794 = vmatprep.subr.bf16.mxu1 %v4370_v3  ;;  %v4401_v3 = vld [vmem:[#allocation5 + $0x2d0] sm:$0xff] }
 0x93c   :  { %9162 = vmatmul.mubr.msk.bf16.gmra.mrb[112].mxu1 %vm5393_vm12, %v10296_v57  ;;  %6141 = vmatpush1.bf16.msra.mxu0 %v4371_v10  ;;  %v4394_v57 = vld [vmem:[#allocation5 + $0x298] sm:$0xff]  ;;  %v4408_v10 = vld [vmem:[#allocation5 + $0x308] sm:$0xff] }
 0x93d   :  { %6795 = vmatpush1.bf16.msra.mxu1 %v4369_v4  ;;  %6151 = vmatprep.subr.bf16.mxu0 %v4376_v15  ;;  %v4406_v4 = vld [vmem:[#allocation5 + $0x2f8] sm:$0xff] }
 0x93e   :  { %6796 = vmatprep.subr.bf16.mxu1 %v4374_v9  ;;  %v4405_v9 = vld [vmem:[#allocation5 + $0x2f0] sm:$0xff] }
 0x941   :  { %6797 = vmatpush1.bf16.msra.mxu1 %v4373_v13  ;;  %v4410_v13 = vld [vmem:[#allocation5 + $0x318] sm:$0xff] }
 0x942   :  { %6807 = vmatprep.subr.bf16.mxu1 %v4378_v16  ;;  %v4407_v16 = vld [vmem:[#allocation5 + $0x300] sm:$0xff] }
 0x9d7   :  { %v5459_v20 = vpop.f32.mrb[84].mxu1 }
 0x9d8   :  { %v5461_v21 = vpop.f32.mrb[85].mxu1 }
 0x9d9   :  { %v9163_v24 = vpack.c.bf16 %v5461_v21, %v5459_v20  ;;  %v5463_v26 = vpop.f32.mrb[86].mxu1  ;;  %v4414_v20 = vld [vmem:[#allocation5 + $0x338] sm:$0xff] }
 0x9da   :  { %v5465_v7 = vpop.f32.mrb[87].mxu1 }
 0x9db   :  { %v5549_v27 = vrot.slane %v9163_v24, %v11290_v22  ;;  %v9165_v8 = vpack.c.bf16 %v5465_v7, %v5463_v26 }
 0x9dd   :  { %9164 = vst.sshfl [vmem:[#allocation4] sm:$0x5 pattern:$0x73625140] %v5549_v27  ;;  %v5570_v28 = vrot.slane %v9165_v8, %v11290_v22 }
 0x9df   :  { %9166 = vst.sshfl [vmem:[#allocation4 + $0x2] sm:$0x5 pattern:$0x73625140] %v5570_v28  ;;  %v5469_v29 = vpop.f32.mrb[88].mxu1  ;;  %v4411_v28 = vld [vmem:[#allocation5 + $0x320] sm:$0xff] }
 0x9e0   :  { %v5471_v30 = vpop.f32.mrb[89].mxu1 }
 0x9e1   :  { %v9167_v31 = vpack.c.bf16 %v5471_v30, %v5469_v29  ;;  %v5473_v32 = vpop.f32.mrb[90].mxu1  ;;  %v4413_v29 = vld [vmem:[#allocation5 + $0x330] sm:$0xff] }
 0x9e2   :  { %v5475_v33 = vpop.f32.mrb[91].mxu1 }
 0x9e3   :  { %v5591_v34 = vrot.slane %v9167_v31, %v11290_v22  ;;  %v9169_v35 = vpack.c.bf16 %v5475_v33, %v5473_v32  ;;  %v4416_v31 = vld [vmem:[#allocation5 + $0x348] sm:$0xff]  ;;  %v4418_v32 = vld [vmem:[#allocation5 + $0x358] sm:$0xff] }
 0x9e5   :  { %9168 = vst.sshfl [vmem:[#allocation4 + $0x4] sm:$0x5 pattern:$0x73625140] %v5591_v34  ;;  %v5612_v12 = vrot.slane %v9169_v35, %v11290_v22 }
 0x9e7   :  { %9170 = vst.sshfl [vmem:[#allocation4 + $0x6] sm:$0x5 pattern:$0x73625140] %v5612_v12  ;;  %v5479_v15 = vpop.f32.mrb[92].mxu1 }
 0x9e8   :  { %v5481_v18 = vpop.f32.mrb[93].mxu1 }
 0x9e9   :  { %v9171_v21 = vpack.c.bf16 %v5481_v18, %v5479_v15  ;;  %v5483_v24 = vpop.f32.mrb[94].mxu1  ;;  %v4433_v15 = vld [vmem:[#allocation5 + $0x3d0] sm:$0xff] }
 0x9ea   :  { %v5485_v26 = vpop.f32.mrb[95].mxu1 }
 0x9eb   :  { %v5633_v7 = vrot.slane %v9171_v21, %v11290_v22  ;;  %v9173_v27 = vpack.c.bf16 %v5485_v26, %v5483_v24  ;;  %v4440_v21 = vld [vmem:[#allocation5 + $0x408] sm:$0xff]  ;;  %v4442_v24 = vld [vmem:[#allocation5 + $0x418] sm:$0xff] }
 0x9ed   :  { %9172 = vst.sshfl [vmem:[#allocation4 + $0x8] sm:$0x5 pattern:$0x73625140] %v5633_v7  ;;  %v5654_v33 = vrot.slane %v9173_v27, %v11290_v22 }
 0x9ee   :  { %v11296_v36 = vld [vmem:[#allocation4] sm:$0xff] }
 0x9ef   :  { %v5889_v14 = vrot.slane %v11296_v36, %v11290_v22  ;;  %v5489_v8 = vpop.f32.mrb[96].mxu1  ;;  %9174 = vst.sshfl [vmem:[#allocation4 + $0xa] sm:$0x5 pattern:$0x73625140] %v5654_v33  ;;  %v4444_v33 = vld [vmem:[#allocation5 + $0x428] sm:$0xff] }
 0x9f0   :  { %v5491_v30 = vpop.f32.mrb[97].mxu1 }
 0x9f1   :  { %v5897_v37 = vcombine.high %v5889_v14, %v5889_v14  ;;  %v11302_v39 = vrot.slane %v5889_v14, %v11290_v22  ;;  %v9175_v34 = vpack.c.bf16 %v5491_v30, %v5489_v8  ;;  %v5493_v35 = vpop.f32.mrb[98].mxu1  ;;  %v4439_v8 = vld [vmem:[#allocation5 + $0x400] sm:$0xff]  ;;  %v4441_v30 = vld [vmem:[#allocation5 + $0x410] sm:$0xff] }
 0x9f2   :  { %v5495_v12 = vpop.f32.mrb[99].mxu1 }
 0x9f3   :  { %v5919_v38 = vrot.slane %v5897_v37, %v11290_v22  ;;  %v5675_v14 = vrot.slane %v9175_v34, %v11290_v22  ;;  %v9177_v37 = vpack.c.bf16 %v5495_v12, %v5493_v35  ;;  %v5927_v27 = vcombine.high %v11302_v39, %v11302_v39  ;;  %v4446_v34 = vld [vmem:[#allocation5 + $0x438] sm:$0xff] }
 0x9f5   :  { %6142 = vmatprep.mubr.bf16.mxu0 %v5919_v38  ;;  %6798 = vmatprep.mubr.bf16.mxu1 %v5919_v38  ;;  %v5929_v43 = vcombine.high %v5919_v38, %v5919_v38  ;;  %v4415_v38 = vld [vmem:[#allocation5 + $0x340] sm:$0xff]  ;;  %9176 = vst.sshfl [vmem:[#allocation4 + $0xc] sm:$0x5 pattern:$0x73625140] %v5675_v14 }
 0x9f6   :  { %6143 = vmatmul.mubr.bf16.vlgmr.msra.gmra.mrb[48].mxu0 %v11302_v39  ;;  %6799 = vmatmul.mubr.bf16.vlgmr.msra.gmra.mrb[116].mxu1 %v11302_v39 }
 0x9f7   :  { %6152 = vmatpush1.bf16.msra.mxu0 %v4375_v41  ;;  %6808 = vmatpush1.bf16.msra.mxu1 %v4377_v42  ;;  %v4417_v41 = vld [vmem:[#allocation5 + $0x350] sm:$0xff]  ;;  %v4420_v42 = vld [vmem:[#allocation5 + $0x368] sm:$0xff] }
 0x9f8   :  { %6183 = vmatprep.mubr.bf16.mxu0 %v5929_v43  ;;  %6839 = vmatprep.mubr.bf16.mxu1 %v5929_v43  ;;  %v4422_v43 = vld [vmem:[#allocation5 + $0x378] sm:$0xff] }
 0x9f9   :  { %6153 = vmatprep.subr.bf16.mxu0 %v4380_v44  ;;  %6809 = vmatprep.subr.bf16.mxu1 %v4382_v45  ;;  %v5696_v44 = vrot.slane %v9177_v37, %v11290_v22  ;;  %v4419_v45 = vld [vmem:[#allocation5 + $0x360] sm:$0xff] }
 0x9fa   :  { %v4443_v37 = vld [vmem:[#allocation5 + $0x420] sm:$0xff] }
 0x9fb   :  { %6154 = vmatpush1.bf16.msra.mxu0 %v4379_v46  ;;  %6810 = vmatpush1.bf16.msra.mxu1 %v4381_v47  ;;  %9178 = vst.sshfl [vmem:[#allocation4 + $0xe] sm:$0x5 pattern:$0x73625140] %v5696_v44  ;;  %v4421_v46 = vld [vmem:[#allocation5 + $0x370] sm:$0xff]  ;;  %v4424_v47 = vld [vmem:[#allocation5 + $0x388] sm:$0xff] }
 0x9fc   :  { %6155 = vmatprep.subr.bf16.mxu0 %v4384_v48  ;;  %6811 = vmatprep.subr.bf16.mxu1 %v4386_v49  ;;  %v4426_v48 = vld [vmem:[#allocation5 + $0x398] sm:$0xff]  ;;  %v5499_v49 = vpop.f32.mrb[100].mxu1 }
 0x9fd   :  { %v4450_v44 = vld [vmem:[#allocation5 + $0x458] sm:$0xff] }
 0x9ff   :  { %6156 = vmatpush1.bf16.msra.mxu0 %v4383_v50  ;;  %6812 = vmatpush1.bf16.msra.mxu1 %v4385_v51  ;;  %v4423_v50 = vld [vmem:[#allocation5 + $0x380] sm:$0xff]  ;;  %v4425_v51 = vld [vmem:[#allocation5 + $0x390] sm:$0xff] }
 0xa00   :  { %6157 = vmatprep.subr.bf16.mxu0 %v4388_v52  ;;  %6813 = vmatprep.subr.bf16.mxu1 %v4390_v53  ;;  %v5501_v52 = vpop.f32.mrb[101].mxu1  ;;  %v4428_v53 = vld [vmem:[#allocation5 + $0x3a8] sm:$0xff] }
 0xa03   :  { %6158 = vmatpush1.bf16.msra.mxu0 %v4387_v54  ;;  %6814 = vmatpush1.bf16.msra.mxu1 %v4389_v55  ;;  %v4430_v54 = vld [vmem:[#allocation5 + $0x3b8] sm:$0xff]  ;;  %v9179_v55 = vpack.c.bf16 %v5501_v52, %v5499_v49  ;;  %v4452_v52 = vld [vmem:[#allocation5 + $0x468] sm:$0xff] }
 0xa04   :  { %6159 = vmatprep.subr.bf16.mxu0 %v4392_v56  ;;  %6815 = vmatprep.subr.bf16.mxu1 %v4394_v57  ;;  %v5503_v56 = vpop.f32.mrb[102].mxu1 }
 0xa05   :  { %v5505_v57 = vpop.f32.mrb[103].mxu1 }
 0xa07   :  { %6160 = vmatpush1.bf16.msra.mxu0 %v4391_v58  ;;  %6816 = vmatpush1.bf16.msra.mxu1 %v4393_v59  ;;  %v5717_v58 = vrot.slane %v9179_v55, %v11290_v22  ;;  %v9181_v59 = vpack.c.bf16 %v5505_v57, %v5503_v56  ;;  %v4451_v55 = vld [vmem:[#allocation5 + $0x460] sm:$0xff]  ;;  %v4453_v56 = vld [vmem:[#allocation5 + $0x470] sm:$0xff]  ;;  %v4456_v57 = vld [vmem:[#allocation5 + $0x488] sm:$0xff] }
 0xa08   :  { %6161 = vmatprep.subr.bf16.mxu0 %v4396_v5  ;;  %6817 = vmatprep.subr.bf16.mxu1 %v4398_v61  ;;  %v5509_v5 = vpop.f32.mrb[104].mxu1  ;;  %v4427_v61 = vld [vmem:[#allocation5 + $0x3a0] sm:$0xff] }
 0xa09   :  { %9180 = vst.sshfl [vmem:[#allocation4 + $0x10] sm:$0x5 pattern:$0x73625140] %v5717_v58  ;;  %v4458_v58 = vld [vmem:[#allocation5 + $0x498] sm:$0xff] }
 0xa0b   :  { %6162 = vmatpush1.bf16.msra.mxu0 %v4395_v62  ;;  %6818 = vmatpush1.bf16.msra.mxu1 %v4397_v63  ;;  %v4429_v62 = vld [vmem:[#allocation5 + $0x3b0] sm:$0xff]  ;;  %v5511_v63 = vpop.f32.mrb[105].mxu1 }
 0xa0c   :  { %6163 = vmatprep.subr.bf16.mxu0 %v4400_v0  ;;  %6819 = vmatprep.subr.bf16.mxu1 %v4402_v1  ;;  %v4432_v0 = vld [vmem:[#allocation5 + $0x3c8] sm:$0xff]  ;;  %v4434_v1 = vld [vmem:[#allocation5 + $0x3d8] sm:$0xff] }
 0xa0f   :  { %6164 = vmatpush1.bf16.msra.mxu0 %v4399_v2  ;;  %6820 = vmatpush1.bf16.msra.mxu1 %v4401_v3  ;;  %v5882_v2 = vcombine.high %v11296_v36, %v11296_v36  ;;  %v5738_v3 = vrot.slane %v9181_v59, %v11290_v22  ;;  %v4455_v59 = vld [vmem:[#allocation5 + $0x480] sm:$0xff] }
 0xa10   :  { %6165 = vmatprep.subr.bf16.mxu0 %v4404_v11  ;;  %6821 = vmatprep.subr.bf16.mxu1 %v4406_v4  ;;  %v9183_v11 = vpack.c.bf16 %v5511_v63, %v5509_v5  ;;  %v5513_v4 = vpop.f32.mrb[106].mxu1  ;;  %v4457_v5 = vld [vmem:[#allocation5 + $0x490] sm:$0xff]  ;;  %v4459_v63 = vld [vmem:[#allocation5 + $0x4a0] sm:$0xff] }
 0xa11   :  { %9182 = vst.sshfl [vmem:[#allocation4 + $0x12] sm:$0x5 pattern:$0x73625140] %v5738_v3  ;;  %v11316_v36 = vrot.slane %v5882_v2, %v11290_v22  ;;  %v4466_v2 = vld [vmem:[#allocation5 + $0x4d8] sm:$0xff]  ;;  %v4463_v3 = vld [vmem:[#allocation5 + $0x4c0] sm:$0xff] }
 0xa13   :  { %6166 = vmatpush1.bf16.msra.mxu0 %v4403_v6  ;;  %6822 = vmatpush1.bf16.msra.mxu1 %v4405_v9  ;;  %v5515_v6 = vpop.f32.mrb[107].mxu1  ;;  %v5759_v9 = vrot.slane %v9183_v11, %v11290_v22  ;;  %v5898_v26 = vcombine.high %v11316_v36, %v11316_v36  ;;  %v4465_v11 = vld [vmem:[#allocation5 + $0x4d0] sm:$0xff] }
 0xa14   :  { %6167 = vmatprep.subr.bf16.mxu0 %v4408_v10  ;;  %6823 = vmatprep.subr.bf16.mxu1 %v4410_v13  ;;  %v9185_v10 = vpack.c.bf16 %v5515_v6, %v5513_v4  ;;  %v4431_v13 = vld [vmem:[#allocation5 + $0x3c0] sm:$0xff]  ;;  %v5519_v7 = vpop.f32.mrb[108].mxu1  ;;  %v4468_v4 = vld [vmem:[#allocation5 + $0x4e8] sm:$0xff]  ;;  %v4470_v6 = vld [vmem:[#allocation5 + $0x4f8] sm:$0xff] }
 0xa15   :  { %9184 = vst.sshfl [vmem:[#allocation4 + $0x14] sm:$0x5 pattern:$0x73625140] %v5759_v9  ;;  %v4467_v9 = vld [vmem:[#allocation5 + $0x4e0] sm:$0xff] }
 0xa16   :  { %v5780_v18 = vrot.slane %v9185_v10, %v11290_v22  ;;  %v4469_v10 = vld [vmem:[#allocation5 + $0x4f0] sm:$0xff] }
 0xa17   :  { %6168 = vmatpush1.bf16.msra.mxu0 %v4407_v16  ;;  %6824 = vmatpush1.bf16.msra.mxu1 %v4409_v17  ;;  %v4436_v16 = vld [vmem:[#allocation5 + $0x3e8] sm:$0xff]  ;;  %v4438_v17 = vld [vmem:[#allocation5 + $0x3f8] sm:$0xff] }
 0xa18   :  { %6169 = vmatprep.subr.bf16.mxu0 %v4412_v19  ;;  %6825 = vmatprep.subr.bf16.mxu1 %v4414_v20  ;;  %9186 = vst.sshfl [vmem:[#allocation4 + $0x16] sm:$0x5 pattern:$0x73625140] %v5780_v18  ;;  %v4435_v19 = vld [vmem:[#allocation5 + $0x3e0] sm:$0xff]  ;;  %v4437_v20 = vld [vmem:[#allocation5 + $0x3f0] sm:$0xff] }
 0xa19   :  { %v4476_v18 = vld [vmem:[#allocation5 + $0x528] sm:$0xff] }
 0xa1b   :  { %6170 = vmatpush1.bf16.msra.mxu0 %v4411_v28  ;;  %6826 = vmatpush1.bf16.msra.mxu1 %v4413_v29  ;;  %v5521_v28 = vpop.f32.mrb[109].mxu1  ;;  %v11324_v29 = vrot.slane %v5898_v26, %v11290_v22  ;;  %v4482_v26 = vld [vmem:[#allocation5 + $0x558] sm:$0xff] }
 0xa1c   :  { %6171 = vmatprep.subr.bf16.mxu0 %v4416_v31  ;;  %6827 = vmatprep.subr.bf16.mxu1 %v4418_v32  ;;  %v9187_v31 = vpack.c.bf16 %v5521_v28, %v5519_v7  ;;  %v5523_v32 = vpop.f32.mrb[110].mxu1  ;;  %v4479_v7 = vld [vmem:[#allocation5 + $0x540] sm:$0xff]  ;;  %v4486_v28 = vld [vmem:[#allocation5 + $0x578] sm:$0xff] }
 0xa1d   :  { %v5525_v35 = vpop.f32.mrb[111].mxu1 }
 0xa1e   :  { %v5801_v39 = vrot.slane %v9187_v31, %v11290_v22  ;;  %v9189_v12 = vpack.c.bf16 %v5525_v35, %v5523_v32  ;;  %v5529_v14 = vpop.f32.mrb[112].mxu1  ;;  %v4485_v31 = vld [vmem:[#allocation5 + $0x570] sm:$0xff]  ;;  %v4488_v32 = vld [vmem:[#allocation5 + $0x588] sm:$0xff] }
 0xa1f   :  { %6172 = vmatpush1.bf16.msra.mxu0 %v4415_v38  ;;  %6828 = vmatpush1.bf16.msra.mxu1 %v4417_v41  ;;  %v4445_v38 = vld [vmem:[#allocation5 + $0x430] sm:$0xff]  ;;  %v4448_v41 = vld [vmem:[#allocation5 + $0x448] sm:$0xff] }
 0xa20   :  { %6173 = vmatprep.subr.bf16.mxu0 %v4420_v42  ;;  %6829 = vmatprep.subr.bf16.mxu1 %v4422_v43  ;;  %9188 = vst.sshfl [vmem:[#allocation4 + $0x18] sm:$0x5 pattern:$0x73625140] %v5801_v39  ;;  %v5822_v42 = vrot.slane %v9189_v12, %v11290_v22  ;;  %v5531_v43 = vpop.f32.mrb[113].mxu1  ;;  %v4489_v35 = vld [vmem:[#allocation5 + $0x590] sm:$0xff] }
 0xa21   :  { %v4492_v39 = vld [vmem:[#allocation5 + $0x5a8] sm:$0xff]  ;;  %v4494_v12 = vld [vmem:[#allocation5 + $0x5b8] sm:$0xff] }
 0xa22   :  { %9190 = vst.sshfl [vmem:[#allocation4 + $0x1a] sm:$0x5 pattern:$0x73625140] %v5822_v42  ;;  %v4495_v42 = vld [vmem:[#allocation5 + $0x5c0] sm:$0xff] }
 0xa23   :  { %6174 = vmatpush1.bf16.msra.mxu0 %v4419_v45  ;;  %6830 = vmatpush1.bf16.msra.mxu1 %v4421_v46  ;;  %v9191_v45 = vpack.c.bf16 %v5531_v43, %v5529_v14  ;;  %v5533_v46 = vpop.f32.mrb[114].mxu1  ;;  %v4491_v14 = vld [vmem:[#allocation5 + $0x5a0] sm:$0xff]  ;;  %v4497_v43 = vld [vmem:[#allocation5 + $0x5d0] sm:$0xff] }
 0xa24   :  { %6175 = vmatprep.subr.bf16.mxu0 %v4424_v47  ;;  %6831 = vmatprep.subr.bf16.mxu1 %v4426_v48  ;;  %v5535_v47 = vpop.f32.mrb[115].mxu1  ;;  %v4447_v48 = vld [vmem:[#allocation5 + $0x440] sm:$0xff] }
 0xa25   :  { %v5843_v49 = vrot.slane %v9191_v45, %v11290_v22  ;;  %v4502_v45 = vld [vmem:[#allocation5 + $0x5f8] sm:$0xff] }
 0xa27   :  { %6176 = vmatpush1.bf16.msra.mxu0 %v4423_v50  ;;  %6832 = vmatpush1.bf16.msra.mxu1 %v4425_v51  ;;  %v9193_v50 = vpack.c.bf16 %v5535_v47, %v5533_v46  ;;  %v4449_v51 = vld [vmem:[#allocation5 + $0x450] sm:$0xff]  ;;  %9192 = vst.sshfl [vmem:[#allocation4 + $0x1c] sm:$0x5 pattern:$0x73625140] %v5843_v49  ;;  %v4499_v46 = vld [vmem:[#allocation5 + $0x5e0] sm:$0xff] }
 0xa28   :  { %6177 = vmatprep.subr.bf16.mxu0 %v4428_v53  ;;  %6833 = vmatprep.subr.bf16.mxu1 %v4430_v54  ;;  %v4454_v53 = vld [vmem:[#allocation5 + $0x478] sm:$0xff]  ;;  %v4501_v47 = vld [vmem:[#allocation5 + $0x5f0] sm:$0xff] }
 0xa29   :  { %v5864_v54 = vrot.slane %v9193_v50, %v11290_v22  ;;  %v4506_v49 = vld [vmem:[#allocation5 + $0x618] sm:$0xff]  ;;  %v11334_v50 = vrot.slane %v11316_v36, %v11290_v22  ;;  %v4509_v36 = vld [vmem:[#allocation5 + $0x630] sm:$0xff] }
 0xa2b   :  { %6178 = vmatpush1.bf16.msra.mxu0 %v4427_v61  ;;  %6834 = vmatpush1.bf16.msra.mxu1 %v4429_v62  ;;  %9194 = vst.sshfl [vmem:[#allocation4 + $0x1e] sm:$0x5 pattern:$0x73625140] %v5864_v54  ;;  %v4460_v61 = vld [vmem:[#allocation5 + $0x4a8] sm:$0xff]  ;;  %v4462_v62 = vld [vmem:[#allocation5 + $0x4b8] sm:$0xff] }
 0xa2c   :  { %6179 = vmatprep.subr.bf16.mxu0 %v4432_v0  ;;  %6835 = vmatprep.subr.bf16.mxu1 %v4434_v1  ;;  %v4461_v0 = vld [vmem:[#allocation5 + $0x4b0] sm:$0xff]  ;;  %v4464_v1 = vld [vmem:[#allocation5 + $0x4c8] sm:$0xff] }
 0xa2d   :  { %v4508_v54 = vld [vmem:[#allocation5 + $0x628] sm:$0xff] }
 0xa2f   :  { %6180 = vmatpush1.bf16.msra.mxu0 %v4431_v13  ;;  %6836 = vmatpush1.bf16.msra.mxu1 %v4433_v15  ;;  %v4472_v13 = vld [vmem:[#allocation5 + $0x508] sm:$0xff]  ;;  %v4474_v15 = vld [vmem:[#allocation5 + $0x518] sm:$0xff] }
 0xa30   :  { %6181 = vmatprep.subr.bf16.mxu0 %v4436_v16  ;;  %6837 = vmatprep.subr.bf16.mxu1 %v4438_v17  ;;  %v4471_v16 = vld [vmem:[#allocation5 + $0x500] sm:$0xff]  ;;  %v4473_v17 = vld [vmem:[#allocation5 + $0x510] sm:$0xff] }
 0xa33   :  { %6182 = vmatpush1.bf16.msra.mxu0 %v4435_v19  ;;  %6838 = vmatpush1.bf16.msra.mxu1 %v4437_v20  ;;  %v4478_v19 = vld [vmem:[#allocation5 + $0x538] sm:$0xff]  ;;  %v4475_v20 = vld [vmem:[#allocation5 + $0x520] sm:$0xff] }
 0xa34   :  { %6192 = vmatprep.subr.bf16.mxu0 %v4440_v21  ;;  %6848 = vmatprep.subr.bf16.mxu1 %v4442_v24  ;;  %v4477_v21 = vld [vmem:[#allocation5 + $0x530] sm:$0xff]  ;;  %v4480_v24 = vld [vmem:[#allocation5 + $0x548] sm:$0xff] }
 0xa36   :  { %6184 = vmatmul.mubr.bf16.vlgmr.msra.gmra.mrb[48].mxu0 %v5927_v27  ;;  %6840 = vmatmul.mubr.bf16.vlgmr.msra.gmra.mrb[116].mxu1 %v5927_v27  ;;  %v4481_v27 = vld [vmem:[#allocation5 + $0x550] sm:$0xff] }
 0xa37   :  { %6193 = vmatpush1.bf16.msra.mxu0 %v4439_v8  ;;  %6224 = vmatprep.mubr.bf16.mxu0 %v11324_v29  ;;  %v4484_v8 = vld [vmem:[#allocation5 + $0x568] sm:$0xff] }
 0xa38   :  { %6849 = vmatpush1.bf16.msra.mxu1 %v4441_v30  ;;  %6880 = vmatprep.mubr.bf16.mxu1 %v11324_v29  ;;  %v4483_v30 = vld [vmem:[#allocation5 + $0x560] sm:$0xff] }
 0xa39   :  { %6194 = vmatprep.subr.bf16.mxu0 %v4444_v33  ;;  %6850 = vmatprep.subr.bf16.mxu1 %v4446_v34  ;;  %v4490_v33 = vld [vmem:[#allocation5 + $0x598] sm:$0xff]  ;;  %v4487_v34 = vld [vmem:[#allocation5 + $0x580] sm:$0xff] }
 0xa3b   :  { %6195 = vmatpush1.bf16.msra.mxu0 %v4443_v37  ;;  %v4493_v37 = vld [vmem:[#allocation5 + $0x5b0] sm:$0xff] }
 0xa3c   :  { %6851 = vmatpush1.bf16.msra.mxu1 %v4445_v38  ;;  %6196 = vmatprep.subr.bf16.mxu0 %v4448_v41  ;;  %v4496_v38 = vld [vmem:[#allocation5 + $0x5c8] sm:$0xff]  ;;  %v4498_v41 = vld [vmem:[#allocation5 + $0x5d8] sm:$0xff] }
 0xa3d   :  { %6852 = vmatprep.subr.bf16.mxu1 %v4450_v44  ;;  %v4500_v44 = vld [vmem:[#allocation5 + $0x5e8] sm:$0xff] }
 0xa3f   :  { %6197 = vmatpush1.bf16.msra.mxu0 %v4447_v48  ;;  %v4504_v48 = vld [vmem:[#allocation5 + $0x608] sm:$0xff] }
 0xa40   :  { %6853 = vmatpush1.bf16.msra.mxu1 %v4449_v51  ;;  %6198 = vmatprep.subr.bf16.mxu0 %v4452_v52  ;;  %v4503_v51 = vld [vmem:[#allocation5 + $0x600] sm:$0xff]  ;;  %v4505_v52 = vld [vmem:[#allocation5 + $0x610] sm:$0xff] }
 0xa41   :  { %6854 = vmatprep.subr.bf16.mxu1 %v4454_v53  ;;  %v5930_v53 = vcombine.high %v11324_v29, %v11324_v29  ;;  %v4513_v29 = vld [vmem:[#allocation5 + $0x650] sm:$0xff] }
 0xa43   :  { %6199 = vmatpush1.bf16.msra.mxu0 %v4451_v55  ;;  %v4510_v55 = vld [vmem:[#allocation5 + $0x638] sm:$0xff] }
 0xa44   :  { %6855 = vmatpush1.bf16.msra.mxu1 %v4453_v56  ;;  %6200 = vmatprep.subr.bf16.mxu0 %v4456_v57  ;;  %v4507_v56 = vld [vmem:[#allocation5 + $0x620] sm:$0xff]  ;;  %v4512_v57 = vld [vmem:[#allocation5 + $0x648] sm:$0xff] }
 0xa45   :  { %6856 = vmatprep.subr.bf16.mxu1 %v4458_v58  ;;  %v4514_v58 = vld [vmem:[#allocation5 + $0x658] sm:$0xff] }
 0xa47   :  { %6201 = vmatpush1.bf16.msra.mxu0 %v4455_v59  ;;  %v4511_v59 = vld [vmem:[#allocation5 + $0x640] sm:$0xff] }
 0xa48   :  { %6857 = vmatpush1.bf16.msra.mxu1 %v4457_v5  ;;  %6202 = vmatprep.subr.bf16.mxu0 %v4460_v61  ;;  %v4516_v5 = vld [vmem:[#allocation5 + $0x668] sm:$0xff]  ;;  %v4518_v61 = vld [vmem:[#allocation5 + $0x678] sm:$0xff] }
 0xa49   :  { %6858 = vmatprep.subr.bf16.mxu1 %v4462_v62  ;;  %v4515_v62 = vld [vmem:[#allocation5 + $0x660] sm:$0xff] }
 0xa4b   :  { %6203 = vmatpush1.bf16.msra.mxu0 %v4459_v63  ;;  %v4517_v63 = vld [vmem:[#allocation5 + $0x670] sm:$0xff] }
 0xa4c   :  { %6859 = vmatpush1.bf16.msra.mxu1 %v4461_v0  ;;  %6204 = vmatprep.subr.bf16.mxu0 %v4464_v1  ;;  %v4520_v0 = vld [vmem:[#allocation5 + $0x688] sm:$0xff]  ;;  %v4522_v1 = vld [vmem:[#allocation5 + $0x698] sm:$0xff] }
 0xa4d   :  { %6860 = vmatprep.subr.bf16.mxu1 %v4466_v2  ;;  %v4519_v2 = vld [vmem:[#allocation5 + $0x680] sm:$0xff] }
 0xa4f   :  { %6205 = vmatpush1.bf16.msra.mxu0 %v4463_v3  ;;  %v4521_v3 = vld [vmem:[#allocation5 + $0x690] sm:$0xff] }
 0xa50   :  { %6861 = vmatpush1.bf16.msra.mxu1 %v4465_v11  ;;  %6206 = vmatprep.subr.bf16.mxu0 %v4468_v4  ;;  %v4524_v11 = vld [vmem:[#allocation5 + $0x6a8] sm:$0xff]  ;;  %v4526_v4 = vld [vmem:[#allocation5 + $0x6b8] sm:$0xff] }
 0xa51   :  { %6862 = vmatprep.subr.bf16.mxu1 %v4470_v6  ;;  %v4523_v6 = vld [vmem:[#allocation5 + $0x6a0] sm:$0xff] }
 0xa53   :  { %6207 = vmatpush1.bf16.msra.mxu0 %v4467_v9  ;;  %v4525_v9 = vld [vmem:[#allocation5 + $0x6b0] sm:$0xff] }
 0xa54   :  { %6863 = vmatpush1.bf16.msra.mxu1 %v4469_v10  ;;  %6208 = vmatprep.subr.bf16.mxu0 %v4472_v13  ;;  %v4528_v10 = vld [vmem:[#allocation5 + $0x6c8] sm:$0xff]  ;;  %v4530_v13 = vld [vmem:[#allocation5 + $0x6d8] sm:$0xff] }
 0xa55   :  { %6864 = vmatprep.subr.bf16.mxu1 %v4474_v15  ;;  %v4527_v15 = vld [vmem:[#allocation5 + $0x6c0] sm:$0xff] }
 0xa57   :  { %6209 = vmatpush1.bf16.msra.mxu0 %v4471_v16  ;;  %v4529_v16 = vld [vmem:[#allocation5 + $0x6d0] sm:$0xff] }
 0xa58   :  { %6865 = vmatpush1.bf16.msra.mxu1 %v4473_v17  ;;  %6210 = vmatprep.subr.bf16.mxu0 %v4476_v18  ;;  %v4532_v17 = vld [vmem:[#allocation5 + $0x6e8] sm:$0xff]  ;;  %v4534_v18 = vld [vmem:[#allocation5 + $0x6f8] sm:$0xff] }
 0xa59   :  { %6866 = vmatprep.subr.bf16.mxu1 %v4478_v19  ;;  %v4531_v19 = vld [vmem:[#allocation5 + $0x6e0] sm:$0xff] }
 0xa5b   :  { %6211 = vmatpush1.bf16.msra.mxu0 %v4475_v20  ;;  %v4533_v20 = vld [vmem:[#allocation5 + $0x6f0] sm:$0xff] }
 0xa5c   :  { %6867 = vmatpush1.bf16.msra.mxu1 %v4477_v21  ;;  %6212 = vmatprep.subr.bf16.mxu0 %v4480_v24  ;;  %v4536_v21 = vld [vmem:[#allocation5 + $0x708] sm:$0xff]  ;;  %v4538_v24 = vld [vmem:[#allocation5 + $0x718] sm:$0xff] }
 0xa5d   :  { %6868 = vmatprep.subr.bf16.mxu1 %v4482_v26  ;;  %v4535_v26 = vld [vmem:[#allocation5 + $0x700] sm:$0xff] }
 0xa5f   :  { %6213 = vmatpush1.bf16.msra.mxu0 %v4479_v7  ;;  %v4537_v7 = vld [vmem:[#allocation5 + $0x710] sm:$0xff] }
 0xa60   :  { %6869 = vmatpush1.bf16.msra.mxu1 %v4481_v27  ;;  %6214 = vmatprep.subr.bf16.mxu0 %v4484_v8  ;;  %v4540_v27 = vld [vmem:[#allocation5 + $0x728] sm:$0xff]  ;;  %v4542_v8 = vld [vmem:[#allocation5 + $0x738] sm:$0xff] }
 0xa61   :  { %6870 = vmatprep.subr.bf16.mxu1 %v4486_v28  ;;  %v4539_v28 = vld [vmem:[#allocation5 + $0x720] sm:$0xff] }
 0xa63   :  { %6215 = vmatpush1.bf16.msra.mxu0 %v4483_v30  ;;  %v4541_v30 = vld [vmem:[#allocation5 + $0x730] sm:$0xff] }
 0xa64   :  { %6871 = vmatpush1.bf16.msra.mxu1 %v4485_v31  ;;  %6216 = vmatprep.subr.bf16.mxu0 %v4488_v32  ;;  %v4544_v31 = vld [vmem:[#allocation5 + $0x748] sm:$0xff]  ;;  %v4546_v32 = vld [vmem:[#allocation5 + $0x758] sm:$0xff] }
 0xa65   :  { %6872 = vmatprep.subr.bf16.mxu1 %v4490_v33  ;;  %v4543_v33 = vld [vmem:[#allocation5 + $0x740] sm:$0xff] }
 0xa67   :  { %6217 = vmatpush1.bf16.msra.mxu0 %v4487_v34  ;;  %v4545_v34 = vld [vmem:[#allocation5 + $0x750] sm:$0xff] }
 0xa68   :  { %6873 = vmatpush1.bf16.msra.mxu1 %v4489_v35  ;;  %6218 = vmatprep.subr.bf16.mxu0 %v4492_v39  ;;  %v4548_v35 = vld [vmem:[#allocation5 + $0x768] sm:$0xff]  ;;  %v4550_v39 = vld [vmem:[#allocation5 + $0x778] sm:$0xff] }
 0xa69   :  { %6874 = vmatprep.subr.bf16.mxu1 %v4494_v12  ;;  %v4547_v12 = vld [vmem:[#allocation5 + $0x760] sm:$0xff] }
 0xa6b   :  { %6219 = vmatpush1.bf16.msra.mxu0 %v4491_v14  ;;  %v4549_v14 = vld [vmem:[#allocation5 + $0x770] sm:$0xff] }
 0xa6c   :  { %6875 = vmatpush1.bf16.msra.mxu1 %v4493_v37  ;;  %6220 = vmatprep.subr.bf16.mxu0 %v4496_v38  ;;  %v4552_v37 = vld [vmem:[#allocation5 + $0x788] sm:$0xff]  ;;  %v4554_v38 = vld [vmem:[#allocation5 + $0x798] sm:$0xff] }
 0xa6d   :  { %6876 = vmatprep.subr.bf16.mxu1 %v4498_v41  ;;  %v4551_v41 = vld [vmem:[#allocation5 + $0x780] sm:$0xff] }
 0xa6f   :  { %6221 = vmatpush1.bf16.msra.mxu0 %v4495_v42  ;;  %v4553_v42 = vld [vmem:[#allocation5 + $0x790] sm:$0xff] }
 0xa70   :  { %6877 = vmatpush1.bf16.msra.mxu1 %v4497_v43  ;;  %6222 = vmatprep.subr.bf16.mxu0 %v4500_v44  ;;  %v4556_v43 = vld [vmem:[#allocation5 + $0x7a8] sm:$0xff]  ;;  %v4558_v44 = vld [vmem:[#allocation5 + $0x7b8] sm:$0xff] }
 0xa71   :  { %6878 = vmatprep.subr.bf16.mxu1 %v4502_v45  ;;  %v4555_v45 = vld [vmem:[#allocation5 + $0x7a0] sm:$0xff] }
 0xa73   :  { %6223 = vmatpush1.bf16.msra.mxu0 %v4499_v46  ;;  %v4557_v46 = vld [vmem:[#allocation5 + $0x7b0] sm:$0xff] }
 0xa74   :  { %6879 = vmatpush1.bf16.msra.mxu1 %v4501_v47  ;;  %6233 = vmatprep.subr.bf16.mxu0 %v4504_v48  ;;  %v4560_v47 = vld [vmem:[#allocation5 + $0x7c8] sm:$0xff]  ;;  %v4562_v48 = vld [vmem:[#allocation5 + $0x7d8] sm:$0xff] }
 0xa75   :  { %6889 = vmatprep.subr.bf16.mxu1 %v4506_v49  ;;  %v11340_v49 = vld [vmem:[#allocation4 + $0x8] sm:$0xff] }
 0xa76   :  { %6225 = vmatmul.mubr.bf16.vlgmr.msra.gmra.mrb[48].mxu0 %v11334_v50 }
 0xa77   :  { %6881 = vmatmul.mubr.bf16.vlgmr.msra.gmra.mrb[116].mxu1 %v11334_v50  ;;  %6234 = vmatpush1.bf16.msra.mxu0 %v4503_v51  ;;  %v4559_v51 = vld [vmem:[#allocation5 + $0x7c0] sm:$0xff] }
 0xa78   :  { %6265 = vmatprep.mubr.bf16.mxu0 %v5930_v53  ;;  %6890 = vmatpush1.bf16.msra.mxu1 %v4505_v52  ;;  %v4561_v52 = vld [vmem:[#allocation5 + $0x7d0] sm:$0xff] }
 0xa79   :  { %6921 = vmatprep.mubr.bf16.mxu1 %v5930_v53  ;;  %6235 = vmatprep.subr.bf16.mxu0 %v4508_v54  ;;  %v4564_v53 = vld [vmem:[#allocation5 + $0x7e8] sm:$0xff]  ;;  %v4566_v54 = vld [vmem:[#allocation5 + $0x7f8] sm:$0xff] }
 0xa7a   :  { %6891 = vmatprep.subr.bf16.mxu1 %v4510_v55  ;;  %v11344_v55 = vrot.slane %v11340_v49, %v11290_v22 }
 0xa7b   :  { %6236 = vmatpush1.bf16.msra.mxu0 %v4507_v56  ;;  %v4563_v56 = vld [vmem:[#allocation5 + $0x7e0] sm:$0xff] }
 0xa7c   :  { %6892 = vmatpush1.bf16.msra.mxu1 %v4509_v36  ;;  %6237 = vmatprep.subr.bf16.mxu0 %v4512_v57  ;;  %v4565_v36 = vld [vmem:[#allocation5 + $0x7f0] sm:$0xff]  ;;  %v4568_v57 = vld [vmem:[#allocation5 + $0x808] sm:$0xff] }
 0xa7d   :  { %6893 = vmatprep.subr.bf16.mxu1 %v4514_v58  ;;  %v4570_v58 = vld [vmem:[#allocation5 + $0x818] sm:$0xff] }
 0xa7f   :  { %6238 = vmatpush1.bf16.msra.mxu0 %v4511_v59  ;;  %v5946_v59 = vcombine.high %v11344_v55, %v11344_v55 }
 0xa80   :  { %6894 = vmatpush1.bf16.msra.mxu1 %v4513_v29  ;;  %6239 = vmatprep.subr.bf16.mxu0 %v4516_v5  ;;  %v5928_v29 = vcombine.high %v11334_v50, %v11334_v50  ;;  %v4567_v5 = vld [vmem:[#allocation5 + $0x800] sm:$0xff]  ;;  %v4573_v50 = vld [vmem:[#allocation5 + $0x830] sm:$0xff] }
 0xa81   :  { %6895 = vmatprep.subr.bf16.mxu1 %v4518_v61  ;;  %v4569_v61 = vld [vmem:[#allocation5 + $0x810] sm:$0xff] }
 0xa83   :  { %6240 = vmatpush1.bf16.msra.mxu0 %v4515_v62  ;;  %v11351_v62 = vrot.slane %v5946_v59, %v11290_v22  ;;  %v4624_v59 = vld [vmem:[#allocation5 + $0x9c8] sm:$0xff] }
 0xa84   :  { %6896 = vmatpush1.bf16.msra.mxu1 %v4517_v63  ;;  %6241 = vmatprep.subr.bf16.mxu0 %v4520_v0  ;;  %v4572_v63 = vld [vmem:[#allocation5 + $0x828] sm:$0xff]  ;;  %v4574_v0 = vld [vmem:[#allocation5 + $0x838] sm:$0xff] }
 0xa85   :  { %6897 = vmatprep.subr.bf16.mxu1 %v4522_v1  ;;  %v4571_v1 = vld [vmem:[#allocation5 + $0x820] sm:$0xff] }
 0xa87   :  { %6242 = vmatpush1.bf16.msra.mxu0 %v4519_v2  ;;  %v4576_v2 = vld [vmem:[#allocation5 + $0x848] sm:$0xff] }
 0xa88   :  { %6898 = vmatpush1.bf16.msra.mxu1 %v4521_v3  ;;  %6243 = vmatprep.subr.bf16.mxu0 %v4524_v11  ;;  %v4578_v3 = vld [vmem:[#allocation5 + $0x858] sm:$0xff]  ;;  %v4575_v11 = vld [vmem:[#allocation5 + $0x840] sm:$0xff] }
 0xa89   :  { %6899 = vmatprep.subr.bf16.mxu1 %v4526_v4  ;;  %v4577_v4 = vld [vmem:[#allocation5 + $0x850] sm:$0xff] }
 0xa8b   :  { %6244 = vmatpush1.bf16.msra.mxu0 %v4523_v6  ;;  %v4580_v6 = vld [vmem:[#allocation5 + $0x868] sm:$0xff] }
 0xa8c   :  { %6900 = vmatpush1.bf16.msra.mxu1 %v4525_v9  ;;  %6245 = vmatprep.subr.bf16.mxu0 %v4528_v10  ;;  %v4582_v9 = vld [vmem:[#allocation5 + $0x878] sm:$0xff]  ;;  %v4579_v10 = vld [vmem:[#allocation5 + $0x860] sm:$0xff] }
 0xa8d   :  { %6901 = vmatprep.subr.bf16.mxu1 %v4530_v13  ;;  %v4581_v13 = vld [vmem:[#allocation5 + $0x870] sm:$0xff] }
 0xa8f   :  { %6246 = vmatpush1.bf16.msra.mxu0 %v4527_v15  ;;  %v4584_v15 = vld [vmem:[#allocation5 + $0x888] sm:$0xff] }
 0xa90   :  { %6902 = vmatpush1.bf16.msra.mxu1 %v4529_v16  ;;  %6247 = vmatprep.subr.bf16.mxu0 %v4532_v17  ;;  %v4586_v16 = vld [vmem:[#allocation5 + $0x898] sm:$0xff]  ;;  %v4583_v17 = vld [vmem:[#allocation5 + $0x880] sm:$0xff] }
 0xa91   :  { %6903 = vmatprep.subr.bf16.mxu1 %v4534_v18  ;;  %v4585_v18 = vld [vmem:[#allocation5 + $0x890] sm:$0xff] }
 0xa93   :  { %6248 = vmatpush1.bf16.msra.mxu0 %v4531_v19  ;;  %v4588_v19 = vld [vmem:[#allocation5 + $0x8a8] sm:$0xff] }
 0xa94   :  { %6904 = vmatpush1.bf16.msra.mxu1 %v4533_v20  ;;  %6249 = vmatprep.subr.bf16.mxu0 %v4536_v21  ;;  %v4590_v20 = vld [vmem:[#allocation5 + $0x8b8] sm:$0xff]  ;;  %v4587_v21 = vld [vmem:[#allocation5 + $0x8a0] sm:$0xff] }
 0xa95   :  { %6905 = vmatprep.subr.bf16.mxu1 %v4538_v24  ;;  %v4589_v24 = vld [vmem:[#allocation5 + $0x8b0] sm:$0xff] }
 0xa97   :  { %6250 = vmatpush1.bf16.msra.mxu0 %v4535_v26  ;;  %v4592_v26 = vld [vmem:[#allocation5 + $0x8c8] sm:$0xff] }
 0xa98   :  { %6906 = vmatpush1.bf16.msra.mxu1 %v4537_v7  ;;  %6251 = vmatprep.subr.bf16.mxu0 %v4540_v27  ;;  %v4594_v7 = vld [vmem:[#allocation5 + $0x8d8] sm:$0xff]  ;;  %v4591_v27 = vld [vmem:[#allocation5 + $0x8c0] sm:$0xff] }
 0xa99   :  { %6907 = vmatprep.subr.bf16.mxu1 %v4542_v8  ;;  %v4593_v8 = vld [vmem:[#allocation5 + $0x8d0] sm:$0xff] }
 0xa9b   :  { %6252 = vmatpush1.bf16.msra.mxu0 %v4539_v28  ;;  %v4596_v28 = vld [vmem:[#allocation5 + $0x8e8] sm:$0xff] }
 0xa9c   :  { %6908 = vmatpush1.bf16.msra.mxu1 %v4541_v30  ;;  %6253 = vmatprep.subr.bf16.mxu0 %v4544_v31  ;;  %v4598_v30 = vld [vmem:[#allocation5 + $0x8f8] sm:$0xff]  ;;  %v4595_v31 = vld [vmem:[#allocation5 + $0x8e0] sm:$0xff] }
 0xa9d   :  { %6909 = vmatprep.subr.bf16.mxu1 %v4546_v32  ;;  %v4597_v32 = vld [vmem:[#allocation5 + $0x8f0] sm:$0xff] }
 0xa9f   :  { %6254 = vmatpush1.bf16.msra.mxu0 %v4543_v33  ;;  %v4600_v33 = vld [vmem:[#allocation5 + $0x908] sm:$0xff] }
 0xaa0   :  { %6910 = vmatpush1.bf16.msra.mxu1 %v4545_v34  ;;  %6255 = vmatprep.subr.bf16.mxu0 %v4548_v35  ;;  %v4602_v34 = vld [vmem:[#allocation5 + $0x918] sm:$0xff]  ;;  %v4599_v35 = vld [vmem:[#allocation5 + $0x900] sm:$0xff] }
 0xaa1   :  { %6911 = vmatprep.subr.bf16.mxu1 %v4550_v39  ;;  %v4601_v39 = vld [vmem:[#allocation5 + $0x910] sm:$0xff] }
 0xaa3   :  { %6256 = vmatpush1.bf16.msra.mxu0 %v4547_v12  ;;  %v4604_v12 = vld [vmem:[#allocation5 + $0x928] sm:$0xff] }
 0xaa4   :  { %6912 = vmatpush1.bf16.msra.mxu1 %v4549_v14  ;;  %6257 = vmatprep.subr.bf16.mxu0 %v4552_v37  ;;  %v4606_v14 = vld [vmem:[#allocation5 + $0x938] sm:$0xff]  ;;  %v4603_v37 = vld [vmem:[#allocation5 + $0x920] sm:$0xff] }
 0xaa5   :  { %6913 = vmatprep.subr.bf16.mxu1 %v4554_v38  ;;  %v4605_v38 = vld [vmem:[#allocation5 + $0x930] sm:$0xff] }
 0xaa7   :  { %6258 = vmatpush1.bf16.msra.mxu0 %v4551_v41  ;;  %v4608_v41 = vld [vmem:[#allocation5 + $0x948] sm:$0xff] }
 0xaa8   :  { %6914 = vmatpush1.bf16.msra.mxu1 %v4553_v42  ;;  %6259 = vmatprep.subr.bf16.mxu0 %v4556_v43  ;;  %v4610_v42 = vld [vmem:[#allocation5 + $0x958] sm:$0xff]  ;;  %v4607_v43 = vld [vmem:[#allocation5 + $0x940] sm:$0xff] }
 0xaa9   :  { %6915 = vmatprep.subr.bf16.mxu1 %v4558_v44  ;;  %v4609_v44 = vld [vmem:[#allocation5 + $0x950] sm:$0xff] }
 0xaab   :  { %6260 = vmatpush1.bf16.msra.mxu0 %v4555_v45  ;;  %v4612_v45 = vld [vmem:[#allocation5 + $0x968] sm:$0xff] }
 0xaac   :  { %6916 = vmatpush1.bf16.msra.mxu1 %v4557_v46  ;;  %6261 = vmatprep.subr.bf16.mxu0 %v4560_v47  ;;  %v4614_v46 = vld [vmem:[#allocation5 + $0x978] sm:$0xff]  ;;  %v4611_v47 = vld [vmem:[#allocation5 + $0x960] sm:$0xff] }
 0xaad   :  { %6917 = vmatprep.subr.bf16.mxu1 %v4562_v48  ;;  %v4613_v48 = vld [vmem:[#allocation5 + $0x970] sm:$0xff] }
 0xaaf   :  { %6262 = vmatpush1.bf16.msra.mxu0 %v4559_v51  ;;  %v4616_v51 = vld [vmem:[#allocation5 + $0x988] sm:$0xff] }
 0xab0   :  { %6918 = vmatpush1.bf16.msra.mxu1 %v4561_v52  ;;  %6263 = vmatprep.subr.bf16.mxu0 %v4564_v53  ;;  %v4618_v52 = vld [vmem:[#allocation5 + $0x998] sm:$0xff]  ;;  %v4615_v53 = vld [vmem:[#allocation5 + $0x980] sm:$0xff] }
 0xab1   :  { %6919 = vmatprep.subr.bf16.mxu1 %v4566_v54  ;;  %v4617_v54 = vld [vmem:[#allocation5 + $0x990] sm:$0xff] }
 0xab3   :  { %6264 = vmatpush1.bf16.msra.mxu0 %v4563_v56  ;;  %v4620_v56 = vld [vmem:[#allocation5 + $0x9a8] sm:$0xff] }
 0xab4   :  { %6920 = vmatpush1.bf16.msra.mxu1 %v4565_v36  ;;  %6274 = vmatprep.subr.bf16.mxu0 %v4568_v57  ;;  %v4622_v36 = vld [vmem:[#allocation5 + $0x9b8] sm:$0xff]  ;;  %v4619_v57 = vld [vmem:[#allocation5 + $0x9a0] sm:$0xff] }
 0xab5   :  { %6930 = vmatprep.subr.bf16.mxu1 %v4570_v58  ;;  %v4621_v58 = vld [vmem:[#allocation5 + $0x9b0] sm:$0xff] }
 0xab6   :  { %6266 = vmatmul.mubr.bf16.vlgmr.msra.gmra.mrb[48].mxu0 %v5928_v29 }
 0xab7   :  { %6922 = vmatmul.mubr.bf16.vlgmr.msra.gmra.mrb[116].mxu1 %v5928_v29  ;;  %6275 = vmatpush1.bf16.msra.mxu0 %v4567_v5  ;;  %v4626_v29 = vld [vmem:[#allocation5 + $0x9d8] sm:$0xff]  ;;  %v4623_v5 = vld [vmem:[#allocation5 + $0x9c0] sm:$0xff] }
 0xab8   :  { %6306 = vmatprep.mubr.bf16.mxu0 %v11351_v62  ;;  %6931 = vmatpush1.bf16.msra.mxu1 %v4569_v61  ;;  %v4625_v61 = vld [vmem:[#allocation5 + $0x9d0] sm:$0xff] }
 0xab9   :  { %6962 = vmatprep.mubr.bf16.mxu1 %v11351_v62  ;;  %6276 = vmatprep.subr.bf16.mxu0 %v4572_v63  ;;  %v4628_v63 = vld [vmem:[#allocation5 + $0x9e8] sm:$0xff] }
 0xaba   :  { %6932 = vmatprep.subr.bf16.mxu1 %v4574_v0  ;;  %v4630_v0 = vld [vmem:[#allocation5 + $0x9f8] sm:$0xff] }
 0xabb   :  { %6277 = vmatpush1.bf16.msra.mxu0 %v4571_v1  ;;  %v4627_v1 = vld [vmem:[#allocation5 + $0x9e0] sm:$0xff] }
 0xabc   :  { %6933 = vmatpush1.bf16.msra.mxu1 %v4573_v50  ;;  %6278 = vmatprep.subr.bf16.mxu0 %v4576_v2  ;;  %v4629_v50 = vld [vmem:[#allocation5 + $0x9f0] sm:$0xff]  ;;  %v4632_v2 = vld [vmem:[#allocation5 + $0xa08] sm:$0xff] }
 0xabd   :  { %6934 = vmatprep.subr.bf16.mxu1 %v4578_v3  ;;  %v4634_v3 = vld [vmem:[#allocation5 + $0xa18] sm:$0xff] }
 0xabf   :  { %6279 = vmatpush1.bf16.msra.mxu0 %v4575_v11  ;;  %v11357_v11 = vrot.slane %v11344_v55, %v11290_v22  ;;  %v4637_v55 = vld [vmem:[#allocation5 + $0xa30] sm:$0xff] }
 0xac0   :  { %6935 = vmatpush1.bf16.msra.mxu1 %v4577_v4  ;;  %6280 = vmatprep.subr.bf16.mxu0 %v4580_v6  ;;  %v4631_v4 = vld [vmem:[#allocation5 + $0xa00] sm:$0xff]  ;;  %v4633_v6 = vld [vmem:[#allocation5 + $0xa10] sm:$0xff] }
 0xac1   :  { %6936 = vmatprep.subr.bf16.mxu1 %v4582_v9  ;;  %v5978_v9 = vcombine.high %v11351_v62, %v11351_v62  ;;  %v4641_v62 = vld [vmem:[#allocation5 + $0xa50] sm:$0xff] }
 0xac3   :  { %6281 = vmatpush1.bf16.msra.mxu0 %v4579_v10  ;;  %v4636_v10 = vld [vmem:[#allocation5 + $0xa28] sm:$0xff] }
 0xac4   :  { %6937 = vmatpush1.bf16.msra.mxu1 %v4581_v13  ;;  %6282 = vmatprep.subr.bf16.mxu0 %v4584_v15  ;;  %v4638_v13 = vld [vmem:[#allocation5 + $0xa38] sm:$0xff]  ;;  %v4635_v15 = vld [vmem:[#allocation5 + $0xa20] sm:$0xff] }
 0xac5   :  { %6938 = vmatprep.subr.bf16.mxu1 %v4586_v16  ;;  %v4640_v16 = vld [vmem:[#allocation5 + $0xa48] sm:$0xff] }
 0xac7   :  { %6283 = vmatpush1.bf16.msra.mxu0 %v4583_v17  ;;  %v4642_v17 = vld [vmem:[#allocation5 + $0xa58] sm:$0xff] }
 0xac8   :  { %6939 = vmatpush1.bf16.msra.mxu1 %v4585_v18  ;;  %6284 = vmatprep.subr.bf16.mxu0 %v4588_v19  ;;  %v4639_v18 = vld [vmem:[#allocation5 + $0xa40] sm:$0xff]  ;;  %v4644_v19 = vld [vmem:[#allocation5 + $0xa68] sm:$0xff] }
 0xac9   :  { %6940 = vmatprep.subr.bf16.mxu1 %v4590_v20  ;;  %v4646_v20 = vld [vmem:[#allocation5 + $0xa78] sm:$0xff] }
 0xacb   :  { %6285 = vmatpush1.bf16.msra.mxu0 %v4587_v21  ;;  %v4643_v21 = vld [vmem:[#allocation5 + $0xa60] sm:$0xff] }
 0xacc   :  { %6941 = vmatpush1.bf16.msra.mxu1 %v4589_v24  ;;  %6286 = vmatprep.subr.bf16.mxu0 %v4592_v26  ;;  %v4645_v24 = vld [vmem:[#allocation5 + $0xa70] sm:$0xff]  ;;  %v4648_v26 = vld [vmem:[#allocation5 + $0xa88] sm:$0xff] }
 0xacd   :  { %6942 = vmatprep.subr.bf16.mxu1 %v4594_v7  ;;  %v4650_v7 = vld [vmem:[#allocation5 + $0xa98] sm:$0xff] }
 0xacf   :  { %6287 = vmatpush1.bf16.msra.mxu0 %v4591_v27  ;;  %v4647_v27 = vld [vmem:[#allocation5 + $0xa80] sm:$0xff] }
 0xad0   :  { %6943 = vmatpush1.bf16.msra.mxu1 %v4593_v8  ;;  %6288 = vmatprep.subr.bf16.mxu0 %v4596_v28  ;;  %v4649_v8 = vld [vmem:[#allocation5 + $0xa90] sm:$0xff]  ;;  %v4652_v28 = vld [vmem:[#allocation5 + $0xaa8] sm:$0xff] }
 0xad1   :  { %6944 = vmatprep.subr.bf16.mxu1 %v4598_v30  ;;  %v4654_v30 = vld [vmem:[#allocation5 + $0xab8] sm:$0xff] }
 0xad3   :  { %6289 = vmatpush1.bf16.msra.mxu0 %v4595_v31  ;;  %v4651_v31 = vld [vmem:[#allocation5 + $0xaa0] sm:$0xff] }
 0xad4   :  { %6945 = vmatpush1.bf16.msra.mxu1 %v4597_v32  ;;  %6290 = vmatprep.subr.bf16.mxu0 %v4600_v33  ;;  %v4653_v32 = vld [vmem:[#allocation5 + $0xab0] sm:$0xff]  ;;  %v4656_v33 = vld [vmem:[#allocation5 + $0xac8] sm:$0xff] }
 0xad5   :  { %6946 = vmatprep.subr.bf16.mxu1 %v4602_v34  ;;  %v4658_v34 = vld [vmem:[#allocation5 + $0xad8] sm:$0xff] }
 0xad7   :  { %6291 = vmatpush1.bf16.msra.mxu0 %v4599_v35  ;;  %v4655_v35 = vld [vmem:[#allocation5 + $0xac0] sm:$0xff] }
 0xad8   :  { %6947 = vmatpush1.bf16.msra.mxu1 %v4601_v39  ;;  %6292 = vmatprep.subr.bf16.mxu0 %v4604_v12  ;;  %v4657_v39 = vld [vmem:[#allocation5 + $0xad0] sm:$0xff]  ;;  %v4660_v12 = vld [vmem:[#allocation5 + $0xae8] sm:$0xff] }
 0xad9   :  { %6948 = vmatprep.subr.bf16.mxu1 %v4606_v14  ;;  %v4662_v14 = vld [vmem:[#allocation5 + $0xaf8] sm:$0xff] }
 0xadb   :  { %6293 = vmatpush1.bf16.msra.mxu0 %v4603_v37  ;;  %v4659_v37 = vld [vmem:[#allocation5 + $0xae0] sm:$0xff] }
 0xadc   :  { %6949 = vmatpush1.bf16.msra.mxu1 %v4605_v38  ;;  %6294 = vmatprep.subr.bf16.mxu0 %v4608_v41  ;;  %v4661_v38 = vld [vmem:[#allocation5 + $0xaf0] sm:$0xff]  ;;  %v4664_v41 = vld [vmem:[#allocation5 + $0xb08] sm:$0xff] }
 0xadd   :  { %6950 = vmatprep.subr.bf16.mxu1 %v4610_v42  ;;  %v4666_v42 = vld [vmem:[#allocation5 + $0xb18] sm:$0xff] }
 0xadf   :  { %6295 = vmatpush1.bf16.msra.mxu0 %v4607_v43  ;;  %v4663_v43 = vld [vmem:[#allocation5 + $0xb00] sm:$0xff] }
 0xae0   :  { %6951 = vmatpush1.bf16.msra.mxu1 %v4609_v44  ;;  %6296 = vmatprep.subr.bf16.mxu0 %v4612_v45  ;;  %v4665_v44 = vld [vmem:[#allocation5 + $0xb10] sm:$0xff]  ;;  %v4668_v45 = vld [vmem:[#allocation5 + $0xb28] sm:$0xff] }
 0xae1   :  { %6952 = vmatprep.subr.bf16.mxu1 %v4614_v46  ;;  %v4670_v46 = vld [vmem:[#allocation5 + $0xb38] sm:$0xff] }
 0xae3   :  { %6297 = vmatpush1.bf16.msra.mxu0 %v4611_v47  ;;  %v4667_v47 = vld [vmem:[#allocation5 + $0xb20] sm:$0xff] }
 0xae4   :  { %6953 = vmatpush1.bf16.msra.mxu1 %v4613_v48  ;;  %6298 = vmatprep.subr.bf16.mxu0 %v4616_v51  ;;  %v4669_v48 = vld [vmem:[#allocation5 + $0xb30] sm:$0xff]  ;;  %v4672_v51 = vld [vmem:[#allocation5 + $0xb48] sm:$0xff] }
 0xae5   :  { %6954 = vmatprep.subr.bf16.mxu1 %v4618_v52  ;;  %v4674_v52 = vld [vmem:[#allocation5 + $0xb58] sm:$0xff] }
 0xae7   :  { %6299 = vmatpush1.bf16.msra.mxu0 %v4615_v53  ;;  %v4671_v53 = vld [vmem:[#allocation5 + $0xb40] sm:$0xff] }
 0xae8   :  { %6955 = vmatpush1.bf16.msra.mxu1 %v4617_v54  ;;  %6300 = vmatprep.subr.bf16.mxu0 %v4620_v56  ;;  %v4673_v54 = vld [vmem:[#allocation5 + $0xb50] sm:$0xff]  ;;  %v4676_v56 = vld [vmem:[#allocation5 + $0xb68] sm:$0xff] }
 0xae9   :  { %6956 = vmatprep.subr.bf16.mxu1 %v4622_v36  ;;  %v4678_v36 = vld [vmem:[#allocation5 + $0xb78] sm:$0xff] }
 0xaeb   :  { %6301 = vmatpush1.bf16.msra.mxu0 %v4619_v57  ;;  %v4675_v57 = vld [vmem:[#allocation5 + $0xb60] sm:$0xff] }
 0xaec   :  { %6957 = vmatpush1.bf16.msra.mxu1 %v4621_v58  ;;  %6302 = vmatprep.subr.bf16.mxu0 %v4624_v59  ;;  %v4677_v58 = vld [vmem:[#allocation5 + $0xb70] sm:$0xff]  ;;  %v4680_v59 = vld [vmem:[#allocation5 + $0xb88] sm:$0xff] }
 0xaed   :  { %6958 = vmatprep.subr.bf16.mxu1 %v4626_v29  ;;  %v4682_v29 = vld [vmem:[#allocation5 + $0xb98] sm:$0xff] }
 0xaef   :  { %6303 = vmatpush1.bf16.msra.mxu0 %v4623_v5  ;;  %v4679_v5 = vld [vmem:[#allocation5 + $0xb80] sm:$0xff] }
 0xaf0   :  { %6959 = vmatpush1.bf16.msra.mxu1 %v4625_v61  ;;  %6304 = vmatprep.subr.bf16.mxu0 %v4628_v63  ;;  %v4681_v61 = vld [vmem:[#allocation5 + $0xb90] sm:$0xff]  ;;  %v4684_v63 = vld [vmem:[#allocation5 + $0xba8] sm:$0xff] }
 0xaf1   :  { %6960 = vmatprep.subr.bf16.mxu1 %v4630_v0  ;;  %v4686_v0 = vld [vmem:[#allocation5 + $0xbb8] sm:$0xff] }
 0xaf3   :  { %6305 = vmatpush1.bf16.msra.mxu0 %v4627_v1  ;;  %v4683_v1 = vld [vmem:[#allocation5 + $0xba0] sm:$0xff] }
 0xaf4   :  { %6961 = vmatpush1.bf16.msra.mxu1 %v4629_v50  ;;  %6315 = vmatprep.subr.bf16.mxu0 %v4632_v2  ;;  %v4685_v50 = vld [vmem:[#allocation5 + $0xbb0] sm:$0xff]  ;;  %v4688_v2 = vld [vmem:[#allocation5 + $0xbc8] sm:$0xff] }
 0xaf5   :  { %6971 = vmatprep.subr.bf16.mxu1 %v4634_v3  ;;  %v4690_v3 = vld [vmem:[#allocation5 + $0xbd8] sm:$0xff] }
 0xaf6   :  { %6307 = vmatmul.mubr.bf16.vlgmr.msra.gmra.mrb[48].mxu0 %v11357_v11 }
 0xaf7   :  { %6963 = vmatmul.mubr.bf16.vlgmr.msra.gmra.mrb[116].mxu1 %v11357_v11  ;;  %6316 = vmatpush1.bf16.msra.mxu0 %v4631_v4  ;;  %v5931_v4 = vcombine.high %v11340_v49, %v11340_v49 }
 0xaf8   :  { %6347 = vmatprep.mubr.bf16.mxu0 %v5978_v9  ;;  %6972 = vmatpush1.bf16.msra.mxu1 %v4633_v6  ;;  %v4687_v6 = vld [vmem:[#allocation5 + $0xbc0] sm:$0xff] }
 0xaf9   :  { %7003 = vmatprep.mubr.bf16.mxu1 %v5978_v9  ;;  %6317 = vmatprep.subr.bf16.mxu0 %v4636_v10  ;;  %v4689_v9 = vld [vmem:[#allocation5 + $0xbd0] sm:$0xff]  ;;  %v4692_v10 = vld [vmem:[#allocation5 + $0xbe8] sm:$0xff] }
 0xafa   :  { %6973 = vmatprep.subr.bf16.mxu1 %v4638_v13  ;;  %v4694_v13 = vld [vmem:[#allocation5 + $0xbf8] sm:$0xff] }
 0xafb   :  { %6318 = vmatpush1.bf16.msra.mxu0 %v4635_v15  ;;  %v11366_v15 = vrot.slane %v5931_v4, %v11290_v22  ;;  %v4744_v4 = vld [vmem:[#allocation5 + $0xd88] sm:$0xff] }
 0xafc   :  { %6974 = vmatpush1.bf16.msra.mxu1 %v4637_v55  ;;  %6319 = vmatprep.subr.bf16.mxu0 %v4640_v16  ;;  %v4691_v55 = vld [vmem:[#allocation5 + $0xbe0] sm:$0xff]  ;;  %v4693_v16 = vld [vmem:[#allocation5 + $0xbf0] sm:$0xff] }
 0xafd   :  { %6975 = vmatprep.subr.bf16.mxu1 %v4642_v17  ;;  %v4696_v17 = vld [vmem:[#allocation5 + $0xc08] sm:$0xff]  ;;  %v5947_v49 = vcombine.high %v11366_v15, %v11366_v15 }
 0xaff   :  { %6320 = vmatpush1.bf16.msra.mxu0 %v4639_v18  ;;  %v4698_v18 = vld [vmem:[#allocation5 + $0xc18] sm:$0xff] }
 0xb00   :  { %6976 = vmatpush1.bf16.msra.mxu1 %v4641_v62  ;;  %6321 = vmatprep.subr.bf16.mxu0 %v4644_v19  ;;  %v5976_v62 = vcombine.high %v11357_v11, %v11357_v11  ;;  %v4695_v19 = vld [vmem:[#allocation5 + $0xc00] sm:$0xff]  ;;  %v4701_v11 = vld [vmem:[#allocation5 + $0xc30] sm:$0xff] }
 0xb01   :  { %6977 = vmatprep.subr.bf16.mxu1 %v4646_v20  ;;  %v4697_v20 = vld [vmem:[#allocation5 + $0xc10] sm:$0xff] }
 0xb03   :  { %6322 = vmatpush1.bf16.msra.mxu0 %v4643_v21  ;;  %v11373_v21 = vrot.slane %v5947_v49, %v11290_v22  ;;  %v4754_v49 = vld [vmem:[#allocation5 + $0xdd8] sm:$0xff] }
 0xb04   :  { %6978 = vmatpush1.bf16.msra.mxu1 %v4645_v24  ;;  %6323 = vmatprep.subr.bf16.mxu0 %v4648_v26  ;;  %v4700_v24 = vld [vmem:[#allocation5 + $0xc28] sm:$0xff]  ;;  %v4702_v26 = vld [vmem:[#allocation5 + $0xc38] sm:$0xff] }
 0xb05   :  { %6979 = vmatprep.subr.bf16.mxu1 %v4650_v7  ;;  %v4699_v7 = vld [vmem:[#allocation5 + $0xc20] sm:$0xff] }
 0xb07   :  { %6324 = vmatpush1.bf16.msra.mxu0 %v4647_v27  ;;  %v4704_v27 = vld [vmem:[#allocation5 + $0xc48] sm:$0xff] }
 0xb08   :  { %6980 = vmatpush1.bf16.msra.mxu1 %v4649_v8  ;;  %6325 = vmatprep.subr.bf16.mxu0 %v4652_v28  ;;  %v4706_v8 = vld [vmem:[#allocation5 + $0xc58] sm:$0xff]  ;;  %v4703_v28 = vld [vmem:[#allocation5 + $0xc40] sm:$0xff] }
 0xb09   :  { %6981 = vmatprep.subr.bf16.mxu1 %v4654_v30  ;;  %v4705_v30 = vld [vmem:[#allocation5 + $0xc50] sm:$0xff] }
 0xb0b   :  { %6326 = vmatpush1.bf16.msra.mxu0 %v4651_v31  ;;  %v4708_v31 = vld [vmem:[#allocation5 + $0xc68] sm:$0xff] }
 0xb0c   :  { %6982 = vmatpush1.bf16.msra.mxu1 %v4653_v32  ;;  %6327 = vmatprep.subr.bf16.mxu0 %v4656_v33  ;;  %v4710_v32 = vld [vmem:[#allocation5 + $0xc78] sm:$0xff]  ;;  %v4707_v33 = vld [vmem:[#allocation5 + $0xc60] sm:$0xff] }
 0xb0d   :  { %6983 = vmatprep.subr.bf16.mxu1 %v4658_v34  ;;  %v4709_v34 = vld [vmem:[#allocation5 + $0xc70] sm:$0xff] }
 0xb0f   :  { %6328 = vmatpush1.bf16.msra.mxu0 %v4655_v35  ;;  %v4712_v35 = vld [vmem:[#allocation5 + $0xc88] sm:$0xff] }
 0xb10   :  { %6984 = vmatpush1.bf16.msra.mxu1 %v4657_v39  ;;  %6329 = vmatprep.subr.bf16.mxu0 %v4660_v12  ;;  %v4714_v39 = vld [vmem:[#allocation5 + $0xc98] sm:$0xff]  ;;  %v4711_v12 = vld [vmem:[#allocation5 + $0xc80] sm:$0xff] }
 0xb11   :  { %6985 = vmatprep.subr.bf16.mxu1 %v4662_v14  ;;  %v4713_v14 = vld [vmem:[#allocation5 + $0xc90] sm:$0xff] }
 0xb13   :  { %6330 = vmatpush1.bf16.msra.mxu0 %v4659_v37  ;;  %v4716_v37 = vld [vmem:[#allocation5 + $0xca8] sm:$0xff] }
 0xb14   :  { %6986 = vmatpush1.bf16.msra.mxu1 %v4661_v38  ;;  %6331 = vmatprep.subr.bf16.mxu0 %v4664_v41  ;;  %v4718_v38 = vld [vmem:[#allocation5 + $0xcb8] sm:$0xff]  ;;  %v4715_v41 = vld [vmem:[#allocation5 + $0xca0] sm:$0xff] }
 0xb15   :  { %6987 = vmatprep.subr.bf16.mxu1 %v4666_v42  ;;  %v4717_v42 = vld [vmem:[#allocation5 + $0xcb0] sm:$0xff] }
 0xb17   :  { %6332 = vmatpush1.bf16.msra.mxu0 %v4663_v43  ;;  %v4720_v43 = vld [vmem:[#allocation5 + $0xcc8] sm:$0xff] }
 0xb18   :  { %6988 = vmatpush1.bf16.msra.mxu1 %v4665_v44  ;;  %6333 = vmatprep.subr.bf16.mxu0 %v4668_v45  ;;  %v4722_v44 = vld [vmem:[#allocation5 + $0xcd8] sm:$0xff]  ;;  %v4719_v45 = vld [vmem:[#allocation5 + $0xcc0] sm:$0xff] }
 0xb19   :  { %6989 = vmatprep.subr.bf16.mxu1 %v4670_v46  ;;  %v4721_v46 = vld [vmem:[#allocation5 + $0xcd0] sm:$0xff] }
 0xb1b   :  { %6334 = vmatpush1.bf16.msra.mxu0 %v4667_v47  ;;  %v4724_v47 = vld [vmem:[#allocation5 + $0xce8] sm:$0xff] }
 0xb1c   :  { %6990 = vmatpush1.bf16.msra.mxu1 %v4669_v48  ;;  %6335 = vmatprep.subr.bf16.mxu0 %v4672_v51  ;;  %v4726_v48 = vld [vmem:[#allocation5 + $0xcf8] sm:$0xff]  ;;  %v4723_v51 = vld [vmem:[#allocation5 + $0xce0] sm:$0xff] }
 0xb1d   :  { %6991 = vmatprep.subr.bf16.mxu1 %v4674_v52  ;;  %v4725_v52 = vld [vmem:[#allocation5 + $0xcf0] sm:$0xff] }
 0xb1f   :  { %6336 = vmatpush1.bf16.msra.mxu0 %v4671_v53  ;;  %v4728_v53 = vld [vmem:[#allocation5 + $0xd08] sm:$0xff] }
 0xb20   :  { %6992 = vmatpush1.bf16.msra.mxu1 %v4673_v54  ;;  %6337 = vmatprep.subr.bf16.mxu0 %v4676_v56  ;;  %v4730_v54 = vld [vmem:[#allocation5 + $0xd18] sm:$0xff]  ;;  %v4727_v56 = vld [vmem:[#allocation5 + $0xd00] sm:$0xff] }
 0xb21   :  { %6993 = vmatprep.subr.bf16.mxu1 %v4678_v36  ;;  %v4729_v36 = vld [vmem:[#allocation5 + $0xd10] sm:$0xff] }
 0xb23   :  { %6338 = vmatpush1.bf16.msra.mxu0 %v4675_v57  ;;  %v4732_v57 = vld [vmem:[#allocation5 + $0xd28] sm:$0xff] }
 0xb24   :  { %6994 = vmatpush1.bf16.msra.mxu1 %v4677_v58  ;;  %6339 = vmatprep.subr.bf16.mxu0 %v4680_v59  ;;  %v4734_v58 = vld [vmem:[#allocation5 + $0xd38] sm:$0xff]  ;;  %v4731_v59 = vld [vmem:[#allocation5 + $0xd20] sm:$0xff] }
 0xb25   :  { %6995 = vmatprep.subr.bf16.mxu1 %v4682_v29  ;;  %v4733_v29 = vld [vmem:[#allocation5 + $0xd30] sm:$0xff] }
 0xb27   :  { %6340 = vmatpush1.bf16.msra.mxu0 %v4679_v5  ;;  %v4736_v5 = vld [vmem:[#allocation5 + $0xd48] sm:$0xff] }
 0xb28   :  { %6996 = vmatpush1.bf16.msra.mxu1 %v4681_v61  ;;  %6341 = vmatprep.subr.bf16.mxu0 %v4684_v63  ;;  %v4738_v61 = vld [vmem:[#allocation5 + $0xd58] sm:$0xff]  ;;  %v4735_v63 = vld [vmem:[#allocation5 + $0xd40] sm:$0xff] }
 0xb29   :  { %6997 = vmatprep.subr.bf16.mxu1 %v4686_v0  ;;  %v4737_v0 = vld [vmem:[#allocation5 + $0xd50] sm:$0xff] }
 0xb2b   :  { %6342 = vmatpush1.bf16.msra.mxu0 %v4683_v1  ;;  %v4740_v1 = vld [vmem:[#allocation5 + $0xd68] sm:$0xff] }
 0xb2c   :  { %6998 = vmatpush1.bf16.msra.mxu1 %v4685_v50  ;;  %6343 = vmatprep.subr.bf16.mxu0 %v4688_v2  ;;  %v4742_v50 = vld [vmem:[#allocation5 + $0xd78] sm:$0xff]  ;;  %v4739_v2 = vld [vmem:[#allocation5 + $0xd60] sm:$0xff] }
 0xb2d   :  { %6999 = vmatprep.subr.bf16.mxu1 %v4690_v3  ;;  %v4741_v3 = vld [vmem:[#allocation5 + $0xd70] sm:$0xff] }
 0xb2f   :  { %6344 = vmatpush1.bf16.msra.mxu0 %v4687_v6  ;;  %v4746_v6 = vld [vmem:[#allocation5 + $0xd98] sm:$0xff] }
 0xb30   :  { %7000 = vmatpush1.bf16.msra.mxu1 %v4689_v9  ;;  %6345 = vmatprep.subr.bf16.mxu0 %v4692_v10  ;;  %v4743_v9 = vld [vmem:[#allocation5 + $0xd80] sm:$0xff]  ;;  %v4745_v10 = vld [vmem:[#allocation5 + $0xd90] sm:$0xff] }
 0xb31   :  { %7001 = vmatprep.subr.bf16.mxu1 %v4694_v13  ;;  %v4748_v13 = vld [vmem:[#allocation5 + $0xda8] sm:$0xff] }
 0xb33   :  { %6346 = vmatpush1.bf16.msra.mxu0 %v4691_v55  ;;  %v4750_v55 = vld [vmem:[#allocation5 + $0xdb8] sm:$0xff] }
 0xb34   :  { %7002 = vmatpush1.bf16.msra.mxu1 %v4693_v16  ;;  %6356 = vmatprep.subr.bf16.mxu0 %v4696_v17  ;;  %v4747_v16 = vld [vmem:[#allocation5 + $0xda0] sm:$0xff]  ;;  %v4749_v17 = vld [vmem:[#allocation5 + $0xdb0] sm:$0xff] }
 0xb35   :  { %7012 = vmatprep.subr.bf16.mxu1 %v4698_v18  ;;  %v4752_v18 = vld [vmem:[#allocation5 + $0xdc8] sm:$0xff] }
 0xb36   :  { %6348 = vmatmul.mubr.bf16.vlgmr.msra.gmra.mrb[48].mxu0 %v5976_v62 }
 0xb37   :  { %7004 = vmatmul.mubr.bf16.vlgmr.msra.gmra.mrb[116].mxu1 %v5976_v62  ;;  %6357 = vmatpush1.bf16.msra.mxu0 %v4695_v19  ;;  %v4751_v62 = vld [vmem:[#allocation5 + $0xdc0] sm:$0xff]  ;;  %v4753_v19 = vld [vmem:[#allocation5 + $0xdd0] sm:$0xff] }
 0xb38   :  { %6388 = vmatprep.mubr.bf16.mxu0 %v11373_v21  ;;  %7013 = vmatpush1.bf16.msra.mxu1 %v4697_v20  ;;  %v4756_v20 = vld [vmem:[#allocation5 + $0xde8] sm:$0xff] }
 0xb39   :  { %7044 = vmatprep.mubr.bf16.mxu1 %v11373_v21  ;;  %6358 = vmatprep.subr.bf16.mxu0 %v4700_v24  ;;  %v4758_v24 = vld [vmem:[#allocation5 + $0xdf8] sm:$0xff] }
 0xb3a   :  { %7014 = vmatprep.subr.bf16.mxu1 %v4702_v26  ;;  %v4755_v26 = vld [vmem:[#allocation5 + $0xde0] sm:$0xff] }
 0xb3b   :  { %6359 = vmatpush1.bf16.msra.mxu0 %v4699_v7  ;;  %v4757_v7 = vld [vmem:[#allocation5 + $0xdf0] sm:$0xff] }
 0xb3c   :  { %7015 = vmatpush1.bf16.msra.mxu1 %v4701_v11  ;;  %6360 = vmatprep.subr.bf16.mxu0 %v4704_v27  ;;  %v4760_v11 = vld [vmem:[#allocation5 + $0xe08] sm:$0xff]  ;;  %v4762_v27 = vld [vmem:[#allocation5 + $0xe18] sm:$0xff] }
 0xb3d   :  { %7016 = vmatprep.subr.bf16.mxu1 %v4706_v8  ;;  %v11379_v8 = vrot.slane %v11366_v15, %v11290_v22  ;;  %v4765_v15 = vld [vmem:[#allocation5 + $0xe30] sm:$0xff] }
 0xb3f   :  { %6361 = vmatpush1.bf16.msra.mxu0 %v4703_v28  ;;  %v4759_v28 = vld [vmem:[#allocation5 + $0xe00] sm:$0xff] }
 0xb40   :  { %7017 = vmatpush1.bf16.msra.mxu1 %v4705_v30  ;;  %6362 = vmatprep.subr.bf16.mxu0 %v4708_v31  ;;  %v4761_v30 = vld [vmem:[#allocation5 + $0xe10] sm:$0xff]  ;;  %v5979_v31 = vcombine.high %v11373_v21, %v11373_v21 }
 0xb41   :  { %7018 = vmatprep.subr.bf16.mxu1 %v4710_v32  ;;  %v4764_v32 = vld [vmem:[#allocation5 + $0xe28] sm:$0xff]  ;;  %v4769_v21 = vld [vmem:[#allocation5 + $0xe50] sm:$0xff] }
 0xb43   :  { %6363 = vmatpush1.bf16.msra.mxu0 %v4707_v33  ;;  %v4766_v33 = vld [vmem:[#allocation5 + $0xe38] sm:$0xff] }
 0xb44   :  { %7019 = vmatpush1.bf16.msra.mxu1 %v4709_v34  ;;  %6364 = vmatprep.subr.bf16.mxu0 %v4712_v35  ;;  %v4763_v34 = vld [vmem:[#allocation5 + $0xe20] sm:$0xff]  ;;  %v4768_v35 = vld [vmem:[#allocation5 + $0xe48] sm:$0xff] }
 0xb45   :  { %7020 = vmatprep.subr.bf16.mxu1 %v4714_v39  ;;  %v4770_v39 = vld [vmem:[#allocation5 + $0xe58] sm:$0xff] }
 0xb47   :  { %6365 = vmatpush1.bf16.msra.mxu0 %v4711_v12  ;;  %v4767_v12 = vld [vmem:[#allocation5 + $0xe40] sm:$0xff] }
 0xb48   :  { %7021 = vmatpush1.bf16.msra.mxu1 %v4713_v14  ;;  %6366 = vmatprep.subr.bf16.mxu0 %v4716_v37  ;;  %v4772_v14 = vld [vmem:[#allocation5 + $0xe68] sm:$0xff]  ;;  %v4774_v37 = vld [vmem:[#allocation5 + $0xe78] sm:$0xff] }
 0xb49   :  { %7022 = vmatprep.subr.bf16.mxu1 %v4718_v38  ;;  %v4771_v38 = vld [vmem:[#allocation5 + $0xe60] sm:$0xff] }
 0xb4b   :  { %6367 = vmatpush1.bf16.msra.mxu0 %v4715_v41  ;;  %v4773_v41 = vld [vmem:[#allocation5 + $0xe70] sm:$0xff] }
 0xb4c   :  { %7023 = vmatpush1.bf16.msra.mxu1 %v4717_v42  ;;  %6368 = vmatprep.subr.bf16.mxu0 %v4720_v43  ;;  %v4776_v42 = vld [vmem:[#allocation5 + $0xe88] sm:$0xff]  ;;  %v4778_v43 = vld [vmem:[#allocation5 + $0xe98] sm:$0xff] }
 0xb4d   :  { %7024 = vmatprep.subr.bf16.mxu1 %v4722_v44  ;;  %v4775_v44 = vld [vmem:[#allocation5 + $0xe80] sm:$0xff] }
 0xb4f   :  { %6369 = vmatpush1.bf16.msra.mxu0 %v4719_v45  ;;  %v4777_v45 = vld [vmem:[#allocation5 + $0xe90] sm:$0xff] }
 0xb50   :  { %7025 = vmatpush1.bf16.msra.mxu1 %v4721_v46  ;;  %6370 = vmatprep.subr.bf16.mxu0 %v4724_v47  ;;  %v4780_v46 = vld [vmem:[#allocation5 + $0xea8] sm:$0xff]  ;;  %v4782_v47 = vld [vmem:[#allocation5 + $0xeb8] sm:$0xff] }
 0xb51   :  { %7026 = vmatprep.subr.bf16.mxu1 %v4726_v48  ;;  %v4779_v48 = vld [vmem:[#allocation5 + $0xea0] sm:$0xff] }
 0xb53   :  { %6371 = vmatpush1.bf16.msra.mxu0 %v4723_v51  ;;  %v4781_v51 = vld [vmem:[#allocation5 + $0xeb0] sm:$0xff] }
 0xb54   :  { %7027 = vmatpush1.bf16.msra.mxu1 %v4725_v52  ;;  %6372 = vmatprep.subr.bf16.mxu0 %v4728_v53  ;;  %v4784_v52 = vld [vmem:[#allocation5 + $0xec8] sm:$0xff]  ;;  %v4786_v53 = vld [vmem:[#allocation5 + $0xed8] sm:$0xff] }
 0xb55   :  { %7028 = vmatprep.subr.bf16.mxu1 %v4730_v54  ;;  %v4783_v54 = vld [vmem:[#allocation5 + $0xec0] sm:$0xff] }
 0xb57   :  { %6373 = vmatpush1.bf16.msra.mxu0 %v4727_v56  ;;  %v4785_v56 = vld [vmem:[#allocation5 + $0xed0] sm:$0xff] }
 0xb58   :  { %7029 = vmatpush1.bf16.msra.mxu1 %v4729_v36  ;;  %6374 = vmatprep.subr.bf16.mxu0 %v4732_v57  ;;  %v4788_v36 = vld [vmem:[#allocation5 + $0xee8] sm:$0xff]  ;;  %v4790_v57 = vld [vmem:[#allocation5 + $0xef8] sm:$0xff] }
 0xb59   :  { %7030 = vmatprep.subr.bf16.mxu1 %v4734_v58  ;;  %v4787_v58 = vld [vmem:[#allocation5 + $0xee0] sm:$0xff] }
 0xb5b   :  { %6375 = vmatpush1.bf16.msra.mxu0 %v4731_v59  ;;  %v4789_v59 = vld [vmem:[#allocation5 + $0xef0] sm:$0xff] }
 0xb5c   :  { %7031 = vmatpush1.bf16.msra.mxu1 %v4733_v29  ;;  %6376 = vmatprep.subr.bf16.mxu0 %v4736_v5  ;;  %v4792_v29 = vld [vmem:[#allocation5 + $0xf08] sm:$0xff]  ;;  %v4794_v5 = vld [vmem:[#allocation5 + $0xf18] sm:$0xff] }
 0xb5d   :  { %7032 = vmatprep.subr.bf16.mxu1 %v4738_v61  ;;  %v4791_v61 = vld [vmem:[#allocation5 + $0xf00] sm:$0xff] }
 0xb5f   :  { %6377 = vmatpush1.bf16.msra.mxu0 %v4735_v63  ;;  %v4793_v63 = vld [vmem:[#allocation5 + $0xf10] sm:$0xff] }
 0xb60   :  { %7033 = vmatpush1.bf16.msra.mxu1 %v4737_v0  ;;  %6378 = vmatprep.subr.bf16.mxu0 %v4740_v1  ;;  %v4796_v0 = vld [vmem:[#allocation5 + $0xf28] sm:$0xff]  ;;  %v4798_v1 = vld [vmem:[#allocation5 + $0xf38] sm:$0xff] }
 0xb61   :  { %7034 = vmatprep.subr.bf16.mxu1 %v4742_v50  ;;  %v4795_v50 = vld [vmem:[#allocation5 + $0xf20] sm:$0xff] }
 0xb63   :  { %6379 = vmatpush1.bf16.msra.mxu0 %v4739_v2  ;;  %v4797_v2 = vld [vmem:[#allocation5 + $0xf30] sm:$0xff] }
 0xb64   :  { %7035 = vmatpush1.bf16.msra.mxu1 %v4741_v3  ;;  %6380 = vmatprep.subr.bf16.mxu0 %v4744_v4  ;;  %v4800_v3 = vld [vmem:[#allocation5 + $0xf48] sm:$0xff]  ;;  %v4802_v4 = vld [vmem:[#allocation5 + $0xf58] sm:$0xff] }
 0xb65   :  { %7036 = vmatprep.subr.bf16.mxu1 %v4746_v6  ;;  %v4799_v6 = vld [vmem:[#allocation5 + $0xf40] sm:$0xff] }
 0xb67   :  { %6381 = vmatpush1.bf16.msra.mxu0 %v4743_v9  ;;  %v4801_v9 = vld [vmem:[#allocation5 + $0xf50] sm:$0xff] }
 0xb68   :  { %7037 = vmatpush1.bf16.msra.mxu1 %v4745_v10  ;;  %6382 = vmatprep.subr.bf16.mxu0 %v4748_v13  ;;  %v4804_v10 = vld [vmem:[#allocation5 + $0xf68] sm:$0xff]  ;;  %v4806_v13 = vld [vmem:[#allocation5 + $0xf78] sm:$0xff] }
 0xb69   :  { %7038 = vmatprep.subr.bf16.mxu1 %v4750_v55  ;;  %v4803_v55 = vld [vmem:[#allocation5 + $0xf60] sm:$0xff] }
 0xb6b   :  { %6383 = vmatpush1.bf16.msra.mxu0 %v4747_v16  ;;  %v4805_v16 = vld [vmem:[#allocation5 + $0xf70] sm:$0xff] }
 0xb6c   :  { %7039 = vmatpush1.bf16.msra.mxu1 %v4749_v17  ;;  %6384 = vmatprep.subr.bf16.mxu0 %v4752_v18  ;;  %v4808_v17 = vld [vmem:[#allocation5 + $0xf88] sm:$0xff]  ;;  %v4810_v18 = vld [vmem:[#allocation5 + $0xf98] sm:$0xff] }
 0xb6d   :  { %7040 = vmatprep.subr.bf16.mxu1 %v4754_v49  ;;  %v4807_v49 = vld [vmem:[#allocation5 + $0xf80] sm:$0xff] }
 0xb6f   :  { %6385 = vmatpush1.bf16.msra.mxu0 %v4751_v62  ;;  %v4809_v62 = vld [vmem:[#allocation5 + $0xf90] sm:$0xff] }
 0xb70   :  { %7041 = vmatpush1.bf16.msra.mxu1 %v4753_v19  ;;  %6386 = vmatprep.subr.bf16.mxu0 %v4756_v20  ;;  %v4812_v19 = vld [vmem:[#allocation5 + $0xfa8] sm:$0xff]  ;;  %v4814_v20 = vld [vmem:[#allocation5 + $0xfb8] sm:$0xff] }
 0xb71   :  { %7042 = vmatprep.subr.bf16.mxu1 %v4758_v24  ;;  %v4811_v24 = vld [vmem:[#allocation5 + $0xfa0] sm:$0xff] }
 0xb73   :  { %6387 = vmatpush1.bf16.msra.mxu0 %v4755_v26  ;;  %v4813_v26 = vld [vmem:[#allocation5 + $0xfb0] sm:$0xff] }
 0xb74   :  { %7043 = vmatpush1.bf16.msra.mxu1 %v4757_v7  ;;  %6397 = vmatprep.subr.bf16.mxu0 %v4760_v11  ;;  %v4816_v7 = vld [vmem:[#allocation5 + $0xfc8] sm:$0xff]  ;;  %v4818_v11 = vld [vmem:[#allocation5 + $0xfd8] sm:$0xff] }
 0xb75   :  { %7053 = vmatprep.subr.bf16.mxu1 %v4762_v27  ;;  %v11385_v27 = vld [vmem:[#allocation4 + $0x10] sm:$0xff] }
 0xb76   :  { %6389 = vmatmul.mubr.bf16.vlgmr.msra.gmra.mrb[48].mxu0 %v11379_v8 }
 0xb77   :  { %7045 = vmatmul.mubr.bf16.vlgmr.msra.gmra.mrb[116].mxu1 %v11379_v8  ;;  %6398 = vmatpush1.bf16.msra.mxu0 %v4759_v28  ;;  %v4815_v28 = vld [vmem:[#allocation5 + $0xfc0] sm:$0xff] }
 0xb78   :  { %6429 = vmatprep.mubr.bf16.mxu0 %v5979_v31  ;;  %7054 = vmatpush1.bf16.msra.mxu1 %v4761_v30  ;;  %v4817_v30 = vld [vmem:[#allocation5 + $0xfd0] sm:$0xff] }
 0xb79   :  { %7085 = vmatprep.mubr.bf16.mxu1 %v5979_v31  ;;  %6399 = vmatprep.subr.bf16.mxu0 %v4764_v32  ;;  %v4820_v31 = vld [vmem:[#allocation5 + $0xfe8] sm:$0xff]  ;;  %v4822_v32 = vld [vmem:[#allocation5 + $0xff8] sm:$0xff] }
 0xb7a   :  { %7055 = vmatprep.subr.bf16.mxu1 %v4766_v33  ;;  %v11389_v33 = vrot.slane %v11385_v27, %v11290_v22 }
 0xb7b   :  { %6400 = vmatpush1.bf16.msra.mxu0 %v4763_v34  ;;  %v4819_v34 = vld [vmem:[#allocation5 + $0xfe0] sm:$0xff] }
 0xb7c   :  { %7056 = vmatpush1.bf16.msra.mxu1 %v4765_v15  ;;  %6401 = vmatprep.subr.bf16.mxu0 %v4768_v35  ;;  %v4821_v15 = vld [vmem:[#allocation5 + $0xff0] sm:$0xff]  ;;  %v4824_v35 = vld [vmem:[#allocation5 + $0x1008] sm:$0xff] }
 0xb7d   :  { %7057 = vmatprep.subr.bf16.mxu1 %v4770_v39  ;;  %v4826_v39 = vld [vmem:[#allocation5 + $0x1018] sm:$0xff] }
 0xb7f   :  { %6402 = vmatpush1.bf16.msra.mxu0 %v4767_v12  ;;  %v5995_v12 = vcombine.high %v11389_v33, %v11389_v33 }
 0xb80   :  { %7058 = vmatpush1.bf16.msra.mxu1 %v4769_v21  ;;  %6403 = vmatprep.subr.bf16.mxu0 %v4772_v14  ;;  %v5977_v21 = vcombine.high %v11379_v8, %v11379_v8  ;;  %v4823_v14 = vld [vmem:[#allocation5 + $0x1000] sm:$0xff]  ;;  %v4829_v8 = vld [vmem:[#allocation5 + $0x1030] sm:$0xff] }
 0xb81   :  { %7059 = vmatprep.subr.bf16.mxu1 %v4774_v37  ;;  %v4825_v37 = vld [vmem:[#allocation5 + $0x1010] sm:$0xff] }
 0xb83   :  { %6404 = vmatpush1.bf16.msra.mxu0 %v4771_v38  ;;  %v11396_v38 = vrot.slane %v5995_v12, %v11290_v22  ;;  %v4880_v12 = vld [vmem:[#allocation5 + $0x11c8] sm:$0xff] }
 0xb84   :  { %7060 = vmatpush1.bf16.msra.mxu1 %v4773_v41  ;;  %6405 = vmatprep.subr.bf16.mxu0 %v4776_v42  ;;  %v4828_v41 = vld [vmem:[#allocation5 + $0x1028] sm:$0xff]  ;;  %v4830_v42 = vld [vmem:[#allocation5 + $0x1038] sm:$0xff] }
 0xb85   :  { %7061 = vmatprep.subr.bf16.mxu1 %v4778_v43  ;;  %v4827_v43 = vld [vmem:[#allocation5 + $0x1020] sm:$0xff] }
 0xb87   :  { %6406 = vmatpush1.bf16.msra.mxu0 %v4775_v44  ;;  %v4832_v44 = vld [vmem:[#allocation5 + $0x1048] sm:$0xff] }
 0xb88   :  { %7062 = vmatpush1.bf16.msra.mxu1 %v4777_v45  ;;  %6407 = vmatprep.subr.bf16.mxu0 %v4780_v46  ;;  %v4834_v45 = vld [vmem:[#allocation5 + $0x1058] sm:$0xff]  ;;  %v4831_v46 = vld [vmem:[#allocation5 + $0x1040] sm:$0xff] }
 0xb89   :  { %7063 = vmatprep.subr.bf16.mxu1 %v4782_v47  ;;  %v4833_v47 = vld [vmem:[#allocation5 + $0x1050] sm:$0xff] }
 0xb8b   :  { %6408 = vmatpush1.bf16.msra.mxu0 %v4779_v48  ;;  %v4836_v48 = vld [vmem:[#allocation5 + $0x1068] sm:$0xff] }
 0xb8c   :  { %7064 = vmatpush1.bf16.msra.mxu1 %v4781_v51  ;;  %6409 = vmatprep.subr.bf16.mxu0 %v4784_v52  ;;  %v4838_v51 = vld [vmem:[#allocation5 + $0x1078] sm:$0xff]  ;;  %v4835_v52 = vld [vmem:[#allocation5 + $0x1060] sm:$0xff] }
 0xb8d   :  { %7065 = vmatprep.subr.bf16.mxu1 %v4786_v53  ;;  %v4837_v53 = vld [vmem:[#allocation5 + $0x1070] sm:$0xff] }
 0xb8f   :  { %6410 = vmatpush1.bf16.msra.mxu0 %v4783_v54  ;;  %v4840_v54 = vld [vmem:[#allocation5 + $0x1088] sm:$0xff] }
 0xb90   :  { %7066 = vmatpush1.bf16.msra.mxu1 %v4785_v56  ;;  %6411 = vmatprep.subr.bf16.mxu0 %v4788_v36  ;;  %v4842_v56 = vld [vmem:[#allocation5 + $0x1098] sm:$0xff]  ;;  %v4839_v36 = vld [vmem:[#allocation5 + $0x1080] sm:$0xff] }
 0xb91   :  { %7067 = vmatprep.subr.bf16.mxu1 %v4790_v57  ;;  %v4841_v57 = vld [vmem:[#allocation5 + $0x1090] sm:$0xff] }
 0xb93   :  { %6412 = vmatpush1.bf16.msra.mxu0 %v4787_v58  ;;  %v4844_v58 = vld [vmem:[#allocation5 + $0x10a8] sm:$0xff] }
 0xb94   :  { %7068 = vmatpush1.bf16.msra.mxu1 %v4789_v59  ;;  %6413 = vmatprep.subr.bf16.mxu0 %v4792_v29  ;;  %v4846_v59 = vld [vmem:[#allocation5 + $0x10b8] sm:$0xff]  ;;  %v4843_v29 = vld [vmem:[#allocation5 + $0x10a0] sm:$0xff] }
 0xb95   :  { %7069 = vmatprep.subr.bf16.mxu1 %v4794_v5  ;;  %v4845_v5 = vld [vmem:[#allocation5 + $0x10b0] sm:$0xff] }
 0xb97   :  { %6414 = vmatpush1.bf16.msra.mxu0 %v4791_v61  ;;  %v4848_v61 = vld [vmem:[#allocation5 + $0x10c8] sm:$0xff] }
 0xb98   :  { %7070 = vmatpush1.bf16.msra.mxu1 %v4793_v63  ;;  %6415 = vmatprep.subr.bf16.mxu0 %v4796_v0  ;;  %v4850_v63 = vld [vmem:[#allocation5 + $0x10d8] sm:$0xff]  ;;  %v4847_v0 = vld [vmem:[#allocation5 + $0x10c0] sm:$0xff] }
 0xb99   :  { %7071 = vmatprep.subr.bf16.mxu1 %v4798_v1  ;;  %v4849_v1 = vld [vmem:[#allocation5 + $0x10d0] sm:$0xff] }
 0xb9b   :  { %6416 = vmatpush1.bf16.msra.mxu0 %v4795_v50  ;;  %v4852_v50 = vld [vmem:[#allocation5 + $0x10e8] sm:$0xff] }
 0xb9c   :  { %7072 = vmatpush1.bf16.msra.mxu1 %v4797_v2  ;;  %6417 = vmatprep.subr.bf16.mxu0 %v4800_v3  ;;  %v4854_v2 = vld [vmem:[#allocation5 + $0x10f8] sm:$0xff]  ;;  %v4851_v3 = vld [vmem:[#allocation5 + $0x10e0] sm:$0xff] }
 0xb9d   :  { %7073 = vmatprep.subr.bf16.mxu1 %v4802_v4  ;;  %v4853_v4 = vld [vmem:[#allocation5 + $0x10f0] sm:$0xff] }
 0xb9f   :  { %6418 = vmatpush1.bf16.msra.mxu0 %v4799_v6  ;;  %v4856_v6 = vld [vmem:[#allocation5 + $0x1108] sm:$0xff] }
 0xba0   :  { %7074 = vmatpush1.bf16.msra.mxu1 %v4801_v9  ;;  %6419 = vmatprep.subr.bf16.mxu0 %v4804_v10  ;;  %v4858_v9 = vld [vmem:[#allocation5 + $0x1118] sm:$0xff]  ;;  %v4855_v10 = vld [vmem:[#allocation5 + $0x1100] sm:$0xff] }
 0xba1   :  { %7075 = vmatprep.subr.bf16.mxu1 %v4806_v13  ;;  %v4857_v13 = vld [vmem:[#allocation5 + $0x1110] sm:$0xff] }
 0xba3   :  { %6420 = vmatpush1.bf16.msra.mxu0 %v4803_v55  ;;  %v4860_v55 = vld [vmem:[#allocation5 + $0x1128] sm:$0xff] }
 0xba4   :  { %7076 = vmatpush1.bf16.msra.mxu1 %v4805_v16  ;;  %6421 = vmatprep.subr.bf16.mxu0 %v4808_v17  ;;  %v4862_v16 = vld [vmem:[#allocation5 + $0x1138] sm:$0xff]  ;;  %v4859_v17 = vld [vmem:[#allocation5 + $0x1120] sm:$0xff] }
 0xba5   :  { %7077 = vmatprep.subr.bf16.mxu1 %v4810_v18  ;;  %v4861_v18 = vld [vmem:[#allocation5 + $0x1130] sm:$0xff] }
 0xba7   :  { %6422 = vmatpush1.bf16.msra.mxu0 %v4807_v49  ;;  %v4864_v49 = vld [vmem:[#allocation5 + $0x1148] sm:$0xff] }
 0xba8   :  { %7078 = vmatpush1.bf16.msra.mxu1 %v4809_v62  ;;  %6423 = vmatprep.subr.bf16.mxu0 %v4812_v19  ;;  %v4866_v62 = vld [vmem:[#allocation5 + $0x1158] sm:$0xff]  ;;  %v4863_v19 = vld [vmem:[#allocation5 + $0x1140] sm:$0xff] }
 0xba9   :  { %7079 = vmatprep.subr.bf16.mxu1 %v4814_v20  ;;  %v4865_v20 = vld [vmem:[#allocation5 + $0x1150] sm:$0xff] }
 0xbab   :  { %6424 = vmatpush1.bf16.msra.mxu0 %v4811_v24  ;;  %v4868_v24 = vld [vmem:[#allocation5 + $0x1168] sm:$0xff] }
 0xbac   :  { %7080 = vmatpush1.bf16.msra.mxu1 %v4813_v26  ;;  %6425 = vmatprep.subr.bf16.mxu0 %v4816_v7  ;;  %v4870_v26 = vld [vmem:[#allocation5 + $0x1178] sm:$0xff]  ;;  %v4867_v7 = vld [vmem:[#allocation5 + $0x1160] sm:$0xff] }
 0xbad   :  { %7081 = vmatprep.subr.bf16.mxu1 %v4818_v11  ;;  %v4869_v11 = vld [vmem:[#allocation5 + $0x1170] sm:$0xff] }
 0xbaf   :  { %6426 = vmatpush1.bf16.msra.mxu0 %v4815_v28  ;;  %v4872_v28 = vld [vmem:[#allocation5 + $0x1188] sm:$0xff] }
 0xbb0   :  { %7082 = vmatpush1.bf16.msra.mxu1 %v4817_v30  ;;  %6427 = vmatprep.subr.bf16.mxu0 %v4820_v31  ;;  %v4874_v30 = vld [vmem:[#allocation5 + $0x1198] sm:$0xff]  ;;  %v4871_v31 = vld [vmem:[#allocation5 + $0x1180] sm:$0xff] }
 0xbb1   :  { %7083 = vmatprep.subr.bf16.mxu1 %v4822_v32  ;;  %v4873_v32 = vld [vmem:[#allocation5 + $0x1190] sm:$0xff] }
 0xbb3   :  { %6428 = vmatpush1.bf16.msra.mxu0 %v4819_v34  ;;  %v4876_v34 = vld [vmem:[#allocation5 + $0x11a8] sm:$0xff] }
 0xbb4   :  { %7084 = vmatpush1.bf16.msra.mxu1 %v4821_v15  ;;  %6438 = vmatprep.subr.bf16.mxu0 %v4824_v35  ;;  %v4878_v15 = vld [vmem:[#allocation5 + $0x11b8] sm:$0xff]  ;;  %v4875_v35 = vld [vmem:[#allocation5 + $0x11a0] sm:$0xff] }
 0xbb5   :  { %7094 = vmatprep.subr.bf16.mxu1 %v4826_v39  ;;  %v4877_v39 = vld [vmem:[#allocation5 + $0x11b0] sm:$0xff] }
 0xbb6   :  { %6430 = vmatmul.mubr.bf16.vlgmr.msra.gmra.mrb[48].mxu0 %v5977_v21 }
 0xbb7   :  { %7086 = vmatmul.mubr.bf16.vlgmr.msra.gmra.mrb[116].mxu1 %v5977_v21  ;;  %6439 = vmatpush1.bf16.msra.mxu0 %v4823_v14  ;;  %v4882_v21 = vld [vmem:[#allocation5 + $0x11d8] sm:$0xff]  ;;  %v4879_v14 = vld [vmem:[#allocation5 + $0x11c0] sm:$0xff] }
 0xbb8   :  { %6470 = vmatprep.mubr.bf16.mxu0 %v11396_v38  ;;  %7095 = vmatpush1.bf16.msra.mxu1 %v4825_v37  ;;  %v4881_v37 = vld [vmem:[#allocation5 + $0x11d0] sm:$0xff] }
 0xbb9   :  { %7126 = vmatprep.mubr.bf16.mxu1 %v11396_v38  ;;  %6440 = vmatprep.subr.bf16.mxu0 %v4828_v41  ;;  %v4884_v41 = vld [vmem:[#allocation5 + $0x11e8] sm:$0xff] }
 0xbba   :  { %7096 = vmatprep.subr.bf16.mxu1 %v4830_v42  ;;  %v4886_v42 = vld [vmem:[#allocation5 + $0x11f8] sm:$0xff] }
 0xbbb   :  { %6441 = vmatpush1.bf16.msra.mxu0 %v4827_v43  ;;  %v4883_v43 = vld [vmem:[#allocation5 + $0x11e0] sm:$0xff] }
 0xbbc   :  { %7097 = vmatpush1.bf16.msra.mxu1 %v4829_v8  ;;  %6442 = vmatprep.subr.bf16.mxu0 %v4832_v44  ;;  %v4885_v8 = vld [vmem:[#allocation5 + $0x11f0] sm:$0xff]  ;;  %v4888_v44 = vld [vmem:[#allocation5 + $0x1208] sm:$0xff] }
 0xbbd   :  { %7098 = vmatprep.subr.bf16.mxu1 %v4834_v45  ;;  %v4890_v45 = vld [vmem:[#allocation5 + $0x1218] sm:$0xff] }
 0xbbf   :  { %6443 = vmatpush1.bf16.msra.mxu0 %v4831_v46  ;;  %v11402_v46 = vrot.slane %v11389_v33, %v11290_v22  ;;  %v4893_v33 = vld [vmem:[#allocation5 + $0x1230] sm:$0xff] }
 0xbc0   :  { %7099 = vmatpush1.bf16.msra.mxu1 %v4833_v47  ;;  %6444 = vmatprep.subr.bf16.mxu0 %v4836_v48  ;;  %v4887_v47 = vld [vmem:[#allocation5 + $0x1200] sm:$0xff]  ;;  %v4889_v48 = vld [vmem:[#allocation5 + $0x1210] sm:$0xff] }
 0xbc1   :  { %7100 = vmatprep.subr.bf16.mxu1 %v4838_v51  ;;  %v6027_v51 = vcombine.high %v11396_v38, %v11396_v38  ;;  %v4897_v38 = vld [vmem:[#allocation5 + $0x1250] sm:$0xff] }
 0xbc3   :  { %6445 = vmatpush1.bf16.msra.mxu0 %v4835_v52  ;;  %v4892_v52 = vld [vmem:[#allocation5 + $0x1228] sm:$0xff] }
 0xbc4   :  { %7101 = vmatpush1.bf16.msra.mxu1 %v4837_v53  ;;  %6446 = vmatprep.subr.bf16.mxu0 %v4840_v54  ;;  %v4894_v53 = vld [vmem:[#allocation5 + $0x1238] sm:$0xff]  ;;  %v4891_v54 = vld [vmem:[#allocation5 + $0x1220] sm:$0xff] }
 0xbc5   :  { %7102 = vmatprep.subr.bf16.mxu1 %v4842_v56  ;;  %v4896_v56 = vld [vmem:[#allocation5 + $0x1248] sm:$0xff] }
 0xbc7   :  { %6447 = vmatpush1.bf16.msra.mxu0 %v4839_v36  ;;  %v4898_v36 = vld [vmem:[#allocation5 + $0x1258] sm:$0xff] }
 0xbc8   :  { %7103 = vmatpush1.bf16.msra.mxu1 %v4841_v57  ;;  %6448 = vmatprep.subr.bf16.mxu0 %v4844_v58  ;;  %v4895_v57 = vld [vmem:[#allocation5 + $0x1240] sm:$0xff]  ;;  %v4900_v58 = vld [vmem:[#allocation5 + $0x1268] sm:$0xff] }
 0xbc9   :  { %7104 = vmatprep.subr.bf16.mxu1 %v4846_v59  ;;  %v4902_v59 = vld [vmem:[#allocation5 + $0x1278] sm:$0xff] }
 0xbcb   :  { %6449 = vmatpush1.bf16.msra.mxu0 %v4843_v29  ;;  %v4899_v29 = vld [vmem:[#allocation5 + $0x1260] sm:$0xff] }
 0xbcc   :  { %7105 = vmatpush1.bf16.msra.mxu1 %v4845_v5  ;;  %6450 = vmatprep.subr.bf16.mxu0 %v4848_v61  ;;  %v4901_v5 = vld [vmem:[#allocation5 + $0x1270] sm:$0xff]  ;;  %v4904_v61 = vld [vmem:[#allocation5 + $0x1288] sm:$0xff] }
 0xbcd   :  { %7106 = vmatprep.subr.bf16.mxu1 %v4850_v63  ;;  %v4906_v63 = vld [vmem:[#allocation5 + $0x1298] sm:$0xff] }
 0xbcf   :  { %6451 = vmatpush1.bf16.msra.mxu0 %v4847_v0  ;;  %v4903_v0 = vld [vmem:[#allocation5 + $0x1280] sm:$0xff] }
 0xbd0   :  { %7107 = vmatpush1.bf16.msra.mxu1 %v4849_v1  ;;  %6452 = vmatprep.subr.bf16.mxu0 %v4852_v50  ;;  %v4905_v1 = vld [vmem:[#allocation5 + $0x1290] sm:$0xff]  ;;  %v4908_v50 = vld [vmem:[#allocation5 + $0x12a8] sm:$0xff] }
 0xbd1   :  { %7108 = vmatprep.subr.bf16.mxu1 %v4854_v2  ;;  %v4910_v2 = vld [vmem:[#allocation5 + $0x12b8] sm:$0xff] }
 0xbd3   :  { %6453 = vmatpush1.bf16.msra.mxu0 %v4851_v3  ;;  %v4907_v3 = vld [vmem:[#allocation5 + $0x12a0] sm:$0xff] }
 0xbd4   :  { %7109 = vmatpush1.bf16.msra.mxu1 %v4853_v4  ;;  %6454 = vmatprep.subr.bf16.mxu0 %v4856_v6  ;;  %v4909_v4 = vld [vmem:[#allocation5 + $0x12b0] sm:$0xff]  ;;  %v4912_v6 = vld [vmem:[#allocation5 + $0x12c8] sm:$0xff] }
 0xbd5   :  { %7110 = vmatprep.subr.bf16.mxu1 %v4858_v9  ;;  %v4914_v9 = vld [vmem:[#allocation5 + $0x12d8] sm:$0xff] }
 0xbd7   :  { %6455 = vmatpush1.bf16.msra.mxu0 %v4855_v10  ;;  %v4911_v10 = vld [vmem:[#allocation5 + $0x12c0] sm:$0xff] }
 0xbd8   :  { %7111 = vmatpush1.bf16.msra.mxu1 %v4857_v13  ;;  %6456 = vmatprep.subr.bf16.mxu0 %v4860_v55  ;;  %v4913_v13 = vld [vmem:[#allocation5 + $0x12d0] sm:$0xff]  ;;  %v4916_v55 = vld [vmem:[#allocation5 + $0x12e8] sm:$0xff] }
 0xbd9   :  { %7112 = vmatprep.subr.bf16.mxu1 %v4862_v16  ;;  %v4918_v16 = vld [vmem:[#allocation5 + $0x12f8] sm:$0xff] }
 0xbdb   :  { %6457 = vmatpush1.bf16.msra.mxu0 %v4859_v17  ;;  %v4915_v17 = vld [vmem:[#allocation5 + $0x12e0] sm:$0xff] }
 0xbdc   :  { %7113 = vmatpush1.bf16.msra.mxu1 %v4861_v18  ;;  %6458 = vmatprep.subr.bf16.mxu0 %v4864_v49  ;;  %v4917_v18 = vld [vmem:[#allocation5 + $0x12f0] sm:$0xff]  ;;  %v4920_v49 = vld [vmem:[#allocation5 + $0x1308] sm:$0xff] }
 0xbdd   :  { %7114 = vmatprep.subr.bf16.mxu1 %v4866_v62  ;;  %v4922_v62 = vld [vmem:[#allocation5 + $0x1318] sm:$0xff] }
 0xbdf   :  { %6459 = vmatpush1.bf16.msra.mxu0 %v4863_v19  ;;  %v4919_v19 = vld [vmem:[#allocation5 + $0x1300] sm:$0xff] }
 0xbe0   :  { %7115 = vmatpush1.bf16.msra.mxu1 %v4865_v20  ;;  %6460 = vmatprep.subr.bf16.mxu0 %v4868_v24  ;;  %v4921_v20 = vld [vmem:[#allocation5 + $0x1310] sm:$0xff]  ;;  %v4924_v24 = vld [vmem:[#allocation5 + $0x1328] sm:$0xff] }
 0xbe1   :  { %7116 = vmatprep.subr.bf16.mxu1 %v4870_v26  ;;  %v4926_v26 = vld [vmem:[#allocation5 + $0x1338] sm:$0xff] }
 0xbe3   :  { %6461 = vmatpush1.bf16.msra.mxu0 %v4867_v7  ;;  %v4923_v7 = vld [vmem:[#allocation5 + $0x1320] sm:$0xff] }
 0xbe4   :  { %7117 = vmatpush1.bf16.msra.mxu1 %v4869_v11  ;;  %6462 = vmatprep.subr.bf16.mxu0 %v4872_v28  ;;  %v4925_v11 = vld [vmem:[#allocation5 + $0x1330] sm:$0xff]  ;;  %v4928_v28 = vld [vmem:[#allocation5 + $0x1348] sm:$0xff] }
 0xbe5   :  { %7118 = vmatprep.subr.bf16.mxu1 %v4874_v30  ;;  %v4930_v30 = vld [vmem:[#allocation5 + $0x1358] sm:$0xff] }
 0xbe7   :  { %6463 = vmatpush1.bf16.msra.mxu0 %v4871_v31  ;;  %v4927_v31 = vld [vmem:[#allocation5 + $0x1340] sm:$0xff] }
 0xbe8   :  { %7119 = vmatpush1.bf16.msra.mxu1 %v4873_v32  ;;  %6464 = vmatprep.subr.bf16.mxu0 %v4876_v34  ;;  %v4929_v32 = vld [vmem:[#allocation5 + $0x1350] sm:$0xff]  ;;  %v4932_v34 = vld [vmem:[#allocation5 + $0x1368] sm:$0xff] }
 0xbe9   :  { %7120 = vmatprep.subr.bf16.mxu1 %v4878_v15  ;;  %v4934_v15 = vld [vmem:[#allocation5 + $0x1378] sm:$0xff] }
 0xbeb   :  { %6465 = vmatpush1.bf16.msra.mxu0 %v4875_v35  ;;  %v4931_v35 = vld [vmem:[#allocation5 + $0x1360] sm:$0xff] }
 0xbec   :  { %7121 = vmatpush1.bf16.msra.mxu1 %v4877_v39  ;;  %6466 = vmatprep.subr.bf16.mxu0 %v4880_v12  ;;  %v4933_v39 = vld [vmem:[#allocation5 + $0x1370] sm:$0xff]  ;;  %v4936_v12 = vld [vmem:[#allocation5 + $0x1388] sm:$0xff] }
 0xbed   :  { %7122 = vmatprep.subr.bf16.mxu1 %v4882_v21  ;;  %v4938_v21 = vld [vmem:[#allocation5 + $0x1398] sm:$0xff] }
 0xbef   :  { %6467 = vmatpush1.bf16.msra.mxu0 %v4879_v14  ;;  %v4935_v14 = vld [vmem:[#allocation5 + $0x1380] sm:$0xff] }
 0xbf0   :  { %7123 = vmatpush1.bf16.msra.mxu1 %v4881_v37  ;;  %6468 = vmatprep.subr.bf16.mxu0 %v4884_v41  ;;  %v4937_v37 = vld [vmem:[#allocation5 + $0x1390] sm:$0xff]  ;;  %v4940_v41 = vld [vmem:[#allocation5 + $0x13a8] sm:$0xff] }
 0xbf1   :  { %7124 = vmatprep.subr.bf16.mxu1 %v4886_v42  ;;  %v4942_v42 = vld [vmem:[#allocation5 + $0x13b8] sm:$0xff] }
 0xbf3   :  { %6469 = vmatpush1.bf16.msra.mxu0 %v4883_v43  ;;  %v4939_v43 = vld [vmem:[#allocation5 + $0x13a0] sm:$0xff] }
 0xbf4   :  { %7125 = vmatpush1.bf16.msra.mxu1 %v4885_v8  ;;  %6479 = vmatprep.subr.bf16.mxu0 %v4888_v44  ;;  %v4941_v8 = vld [vmem:[#allocation5 + $0x13b0] sm:$0xff]  ;;  %v4944_v44 = vld [vmem:[#allocation5 + $0x13c8] sm:$0xff] }
 0xbf5   :  { %7135 = vmatprep.subr.bf16.mxu1 %v4890_v45  ;;  %v4946_v45 = vld [vmem:[#allocation5 + $0x13d8] sm:$0xff] }
 0xbf6   :  { %6471 = vmatmul.mubr.bf16.vlgmr.msra.gmra.mrb[48].mxu0 %v11402_v46 }
 0xbf7   :  { %7127 = vmatmul.mubr.bf16.vlgmr.msra.gmra.mrb[116].mxu1 %v11402_v46  ;;  %6480 = vmatpush1.bf16.msra.mxu0 %v4887_v47  ;;  %v5980_v47 = vcombine.high %v11385_v27, %v11385_v27 }
 0xbf8   :  { %6511 = vmatprep.mubr.bf16.mxu0 %v6027_v51  ;;  %7136 = vmatpush1.bf16.msra.mxu1 %v4889_v48  ;;  %v4943_v48 = vld [vmem:[#allocation5 + $0x13c0] sm:$0xff] }
 0xbf9   :  { %7167 = vmatprep.mubr.bf16.mxu1 %v6027_v51  ;;  %6481 = vmatprep.subr.bf16.mxu0 %v4892_v52  ;;  %v4945_v51 = vld [vmem:[#allocation5 + $0x13d0] sm:$0xff]  ;;  %v4948_v52 = vld [vmem:[#allocation5 + $0x13e8] sm:$0xff] }
 0xbfa   :  { %7137 = vmatprep.subr.bf16.mxu1 %v4894_v53  ;;  %v4950_v53 = vld [vmem:[#allocation5 + $0x13f8] sm:$0xff] }
 0xbfb   :  { %6482 = vmatpush1.bf16.msra.mxu0 %v4891_v54  ;;  %v11411_v54 = vrot.slane %v5980_v47, %v11290_v22  ;;  %v5000_v47 = vld [vmem:[#allocation5 + $0x1588] sm:$0xff] }
 0xbfc   :  { %7138 = vmatpush1.bf16.msra.mxu1 %v4893_v33  ;;  %6483 = vmatprep.subr.bf16.mxu0 %v4896_v56  ;;  %v4947_v33 = vld [vmem:[#allocation5 + $0x13e0] sm:$0xff]  ;;  %v4949_v56 = vld [vmem:[#allocation5 + $0x13f0] sm:$0xff] }
 0xbfd   :  { %7139 = vmatprep.subr.bf16.mxu1 %v4898_v36  ;;  %v4952_v36 = vld [vmem:[#allocation5 + $0x1408] sm:$0xff]  ;;  %v5996_v27 = vcombine.high %v11411_v54, %v11411_v54 }
 0xbff   :  { %6484 = vmatpush1.bf16.msra.mxu0 %v4895_v57  ;;  %v4954_v57 = vld [vmem:[#allocation5 + $0x1418] sm:$0xff] }
 0xc00   :  { %7140 = vmatpush1.bf16.msra.mxu1 %v4897_v38  ;;  %6485 = vmatprep.subr.bf16.mxu0 %v4900_v58  ;;  %v6025_v38 = vcombine.high %v11402_v46, %v11402_v46  ;;  %v4951_v58 = vld [vmem:[#allocation5 + $0x1400] sm:$0xff]  ;;  %v4957_v46 = vld [vmem:[#allocation5 + $0x1430] sm:$0xff] }
 0xc01   :  { %7141 = vmatprep.subr.bf16.mxu1 %v4902_v59  ;;  %v4953_v59 = vld [vmem:[#allocation5 + $0x1410] sm:$0xff] }
 0xc03   :  { %6486 = vmatpush1.bf16.msra.mxu0 %v4899_v29  ;;  %v11418_v29 = vrot.slane %v5996_v27, %v11290_v22  ;;  %v5010_v27 = vld [vmem:[#allocation5 + $0x15d8] sm:$0xff] }
 0xc04   :  { %7142 = vmatpush1.bf16.msra.mxu1 %v4901_v5  ;;  %6487 = vmatprep.subr.bf16.mxu0 %v4904_v61  ;;  %v4956_v5 = vld [vmem:[#allocation5 + $0x1428] sm:$0xff]  ;;  %v4958_v61 = vld [vmem:[#allocation5 + $0x1438] sm:$0xff] }
 0xc05   :  { %7143 = vmatprep.subr.bf16.mxu1 %v4906_v63  ;;  %v4955_v63 = vld [vmem:[#allocation5 + $0x1420] sm:$0xff] }
 0xc07   :  { %6488 = vmatpush1.bf16.msra.mxu0 %v4903_v0  ;;  %v4960_v0 = vld [vmem:[#allocation5 + $0x1448] sm:$0xff] }
 0xc08   :  { %7144 = vmatpush1.bf16.msra.mxu1 %v4905_v1  ;;  %6489 = vmatprep.subr.bf16.mxu0 %v4908_v50  ;;  %v4962_v1 = vld [vmem:[#allocation5 + $0x1458] sm:$0xff]  ;;  %v4959_v50 = vld [vmem:[#allocation5 + $0x1440] sm:$0xff] }
 0xc09   :  { %7145 = vmatprep.subr.bf16.mxu1 %v4910_v2  ;;  %v4961_v2 = vld [vmem:[#allocation5 + $0x1450] sm:$0xff] }
 0xc0b   :  { %6490 = vmatpush1.bf16.msra.mxu0 %v4907_v3  ;;  %v4964_v3 = vld [vmem:[#allocation5 + $0x1468] sm:$0xff] }
 0xc0c   :  { %7146 = vmatpush1.bf16.msra.mxu1 %v4909_v4  ;;  %6491 = vmatprep.subr.bf16.mxu0 %v4912_v6  ;;  %v4966_v4 = vld [vmem:[#allocation5 + $0x1478] sm:$0xff]  ;;  %v4963_v6 = vld [vmem:[#allocation5 + $0x1460] sm:$0xff] }
 0xc0d   :  { %7147 = vmatprep.subr.bf16.mxu1 %v4914_v9  ;;  %v4965_v9 = vld [vmem:[#allocation5 + $0x1470] sm:$0xff] }
 0xc0f   :  { %6492 = vmatpush1.bf16.msra.mxu0 %v4911_v10  ;;  %v4968_v10 = vld [vmem:[#allocation5 + $0x1488] sm:$0xff] }
 0xc10   :  { %7148 = vmatpush1.bf16.msra.mxu1 %v4913_v13  ;;  %6493 = vmatprep.subr.bf16.mxu0 %v4916_v55  ;;  %v4970_v13 = vld [vmem:[#allocation5 + $0x1498] sm:$0xff]  ;;  %v4967_v55 = vld [vmem:[#allocation5 + $0x1480] sm:$0xff] }
 0xc11   :  { %7149 = vmatprep.subr.bf16.mxu1 %v4918_v16  ;;  %v4969_v16 = vld [vmem:[#allocation5 + $0x1490] sm:$0xff] }
 0xc13   :  { %6494 = vmatpush1.bf16.msra.mxu0 %v4915_v17  ;;  %v4972_v17 = vld [vmem:[#allocation5 + $0x14a8] sm:$0xff] }
 0xc14   :  { %7150 = vmatpush1.bf16.msra.mxu1 %v4917_v18  ;;  %6495 = vmatprep.subr.bf16.mxu0 %v4920_v49  ;;  %v4974_v18 = vld [vmem:[#allocation5 + $0x14b8] sm:$0xff]  ;;  %v4971_v49 = vld [vmem:[#allocation5 + $0x14a0] sm:$0xff] }
 0xc15   :  { %7151 = vmatprep.subr.bf16.mxu1 %v4922_v62  ;;  %v4973_v62 = vld [vmem:[#allocation5 + $0x14b0] sm:$0xff] }
 0xc17   :  { %6496 = vmatpush1.bf16.msra.mxu0 %v4919_v19  ;;  %v4976_v19 = vld [vmem:[#allocation5 + $0x14c8] sm:$0xff] }
 0xc18   :  { %7152 = vmatpush1.bf16.msra.mxu1 %v4921_v20  ;;  %6497 = vmatprep.subr.bf16.mxu0 %v4924_v24  ;;  %v4978_v20 = vld [vmem:[#allocation5 + $0x14d8] sm:$0xff]  ;;  %v4975_v24 = vld [vmem:[#allocation5 + $0x14c0] sm:$0xff] }
 0xc19   :  { %7153 = vmatprep.subr.bf16.mxu1 %v4926_v26  ;;  %v4977_v26 = vld [vmem:[#allocation5 + $0x14d0] sm:$0xff] }
 0xc1b   :  { %6498 = vmatpush1.bf16.msra.mxu0 %v4923_v7  ;;  %v4980_v7 = vld [vmem:[#allocation5 + $0x14e8] sm:$0xff] }
 0xc1c   :  { %7154 = vmatpush1.bf16.msra.mxu1 %v4925_v11  ;;  %6499 = vmatprep.subr.bf16.mxu0 %v4928_v28  ;;  %v4982_v11 = vld [vmem:[#allocation5 + $0x14f8] sm:$0xff]  ;;  %v4979_v28 = vld [vmem:[#allocation5 + $0x14e0] sm:$0xff] }
 0xc1d   :  { %7155 = vmatprep.subr.bf16.mxu1 %v4930_v30  ;;  %v4981_v30 = vld [vmem:[#allocation5 + $0x14f0] sm:$0xff] }
 0xc1f   :  { %6500 = vmatpush1.bf16.msra.mxu0 %v4927_v31  ;;  %v4984_v31 = vld [vmem:[#allocation5 + $0x1508] sm:$0xff] }
 0xc20   :  { %7156 = vmatpush1.bf16.msra.mxu1 %v4929_v32  ;;  %6501 = vmatprep.subr.bf16.mxu0 %v4932_v34  ;;  %v4986_v32 = vld [vmem:[#allocation5 + $0x1518] sm:$0xff]  ;;  %v4983_v34 = vld [vmem:[#allocation5 + $0x1500] sm:$0xff] }
 0xc21   :  { %7157 = vmatprep.subr.bf16.mxu1 %v4934_v15  ;;  %v4985_v15 = vld [vmem:[#allocation5 + $0x1510] sm:$0xff] }
 0xc23   :  { %6502 = vmatpush1.bf16.msra.mxu0 %v4931_v35  ;;  %v4988_v35 = vld [vmem:[#allocation5 + $0x1528] sm:$0xff] }
 0xc24   :  { %7158 = vmatpush1.bf16.msra.mxu1 %v4933_v39  ;;  %6503 = vmatprep.subr.bf16.mxu0 %v4936_v12  ;;  %v4990_v39 = vld [vmem:[#allocation5 + $0x1538] sm:$0xff]  ;;  %v4987_v12 = vld [vmem:[#allocation5 + $0x1520] sm:$0xff] }
 0xc25   :  { %7159 = vmatprep.subr.bf16.mxu1 %v4938_v21  ;;  %v4989_v21 = vld [vmem:[#allocation5 + $0x1530] sm:$0xff] }
 0xc27   :  { %6504 = vmatpush1.bf16.msra.mxu0 %v4935_v14  ;;  %v4992_v14 = vld [vmem:[#allocation5 + $0x1548] sm:$0xff] }
 0xc28   :  { %7160 = vmatpush1.bf16.msra.mxu1 %v4937_v37  ;;  %6505 = vmatprep.subr.bf16.mxu0 %v4940_v41  ;;  %v4994_v37 = vld [vmem:[#allocation5 + $0x1558] sm:$0xff]  ;;  %v4991_v41 = vld [vmem:[#allocation5 + $0x1540] sm:$0xff] }
 0xc29   :  { %7161 = vmatprep.subr.bf16.mxu1 %v4942_v42  ;;  %v4993_v42 = vld [vmem:[#allocation5 + $0x1550] sm:$0xff] }
 0xc2b   :  { %6506 = vmatpush1.bf16.msra.mxu0 %v4939_v43  ;;  %v4996_v43 = vld [vmem:[#allocation5 + $0x1568] sm:$0xff] }
 0xc2c   :  { %7162 = vmatpush1.bf16.msra.mxu1 %v4941_v8  ;;  %6507 = vmatprep.subr.bf16.mxu0 %v4944_v44  ;;  %v4998_v8 = vld [vmem:[#allocation5 + $0x1578] sm:$0xff]  ;;  %v4995_v44 = vld [vmem:[#allocation5 + $0x1560] sm:$0xff] }
 0xc2d   :  { %7163 = vmatprep.subr.bf16.mxu1 %v4946_v45  ;;  %v4997_v45 = vld [vmem:[#allocation5 + $0x1570] sm:$0xff] }
 0xc2f   :  { %6508 = vmatpush1.bf16.msra.mxu0 %v4943_v48  ;;  %v5002_v48 = vld [vmem:[#allocation5 + $0x1598] sm:$0xff] }
 0xc30   :  { %7164 = vmatpush1.bf16.msra.mxu1 %v4945_v51  ;;  %6509 = vmatprep.subr.bf16.mxu0 %v4948_v52  ;;  %v4999_v51 = vld [vmem:[#allocation5 + $0x1580] sm:$0xff]  ;;  %v5001_v52 = vld [vmem:[#allocation5 + $0x1590] sm:$0xff] }
 0xc31   :  { %7165 = vmatprep.subr.bf16.mxu1 %v4950_v53  ;;  %v5004_v53 = vld [vmem:[#allocation5 + $0x15a8] sm:$0xff] }
 0xc33   :  { %6510 = vmatpush1.bf16.msra.mxu0 %v4947_v33  ;;  %v5006_v33 = vld [vmem:[#allocation5 + $0x15b8] sm:$0xff] }
 0xc34   :  { %7166 = vmatpush1.bf16.msra.mxu1 %v4949_v56  ;;  %6520 = vmatprep.subr.bf16.mxu0 %v4952_v36  ;;  %v5003_v56 = vld [vmem:[#allocation5 + $0x15a0] sm:$0xff]  ;;  %v5005_v36 = vld [vmem:[#allocation5 + $0x15b0] sm:$0xff] }
 0xc35   :  { %7176 = vmatprep.subr.bf16.mxu1 %v4954_v57  ;;  %v5008_v57 = vld [vmem:[#allocation5 + $0x15c8] sm:$0xff] }
 0xc36   :  { %6512 = vmatmul.mubr.bf16.vlgmr.msra.gmra.mrb[48].mxu0 %v6025_v38 }
 0xc37   :  { %7168 = vmatmul.mubr.bf16.vlgmr.msra.gmra.mrb[116].mxu1 %v6025_v38  ;;  %6521 = vmatpush1.bf16.msra.mxu0 %v4951_v58  ;;  %v5007_v38 = vld [vmem:[#allocation5 + $0x15c0] sm:$0xff]  ;;  %v5009_v58 = vld [vmem:[#allocation5 + $0x15d0] sm:$0xff] }
 0xc38   :  { %6552 = vmatprep.mubr.bf16.mxu0 %v11418_v29  ;;  %7177 = vmatpush1.bf16.msra.mxu1 %v4953_v59  ;;  %v5012_v59 = vld [vmem:[#allocation5 + $0x15e8] sm:$0xff] }
 0xc39   :  { %7208 = vmatprep.mubr.bf16.mxu1 %v11418_v29  ;;  %6522 = vmatprep.subr.bf16.mxu0 %v4956_v5  ;;  %v5014_v5 = vld [vmem:[#allocation5 + $0x15f8] sm:$0xff] }
 0xc3a   :  { %7178 = vmatprep.subr.bf16.mxu1 %v4958_v61  ;;  %v5011_v61 = vld [vmem:[#allocation5 + $0x15e0] sm:$0xff] }
 0xc3b   :  { %6523 = vmatpush1.bf16.msra.mxu0 %v4955_v63  ;;  %v5013_v63 = vld [vmem:[#allocation5 + $0x15f0] sm:$0xff] }
 0xc3c   :  { %7179 = vmatpush1.bf16.msra.mxu1 %v4957_v46  ;;  %6524 = vmatprep.subr.bf16.mxu0 %v4960_v0  ;;  %v5016_v46 = vld [vmem:[#allocation5 + $0x1608] sm:$0xff]  ;;  %v5018_v0 = vld [vmem:[#allocation5 + $0x1618] sm:$0xff] }
 0xc3d   :  { %7180 = vmatprep.subr.bf16.mxu1 %v4962_v1  ;;  %v11424_v1 = vrot.slane %v11411_v54, %v11290_v22  ;;  %v5021_v54 = vld [vmem:[#allocation5 + $0x1630] sm:$0xff] }
 0xc3f   :  { %6525 = vmatpush1.bf16.msra.mxu0 %v4959_v50  ;;  %v5015_v50 = vld [vmem:[#allocation5 + $0x1600] sm:$0xff] }
 0xc40   :  { %7181 = vmatpush1.bf16.msra.mxu1 %v4961_v2  ;;  %6526 = vmatprep.subr.bf16.mxu0 %v4964_v3  ;;  %v5017_v2 = vld [vmem:[#allocation5 + $0x1610] sm:$0xff]  ;;  %v6028_v3 = vcombine.high %v11418_v29, %v11418_v29 }
 0xc41   :  { %7182 = vmatprep.subr.bf16.mxu1 %v4966_v4  ;;  %v5020_v4 = vld [vmem:[#allocation5 + $0x1628] sm:$0xff]  ;;  %v5025_v29 = vld [vmem:[#allocation5 + $0x1650] sm:$0xff] }
 0xc43   :  { %6527 = vmatpush1.bf16.msra.mxu0 %v4963_v6  ;;  %v5022_v6 = vld [vmem:[#allocation5 + $0x1638] sm:$0xff] }
 0xc44   :  { %7183 = vmatpush1.bf16.msra.mxu1 %v4965_v9  ;;  %6528 = vmatprep.subr.bf16.mxu0 %v4968_v10  ;;  %v5019_v9 = vld [vmem:[#allocation5 + $0x1620] sm:$0xff]  ;;  %v5024_v10 = vld [vmem:[#allocation5 + $0x1648] sm:$0xff] }
 0xc45   :  { %7184 = vmatprep.subr.bf16.mxu1 %v4970_v13  ;;  %v5026_v13 = vld [vmem:[#allocation5 + $0x1658] sm:$0xff] }
 0xc47   :  { %6529 = vmatpush1.bf16.msra.mxu0 %v4967_v55  ;;  %v5023_v55 = vld [vmem:[#allocation5 + $0x1640] sm:$0xff] }
 0xc48   :  { %7185 = vmatpush1.bf16.msra.mxu1 %v4969_v16  ;;  %6530 = vmatprep.subr.bf16.mxu0 %v4972_v17  ;;  %v5028_v16 = vld [vmem:[#allocation5 + $0x1668] sm:$0xff]  ;;  %v5030_v17 = vld [vmem:[#allocation5 + $0x1678] sm:$0xff] }
 0xc49   :  { %7186 = vmatprep.subr.bf16.mxu1 %v4974_v18  ;;  %v5027_v18 = vld [vmem:[#allocation5 + $0x1660] sm:$0xff] }
 0xc4b   :  { %6531 = vmatpush1.bf16.msra.mxu0 %v4971_v49  ;;  %v5029_v49 = vld [vmem:[#allocation5 + $0x1670] sm:$0xff] }
 0xc4c   :  { %7187 = vmatpush1.bf16.msra.mxu1 %v4973_v62  ;;  %6532 = vmatprep.subr.bf16.mxu0 %v4976_v19  ;;  %v5032_v62 = vld [vmem:[#allocation5 + $0x1688] sm:$0xff]  ;;  %v5034_v19 = vld [vmem:[#allocation5 + $0x1698] sm:$0xff] }
 0xc4d   :  { %7188 = vmatprep.subr.bf16.mxu1 %v4978_v20  ;;  %v5031_v20 = vld [vmem:[#allocation5 + $0x1680] sm:$0xff] }
 0xc4f   :  { %6533 = vmatpush1.bf16.msra.mxu0 %v4975_v24  ;;  %v5033_v24 = vld [vmem:[#allocation5 + $0x1690] sm:$0xff] }
 0xc50   :  { %7189 = vmatpush1.bf16.msra.mxu1 %v4977_v26  ;;  %6534 = vmatprep.subr.bf16.mxu0 %v4980_v7  ;;  %v5036_v26 = vld [vmem:[#allocation5 + $0x16a8] sm:$0xff]  ;;  %v5038_v7 = vld [vmem:[#allocation5 + $0x16b8] sm:$0xff] }
 0xc51   :  { %7190 = vmatprep.subr.bf16.mxu1 %v4982_v11  ;;  %v5035_v11 = vld [vmem:[#allocation5 + $0x16a0] sm:$0xff] }
 0xc53   :  { %6535 = vmatpush1.bf16.msra.mxu0 %v4979_v28  ;;  %v5037_v28 = vld [vmem:[#allocation5 + $0x16b0] sm:$0xff] }
 0xc54   :  { %7191 = vmatpush1.bf16.msra.mxu1 %v4981_v30  ;;  %6536 = vmatprep.subr.bf16.mxu0 %v4984_v31  ;;  %v5040_v30 = vld [vmem:[#allocation5 + $0x16c8] sm:$0xff]  ;;  %v5042_v31 = vld [vmem:[#allocation5 + $0x16d8] sm:$0xff] }
 0xc55   :  { %7192 = vmatprep.subr.bf16.mxu1 %v4986_v32  ;;  %v5039_v32 = vld [vmem:[#allocation5 + $0x16c0] sm:$0xff] }
 0xc57   :  { %6537 = vmatpush1.bf16.msra.mxu0 %v4983_v34  ;;  %v5041_v34 = vld [vmem:[#allocation5 + $0x16d0] sm:$0xff] }
 0xc58   :  { %7193 = vmatpush1.bf16.msra.mxu1 %v4985_v15  ;;  %6538 = vmatprep.subr.bf16.mxu0 %v4988_v35  ;;  %v5044_v15 = vld [vmem:[#allocation5 + $0x16e8] sm:$0xff]  ;;  %v5046_v35 = vld [vmem:[#allocation5 + $0x16f8] sm:$0xff] }
 0xc59   :  { %7194 = vmatprep.subr.bf16.mxu1 %v4990_v39  ;;  %v5043_v39 = vld [vmem:[#allocation5 + $0x16e0] sm:$0xff] }
 0xc5b   :  { %6539 = vmatpush1.bf16.msra.mxu0 %v4987_v12  ;;  %v5045_v12 = vld [vmem:[#allocation5 + $0x16f0] sm:$0xff] }
 0xc5c   :  { %7195 = vmatpush1.bf16.msra.mxu1 %v4989_v21  ;;  %6540 = vmatprep.subr.bf16.mxu0 %v4992_v14  ;;  %v5048_v21 = vld [vmem:[#allocation5 + $0x1708] sm:$0xff]  ;;  %v5050_v14 = vld [vmem:[#allocation5 + $0x1718] sm:$0xff] }
 0xc5d   :  { %7196 = vmatprep.subr.bf16.mxu1 %v4994_v37  ;;  %v5047_v37 = vld [vmem:[#allocation5 + $0x1700] sm:$0xff] }
 0xc5f   :  { %6541 = vmatpush1.bf16.msra.mxu0 %v4991_v41  ;;  %v5049_v41 = vld [vmem:[#allocation5 + $0x1710] sm:$0xff] }
 0xc60   :  { %7197 = vmatpush1.bf16.msra.mxu1 %v4993_v42  ;;  %6542 = vmatprep.subr.bf16.mxu0 %v4996_v43  ;;  %v5052_v42 = vld [vmem:[#allocation5 + $0x1728] sm:$0xff]  ;;  %v5054_v43 = vld [vmem:[#allocation5 + $0x1738] sm:$0xff] }
 0xc61   :  { %7198 = vmatprep.subr.bf16.mxu1 %v4998_v8  ;;  %v5051_v8 = vld [vmem:[#allocation5 + $0x1720] sm:$0xff] }
 0xc63   :  { %6543 = vmatpush1.bf16.msra.mxu0 %v4995_v44  ;;  %v5053_v44 = vld [vmem:[#allocation5 + $0x1730] sm:$0xff] }
 0xc64   :  { %7199 = vmatpush1.bf16.msra.mxu1 %v4997_v45  ;;  %6544 = vmatprep.subr.bf16.mxu0 %v5000_v47  ;;  %v5056_v45 = vld [vmem:[#allocation5 + $0x1748] sm:$0xff]  ;;  %v5058_v47 = vld [vmem:[#allocation5 + $0x1758] sm:$0xff] }
 0xc65   :  { %7200 = vmatprep.subr.bf16.mxu1 %v5002_v48  ;;  %v5055_v48 = vld [vmem:[#allocation5 + $0x1740] sm:$0xff] }
 0xc67   :  { %6545 = vmatpush1.bf16.msra.mxu0 %v4999_v51  ;;  %v5057_v51 = vld [vmem:[#allocation5 + $0x1750] sm:$0xff] }
 0xc68   :  { %7201 = vmatpush1.bf16.msra.mxu1 %v5001_v52  ;;  %6546 = vmatprep.subr.bf16.mxu0 %v5004_v53  ;;  %v5060_v52 = vld [vmem:[#allocation5 + $0x1768] sm:$0xff]  ;;  %v5062_v53 = vld [vmem:[#allocation5 + $0x1778] sm:$0xff] }
 0xc69   :  { %7202 = vmatprep.subr.bf16.mxu1 %v5006_v33  ;;  %v5059_v33 = vld [vmem:[#allocation5 + $0x1760] sm:$0xff] }
 0xc6b   :  { %6547 = vmatpush1.bf16.msra.mxu0 %v5003_v56  ;;  %v5061_v56 = vld [vmem:[#allocation5 + $0x1770] sm:$0xff] }
 0xc6c   :  { %7203 = vmatpush1.bf16.msra.mxu1 %v5005_v36  ;;  %6548 = vmatprep.subr.bf16.mxu0 %v5008_v57  ;;  %v5064_v36 = vld [vmem:[#allocation5 + $0x1788] sm:$0xff]  ;;  %v5066_v57 = vld [vmem:[#allocation5 + $0x1798] sm:$0xff] }
 0xc6d   :  { %7204 = vmatprep.subr.bf16.mxu1 %v5010_v27  ;;  %v5063_v27 = vld [vmem:[#allocation5 + $0x1780] sm:$0xff] }
 0xc6f   :  { %6549 = vmatpush1.bf16.msra.mxu0 %v5007_v38  ;;  %v5065_v38 = vld [vmem:[#allocation5 + $0x1790] sm:$0xff] }
 0xc70   :  { %7205 = vmatpush1.bf16.msra.mxu1 %v5009_v58  ;;  %6550 = vmatprep.subr.bf16.mxu0 %v5012_v59  ;;  %v5068_v58 = vld [vmem:[#allocation5 + $0x17a8] sm:$0xff]  ;;  %v5070_v59 = vld [vmem:[#allocation5 + $0x17b8] sm:$0xff] }
 0xc71   :  { %7206 = vmatprep.subr.bf16.mxu1 %v5014_v5  ;;  %v5067_v5 = vld [vmem:[#allocation5 + $0x17a0] sm:$0xff] }
 0xc73   :  { %6551 = vmatpush1.bf16.msra.mxu0 %v5011_v61  ;;  %v5069_v61 = vld [vmem:[#allocation5 + $0x17b0] sm:$0xff] }
 0xc74   :  { %7207 = vmatpush1.bf16.msra.mxu1 %v5013_v63  ;;  %6561 = vmatprep.subr.bf16.mxu0 %v5016_v46  ;;  %v5072_v63 = vld [vmem:[#allocation5 + $0x17c8] sm:$0xff]  ;;  %v5074_v46 = vld [vmem:[#allocation5 + $0x17d8] sm:$0xff] }
 0xc75   :  { %7217 = vmatprep.subr.bf16.mxu1 %v5018_v0  ;;  %v11430_v0 = vld [vmem:[#allocation4 + $0x18] sm:$0xff] }
 0xc76   :  { %6553 = vmatmul.mubr.bf16.vlgmr.msra.gmra.mrb[48].mxu0 %v11424_v1 }
 0xc77   :  { %7209 = vmatmul.mubr.bf16.vlgmr.msra.gmra.mrb[116].mxu1 %v11424_v1  ;;  %6562 = vmatpush1.bf16.msra.mxu0 %v5015_v50  ;;  %v5071_v50 = vld [vmem:[#allocation5 + $0x17c0] sm:$0xff] }
 0xc78   :  { %6593 = vmatprep.mubr.bf16.mxu0 %v6028_v3  ;;  %7218 = vmatpush1.bf16.msra.mxu1 %v5017_v2  ;;  %v5073_v2 = vld [vmem:[#allocation5 + $0x17d0] sm:$0xff] }
 0xc79   :  { %7249 = vmatprep.mubr.bf16.mxu1 %v6028_v3  ;;  %6563 = vmatprep.subr.bf16.mxu0 %v5020_v4  ;;  %v5076_v3 = vld [vmem:[#allocation5 + $0x17e8] sm:$0xff]  ;;  %v5078_v4 = vld [vmem:[#allocation5 + $0x17f8] sm:$0xff] }
 0xc7a   :  { %7219 = vmatprep.subr.bf16.mxu1 %v5022_v6  ;;  %v11434_v6 = vrot.slane %v11430_v0, %v11290_v22 }
 0xc7b   :  { %6564 = vmatpush1.bf16.msra.mxu0 %v5019_v9  ;;  %v5075_v9 = vld [vmem:[#allocation5 + $0x17e0] sm:$0xff] }
 0xc7c   :  { %7220 = vmatpush1.bf16.msra.mxu1 %v5021_v54  ;;  %6565 = vmatprep.subr.bf16.mxu0 %v5024_v10  ;;  %v5077_v54 = vld [vmem:[#allocation5 + $0x17f0] sm:$0xff]  ;;  %v5080_v10 = vld [vmem:[#allocation5 + $0x1808] sm:$0xff] }
 0xc7d   :  { %7221 = vmatprep.subr.bf16.mxu1 %v5026_v13  ;;  %v5082_v13 = vld [vmem:[#allocation5 + $0x1818] sm:$0xff] }
 0xc7f   :  { %6566 = vmatpush1.bf16.msra.mxu0 %v5023_v55  ;;  %v6044_v55 = vcombine.high %v11434_v6, %v11434_v6 }
 0xc80   :  { %7222 = vmatpush1.bf16.msra.mxu1 %v5025_v29  ;;  %6567 = vmatprep.subr.bf16.mxu0 %v5028_v16  ;;  %v6026_v29 = vcombine.high %v11424_v1, %v11424_v1  ;;  %v5079_v16 = vld [vmem:[#allocation5 + $0x1800] sm:$0xff]  ;;  %v5085_v1 = vld [vmem:[#allocation5 + $0x1830] sm:$0xff] }
 0xc81   :  { %7223 = vmatprep.subr.bf16.mxu1 %v5030_v17  ;;  %v5081_v17 = vld [vmem:[#allocation5 + $0x1810] sm:$0xff] }
 0xc83   :  { %6568 = vmatpush1.bf16.msra.mxu0 %v5027_v18  ;;  %v11441_v18 = vrot.slane %v6044_v55, %v11290_v22  ;;  %v5136_v55 = vld [vmem:[#allocation5 + $0x19c8] sm:$0xff] }
 0xc84   :  { %7224 = vmatpush1.bf16.msra.mxu1 %v5029_v49  ;;  %6569 = vmatprep.subr.bf16.mxu0 %v5032_v62  ;;  %v5084_v49 = vld [vmem:[#allocation5 + $0x1828] sm:$0xff]  ;;  %v5086_v62 = vld [vmem:[#allocation5 + $0x1838] sm:$0xff] }
 0xc85   :  { %7225 = vmatprep.subr.bf16.mxu1 %v5034_v19  ;;  %v5083_v19 = vld [vmem:[#allocation5 + $0x1820] sm:$0xff] }
 0xc87   :  { %6570 = vmatpush1.bf16.msra.mxu0 %v5031_v20  ;;  %v5088_v20 = vld [vmem:[#allocation5 + $0x1848] sm:$0xff] }
 0xc88   :  { %7226 = vmatpush1.bf16.msra.mxu1 %v5033_v24  ;;  %6571 = vmatprep.subr.bf16.mxu0 %v5036_v26  ;;  %v5090_v24 = vld [vmem:[#allocation5 + $0x1858] sm:$0xff]  ;;  %v5087_v26 = vld [vmem:[#allocation5 + $0x1840] sm:$0xff] }
 0xc89   :  { %7227 = vmatprep.subr.bf16.mxu1 %v5038_v7  ;;  %v5089_v7 = vld [vmem:[#allocation5 + $0x1850] sm:$0xff] }
 0xc8b   :  { %6572 = vmatpush1.bf16.msra.mxu0 %v5035_v11  ;;  %v5092_v11 = vld [vmem:[#allocation5 + $0x1868] sm:$0xff] }
 0xc8c   :  { %7228 = vmatpush1.bf16.msra.mxu1 %v5037_v28  ;;  %6573 = vmatprep.subr.bf16.mxu0 %v5040_v30  ;;  %v5094_v28 = vld [vmem:[#allocation5 + $0x1878] sm:$0xff]  ;;  %v5091_v30 = vld [vmem:[#allocation5 + $0x1860] sm:$0xff] }
 0xc8d   :  { %7229 = vmatprep.subr.bf16.mxu1 %v5042_v31  ;;  %v5093_v31 = vld [vmem:[#allocation5 + $0x1870] sm:$0xff] }
 0xc8f   :  { %6574 = vmatpush1.bf16.msra.mxu0 %v5039_v32  ;;  %v5096_v32 = vld [vmem:[#allocation5 + $0x1888] sm:$0xff] }
 0xc90   :  { %7230 = vmatpush1.bf16.msra.mxu1 %v5041_v34  ;;  %6575 = vmatprep.subr.bf16.mxu0 %v5044_v15  ;;  %v5098_v34 = vld [vmem:[#allocation5 + $0x1898] sm:$0xff]  ;;  %v5095_v15 = vld [vmem:[#allocation5 + $0x1880] sm:$0xff] }
 0xc91   :  { %7231 = vmatprep.subr.bf16.mxu1 %v5046_v35  ;;  %v5097_v35 = vld [vmem:[#allocation5 + $0x1890] sm:$0xff] }
 0xc93   :  { %6576 = vmatpush1.bf16.msra.mxu0 %v5043_v39  ;;  %v5100_v39 = vld [vmem:[#allocation5 + $0x18a8] sm:$0xff] }
 0xc94   :  { %7232 = vmatpush1.bf16.msra.mxu1 %v5045_v12  ;;  %6577 = vmatprep.subr.bf16.mxu0 %v5048_v21  ;;  %v5102_v12 = vld [vmem:[#allocation5 + $0x18b8] sm:$0xff]  ;;  %v5099_v21 = vld [vmem:[#allocation5 + $0x18a0] sm:$0xff] }
 0xc95   :  { %7233 = vmatprep.subr.bf16.mxu1 %v5050_v14  ;;  %v5101_v14 = vld [vmem:[#allocation5 + $0x18b0] sm:$0xff] }
 0xc97   :  { %6578 = vmatpush1.bf16.msra.mxu0 %v5047_v37  ;;  %v5104_v37 = vld [vmem:[#allocation5 + $0x18c8] sm:$0xff] }
 0xc98   :  { %7234 = vmatpush1.bf16.msra.mxu1 %v5049_v41  ;;  %6579 = vmatprep.subr.bf16.mxu0 %v5052_v42  ;;  %v5106_v41 = vld [vmem:[#allocation5 + $0x18d8] sm:$0xff]  ;;  %v5103_v42 = vld [vmem:[#allocation5 + $0x18c0] sm:$0xff] }
 0xc99   :  { %7235 = vmatprep.subr.bf16.mxu1 %v5054_v43  ;;  %v5105_v43 = vld [vmem:[#allocation5 + $0x18d0] sm:$0xff] }
 0xc9b   :  { %6580 = vmatpush1.bf16.msra.mxu0 %v5051_v8  ;;  %v5108_v8 = vld [vmem:[#allocation5 + $0x18e8] sm:$0xff] }
 0xc9c   :  { %7236 = vmatpush1.bf16.msra.mxu1 %v5053_v44  ;;  %6581 = vmatprep.subr.bf16.mxu0 %v5056_v45  ;;  %v5110_v44 = vld [vmem:[#allocation5 + $0x18f8] sm:$0xff]  ;;  %v5107_v45 = vld [vmem:[#allocation5 + $0x18e0] sm:$0xff] }
 0xc9d   :  { %7237 = vmatprep.subr.bf16.mxu1 %v5058_v47  ;;  %v5109_v47 = vld [vmem:[#allocation5 + $0x18f0] sm:$0xff] }
 0xc9f   :  { %6582 = vmatpush1.bf16.msra.mxu0 %v5055_v48  ;;  %v5112_v48 = vld [vmem:[#allocation5 + $0x1908] sm:$0xff] }
 0xca0   :  { %7238 = vmatpush1.bf16.msra.mxu1 %v5057_v51  ;;  %6583 = vmatprep.subr.bf16.mxu0 %v5060_v52  ;;  %v5114_v51 = vld [vmem:[#allocation5 + $0x1918] sm:$0xff]  ;;  %v5111_v52 = vld [vmem:[#allocation5 + $0x1900] sm:$0xff] }
 0xca1   :  { %7239 = vmatprep.subr.bf16.mxu1 %v5062_v53  ;;  %v5113_v53 = vld [vmem:[#allocation5 + $0x1910] sm:$0xff] }
 0xca3   :  { %6584 = vmatpush1.bf16.msra.mxu0 %v5059_v33  ;;  %v5116_v33 = vld [vmem:[#allocation5 + $0x1928] sm:$0xff] }
 0xca4   :  { %7240 = vmatpush1.bf16.msra.mxu1 %v5061_v56  ;;  %6585 = vmatprep.subr.bf16.mxu0 %v5064_v36  ;;  %v5118_v56 = vld [vmem:[#allocation5 + $0x1938] sm:$0xff]  ;;  %v5115_v36 = vld [vmem:[#allocation5 + $0x1920] sm:$0xff] }
 0xca5   :  { %7241 = vmatprep.subr.bf16.mxu1 %v5066_v57  ;;  %v5117_v57 = vld [vmem:[#allocation5 + $0x1930] sm:$0xff] }
 0xca7   :  { %6586 = vmatpush1.bf16.msra.mxu0 %v5063_v27  ;;  %v5120_v27 = vld [vmem:[#allocation5 + $0x1948] sm:$0xff] }
 0xca8   :  { %7242 = vmatpush1.bf16.msra.mxu1 %v5065_v38  ;;  %6587 = vmatprep.subr.bf16.mxu0 %v5068_v58  ;;  %v5122_v38 = vld [vmem:[#allocation5 + $0x1958] sm:$0xff]  ;;  %v5119_v58 = vld [vmem:[#allocation5 + $0x1940] sm:$0xff] }
 0xca9   :  { %7243 = vmatprep.subr.bf16.mxu1 %v5070_v59  ;;  %v5121_v59 = vld [vmem:[#allocation5 + $0x1950] sm:$0xff] }
 0xcab   :  { %6588 = vmatpush1.bf16.msra.mxu0 %v5067_v5  ;;  %v5124_v5 = vld [vmem:[#allocation5 + $0x1968] sm:$0xff] }
 0xcac   :  { %7244 = vmatpush1.bf16.msra.mxu1 %v5069_v61  ;;  %6589 = vmatprep.subr.bf16.mxu0 %v5072_v63  ;;  %v5126_v61 = vld [vmem:[#allocation5 + $0x1978] sm:$0xff]  ;;  %v5123_v63 = vld [vmem:[#allocation5 + $0x1960] sm:$0xff] }
 0xcad   :  { %7245 = vmatprep.subr.bf16.mxu1 %v5074_v46  ;;  %v5125_v46 = vld [vmem:[#allocation5 + $0x1970] sm:$0xff] }
 0xcaf   :  { %6590 = vmatpush1.bf16.msra.mxu0 %v5071_v50  ;;  %v5128_v50 = vld [vmem:[#allocation5 + $0x1988] sm:$0xff] }
 0xcb0   :  { %7246 = vmatpush1.bf16.msra.mxu1 %v5073_v2  ;;  %6591 = vmatprep.subr.bf16.mxu0 %v5076_v3  ;;  %v5130_v2 = vld [vmem:[#allocation5 + $0x1998] sm:$0xff]  ;;  %v5127_v3 = vld [vmem:[#allocation5 + $0x1980] sm:$0xff] }
 0xcb1   :  { %7247 = vmatprep.subr.bf16.mxu1 %v5078_v4  ;;  %v5129_v4 = vld [vmem:[#allocation5 + $0x1990] sm:$0xff] }
 0xcb3   :  { %6592 = vmatpush1.bf16.msra.mxu0 %v5075_v9  ;;  %v5132_v9 = vld [vmem:[#allocation5 + $0x19a8] sm:$0xff] }
 0xcb4   :  { %7248 = vmatpush1.bf16.msra.mxu1 %v5077_v54  ;;  %6602 = vmatprep.subr.bf16.mxu0 %v5080_v10  ;;  %v5134_v54 = vld [vmem:[#allocation5 + $0x19b8] sm:$0xff]  ;;  %v5131_v10 = vld [vmem:[#allocation5 + $0x19a0] sm:$0xff] }
 0xcb5   :  { %7258 = vmatprep.subr.bf16.mxu1 %v5082_v13  ;;  %v5133_v13 = vld [vmem:[#allocation5 + $0x19b0] sm:$0xff] }
 0xcb6   :  { %6594 = vmatmul.mubr.bf16.vlgmr.msra.gmra.mrb[48].mxu0 %v6026_v29 }
 0xcb7   :  { %7250 = vmatmul.mubr.bf16.vlgmr.msra.gmra.mrb[116].mxu1 %v6026_v29  ;;  %6603 = vmatpush1.bf16.msra.mxu0 %v5079_v16  ;;  %v5138_v29 = vld [vmem:[#allocation5 + $0x19d8] sm:$0xff]  ;;  %v5135_v16 = vld [vmem:[#allocation5 + $0x19c0] sm:$0xff] }
 0xcb8   :  { %6634 = vmatprep.mubr.bf16.mxu0 %v11441_v18  ;;  %7259 = vmatpush1.bf16.msra.mxu1 %v5081_v17  ;;  %v5137_v17 = vld [vmem:[#allocation5 + $0x19d0] sm:$0xff] }
 0xcb9   :  { %7290 = vmatprep.mubr.bf16.mxu1 %v11441_v18  ;;  %6604 = vmatprep.subr.bf16.mxu0 %v5084_v49  ;;  %v5140_v49 = vld [vmem:[#allocation5 + $0x19e8] sm:$0xff] }
 0xcba   :  { %7260 = vmatprep.subr.bf16.mxu1 %v5086_v62  ;;  %v5142_v62 = vld [vmem:[#allocation5 + $0x19f8] sm:$0xff] }
 0xcbb   :  { %6605 = vmatpush1.bf16.msra.mxu0 %v5083_v19  ;;  %v5139_v19 = vld [vmem:[#allocation5 + $0x19e0] sm:$0xff] }
 0xcbc   :  { %7261 = vmatpush1.bf16.msra.mxu1 %v5085_v1  ;;  %6606 = vmatprep.subr.bf16.mxu0 %v5088_v20  ;;  %v5141_v1 = vld [vmem:[#allocation5 + $0x19f0] sm:$0xff]  ;;  %v5144_v20 = vld [vmem:[#allocation5 + $0x1a08] sm:$0xff] }
 0xcbd   :  { %7262 = vmatprep.subr.bf16.mxu1 %v5090_v24  ;;  %v5146_v24 = vld [vmem:[#allocation5 + $0x1a18] sm:$0xff] }
 0xcbf   :  { %6607 = vmatpush1.bf16.msra.mxu0 %v5087_v26  ;;  %v11447_v26 = vrot.slane %v11434_v6, %v11290_v22  ;;  %v5149_v6 = vld [vmem:[#allocation5 + $0x1a30] sm:$0xff] }
 0xcc0   :  { %7263 = vmatpush1.bf16.msra.mxu1 %v5089_v7  ;;  %6608 = vmatprep.subr.bf16.mxu0 %v5092_v11  ;;  %v5143_v7 = vld [vmem:[#allocation5 + $0x1a00] sm:$0xff]  ;;  %v5145_v11 = vld [vmem:[#allocation5 + $0x1a10] sm:$0xff] }
 0xcc1   :  { %7264 = vmatprep.subr.bf16.mxu1 %v5094_v28  ;;  %v6076_v28 = vcombine.high %v11441_v18, %v11441_v18  ;;  %v5153_v18 = vld [vmem:[#allocation5 + $0x1a50] sm:$0xff] }
 0xcc3   :  { %6609 = vmatpush1.bf16.msra.mxu0 %v5091_v30  ;;  %v5148_v30 = vld [vmem:[#allocation5 + $0x1a28] sm:$0xff] }
 0xcc4   :  { %7265 = vmatpush1.bf16.msra.mxu1 %v5093_v31  ;;  %6610 = vmatprep.subr.bf16.mxu0 %v5096_v32  ;;  %v5150_v31 = vld [vmem:[#allocation5 + $0x1a38] sm:$0xff]  ;;  %v5147_v32 = vld [vmem:[#allocation5 + $0x1a20] sm:$0xff] }
 0xcc5   :  { %7266 = vmatprep.subr.bf16.mxu1 %v5098_v34  ;;  %v5152_v34 = vld [vmem:[#allocation5 + $0x1a48] sm:$0xff] }
 0xcc7   :  { %6611 = vmatpush1.bf16.msra.mxu0 %v5095_v15  ;;  %v5154_v15 = vld [vmem:[#allocation5 + $0x1a58] sm:$0xff] }
 0xcc8   :  { %7267 = vmatpush1.bf16.msra.mxu1 %v5097_v35  ;;  %6612 = vmatprep.subr.bf16.mxu0 %v5100_v39  ;;  %v5151_v35 = vld [vmem:[#allocation5 + $0x1a40] sm:$0xff]  ;;  %v5156_v39 = vld [vmem:[#allocation5 + $0x1a68] sm:$0xff] }
 0xcc9   :  { %7268 = vmatprep.subr.bf16.mxu1 %v5102_v12  ;;  %v5158_v12 = vld [vmem:[#allocation5 + $0x1a78] sm:$0xff] }
 0xccb   :  { %6613 = vmatpush1.bf16.msra.mxu0 %v5099_v21  ;;  %v5155_v21 = vld [vmem:[#allocation5 + $0x1a60] sm:$0xff] }
 0xccc   :  { %7269 = vmatpush1.bf16.msra.mxu1 %v5101_v14  ;;  %6614 = vmatprep.subr.bf16.mxu0 %v5104_v37  ;;  %v5157_v14 = vld [vmem:[#allocation5 + $0x1a70] sm:$0xff]  ;;  %v5160_v37 = vld [vmem:[#allocation5 + $0x1a88] sm:$0xff] }
 0xccd   :  { %7270 = vmatprep.subr.bf16.mxu1 %v5106_v41  ;;  %v5162_v41 = vld [vmem:[#allocation5 + $0x1a98] sm:$0xff] }
 0xccf   :  { %6615 = vmatpush1.bf16.msra.mxu0 %v5103_v42  ;;  %v5159_v42 = vld [vmem:[#allocation5 + $0x1a80] sm:$0xff] }
 0xcd0   :  { %7271 = vmatpush1.bf16.msra.mxu1 %v5105_v43  ;;  %6616 = vmatprep.subr.bf16.mxu0 %v5108_v8  ;;  %v5161_v43 = vld [vmem:[#allocation5 + $0x1a90] sm:$0xff]  ;;  %v5164_v8 = vld [vmem:[#allocation5 + $0x1aa8] sm:$0xff] }
 0xcd1   :  { %7272 = vmatprep.subr.bf16.mxu1 %v5110_v44  ;;  %v5166_v44 = vld [vmem:[#allocation5 + $0x1ab8] sm:$0xff] }
 0xcd3   :  { %6617 = vmatpush1.bf16.msra.mxu0 %v5107_v45  ;;  %v5163_v45 = vld [vmem:[#allocation5 + $0x1aa0] sm:$0xff] }
 0xcd4   :  { %7273 = vmatpush1.bf16.msra.mxu1 %v5109_v47  ;;  %6618 = vmatprep.subr.bf16.mxu0 %v5112_v48  ;;  %v5165_v47 = vld [vmem:[#allocation5 + $0x1ab0] sm:$0xff]  ;;  %v5168_v48 = vld [vmem:[#allocation5 + $0x1ac8] sm:$0xff] }
 0xcd5   :  { %7274 = vmatprep.subr.bf16.mxu1 %v5114_v51  ;;  %v5170_v51 = vld [vmem:[#allocation5 + $0x1ad8] sm:$0xff] }
 0xcd7   :  { %6619 = vmatpush1.bf16.msra.mxu0 %v5111_v52  ;;  %v5167_v52 = vld [vmem:[#allocation5 + $0x1ac0] sm:$0xff] }
 0xcd8   :  { %7275 = vmatpush1.bf16.msra.mxu1 %v5113_v53  ;;  %6620 = vmatprep.subr.bf16.mxu0 %v5116_v33  ;;  %v5169_v53 = vld [vmem:[#allocation5 + $0x1ad0] sm:$0xff]  ;;  %v5172_v33 = vld [vmem:[#allocation5 + $0x1ae8] sm:$0xff] }
 0xcd9   :  { %7276 = vmatprep.subr.bf16.mxu1 %v5118_v56  ;;  %v5174_v56 = vld [vmem:[#allocation5 + $0x1af8] sm:$0xff] }
 0xcdb   :  { %6621 = vmatpush1.bf16.msra.mxu0 %v5115_v36  ;;  %v5171_v36 = vld [vmem:[#allocation5 + $0x1ae0] sm:$0xff] }
 0xcdc   :  { %7277 = vmatpush1.bf16.msra.mxu1 %v5117_v57  ;;  %6622 = vmatprep.subr.bf16.mxu0 %v5120_v27  ;;  %v5173_v57 = vld [vmem:[#allocation5 + $0x1af0] sm:$0xff]  ;;  %v5176_v27 = vld [vmem:[#allocation5 + $0x1b08] sm:$0xff] }
 0xcdd   :  { %7278 = vmatprep.subr.bf16.mxu1 %v5122_v38  ;;  %v5178_v38 = vld [vmem:[#allocation5 + $0x1b18] sm:$0xff] }
 0xcdf   :  { %6623 = vmatpush1.bf16.msra.mxu0 %v5119_v58  ;;  %v5175_v58 = vld [vmem:[#allocation5 + $0x1b00] sm:$0xff] }
 0xce0   :  { %7279 = vmatpush1.bf16.msra.mxu1 %v5121_v59  ;;  %6624 = vmatprep.subr.bf16.mxu0 %v5124_v5  ;;  %v5177_v59 = vld [vmem:[#allocation5 + $0x1b10] sm:$0xff]  ;;  %v5180_v5 = vld [vmem:[#allocation5 + $0x1b28] sm:$0xff] }
 0xce1   :  { %7280 = vmatprep.subr.bf16.mxu1 %v5126_v61  ;;  %v5182_v61 = vld [vmem:[#allocation5 + $0x1b38] sm:$0xff] }
 0xce3   :  { %6625 = vmatpush1.bf16.msra.mxu0 %v5123_v63  ;;  %v5179_v63 = vld [vmem:[#allocation5 + $0x1b20] sm:$0xff] }
 0xce4   :  { %7281 = vmatpush1.bf16.msra.mxu1 %v5125_v46  ;;  %6626 = vmatprep.subr.bf16.mxu0 %v5128_v50  ;;  %v5181_v46 = vld [vmem:[#allocation5 + $0x1b30] sm:$0xff]  ;;  %v5184_v50 = vld [vmem:[#allocation5 + $0x1b48] sm:$0xff] }
 0xce5   :  { %7282 = vmatprep.subr.bf16.mxu1 %v5130_v2  ;;  %v5186_v2 = vld [vmem:[#allocation5 + $0x1b58] sm:$0xff] }
 0xce7   :  { %6627 = vmatpush1.bf16.msra.mxu0 %v5127_v3  ;;  %v5183_v3 = vld [vmem:[#allocation5 + $0x1b40] sm:$0xff] }
 0xce8   :  { %7283 = vmatpush1.bf16.msra.mxu1 %v5129_v4  ;;  %6628 = vmatprep.subr.bf16.mxu0 %v5132_v9  ;;  %v5185_v4 = vld [vmem:[#allocation5 + $0x1b50] sm:$0xff]  ;;  %v5188_v9 = vld [vmem:[#allocation5 + $0x1b68] sm:$0xff] }
 0xce9   :  { %7284 = vmatprep.subr.bf16.mxu1 %v5134_v54  ;;  %v5190_v54 = vld [vmem:[#allocation5 + $0x1b78] sm:$0xff] }
 0xceb   :  { %6629 = vmatpush1.bf16.msra.mxu0 %v5131_v10  ;;  %v5187_v10 = vld [vmem:[#allocation5 + $0x1b60] sm:$0xff] }
 0xcec   :  { %7285 = vmatpush1.bf16.msra.mxu1 %v5133_v13  ;;  %6630 = vmatprep.subr.bf16.mxu0 %v5136_v55  ;;  %v5189_v13 = vld [vmem:[#allocation5 + $0x1b70] sm:$0xff]  ;;  %v5192_v55 = vld [vmem:[#allocation5 + $0x1b88] sm:$0xff] }
 0xced   :  { %7286 = vmatprep.subr.bf16.mxu1 %v5138_v29  ;;  %v5194_v29 = vld [vmem:[#allocation5 + $0x1b98] sm:$0xff] }
 0xcef   :  { %6631 = vmatpush1.bf16.msra.mxu0 %v5135_v16  ;;  %v5191_v16 = vld [vmem:[#allocation5 + $0x1b80] sm:$0xff] }
 0xcf0   :  { %7287 = vmatpush1.bf16.msra.mxu1 %v5137_v17  ;;  %6632 = vmatprep.subr.bf16.mxu0 %v5140_v49  ;;  %v5193_v17 = vld [vmem:[#allocation5 + $0x1b90] sm:$0xff]  ;;  %v5196_v49 = vld [vmem:[#allocation5 + $0x1ba8] sm:$0xff] }
 0xcf1   :  { %7288 = vmatprep.subr.bf16.mxu1 %v5142_v62  ;;  %v5198_v62 = vld [vmem:[#allocation5 + $0x1bb8] sm:$0xff] }
 0xcf3   :  { %6633 = vmatpush1.bf16.msra.mxu0 %v5139_v19  ;;  %v5195_v19 = vld [vmem:[#allocation5 + $0x1ba0] sm:$0xff] }
 0xcf4   :  { %7289 = vmatpush1.bf16.msra.mxu1 %v5141_v1  ;;  %6643 = vmatprep.subr.bf16.mxu0 %v5144_v20  ;;  %v5197_v1 = vld [vmem:[#allocation5 + $0x1bb0] sm:$0xff]  ;;  %v5200_v20 = vld [vmem:[#allocation5 + $0x1bc8] sm:$0xff] }
 0xcf5   :  { %7299 = vmatprep.subr.bf16.mxu1 %v5146_v24  ;;  %v5202_v24 = vld [vmem:[#allocation5 + $0x1bd8] sm:$0xff] }
 0xcf6   :  { %6635 = vmatmul.mubr.bf16.vlgmr.msra.gmra.mrb[48].mxu0 %v11447_v26 }
 0xcf7   :  { %7291 = vmatmul.mubr.bf16.vlgmr.msra.gmra.mrb[116].mxu1 %v11447_v26  ;;  %6644 = vmatpush1.bf16.msra.mxu0 %v5143_v7  ;;  %v6029_v7 = vcombine.high %v11430_v0, %v11430_v0 }
 0xcf8   :  { %6675 = vmatprep.mubr.bf16.mxu0 %v6076_v28  ;;  %7300 = vmatpush1.bf16.msra.mxu1 %v5145_v11  ;;  %v5199_v11 = vld [vmem:[#allocation5 + $0x1bc0] sm:$0xff] }
 0xcf9   :  { %7331 = vmatprep.mubr.bf16.mxu1 %v6076_v28  ;;  %6645 = vmatprep.subr.bf16.mxu0 %v5148_v30  ;;  %v5201_v28 = vld [vmem:[#allocation5 + $0x1bd0] sm:$0xff]  ;;  %v5204_v30 = vld [vmem:[#allocation5 + $0x1be8] sm:$0xff] }
 0xcfa   :  { %7301 = vmatprep.subr.bf16.mxu1 %v5150_v31  ;;  %v5206_v31 = vld [vmem:[#allocation5 + $0x1bf8] sm:$0xff] }
 0xcfb   :  { %6646 = vmatpush1.bf16.msra.mxu0 %v5147_v32  ;;  %v11456_v32 = vrot.slane %v6029_v7, %v11290_v22  ;;  %v5256_v7 = vld [vmem:[#allocation5 + $0x1d88] sm:$0xff] }
 0xcfc   :  { %7302 = vmatpush1.bf16.msra.mxu1 %v5149_v6  ;;  %6647 = vmatprep.subr.bf16.mxu0 %v5152_v34  ;;  %v5203_v6 = vld [vmem:[#allocation5 + $0x1be0] sm:$0xff]  ;;  %v5205_v34 = vld [vmem:[#allocation5 + $0x1bf0] sm:$0xff] }
 0xcfd   :  { %7303 = vmatprep.subr.bf16.mxu1 %v5154_v15  ;;  %v5208_v15 = vld [vmem:[#allocation5 + $0x1c08] sm:$0xff]  ;;  %v6045_v0 = vcombine.high %v11456_v32, %v11456_v32 }
 0xcff   :  { %6648 = vmatpush1.bf16.msra.mxu0 %v5151_v35  ;;  %v5210_v35 = vld [vmem:[#allocation5 + $0x1c18] sm:$0xff] }
 0xd00   :  { %7304 = vmatpush1.bf16.msra.mxu1 %v5153_v18  ;;  %6649 = vmatprep.subr.bf16.mxu0 %v5156_v39  ;;  %v6074_v18 = vcombine.high %v11447_v26, %v11447_v26  ;;  %v5207_v39 = vld [vmem:[#allocation5 + $0x1c00] sm:$0xff]  ;;  %v5213_v26 = vld [vmem:[#allocation5 + $0x1c30] sm:$0xff] }
 0xd01   :  { %7305 = vmatprep.subr.bf16.mxu1 %v5158_v12  ;;  %v5209_v12 = vld [vmem:[#allocation5 + $0x1c10] sm:$0xff] }
 0xd03   :  { %6650 = vmatpush1.bf16.msra.mxu0 %v5155_v21  ;;  %v11463_v21 = vrot.slane %v6045_v0, %v11290_v22  ;;  %v5266_v0 = vld [vmem:[#allocation5 + $0x1dd8] sm:$0xff] }
 0xd04   :  { %7306 = vmatpush1.bf16.msra.mxu1 %v5157_v14  ;;  %6651 = vmatprep.subr.bf16.mxu0 %v5160_v37  ;;  %v5212_v14 = vld [vmem:[#allocation5 + $0x1c28] sm:$0xff]  ;;  %v5214_v37 = vld [vmem:[#allocation5 + $0x1c38] sm:$0xff] }
 0xd05   :  { %7307 = vmatprep.subr.bf16.mxu1 %v5162_v41  ;;  %v5211_v41 = vld [vmem:[#allocation5 + $0x1c20] sm:$0xff] }
 0xd07   :  { %6652 = vmatpush1.bf16.msra.mxu0 %v5159_v42  ;;  %v5216_v42 = vld [vmem:[#allocation5 + $0x1c48] sm:$0xff] }
 0xd08   :  { %7308 = vmatpush1.bf16.msra.mxu1 %v5161_v43  ;;  %6653 = vmatprep.subr.bf16.mxu0 %v5164_v8  ;;  %v5218_v43 = vld [vmem:[#allocation5 + $0x1c58] sm:$0xff]  ;;  %v5215_v8 = vld [vmem:[#allocation5 + $0x1c40] sm:$0xff] }
 0xd09   :  { %7309 = vmatprep.subr.bf16.mxu1 %v5166_v44  ;;  %v5217_v44 = vld [vmem:[#allocation5 + $0x1c50] sm:$0xff] }
 0xd0b   :  { %6654 = vmatpush1.bf16.msra.mxu0 %v5163_v45  ;;  %v5220_v45 = vld [vmem:[#allocation5 + $0x1c68] sm:$0xff] }
 0xd0c   :  { %7310 = vmatpush1.bf16.msra.mxu1 %v5165_v47  ;;  %6655 = vmatprep.subr.bf16.mxu0 %v5168_v48  ;;  %v5222_v47 = vld [vmem:[#allocation5 + $0x1c78] sm:$0xff]  ;;  %v5219_v48 = vld [vmem:[#allocation5 + $0x1c60] sm:$0xff] }
 0xd0d   :  { %7311 = vmatprep.subr.bf16.mxu1 %v5170_v51  ;;  %v5221_v51 = vld [vmem:[#allocation5 + $0x1c70] sm:$0xff] }
 0xd0f   :  { %6656 = vmatpush1.bf16.msra.mxu0 %v5167_v52  ;;  %v5224_v52 = vld [vmem:[#allocation5 + $0x1c88] sm:$0xff] }
 0xd10   :  { %7312 = vmatpush1.bf16.msra.mxu1 %v5169_v53  ;;  %6657 = vmatprep.subr.bf16.mxu0 %v5172_v33  ;;  %v5226_v53 = vld [vmem:[#allocation5 + $0x1c98] sm:$0xff]  ;;  %v5223_v33 = vld [vmem:[#allocation5 + $0x1c80] sm:$0xff] }
 0xd11   :  { %7313 = vmatprep.subr.bf16.mxu1 %v5174_v56  ;;  %v5225_v56 = vld [vmem:[#allocation5 + $0x1c90] sm:$0xff] }
 0xd13   :  { %6658 = vmatpush1.bf16.msra.mxu0 %v5171_v36  ;;  %v5228_v36 = vld [vmem:[#allocation5 + $0x1ca8] sm:$0xff] }
 0xd14   :  { %7314 = vmatpush1.bf16.msra.mxu1 %v5173_v57  ;;  %6659 = vmatprep.subr.bf16.mxu0 %v5176_v27  ;;  %v5230_v57 = vld [vmem:[#allocation5 + $0x1cb8] sm:$0xff]  ;;  %v5227_v27 = vld [vmem:[#allocation5 + $0x1ca0] sm:$0xff] }
 0xd15   :  { %7315 = vmatprep.subr.bf16.mxu1 %v5178_v38  ;;  %v5229_v38 = vld [vmem:[#allocation5 + $0x1cb0] sm:$0xff] }
 0xd17   :  { %6660 = vmatpush1.bf16.msra.mxu0 %v5175_v58  ;;  %v5232_v58 = vld [vmem:[#allocation5 + $0x1cc8] sm:$0xff] }
 0xd18   :  { %7316 = vmatpush1.bf16.msra.mxu1 %v5177_v59  ;;  %6661 = vmatprep.subr.bf16.mxu0 %v5180_v5  ;;  %v5234_v59 = vld [vmem:[#allocation5 + $0x1cd8] sm:$0xff]  ;;  %v5231_v5 = vld [vmem:[#allocation5 + $0x1cc0] sm:$0xff] }
 0xd19   :  { %7317 = vmatprep.subr.bf16.mxu1 %v5182_v61  ;;  %v5233_v61 = vld [vmem:[#allocation5 + $0x1cd0] sm:$0xff] }
 0xd1b   :  { %6662 = vmatpush1.bf16.msra.mxu0 %v5179_v63  ;;  %v5236_v63 = vld [vmem:[#allocation5 + $0x1ce8] sm:$0xff] }
 0xd1c   :  { %7318 = vmatpush1.bf16.msra.mxu1 %v5181_v46  ;;  %6663 = vmatprep.subr.bf16.mxu0 %v5184_v50  ;;  %v5238_v46 = vld [vmem:[#allocation5 + $0x1cf8] sm:$0xff]  ;;  %v5235_v50 = vld [vmem:[#allocation5 + $0x1ce0] sm:$0xff] }
 0xd1d   :  { %7319 = vmatprep.subr.bf16.mxu1 %v5186_v2  ;;  %v5237_v2 = vld [vmem:[#allocation5 + $0x1cf0] sm:$0xff] }
 0xd1f   :  { %6664 = vmatpush1.bf16.msra.mxu0 %v5183_v3  ;;  %v5240_v3 = vld [vmem:[#allocation5 + $0x1d08] sm:$0xff] }
 0xd20   :  { %7320 = vmatpush1.bf16.msra.mxu1 %v5185_v4  ;;  %6665 = vmatprep.subr.bf16.mxu0 %v5188_v9  ;;  %v5242_v4 = vld [vmem:[#allocation5 + $0x1d18] sm:$0xff]  ;;  %v5239_v9 = vld [vmem:[#allocation5 + $0x1d00] sm:$0xff] }
 0xd21   :  { %7321 = vmatprep.subr.bf16.mxu1 %v5190_v54  ;;  %v5241_v54 = vld [vmem:[#allocation5 + $0x1d10] sm:$0xff] }
 0xd23   :  { %6666 = vmatpush1.bf16.msra.mxu0 %v5187_v10  ;;  %v5244_v10 = vld [vmem:[#allocation5 + $0x1d28] sm:$0xff] }
 0xd24   :  { %7322 = vmatpush1.bf16.msra.mxu1 %v5189_v13  ;;  %6667 = vmatprep.subr.bf16.mxu0 %v5192_v55  ;;  %v5246_v13 = vld [vmem:[#allocation5 + $0x1d38] sm:$0xff]  ;;  %v5243_v55 = vld [vmem:[#allocation5 + $0x1d20] sm:$0xff] }
 0xd25   :  { %7323 = vmatprep.subr.bf16.mxu1 %v5194_v29  ;;  %v5245_v29 = vld [vmem:[#allocation5 + $0x1d30] sm:$0xff] }
 0xd27   :  { %6668 = vmatpush1.bf16.msra.mxu0 %v5191_v16  ;;  %v5248_v16 = vld [vmem:[#allocation5 + $0x1d48] sm:$0xff] }
 0xd28   :  { %7324 = vmatpush1.bf16.msra.mxu1 %v5193_v17  ;;  %6669 = vmatprep.subr.bf16.mxu0 %v5196_v49  ;;  %v5250_v17 = vld [vmem:[#allocation5 + $0x1d58] sm:$0xff]  ;;  %v5247_v49 = vld [vmem:[#allocation5 + $0x1d40] sm:$0xff] }
 0xd29   :  { %7325 = vmatprep.subr.bf16.mxu1 %v5198_v62  ;;  %v5249_v62 = vld [vmem:[#allocation5 + $0x1d50] sm:$0xff] }
 0xd2b   :  { %6670 = vmatpush1.bf16.msra.mxu0 %v5195_v19  ;;  %v5252_v19 = vld [vmem:[#allocation5 + $0x1d68] sm:$0xff] }
 0xd2c   :  { %7326 = vmatpush1.bf16.msra.mxu1 %v5197_v1  ;;  %6671 = vmatprep.subr.bf16.mxu0 %v5200_v20  ;;  %v5254_v1 = vld [vmem:[#allocation5 + $0x1d78] sm:$0xff]  ;;  %v5251_v20 = vld [vmem:[#allocation5 + $0x1d60] sm:$0xff] }
 0xd2d   :  { %7327 = vmatprep.subr.bf16.mxu1 %v5202_v24  ;;  %v5253_v24 = vld [vmem:[#allocation5 + $0x1d70] sm:$0xff] }
 0xd2f   :  { %6672 = vmatpush1.bf16.msra.mxu0 %v5199_v11  ;;  %v5258_v11 = vld [vmem:[#allocation5 + $0x1d98] sm:$0xff] }
 0xd30   :  { %7328 = vmatpush1.bf16.msra.mxu1 %v5201_v28  ;;  %6673 = vmatprep.subr.bf16.mxu0 %v5204_v30  ;;  %v5255_v28 = vld [vmem:[#allocation5 + $0x1d80] sm:$0xff]  ;;  %v5257_v30 = vld [vmem:[#allocation5 + $0x1d90] sm:$0xff] }
 0xd31   :  { %7329 = vmatprep.subr.bf16.mxu1 %v5206_v31  ;;  %v5260_v31 = vld [vmem:[#allocation5 + $0x1da8] sm:$0xff] }
 0xd33   :  { %6674 = vmatpush1.bf16.msra.mxu0 %v5203_v6  ;;  %v5262_v6 = vld [vmem:[#allocation5 + $0x1db8] sm:$0xff] }
 0xd34   :  { %7330 = vmatpush1.bf16.msra.mxu1 %v5205_v34  ;;  %6684 = vmatprep.subr.bf16.mxu0 %v5208_v15  ;;  %v5259_v34 = vld [vmem:[#allocation5 + $0x1da0] sm:$0xff]  ;;  %v5261_v15 = vld [vmem:[#allocation5 + $0x1db0] sm:$0xff] }
 0xd35   :  { %7340 = vmatprep.subr.bf16.mxu1 %v5210_v35  ;;  %v5264_v35 = vld [vmem:[#allocation5 + $0x1dc8] sm:$0xff] }
 0xd36   :  { %6676 = vmatmul.mubr.bf16.vlgmr.msra.gmra.mrb[48].mxu0 %v6074_v18 }
 0xd37   :  { %7332 = vmatmul.mubr.bf16.vlgmr.msra.gmra.mrb[116].mxu1 %v6074_v18  ;;  %6685 = vmatpush1.bf16.msra.mxu0 %v5207_v39  ;;  %v5263_v18 = vld [vmem:[#allocation5 + $0x1dc0] sm:$0xff]  ;;  %v5265_v39 = vld [vmem:[#allocation5 + $0x1dd0] sm:$0xff] }
 0xd38   :  { %6716 = vmatprep.mubr.bf16.mxu0 %v11463_v21  ;;  %7341 = vmatpush1.bf16.msra.mxu1 %v5209_v12  ;;  %v5268_v12 = vld [vmem:[#allocation5 + $0x1de8] sm:$0xff] }
 0xd39   :  { %7372 = vmatprep.mubr.bf16.mxu1 %v11463_v21  ;;  %6686 = vmatprep.subr.bf16.mxu0 %v5212_v14  ;;  %v5270_v14 = vld [vmem:[#allocation5 + $0x1df8] sm:$0xff] }
 0xd3a   :  { %7342 = vmatprep.subr.bf16.mxu1 %v5214_v37  ;;  %v5267_v37 = vld [vmem:[#allocation5 + $0x1de0] sm:$0xff] }
 0xd3b   :  { %6687 = vmatpush1.bf16.msra.mxu0 %v5211_v41  ;;  %v5269_v41 = vld [vmem:[#allocation5 + $0x1df0] sm:$0xff] }
 0xd3c   :  { %7343 = vmatpush1.bf16.msra.mxu1 %v5213_v26  ;;  %6688 = vmatprep.subr.bf16.mxu0 %v5216_v42  ;;  %v5272_v26 = vld [vmem:[#allocation5 + $0x1e08] sm:$0xff]  ;;  %v5274_v42 = vld [vmem:[#allocation5 + $0x1e18] sm:$0xff] }
 0xd3d   :  { %7344 = vmatprep.subr.bf16.mxu1 %v5218_v43  ;;  %v11469_v43 = vrot.slane %v11456_v32, %v11290_v22  ;;  %v5277_v22 = vld [vmem:[#allocation5 + $0x1e30] sm:$0xff]  ;;  %v5280_v32 = vld [vmem:[#allocation5 + $0x1e48] sm:$0xff] }
 0xd3f   :  { %6689 = vmatpush1.bf16.msra.mxu0 %v5215_v8  ;;  %v5271_v8 = vld [vmem:[#allocation5 + $0x1e00] sm:$0xff] }
 0xd40   :  { %7345 = vmatpush1.bf16.msra.mxu1 %v5217_v44  ;;  %6690 = vmatprep.subr.bf16.mxu0 %v5220_v45  ;;  %v5273_v44 = vld [vmem:[#allocation5 + $0x1e10] sm:$0xff]  ;;  %v6077_v45 = vcombine.high %v11463_v21, %v11463_v21 }
 0xd41   :  { %7346 = vmatprep.subr.bf16.mxu1 %v5222_v47  ;;  %v5276_v47 = vld [vmem:[#allocation5 + $0x1e28] sm:$0xff]  ;;  %v5281_v21 = vld [vmem:[#allocation5 + $0x1e50] sm:$0xff] }
 0xd43   :  { %6691 = vmatpush1.bf16.msra.mxu0 %v5219_v48  ;;  %v5278_v48 = vld [vmem:[#allocation5 + $0x1e38] sm:$0xff] }
 0xd44   :  { %7347 = vmatpush1.bf16.msra.mxu1 %v5221_v51  ;;  %6692 = vmatprep.subr.bf16.mxu0 %v5224_v52  ;;  %v5275_v51 = vld [vmem:[#allocation5 + $0x1e20] sm:$0xff]  ;;  %v5282_v52 = vld [vmem:[#allocation5 + $0x1e58] sm:$0xff] }
 0xd45   :  { %7348 = vmatprep.subr.bf16.mxu1 %v5226_v53  ;;  %v5279_v53 = vld [vmem:[#allocation5 + $0x1e40] sm:$0xff] }
 0xd47   :  { %6693 = vmatpush1.bf16.msra.mxu0 %v5223_v33  ;;  %v5284_v33 = vld [vmem:[#allocation5 + $0x1e68] sm:$0xff] }
 0xd48   :  { %7349 = vmatpush1.bf16.msra.mxu1 %v5225_v56  ;;  %6694 = vmatprep.subr.bf16.mxu0 %v5228_v36  ;;  %v5286_v56 = vld [vmem:[#allocation5 + $0x1e78] sm:$0xff]  ;;  %v5283_v36 = vld [vmem:[#allocation5 + $0x1e60] sm:$0xff] }
 0xd49   :  { %7350 = vmatprep.subr.bf16.mxu1 %v5230_v57  ;;  %v5285_v57 = vld [vmem:[#allocation5 + $0x1e70] sm:$0xff] }
 0xd4b   :  { %6695 = vmatpush1.bf16.msra.mxu0 %v5227_v27  ;;  %v5288_v27 = vld [vmem:[#allocation5 + $0x1e88] sm:$0xff] }
 0xd4c   :  { %7351 = vmatpush1.bf16.msra.mxu1 %v5229_v38  ;;  %6696 = vmatprep.subr.bf16.mxu0 %v5232_v58  ;;  %v5290_v38 = vld [vmem:[#allocation5 + $0x1e98] sm:$0xff]  ;;  %v5287_v58 = vld [vmem:[#allocation5 + $0x1e80] sm:$0xff] }
 0xd4d   :  { %7352 = vmatprep.subr.bf16.mxu1 %v5234_v59  ;;  %v5289_v59 = vld [vmem:[#allocation5 + $0x1e90] sm:$0xff] }
 0xd4f   :  { %6697 = vmatpush1.bf16.msra.mxu0 %v5231_v5  ;;  %v5292_v5 = vld [vmem:[#allocation5 + $0x1ea8] sm:$0xff] }
 0xd50   :  { %7353 = vmatpush1.bf16.msra.mxu1 %v5233_v61  ;;  %6698 = vmatprep.subr.bf16.mxu0 %v5236_v63  ;;  %v5294_v61 = vld [vmem:[#allocation5 + $0x1eb8] sm:$0xff]  ;;  %v5291_v63 = vld [vmem:[#allocation5 + $0x1ea0] sm:$0xff] }
 0xd51   :  { %7354 = vmatprep.subr.bf16.mxu1 %v5238_v46  ;;  %v5293_v46 = vld [vmem:[#allocation5 + $0x1eb0] sm:$0xff] }
 0xd53   :  { %6699 = vmatpush1.bf16.msra.mxu0 %v5235_v50  ;;  %v5296_v50 = vld [vmem:[#allocation5 + $0x1ec8] sm:$0xff] }
 0xd54   :  { %7355 = vmatpush1.bf16.msra.mxu1 %v5237_v2  ;;  %6700 = vmatprep.subr.bf16.mxu0 %v5240_v3  ;;  %v5298_v2 = vld [vmem:[#allocation5 + $0x1ed8] sm:$0xff]  ;;  %v5295_v3 = vld [vmem:[#allocation5 + $0x1ec0] sm:$0xff] }
 0xd55   :  { %7356 = vmatprep.subr.bf16.mxu1 %v5242_v4  ;;  %v5297_v4 = vld [vmem:[#allocation5 + $0x1ed0] sm:$0xff] }
 0xd57   :  { %6701 = vmatpush1.bf16.msra.mxu0 %v5239_v9  ;;  %v5300_v9 = vld [vmem:[#allocation5 + $0x1ee8] sm:$0xff] }
 0xd58   :  { %7357 = vmatpush1.bf16.msra.mxu1 %v5241_v54  ;;  %6702 = vmatprep.subr.bf16.mxu0 %v5244_v10  ;;  %v5302_v54 = vld [vmem:[#allocation5 + $0x1ef8] sm:$0xff]  ;;  %v5299_v10 = vld [vmem:[#allocation5 + $0x1ee0] sm:$0xff] }
 0xd59   :  { %7358 = vmatprep.subr.bf16.mxu1 %v5246_v13  ;;  %v5301_v13 = vld [vmem:[#allocation5 + $0x1ef0] sm:$0xff] }
 0xd5b   :  { %6703 = vmatpush1.bf16.msra.mxu0 %v5243_v55  ;;  %v5304_v55 = vld [vmem:[#allocation5 + $0x1f08] sm:$0xff] }
 0xd5c   :  { %7359 = vmatpush1.bf16.msra.mxu1 %v5245_v29  ;;  %6704 = vmatprep.subr.bf16.mxu0 %v5248_v16  ;;  %v5306_v29 = vld [vmem:[#allocation5 + $0x1f18] sm:$0xff]  ;;  %v5303_v16 = vld [vmem:[#allocation5 + $0x1f00] sm:$0xff] }
 0xd5d   :  { %7360 = vmatprep.subr.bf16.mxu1 %v5250_v17  ;;  %v5305_v17 = vld [vmem:[#allocation5 + $0x1f10] sm:$0xff] }
 0xd5f   :  { %6705 = vmatpush1.bf16.msra.mxu0 %v5247_v49  ;;  %v5308_v49 = vld [vmem:[#allocation5 + $0x1f28] sm:$0xff] }
 0xd60   :  { %7361 = vmatpush1.bf16.msra.mxu1 %v5249_v62  ;;  %6706 = vmatprep.subr.bf16.mxu0 %v5252_v19  ;;  %v5310_v62 = vld [vmem:[#allocation5 + $0x1f38] sm:$0xff]  ;;  %v5307_v19 = vld [vmem:[#allocation5 + $0x1f20] sm:$0xff] }
 0xd61   :  { %7362 = vmatprep.subr.bf16.mxu1 %v5254_v1  ;;  %v5309_v1 = vld [vmem:[#allocation5 + $0x1f30] sm:$0xff] }
 0xd63   :  { %6707 = vmatpush1.bf16.msra.mxu0 %v5251_v20  ;;  %v5312_v20 = vld [vmem:[#allocation5 + $0x1f48] sm:$0xff] }
 0xd64   :  { %7363 = vmatpush1.bf16.msra.mxu1 %v5253_v24  ;;  %6708 = vmatprep.subr.bf16.mxu0 %v5256_v7  ;;  %v5314_v24 = vld [vmem:[#allocation5 + $0x1f58] sm:$0xff]  ;;  %v5311_v7 = vld [vmem:[#allocation5 + $0x1f40] sm:$0xff] }
 0xd65   :  { %7364 = vmatprep.subr.bf16.mxu1 %v5258_v11  ;;  %v5313_v11 = vld [vmem:[#allocation5 + $0x1f50] sm:$0xff] }
 0xd67   :  { %6709 = vmatpush1.bf16.msra.mxu0 %v5255_v28  ;;  %v5316_v28 = vld [vmem:[#allocation5 + $0x1f68] sm:$0xff] }
 0xd68   :  { %7365 = vmatpush1.bf16.msra.mxu1 %v5257_v30  ;;  %6710 = vmatprep.subr.bf16.mxu0 %v5260_v31  ;;  %v5318_v30 = vld [vmem:[#allocation5 + $0x1f78] sm:$0xff]  ;;  %v5315_v31 = vld [vmem:[#allocation5 + $0x1f60] sm:$0xff] }
 0xd69   :  { %7366 = vmatprep.subr.bf16.mxu1 %v5262_v6  ;;  %v5317_v6 = vld [vmem:[#allocation5 + $0x1f70] sm:$0xff] }
 0xd6b   :  { %6711 = vmatpush1.bf16.msra.mxu0 %v5259_v34  ;;  %v5320_v34 = vld [vmem:[#allocation5 + $0x1f88] sm:$0xff] }
 0xd6c   :  { %7367 = vmatpush1.bf16.msra.mxu1 %v5261_v15  ;;  %6712 = vmatprep.subr.bf16.mxu0 %v5264_v35  ;;  %v5322_v15 = vld [vmem:[#allocation5 + $0x1f98] sm:$0xff]  ;;  %v5319_v35 = vld [vmem:[#allocation5 + $0x1f80] sm:$0xff] }
 0xd6d   :  { %7368 = vmatprep.subr.bf16.mxu1 %v5266_v0  ;;  %v5321_v0 = vld [vmem:[#allocation5 + $0x1f90] sm:$0xff] }
 0xd6f   :  { %6713 = vmatpush1.bf16.msra.mxu0 %v5263_v18  ;;  %v5324_v18 = vld [vmem:[#allocation5 + $0x1fa8] sm:$0xff] }
 0xd70   :  { %7369 = vmatpush1.bf16.msra.mxu1 %v5265_v39  ;;  %6714 = vmatprep.subr.bf16.mxu0 %v5268_v12  ;;  %v5326_v39 = vld [vmem:[#allocation5 + $0x1fb8] sm:$0xff]  ;;  %v5323_v12 = vld [vmem:[#allocation5 + $0x1fa0] sm:$0xff] }
 0xd71   :  { %7370 = vmatprep.subr.bf16.mxu1 %v5270_v14  ;;  %v5325_v14 = vld [vmem:[#allocation5 + $0x1fb0] sm:$0xff] }
 0xd73   :  { %6715 = vmatpush1.bf16.msra.mxu0 %v5267_v37  ;;  %v5328_v37 = vld [vmem:[#allocation5 + $0x1fc8] sm:$0xff] }
 0xd74   :  { %7371 = vmatpush1.bf16.msra.mxu1 %v5269_v41  ;;  %6725 = vmatprep.subr.bf16.mxu0 %v5272_v26  ;;  %v5330_v41 = vld [vmem:[#allocation5 + $0x1fd8] sm:$0xff]  ;;  %v5327_v26 = vld [vmem:[#allocation5 + $0x1fc0] sm:$0xff] }
 0xd75   :  { %7381 = vmatprep.subr.bf16.mxu1 %v5274_v42  ;;  %v5329_v42 = vld [vmem:[#allocation5 + $0x1fd0] sm:$0xff] }
 0xd76   :  { %6717 = vmatmul.mubr.bf16.vlgmr.msra.gmra.mrb[48].mxu0 %v11469_v43 }
 0xd77   :  { %7373 = vmatmul.mubr.bf16.vlgmr.msra.gmra.mrb[116].mxu1 %v11469_v43  ;;  %6726 = vmatpush1.bf16.msra.mxu0 %v5271_v8  ;;  %v5332_v8 = vld [vmem:[#allocation5 + $0x1fe8] sm:$0xff] }
 0xd78   :  { %6757 = vmatprep.mubr.bf16.mxu0 %v6077_v45  ;;  %7382 = vmatpush1.bf16.msra.mxu1 %v5273_v44  ;;  %v5334_v44 = vld [vmem:[#allocation5 + $0x1ff8] sm:$0xff] }
 0xd79   :  { %7413 = vmatprep.mubr.bf16.mxu1 %v6077_v45  ;;  %6727 = vmatprep.subr.bf16.mxu0 %v5276_v47  ;;  %v5331_v45 = vld [vmem:[#allocation5 + $0x1fe0] sm:$0xff] }
 0xd7a   :  { %7383 = vmatprep.subr.bf16.mxu1 %v5278_v48  ;;  %v10305_v47 = vld [vmem:[#allocation27 + $0xc] ss:$16 sps:$4 sm:$0xff]  }
 0xd7b   :  { %6728 = vmatpush1.bf16.msra.mxu0 %v5275_v51  ;;  %v5333_v48 = vld [vmem:[#allocation5 + $0x1ff0] sm:$0xff] }
 0xd7c   :  { %7384 = vmatpush1.bf16.msra.mxu1 %v5277_v22  ;;  %6729 = vmatprep.subr.bf16.mxu0 %v5280_v32  ;;  %v10302_v51 = vld [vmem:[#allocation27 + $0x4] ss:$16 sps:$4 sm:$0xff]   ;;  %v10303_v22 = vld [vmem:[#allocation27 + $0x8] ss:$16 sps:$4 sm:$0xff]   ;;  %v6075_v32 = vcombine.high %v11469_v43, %v11469_v43 }
 0xd7d   :  { %7385 = vmatprep.subr.bf16.mxu1 %v5282_v52  ;;  %v10300_v52 = vld [vmem:[#allocation27] ss:$16 sps:$4 sm:$0xff]  }
 0xd7f   :  { %6730 = vmatpush1.bf16.msra.mxu0 %v5279_v53  ;;  %v7572_v53 = vld [vmem:[%s11668_s13] sm:$0x1] }
 0xd80   :  { %7386 = vmatpush1.bf16.msra.mxu1 %v5281_v21  ;;  %6731 = vmatprep.subr.bf16.mxu0 %v5284_v33 }
 0xd81   :  { %7387 = vmatprep.subr.bf16.mxu1 %v5286_v56 }
 0xd83   :  { %6732 = vmatpush1.bf16.msra.mxu0 %v5283_v36  ;;  %v7577_v36 = vld [vmem:[#allocation28] sm:$0xf] }
 0xd84   :  { %7388 = vmatpush1.bf16.msra.mxu1 %v5285_v57  ;;  %6733 = vmatprep.subr.bf16.mxu0 %v5288_v27 }
 0xd85   :  { %7389 = vmatprep.subr.bf16.mxu1 %v5290_v38 }
 0xd87   :  { %6734 = vmatpush1.bf16.msra.mxu0 %v5287_v58 }
 0xd88   :  { %7390 = vmatpush1.bf16.msra.mxu1 %v5289_v59  ;;  %6735 = vmatprep.subr.bf16.mxu0 %v5292_v5  ;;  %v11488_v5 = vsub.s32 2, %v11237_v40 }
 0xd89   :  { %7391 = vmatprep.subr.bf16.mxu1 %v5294_v61 }
 0xd8b   :  { %6736 = vmatpush1.bf16.msra.mxu0 %v5291_v63 }
 0xd8c   :  { %7392 = vmatpush1.bf16.msra.mxu1 %v5293_v46  ;;  %6737 = vmatprep.subr.bf16.mxu0 %v5296_v50 }
 0xd8d   :  { %7393 = vmatprep.subr.bf16.mxu1 %v5298_v2 }
 0xd8f   :  { %6738 = vmatpush1.bf16.msra.mxu0 %v5295_v3 }
 0xd90   :  { %7394 = vmatpush1.bf16.msra.mxu1 %v5297_v4  ;;  %6739 = vmatprep.subr.bf16.mxu0 %v5300_v9  ;;  %v11492_v4 = vsub.s32 3, %v11237_v40 }
 0xd91   :  { %7395 = vmatprep.subr.bf16.mxu1 %v5302_v54 }
 0xd93   :  { %6740 = vmatpush1.bf16.msra.mxu0 %v5299_v10 }
 0xd94   :  { %7396 = vmatpush1.bf16.msra.mxu1 %v5301_v13  ;;  %6741 = vmatprep.subr.bf16.mxu0 %v5304_v55  ;;  %v7590_v13 = vrot.slane %v7577_v36, %v11488_v5 }
 0xd95   :  { %7397 = vmatprep.subr.bf16.mxu1 %v5306_v29 }
 0xd97   :  { %6742 = vmatpush1.bf16.msra.mxu0 %v5303_v16  ;;  %v7582_v16 = vrot.slane %v7577_v36, %v11240_v23 }
 0xd98   :  { %7398 = vmatpush1.bf16.msra.mxu1 %v5305_v17  ;;  %6743 = vmatprep.subr.bf16.mxu0 %v5308_v49  ;;  %v7594_v17 = vrot.slane %v7577_v36, %v11492_v4 }
 0xd99   :  { %7399 = vmatprep.subr.bf16.mxu1 %v5310_v62 }
 0xd9b   :  { %6744 = vmatpush1.bf16.msra.mxu0 %v5307_v19  ;;  %v7586_v19 = vrot.slane %v7577_v36, %v11243_v25 }
 0xd9c   :  { %7400 = vmatpush1.bf16.msra.mxu1 %v5309_v1  ;;  %6745 = vmatprep.subr.bf16.mxu0 %v5312_v20 }
 0xd9d   :  { %7401 = vmatprep.subr.bf16.mxu1 %v5314_v24 }
 0xd9f   :  { %6746 = vmatpush1.bf16.msra.mxu0 %v5311_v7 }
 0xda0   :  { %7402 = vmatpush1.bf16.msra.mxu1 %v5313_v11  ;;  %6747 = vmatprep.subr.bf16.mxu0 %v5316_v28 }
 0xda1   :  { %7403 = vmatprep.subr.bf16.mxu1 %v5318_v30 }
 0xda3   :  { %6748 = vmatpush1.bf16.msra.mxu0 %v5315_v31 }
 0xda4   :  { %7404 = vmatpush1.bf16.msra.mxu1 %v5317_v6  ;;  %6749 = vmatprep.subr.bf16.mxu0 %v5320_v34 }
 0xda5   :  { %7405 = vmatprep.subr.bf16.mxu1 %v5322_v15 }
 0xda7   :  { %6750 = vmatpush1.bf16.msra.mxu0 %v5319_v35 }
 0xda8   :  { %7406 = vmatpush1.bf16.msra.mxu1 %v5321_v0  ;;  %6751 = vmatprep.subr.bf16.mxu0 %v5324_v18 }
 0xda9   :  { %7407 = vmatprep.subr.bf16.mxu1 %v5326_v39 }
 0xdab   :  { %6752 = vmatpush1.bf16.msra.mxu0 %v5323_v12 }
 0xdac   :  { %7408 = vmatpush1.bf16.msra.mxu1 %v5325_v14  ;;  %6753 = vmatprep.subr.bf16.mxu0 %v5328_v37 }
 0xdad   :  { %7409 = vmatprep.subr.bf16.mxu1 %v5330_v41 }
 0xdaf   :  { %6754 = vmatpush1.bf16.msra.mxu0 %v5327_v26 }
 0xdb0   :  { %7410 = vmatpush1.bf16.msra.mxu1 %v5329_v42  ;;  %6755 = vmatprep.subr.bf16.mxu0 %v5332_v8 }
 0xdb1   :  { %7411 = vmatprep.subr.bf16.mxu1 %v5334_v44 }
 0xdb3   :  { %6756 = vmatpush1.bf16.msra.mxu0 %v5331_v45 }
 0xdb4   :  { %7412 = vmatpush1.bf16.msra.mxu1 %v5333_v48  ;;  %7663 = vmatprep.subr.bf16.mxu0 %v10305_v47 }
 0xdb5   :  { %7622 = vmatprep.subr.bf16.mxu1 %v10302_v51 }
 0xdb6   :  { %6758 = vmatmul.mubr.bf16.vlgmr.msra.gmra.mrb[48].mxu0 %v6075_v32 }
 0xdb7   :  { %7414 = vmatmul.mubr.bf16.vlgmr.msra.gmra.mrb[116].mxu1 %v6075_v32  ;;  %7664 = vmatpush1.bf16.msra.mxu0 %v10303_v22 }
 0xdb8   :  { %7623 = vmatpush1.bf16.msra.mxu1 %v10300_v52  ;;  %7654 = vmatprep.mubr.bf16.mxu1 %v10700_v60 }
 0xdb9   :  { %7695 = vmatprep.mubr.bf16.mxu0 %v10700_v60 }
 0xdbe   :  { %9200 = vmatmul.mubr.msk.bf16.vlgmr.msra.gmra.mrb[52].mxu0 %vm448_vm0, %v7572_v53 }
 0xdbf   :  { %9199 = vmatmul.mubr.msk.bf16.vlgmr.msra.gmra.mrb[120].mxu1 %vm448_vm0, %v7572_v53 }
 0xe89   :  { %v6759_v43 = vpop.f32.mrb[48].mxu0 }
 0xe8a   :  { %v7423_v21 = vsel %vm7422_vm13, %v6759_v43, 0.0  ;;  %v7415_v33 = vpop.f32.mrb[116].mxu1  ;;  %v6761_v56 = vpop.f32.mrb[49].mxu0 }
 0xe8b   :  { %v7424_v57 = vrot.slane %v7423_v21, 4  ;;  %v7437_v27 = vsel %vm7422_vm13, %v7415_v33, 0.0  ;;  %v7430_v60 = vsel %vm7422_vm13, %v6761_v56, 0.0  ;;  %v7417_v38 = vpop.f32.mrb[117].mxu1  ;;  %v6763_v58 = vpop.f32.mrb[50].mxu0 }
 0xe8c   :  { %v7438_v59 = vrot.slane %v7437_v27, 4  ;;  %v7431_v61 = vrot.slane %v7430_v60, 4  ;;  %v7444_v63 = vsel %vm7422_vm13, %v7417_v38, 0.0  ;;  %v7419_v46 = vpop.f32.mrb[118].mxu1  ;;  %v6764_v50 = vpop.f32.mrb[51].mxu0 }
 0xe8d   :  { %v7425_v2 = vadd.f32 %v7424_v57, %v7423_v21  ;;  %v7445_v3 = vrot.slane %v7444_v63, 4  ;;  %v7420_v9 = vpop.f32.mrb[119].mxu1 }
 0xe8e   :  { %v7439_v54 = vadd.f32 %v7438_v59, %v7437_v27  ;;  %v7432_v10 = vadd.f32 %v7431_v61, %v7430_v60 }
 0xe8f   :  { %v7426_v55 = vrot.slane %v7425_v2, 2  ;;  %v7446_v29 = vadd.f32 %v7445_v3, %v7444_v63 }
 0xe90   :  { %v7440_v49 = vrot.slane %v7439_v54, 2  ;;  %v7433_v62 = vrot.slane %v7432_v10, 2 }
 0xe91   :  { %v7427_v1 = vadd.f32 %v7426_v55, %v7425_v2  ;;  %v7447_v20 = vrot.slane %v7446_v29, 2  ;;  %v7697_v24 = vpop.f32.mrb[52].mxu0 }
 0xe92   :  { %v7441_v40 = vadd.f32 %v7440_v49, %v7439_v54  ;;  %v7434_v7 = vadd.f32 %v7433_v62, %v7432_v10  ;;  %v7656_v11 = vpop.f32.mrb[120].mxu1  ;;  %v11498_v28 = vadd.f32 %v7697_v24, %v7590_v13  ;;  %v7699_v30 = vpop.f32.mrb[53].mxu0 }
 0xe93   :  { %v7428_v31 = vrot.slane %v7427_v1, 1  ;;  %v7448_v6 = vadd.f32 %v7447_v20, %v7446_v29  ;;  %v11500_v34 = vadd.f32 %v7656_v11, %v7582_v16  ;;  %v7658_v15 = vpop.f32.mrb[121].mxu1  ;;  %v11502_v35 = vadd.f32 %v7699_v30, %v7594_v17  ;;  %v7701_v0 = vpop.f32.mrb[54].mxu0 }
 0xe94   :  { %v7442_v18 = vrot.slane %v7441_v40, 1  ;;  %v7435_v39 = vrot.slane %v7434_v7, 1  ;;  %v11504_v12 = vadd.f32 %v7658_v15, %v7586_v19  ;;  %v7660_v14 = vpop.f32.mrb[122].mxu1  ;;  %v7702_v37 = vpop.f32.mrb[55].mxu0 }
 0xe95   :  { %v7429_v41 = vadd.f32 %v7428_v31, %v7427_v1  ;;  %v7449_v26 = vrot.slane %v7448_v6, 1  ;;  %v7661_v42 = vpop.f32.mrb[123].mxu1  ;;  %v7508_v14 = vld [vmem:[#allocation24] sm:$0xf]  ;;  %v7534_v37 = vld [vmem:[#allocation25] sm:$0xf] }
 0xe96   :  { %v7443_v8 = vadd.f32 %v7442_v18, %v7441_v40  ;;  %v7436_v44 = vadd.f32 %v7435_v39, %v7434_v7  ;;  %v7521_v42 = vrot.slane %v7508_v14, %v11488_v5 }
 0xe97   :  { %v7452_v45 = vmul.f32 0.5, %v7429_v41  ;;  %v7450_v47 = vadd.f32 %v7449_v26, %v7448_v6  ;;  %v7513_v41 = vrot.slane %v7508_v14, %v11240_v23 }
 0xe98   :  { %v7454_v48 = vmul.f32 0.5, %v7443_v8  ;;  %v7453_v51 = vmul.f32 0.5, %v7436_v44 }
 0xe99   :  { %v7456_v22 = vsub.f32 %v6759_v43, %v7452_v45  ;;  %v7455_v32 = vmul.f32 0.5, %v7450_v47  ;;  %v7539_v45 = vrot.slane %v7534_v37, %v11240_v23  ;;  %v7517_v47 = vrot.slane %v7508_v14, %v11243_v25 }
 0xe9a   :  { %v7458_v52 = vsub.f32 %v7415_v33, %v7454_v48  ;;  %v7457_v53 = vsub.f32 %v6761_v56, %v7453_v51 }
 0xe9b   :  { %v7460_v21 = vmul.f32 %v7456_v22, %v7456_v22  ;;  %v7459_v36 = vsub.f32 %v7417_v38, %v7455_v32  ;;  %v7547_v32 = vrot.slane %v7534_v37, %v11488_v5 }
 0xe9c   :  { %v7462_v57 = vmul.f32 %v7458_v52, %v7458_v52  ;;  %v7461_v27 = vmul.f32 %v7457_v53, %v7457_v53 }
 0xe9d   :  { %v7464_v60 = vsel %vm7422_vm13, %v7460_v21, 0.0  ;;  %v7463_v58 = vmul.f32 %v7459_v36, %v7459_v36  ;;  %v7525_v21 = vrot.slane %v7508_v14, %v11492_v4 }
 0xe9e   :  { %v7465_v59 = vrot.slane %v7464_v60, 4  ;;  %v7478_v61 = vsel %vm7422_vm13, %v7462_v57, 0.0  ;;  %v7471_v63 = vsel %vm7422_vm13, %v7461_v27, 0.0 }
 0xe9f   :  { %v7479_v46 = vrot.slane %v7478_v61, 4  ;;  %v7472_v50 = vrot.slane %v7471_v63, 4  ;;  %v7485_v2 = vsel %vm7422_vm13, %v7463_v58, 0.0  ;;  %v7543_v58 = vrot.slane %v7534_v37, %v11243_v25 }
 0xea0   :  { %v7466_v43 = vadd.f32 %v7465_v59, %v7464_v60  ;;  %v7486_v3 = vrot.slane %v7485_v2, 4 }
 0xea1   :  { %v7480_v33 = vadd.f32 %v7479_v46, %v7478_v61  ;;  %v7473_v56 = vadd.f32 %v7472_v50, %v7471_v63  ;;  %v7551_v63 = vrot.slane %v7534_v37, %v11492_v4 }
 0xea2   :  { %v7467_v9 = vrot.slane %v7466_v43, 2  ;;  %v7487_v38 = vadd.f32 %v7486_v3, %v7485_v2 }
 0xea3   :  { %v7481_v54 = vrot.slane %v7480_v33, 2  ;;  %v7474_v10 = vrot.slane %v7473_v56, 2 }
 0xea4   :  { %v7468_v13 = vadd.f32 %v7467_v9, %v7466_v43  ;;  %v7488_v55 = vrot.slane %v7487_v38, 2 }
 0xea5   :  { %v7482_v29 = vadd.f32 %v7481_v54, %v7480_v33  ;;  %v7475_v16 = vadd.f32 %v7474_v10, %v7473_v56 }
 0xea6   :  { %v7469_v17 = vrot.slane %v7468_v13, 1  ;;  %v7489_v49 = vadd.f32 %v7488_v55, %v7487_v38 }
 0xea7   :  { %v7483_v62 = vrot.slane %v7482_v29, 1  ;;  %v7476_v19 = vrot.slane %v7475_v16, 1 }
 0xea8   :  { %v7470_v1 = vadd.f32 %v7469_v17, %v7468_v13  ;;  %v7490_v20 = vrot.slane %v7489_v49, 1 }
 0xea9   :  { %v7484_v24 = vadd.f32 %v7483_v62, %v7482_v29  ;;  %v7477_v40 = vadd.f32 %v7476_v19, %v7475_v16 }
 0xeaa   :  { %v7492_v7 = vmul.f32 0.5, %v7470_v1  ;;  %v7491_v11 = vadd.f32 %v7490_v20, %v7489_v49 }
 0xeab   :  { %v7494_v30 = vmul.f32 0.5, %v7484_v24  ;;  %v7493_v31 = vmul.f32 0.5, %v7477_v40 }
 0xeac   :  { %v7496_v6 = vadd.f32 1e-05, %v7492_v7  ;;  %v7495_v15 = vmul.f32 0.5, %v7491_v11 }
 0xead   :  { %v7498_v0 = vadd.f32 1e-05, %v7494_v30  ;;  %v7497_v18 = vadd.f32 1e-05, %v7493_v31 }
 0xeae   :  { %10306 = vrsqrt.f32 %v7496_v6  ;;  %v7499_v39 = vadd.f32 1e-05, %v7495_v15 }
 0xeaf   :  { %10308 = vrsqrt.f32 %v7498_v0 }
 0xeb0   :  { %10310 = vrsqrt.f32 %v7497_v18 }
 0xeb1   :  { %10312 = vrsqrt.f32 %v7499_v39 }
 0xeb8   :  { %v10307_v26 = vpop.eup %10306 }
 0xeb9   :  { %v10309_v8 = vpop.eup %10308  ;;  %v7504_v44 = vmul.f32 %v10307_v26, %v7456_v22 }
 0xeba   :  { %v10311_v48 = vpop.eup %10310  ;;  %v7506_v51 = vmul.f32 %v10309_v8, %v7458_v52 }
 0xebb   :  { %v10313_v57 = vpop.eup %10312  ;;  %v7530_v27 = vmul.f32 %v7513_v41, %v7504_v44  ;;  %v7505_v60 = vmul.f32 %v10311_v48, %v7457_v53 }
 0xebc   :  { %v7532_v59 = vmul.f32 %v7521_v42, %v7506_v51  ;;  %v7507_v61 = vmul.f32 %v10313_v57, %v7459_v36 }
 0xebd   :  { %v7556_v22 = vadd.f32 %v7539_v45, %v7530_v27  ;;  %v7531_v46 = vmul.f32 %v7517_v47, %v7505_v60 }
 0xebe   :  { %v7558_v50 = vadd.f32 %v7547_v32, %v7532_v59  ;;  %v7533_v2 = vmul.f32 %v7525_v21, %v7507_v61 }
 0xebf   :  { %vm7560_vm0 = vcmp.gt.f32.partialorder %v7556_v22, 0.0  ;;  %v7564_v43 = vmul.f32 0.2, %v7556_v22  ;;  %v7557_v52 = vadd.f32 %v7543_v58, %v7531_v46 }
 0xec0   :  { %vm7562_vm14 = vcmp.gt.f32.partialorder %v7558_v50, 0.0  ;;  %v7566_v3 = vmul.f32 0.2, %v7558_v50  ;;  %v7559_v33 = vadd.f32 %v7551_v63, %v7533_v2 }
 0xec1   :  { %v11518_v56 = vsel %vm7560_vm0, %v7556_v22, %v7564_v43  ;;  %vm7561_vm15 = vcmp.gt.f32.partialorder %v7557_v52, 0.0  ;;  %v7565_v53 = vmul.f32 0.2, %v7557_v52 }
 0xec2   :  { %v11520_v9 = vsel %vm7562_vm14, %v7558_v50, %v7566_v3  ;;  %vm7563_vm1 = vcmp.gt.f32.partialorder %v7559_v33, 0.0  ;;  %v7567_v36 = vmul.f32 0.2, %v7559_v33 }
 0xec3   :  { %v11522_v38 = vsel %vm7561_vm15, %v7557_v52, %v7565_v53 }
 0xec4   :  { %v11524_v54 = vsel %vm7563_vm1, %v7559_v33, %v7567_v36 }
 0xec5   :  { %10660 = dma.done.wait [#allocation9 + $0x1], 16384 }
 0xec6   :  { %10661 = vsyncadd [#allocation9 + $0x1], 4294950912 }
 0xec7   :  { %10662 = dma.done.wait [#allocation9 + $0x2], 16384 }
 0xec8   :  { %10663 = vsyncadd [#allocation9 + $0x2], 4294950912  ;;  %v11528_v10 = vpack.c.bf16 %v11504_v12, %v11504_v12  ;;  %v7847_v13 = vld [vmem:[#allocation7 + $0x8] sm:$0xff]  ;;  %v7846_v55 = vld [vmem:[#allocation7] sm:$0xff]  ;;  %v11533_v32 = vpack.c.bf16 %v11500_v34, %v11500_v34  ;;  %v11537_v21 = vpack.c.bf16 %v11502_v35, %v11502_v35 }
 0xec9   :  { %v7851_v29 = vld [vmem:[#allocation7 + $0x28] sm:$0xff]  ;;  %7974 = vmatprep.subr.bf16.mxu0 %v7847_v13  ;;  %v7850_v16 = vld [vmem:[#allocation7 + $0x20] sm:$0xff] }
 0xeca   :  { %8006 = vmatprep.mubr.bf16.mxu0 %v11528_v10  ;;  %7975 = vmatpush1.bf16.msra.mxu0 %v7846_v55  ;;  %v7855_v17 = vld [vmem:[#allocation7 + $0x48] sm:$0xff]  ;;  %v7854_v49 = vld [vmem:[#allocation7 + $0x40] sm:$0xff] }
 0xecb   :  { %7976 = vmatprep.subr.bf16.mxu0 %v7851_v29  ;;  %v7859_v62 = vld [vmem:[#allocation7 + $0x68] sm:$0xff]  ;;  %v7858_v19 = vld [vmem:[#allocation7 + $0x60] sm:$0xff] }
 0xecc   :  { %v7863_v1 = vld [vmem:[#allocation7 + $0x88] sm:$0xff]  ;;  %v7862_v12 = vld [vmem:[#allocation7 + $0x80] sm:$0xff] }
 0xecd   :  { %v7867_v20 = vld [vmem:[#allocation7 + $0xa8] sm:$0xff]  ;;  %v7866_v24 = vld [vmem:[#allocation7 + $0xa0] sm:$0xff] }
 0xece   :  { %7977 = vmatpush1.bf16.msra.mxu0 %v7850_v16  ;;  %v7871_v40 = vld [vmem:[#allocation7 + $0xc8] sm:$0xff]  ;;  %v7870_v7 = vld [vmem:[#allocation7 + $0xc0] sm:$0xff] }
 0xecf   :  { %7978 = vmatprep.subr.bf16.mxu0 %v7855_v17  ;;  %v7875_v11 = vld [vmem:[#allocation7 + $0xe8] sm:$0xff]  ;;  %v7874_v30 = vld [vmem:[#allocation7 + $0xe0] sm:$0xff] }
 0xed0   :  { %v7879_v31 = vld [vmem:[#allocation7 + $0x108] sm:$0xff]  ;;  %v7878_v6 = vld [vmem:[#allocation7 + $0x100] sm:$0xff] }
 0xed1   :  { %v7883_v15 = vld [vmem:[#allocation7 + $0x128] sm:$0xff]  ;;  %v7882_v0 = vld [vmem:[#allocation7 + $0x120] sm:$0xff] }
 0xed2   :  { %7979 = vmatpush1.bf16.msra.mxu0 %v7854_v49  ;;  %v7887_v18 = vld [vmem:[#allocation7 + $0x148] sm:$0xff]  ;;  %v7886_v39 = vld [vmem:[#allocation7 + $0x140] sm:$0xff] }
 0xed3   :  { %7980 = vmatprep.subr.bf16.mxu0 %v7859_v62  ;;  %v7891_v14 = vld [vmem:[#allocation7 + $0x168] sm:$0xff]  ;;  %v7890_v37 = vld [vmem:[#allocation7 + $0x160] sm:$0xff] }
 0xed4   :  { %v7895_v41 = vld [vmem:[#allocation7 + $0x188] sm:$0xff]  ;;  %v7894_v26 = vld [vmem:[#allocation7 + $0x180] sm:$0xff] }
 0xed5   :  { %v7899_v42 = vld [vmem:[#allocation7 + $0x1a8] sm:$0xff]  ;;  %v7898_v8 = vld [vmem:[#allocation7 + $0x1a0] sm:$0xff] }
 0xed6   :  { %7981 = vmatpush1.bf16.msra.mxu0 %v7858_v19  ;;  %v7903_v44 = vld [vmem:[#allocation7 + $0x1c8] sm:$0xff]  ;;  %v7902_v45 = vld [vmem:[#allocation7 + $0x1c0] sm:$0xff] }
 0xed7   :  { %7982 = vmatprep.subr.bf16.mxu0 %v7863_v1  ;;  %v7907_v47 = vld [vmem:[#allocation7 + $0x1e8] sm:$0xff]  ;;  %v7906_v48 = vld [vmem:[#allocation7 + $0x1e0] sm:$0xff] }
 0xed8   :  { %v7911_v51 = vld [vmem:[#allocation7 + $0x208] sm:$0xff]  ;;  %v7910_v57 = vld [vmem:[#allocation7 + $0x200] sm:$0xff] }
 0xed9   :  { %v7915_v27 = vld [vmem:[#allocation7 + $0x228] sm:$0xff]  ;;  %v7914_v60 = vld [vmem:[#allocation7 + $0x220] sm:$0xff] }
 0xeda   :  { %7983 = vmatpush1.bf16.msra.mxu0 %v7862_v12  ;;  %v7919_v58 = vld [vmem:[#allocation7 + $0x248] sm:$0xff]  ;;  %v7918_v34 = vld [vmem:[#allocation7 + $0x240] sm:$0xff] }
 0xedb   :  { %7984 = vmatprep.subr.bf16.mxu0 %v7867_v20  ;;  %v7923_v59 = vld [vmem:[#allocation7 + $0x268] sm:$0xff]  ;;  %v7922_v61 = vld [vmem:[#allocation7 + $0x260] sm:$0xff] }
 0xedc   :  { %v7927_v35 = vld [vmem:[#allocation7 + $0x288] sm:$0xff]  ;;  %v7926_v63 = vld [vmem:[#allocation7 + $0x280] sm:$0xff] }
 0xedd   :  { %v7931_v22 = vld [vmem:[#allocation7 + $0x2a8] sm:$0xff]  ;;  %v7930_v46 = vld [vmem:[#allocation7 + $0x2a0] sm:$0xff] }
 0xede   :  { %7985 = vmatpush1.bf16.msra.mxu0 %v7866_v24  ;;  %v7935_v50 = vld [vmem:[#allocation7 + $0x2c8] sm:$0xff]  ;;  %v7934_v2 = vld [vmem:[#allocation7 + $0x2c0] sm:$0xff] }
 0xedf   :  { %7986 = vmatprep.subr.bf16.mxu0 %v7871_v40  ;;  %v7939_v43 = vld [vmem:[#allocation7 + $0x2e8] sm:$0xff]  ;;  %v7938_v52 = vld [vmem:[#allocation7 + $0x2e0] sm:$0xff]  ;;  %v7849_v40 = vld [vmem:[#allocation7 + $0x18] sm:$0xff] }
 0xee0   :  { %v7943_v3 = vld [vmem:[#allocation7 + $0x308] sm:$0xff]  ;;  %v7942_v33 = vld [vmem:[#allocation7 + $0x300] sm:$0xff] }
 0xee1   :  { %v7947_v53 = vld [vmem:[#allocation7 + $0x328] sm:$0xff]  ;;  %v7946_v36 = vld [vmem:[#allocation7 + $0x320] sm:$0xff] }
 0xee2   :  { %7987 = vmatpush1.bf16.msra.mxu0 %v7870_v7  ;;  %v7951_v13 = vld [vmem:[#allocation7 + $0x348] sm:$0xff]  ;;  %v7950_v55 = vld [vmem:[#allocation7 + $0x340] sm:$0xff]  ;;  %v11543_v7 = vpack.c.bf16 %v11498_v28, %v11498_v28  ;;  %v7860_v28 = vld [vmem:[#allocation7 + $0x70] sm:$0xff] }
 0xee3   :  { %7988 = vmatprep.subr.bf16.mxu0 %v7875_v11  ;;  %v7955_v29 = vld [vmem:[#allocation7 + $0x368] sm:$0xff]  ;;  %v7954_v16 = vld [vmem:[#allocation7 + $0x360] sm:$0xff]  ;;  %v7848_v11 = vld [vmem:[#allocation7 + $0x10] sm:$0xff] }
 0xee4   :  { %v7959_v17 = vld [vmem:[#allocation7 + $0x388] sm:$0xff]  ;;  %v7958_v49 = vld [vmem:[#allocation7 + $0x380] sm:$0xff] }
 0xee5   :  { %v7963_v62 = vld [vmem:[#allocation7 + $0x3a8] sm:$0xff]  ;;  %v7962_v19 = vld [vmem:[#allocation7 + $0x3a0] sm:$0xff] }
 0xee6   :  { %7989 = vmatpush1.bf16.msra.mxu0 %v7874_v30  ;;  %v7967_v1 = vld [vmem:[#allocation7 + $0x3c8] sm:$0xff]  ;;  %v7966_v12 = vld [vmem:[#allocation7 + $0x3c0] sm:$0xff]  ;;  %v7853_v30 = vld [vmem:[#allocation7 + $0x38] sm:$0xff] }
 0xee7   :  { %7990 = vmatprep.subr.bf16.mxu0 %v7879_v31  ;;  %v7971_v20 = vld [vmem:[#allocation7 + $0x3e8] sm:$0xff]  ;;  %v7970_v24 = vld [vmem:[#allocation7 + $0x3e0] sm:$0xff]  ;;  %v7852_v31 = vld [vmem:[#allocation7 + $0x30] sm:$0xff] }
 0xeea   :  { %7991 = vmatpush1.bf16.msra.mxu0 %v7878_v6  ;;  %v7857_v6 = vld [vmem:[#allocation7 + $0x58] sm:$0xff] }
 0xeeb   :  { %7992 = vmatprep.subr.bf16.mxu0 %v7883_v15  ;;  %v7856_v15 = vld [vmem:[#allocation7 + $0x50] sm:$0xff] }
 0xeee   :  { %7993 = vmatpush1.bf16.msra.mxu0 %v7882_v0  ;;  %v7861_v0 = vld [vmem:[#allocation7 + $0x78] sm:$0xff] }
 0xeef   :  { %7994 = vmatprep.subr.bf16.mxu0 %v7887_v18  ;;  %v7865_v18 = vld [vmem:[#allocation7 + $0x98] sm:$0xff] }
 0xef2   :  { %7995 = vmatpush1.bf16.msra.mxu0 %v7886_v39  ;;  %v7864_v39 = vld [vmem:[#allocation7 + $0x90] sm:$0xff] }
 0xef3   :  { %7996 = vmatprep.subr.bf16.mxu0 %v7891_v14  ;;  %v7869_v14 = vld [vmem:[#allocation7 + $0xb8] sm:$0xff] }
 0xef6   :  { %7997 = vmatpush1.bf16.msra.mxu0 %v7890_v37  ;;  %v7868_v37 = vld [vmem:[#allocation7 + $0xb0] sm:$0xff] }
 0xef7   :  { %7998 = vmatprep.subr.bf16.mxu0 %v7895_v41  ;;  %v7873_v41 = vld [vmem:[#allocation7 + $0xd8] sm:$0xff] }
 0xefa   :  { %7999 = vmatpush1.bf16.msra.mxu0 %v7894_v26  ;;  %v7877_v26 = vld [vmem:[#allocation7 + $0xf8] sm:$0xff] }
 0xefb   :  { %8000 = vmatprep.subr.bf16.mxu0 %v7899_v42  ;;  %v7876_v42 = vld [vmem:[#allocation7 + $0xf0] sm:$0xff] }
 0xefe   :  { %8001 = vmatpush1.bf16.msra.mxu0 %v7898_v8  ;;  %v7881_v8 = vld [vmem:[#allocation7 + $0x118] sm:$0xff] }
 0xeff   :  { %8002 = vmatprep.subr.bf16.mxu0 %v7903_v44  ;;  %v7880_v44 = vld [vmem:[#allocation7 + $0x110] sm:$0xff] }
 0xf02   :  { %8003 = vmatpush1.bf16.msra.mxu0 %v7902_v45  ;;  %v7885_v45 = vld [vmem:[#allocation7 + $0x138] sm:$0xff] }
 0xf03   :  { %8004 = vmatprep.subr.bf16.mxu0 %v7907_v47  ;;  %v7884_v47 = vld [vmem:[#allocation7 + $0x130] sm:$0xff] }
 0xf06   :  { %8005 = vmatpush1.bf16.msra.mxu0 %v7906_v48  ;;  %v7889_v48 = vld [vmem:[#allocation7 + $0x158] sm:$0xff] }
 0xf07   :  { %8015 = vmatprep.subr.bf16.mxu0 %v7911_v51  ;;  %v7888_v51 = vld [vmem:[#allocation7 + $0x150] sm:$0xff] }
 0xf09   :  { %8007 = vmatmul.mubr.bf16.vlgmr.msra.gmra.mrb[56].mxu0 %v11533_v32 }
 0xf0a   :  { %8016 = vmatpush1.bf16.msra.mxu0 %v7910_v57  ;;  %8047 = vmatprep.mubr.bf16.mxu0 %v11537_v21  ;;  %v7893_v57 = vld [vmem:[#allocation7 + $0x178] sm:$0xff] }
 0xf0b   :  { %8017 = vmatprep.subr.bf16.mxu0 %v7915_v27  ;;  %v7892_v27 = vld [vmem:[#allocation7 + $0x170] sm:$0xff] }
 0xf0e   :  { %8018 = vmatpush1.bf16.msra.mxu0 %v7914_v60  ;;  %v7897_v60 = vld [vmem:[#allocation7 + $0x198] sm:$0xff] }
 0xf0f   :  { %8019 = vmatprep.subr.bf16.mxu0 %v7919_v58  ;;  %v7896_v58 = vld [vmem:[#allocation7 + $0x190] sm:$0xff] }
 0xf12   :  { %8020 = vmatpush1.bf16.msra.mxu0 %v7918_v34  ;;  %v7901_v34 = vld [vmem:[#allocation7 + $0x1b8] sm:$0xff] }
 0xf13   :  { %8021 = vmatprep.subr.bf16.mxu0 %v7923_v59  ;;  %v7900_v59 = vld [vmem:[#allocation7 + $0x1b0] sm:$0xff] }
 0xf16   :  { %8022 = vmatpush1.bf16.msra.mxu0 %v7922_v61  ;;  %v7905_v61 = vld [vmem:[#allocation7 + $0x1d8] sm:$0xff] }
 0xf17   :  { %8023 = vmatprep.subr.bf16.mxu0 %v7927_v35  ;;  %v7904_v35 = vld [vmem:[#allocation7 + $0x1d0] sm:$0xff] }
 0xf1a   :  { %8024 = vmatpush1.bf16.msra.mxu0 %v7926_v63  ;;  %v7909_v63 = vld [vmem:[#allocation7 + $0x1f8] sm:$0xff] }
 0xf1b   :  { %8025 = vmatprep.subr.bf16.mxu0 %v7931_v22  ;;  %v7908_v22 = vld [vmem:[#allocation7 + $0x1f0] sm:$0xff] }
 0xf1e   :  { %8026 = vmatpush1.bf16.msra.mxu0 %v7930_v46  ;;  %v7913_v46 = vld [vmem:[#allocation7 + $0x218] sm:$0xff] }
 0xf1f   :  { %8027 = vmatprep.subr.bf16.mxu0 %v7935_v50  ;;  %v7912_v50 = vld [vmem:[#allocation7 + $0x210] sm:$0xff] }
 0xf22   :  { %8028 = vmatpush1.bf16.msra.mxu0 %v7934_v2  ;;  %v7917_v2 = vld [vmem:[#allocation7 + $0x238] sm:$0xff] }
 0xf23   :  { %8029 = vmatprep.subr.bf16.mxu0 %v7939_v43  ;;  %v7916_v43 = vld [vmem:[#allocation7 + $0x230] sm:$0xff] }
 0xf26   :  { %8030 = vmatpush1.bf16.msra.mxu0 %v7938_v52  ;;  %v7921_v52 = vld [vmem:[#allocation7 + $0x258] sm:$0xff] }
 0xf27   :  { %8031 = vmatprep.subr.bf16.mxu0 %v7943_v3  ;;  %v7920_v3 = vld [vmem:[#allocation7 + $0x250] sm:$0xff] }
 0xf2a   :  { %8032 = vmatpush1.bf16.msra.mxu0 %v7942_v33  ;;  %v7925_v33 = vld [vmem:[#allocation7 + $0x278] sm:$0xff] }
 0xf2b   :  { %8033 = vmatprep.subr.bf16.mxu0 %v7947_v53  ;;  %v7924_v53 = vld [vmem:[#allocation7 + $0x270] sm:$0xff] }
 0xf2e   :  { %8034 = vmatpush1.bf16.msra.mxu0 %v7946_v36  ;;  %v7929_v36 = vld [vmem:[#allocation7 + $0x298] sm:$0xff] }
 0xf2f   :  { %8035 = vmatprep.subr.bf16.mxu0 %v7951_v13  ;;  %v7928_v13 = vld [vmem:[#allocation7 + $0x290] sm:$0xff] }
 0xf32   :  { %8036 = vmatpush1.bf16.msra.mxu0 %v7950_v55  ;;  %v7933_v55 = vld [vmem:[#allocation7 + $0x2b8] sm:$0xff] }
 0xf33   :  { %8037 = vmatprep.subr.bf16.mxu0 %v7955_v29  ;;  %v7937_v29 = vld [vmem:[#allocation7 + $0x2d8] sm:$0xff] }
 0xf36   :  { %8038 = vmatpush1.bf16.msra.mxu0 %v7954_v16  ;;  %v7941_v16 = vld [vmem:[#allocation7 + $0x2f8] sm:$0xff] }
 0xf37   :  { %8039 = vmatprep.subr.bf16.mxu0 %v7959_v17  ;;  %v7940_v17 = vld [vmem:[#allocation7 + $0x2f0] sm:$0xff] }
 0xf3a   :  { %8040 = vmatpush1.bf16.msra.mxu0 %v7958_v49  ;;  %v7945_v49 = vld [vmem:[#allocation7 + $0x318] sm:$0xff] }
 0xf3b   :  { %8041 = vmatprep.subr.bf16.mxu0 %v7963_v62  ;;  %v7944_v62 = vld [vmem:[#allocation7 + $0x310] sm:$0xff] }
 0xf3e   :  { %8042 = vmatpush1.bf16.msra.mxu0 %v7962_v19  ;;  %v7949_v19 = vld [vmem:[#allocation7 + $0x338] sm:$0xff] }
 0xf3f   :  { %8043 = vmatprep.subr.bf16.mxu0 %v7967_v1  ;;  %v7948_v1 = vld [vmem:[#allocation7 + $0x330] sm:$0xff] }
 0xf42   :  { %8044 = vmatpush1.bf16.msra.mxu0 %v7966_v12  ;;  %v7953_v12 = vld [vmem:[#allocation7 + $0x358] sm:$0xff] }
 0xf43   :  { %8045 = vmatprep.subr.bf16.mxu0 %v7971_v20  ;;  %v7952_v20 = vld [vmem:[#allocation7 + $0x350] sm:$0xff] }
 0xf46   :  { %8046 = vmatpush1.bf16.msra.mxu0 %v7970_v24  ;;  %v7957_v24 = vld [vmem:[#allocation7 + $0x378] sm:$0xff] }
 0xf47   :  { %8056 = vmatprep.subr.bf16.mxu0 %v7849_v40  ;;  %v7956_v40 = vld [vmem:[#allocation7 + $0x370] sm:$0xff] }
 0xf49   :  { %8048 = vmatmul.mubr.bf16.vlgmr.msra.gmra.mrb[60].mxu0 %v11543_v7 }
 0xf4a   :  { %8057 = vmatpush1.bf16.msra.mxu0 %v7848_v11  ;;  %8088 = vmatprep.mubr.bf16.mxu0 %v11528_v10  ;;  %v7872_v10 = vld [vmem:[#allocation7 + $0xd0] sm:$0xff]  ;;  %v7961_v11 = vld [vmem:[#allocation7 + $0x398] sm:$0xff] }
 0xf4b   :  { %8058 = vmatprep.subr.bf16.mxu0 %v7853_v30  ;;  %v7960_v30 = vld [vmem:[#allocation7 + $0x390] sm:$0xff] }
 0xf4e   :  { %8059 = vmatpush1.bf16.msra.mxu0 %v7852_v31  ;;  %v7965_v31 = vld [vmem:[#allocation7 + $0x3b8] sm:$0xff] }
 0xf4f   :  { %8060 = vmatprep.subr.bf16.mxu0 %v7857_v6  ;;  %v7964_v6 = vld [vmem:[#allocation7 + $0x3b0] sm:$0xff] }
 0xf52   :  { %8061 = vmatpush1.bf16.msra.mxu0 %v7856_v15  ;;  %v7969_v15 = vld [vmem:[#allocation7 + $0x3d8] sm:$0xff] }
 0xf53   :  { %8062 = vmatprep.subr.bf16.mxu0 %v7861_v0  ;;  %v7968_v0 = vld [vmem:[#allocation7 + $0x3d0] sm:$0xff] }
 0xf56   :  { %8063 = vmatpush1.bf16.msra.mxu0 %v7860_v28  ;;  %v7973_v28 = vld [vmem:[#allocation7 + $0x3f8] sm:$0xff] }
 0xf57   :  { %8064 = vmatprep.subr.bf16.mxu0 %v7865_v18  ;;  %v7972_v18 = vld [vmem:[#allocation7 + $0x3f0] sm:$0xff] }
 0xf5a   :  { %8065 = vmatpush1.bf16.msra.mxu0 %v7864_v39  ;;  %v7715_v39 = vld [vmem:[#allocation6 + $0x8] sm:$0xff] }
 0xf5b   :  { %8066 = vmatprep.subr.bf16.mxu0 %v7869_v14  ;;  %v11551_v14 = vpack.c.bf16 %v11522_v38, %v11522_v38  ;;  %v7785_v38 = vld [vmem:[#allocation6 + $0x238] sm:$0xff] }
 0xf5e   :  { %8067 = vmatpush1.bf16.msra.mxu0 %v7868_v37  ;;  %v11555_v37 = vpack.c.bf16 %v11524_v54, %v11524_v54  ;;  %v7784_v54 = vld [vmem:[#allocation6 + $0x230] sm:$0xff] }
 0xf5f   :  { %8068 = vmatprep.subr.bf16.mxu0 %v7873_v41  ;;  %v7781_v41 = vld [vmem:[#allocation6 + $0x218] sm:$0xff] }
 0xf60   :  { %8261 = vmatprep.subr.bf16.mxu1 %v7781_v41  ;;  %8293 = vmatprep.mubr.bf16.mxu1 %v11555_v37  ;;  %v7833_v41 = vld [vmem:[#allocation6 + $0x3b8] sm:$0xff] }
 0xf62   :  { %8069 = vmatpush1.bf16.msra.mxu0 %v7872_v10  ;;  %v7714_v10 = vld [vmem:[#allocation6] sm:$0xff] }
 0xf63   :  { %8070 = vmatprep.subr.bf16.mxu0 %v7877_v26  ;;  %v7719_v26 = vld [vmem:[#allocation6 + $0x28] sm:$0xff] }
 0xf66   :  { %8071 = vmatpush1.bf16.msra.mxu0 %v7876_v42  ;;  %v7780_v42 = vld [vmem:[#allocation6 + $0x210] sm:$0xff] }
 0xf67   :  { %8072 = vmatprep.subr.bf16.mxu0 %v7881_v8  ;;  %8262 = vmatpush1.bf16.msra.mxu1 %v7780_v42  ;;  %v7718_v8 = vld [vmem:[#allocation6 + $0x20] sm:$0xff]  ;;  %v7771_v42 = vld [vmem:[#allocation6 + $0x1c8] sm:$0xff] }
 0xf68   :  { %8263 = vmatprep.subr.bf16.mxu1 %v7785_v38  ;;  %v7837_v38 = vld [vmem:[#allocation6 + $0x3d8] sm:$0xff] }
 0xf6a   :  { %8073 = vmatpush1.bf16.msra.mxu0 %v7880_v44  ;;  %v7723_v44 = vld [vmem:[#allocation6 + $0x48] sm:$0xff] }
 0xf6b   :  { %8074 = vmatprep.subr.bf16.mxu0 %v7885_v45  ;;  %8264 = vmatpush1.bf16.msra.mxu1 %v7784_v54  ;;  %v7789_v45 = vld [vmem:[#allocation6 + $0x258] sm:$0xff]  ;;  %v7836_v54 = vld [vmem:[#allocation6 + $0x3d0] sm:$0xff] }
 0xf6c   :  { %8265 = vmatprep.subr.bf16.mxu1 %v7789_v45  ;;  %v7841_v45 = vld [vmem:[#allocation6 + $0x3f8] sm:$0xff] }
 0xf6e   :  { %8075 = vmatpush1.bf16.msra.mxu0 %v7884_v47  ;;  %v7722_v47 = vld [vmem:[#allocation6 + $0x40] sm:$0xff] }
 0xf6f   :  { %8076 = vmatprep.subr.bf16.mxu0 %v7889_v48  ;;  %v7788_v48 = vld [vmem:[#allocation6 + $0x250] sm:$0xff] }
 0xf70   :  { %8266 = vmatpush1.bf16.msra.mxu1 %v7788_v48  ;;  %v7840_v48 = vld [vmem:[#allocation6 + $0x3f0] sm:$0xff] }
 0xf72   :  { %8077 = vmatpush1.bf16.msra.mxu0 %v7888_v51  ;;  %v7727_v51 = vld [vmem:[#allocation6 + $0x68] sm:$0xff] }
 0xf73   :  { %8078 = vmatprep.subr.bf16.mxu0 %v7893_v57  ;;  %v7726_v57 = vld [vmem:[#allocation6 + $0x60] sm:$0xff] }
 0xf76   :  { %8079 = vmatpush1.bf16.msra.mxu0 %v7892_v27  ;;  %v7792_v27 = vld [vmem:[#allocation6 + $0x270] sm:$0xff] }
 0xf77   :  { %8080 = vmatprep.subr.bf16.mxu0 %v7897_v60  ;;  %v7731_v60 = vld [vmem:[#allocation6 + $0x88] sm:$0xff] }
 0xf7a   :  { %8081 = vmatpush1.bf16.msra.mxu0 %v7896_v58  ;;  %v7797_v58 = vld [vmem:[#allocation6 + $0x298] sm:$0xff] }
 0xf7b   :  { %8082 = vmatprep.subr.bf16.mxu0 %v7901_v34  ;;  %v7730_v34 = vld [vmem:[#allocation6 + $0x80] sm:$0xff] }
 0xf7e   :  { %8083 = vmatpush1.bf16.msra.mxu0 %v7900_v59  ;;  %v7796_v59 = vld [vmem:[#allocation6 + $0x290] sm:$0xff] }
 0xf7f   :  { %8084 = vmatprep.subr.bf16.mxu0 %v7905_v61  ;;  %v7735_v61 = vld [vmem:[#allocation6 + $0xa8] sm:$0xff] }
 0xf82   :  { %8085 = vmatpush1.bf16.msra.mxu0 %v7904_v35  ;;  %v7734_v35 = vld [vmem:[#allocation6 + $0xa0] sm:$0xff] }
 0xf83   :  { %8086 = vmatprep.subr.bf16.mxu0 %v7909_v63  ;;  %v7801_v63 = vld [vmem:[#allocation6 + $0x2b8] sm:$0xff] }
 0xf86   :  { %8087 = vmatpush1.bf16.msra.mxu0 %v7908_v22 }
 0xf87   :  { %8097 = vmatprep.subr.bf16.mxu0 %v7913_v46  ;;  %v7739_v46 = vld [vmem:[#allocation6 + $0xc8] sm:$0xff] }
 0xf89   :  { %8089 = vmatmul.mubr.bf16.vlgmr.msra.gmra.mrb[64].mxu0 %v11533_v32  ;;  %v7932_v32 = vld [vmem:[#allocation7 + $0x2b0] sm:$0xff] }
 0xf8a   :  { %8098 = vmatpush1.bf16.msra.mxu0 %v7912_v50  ;;  %8129 = vmatprep.mubr.bf16.mxu0 %v11537_v21  ;;  %v7936_v21 = vld [vmem:[#allocation7 + $0x2d0] sm:$0xff] }
 0xf8b   :  { %8099 = vmatprep.subr.bf16.mxu0 %v7917_v2  ;;  %v7800_v50 = vld [vmem:[#allocation6 + $0x2b0] sm:$0xff] }
 0xf8e   :  { %8100 = vmatpush1.bf16.msra.mxu0 %v7916_v43 }
 0xf8f   :  { %8101 = vmatprep.subr.bf16.mxu0 %v7921_v52 }
 0xf92   :  { %8102 = vmatpush1.bf16.msra.mxu0 %v7920_v3  ;;  %v7738_v3 = vld [vmem:[#allocation6 + $0xc0] sm:$0xff] }
 0xf93   :  { %8103 = vmatprep.subr.bf16.mxu0 %v7925_v33  ;;  %v7805_v33 = vld [vmem:[#allocation6 + $0x2d8] sm:$0xff] }
 0xf96   :  { %8104 = vmatpush1.bf16.msra.mxu0 %v7924_v53  ;;  %v7804_v53 = vld [vmem:[#allocation6 + $0x2d0] sm:$0xff] }
 0xf97   :  { %8105 = vmatprep.subr.bf16.mxu0 %v7929_v36  ;;  %v7743_v36 = vld [vmem:[#allocation6 + $0xe8] sm:$0xff] }
 0xf9a   :  { %8106 = vmatpush1.bf16.msra.mxu0 %v7928_v13  ;;  %v7809_v13 = vld [vmem:[#allocation6 + $0x2f8] sm:$0xff] }
 0xf9b   :  { %8107 = vmatprep.subr.bf16.mxu0 %v7933_v55  ;;  %v7742_v55 = vld [vmem:[#allocation6 + $0xe0] sm:$0xff] }
 0xf9e   :  { %8108 = vmatpush1.bf16.msra.mxu0 %v7932_v32  ;;  %v7808_v32 = vld [vmem:[#allocation6 + $0x2f0] sm:$0xff] }
 0xf9f   :  { %8109 = vmatprep.subr.bf16.mxu0 %v7937_v29  ;;  %v7747_v29 = vld [vmem:[#allocation6 + $0x108] sm:$0xff] }
 0xfa2   :  { %8110 = vmatpush1.bf16.msra.mxu0 %v7936_v21  ;;  %v7813_v21 = vld [vmem:[#allocation6 + $0x318] sm:$0xff] }
 0xfa3   :  { %8111 = vmatprep.subr.bf16.mxu0 %v7941_v16  ;;  %v7746_v16 = vld [vmem:[#allocation6 + $0x100] sm:$0xff] }
 0xfa6   :  { %8112 = vmatpush1.bf16.msra.mxu0 %v7940_v17  ;;  %v7812_v17 = vld [vmem:[#allocation6 + $0x310] sm:$0xff] }
 0xfa7   :  { %8113 = vmatprep.subr.bf16.mxu0 %v7945_v49  ;;  %v7751_v49 = vld [vmem:[#allocation6 + $0x128] sm:$0xff] }
 0xfaa   :  { %8114 = vmatpush1.bf16.msra.mxu0 %v7944_v62  ;;  %v7817_v62 = vld [vmem:[#allocation6 + $0x338] sm:$0xff] }
 0xfab   :  { %8115 = vmatprep.subr.bf16.mxu0 %v7949_v19  ;;  %v7750_v19 = vld [vmem:[#allocation6 + $0x120] sm:$0xff] }
 0xfae   :  { %8116 = vmatpush1.bf16.msra.mxu0 %v7948_v1  ;;  %v7816_v1 = vld [vmem:[#allocation6 + $0x330] sm:$0xff] }
 0xfaf   :  { %8117 = vmatprep.subr.bf16.mxu0 %v7953_v12  ;;  %v7755_v12 = vld [vmem:[#allocation6 + $0x148] sm:$0xff] }
 0xfb2   :  { %8118 = vmatpush1.bf16.msra.mxu0 %v7952_v20  ;;  %v7821_v20 = vld [vmem:[#allocation6 + $0x358] sm:$0xff] }
 0xfb3   :  { %8119 = vmatprep.subr.bf16.mxu0 %v7957_v24  ;;  %v7754_v24 = vld [vmem:[#allocation6 + $0x140] sm:$0xff] }
 0xfb6   :  { %8120 = vmatpush1.bf16.msra.mxu0 %v7956_v40  ;;  %v7820_v40 = vld [vmem:[#allocation6 + $0x350] sm:$0xff] }
 0xfb7   :  { %8121 = vmatprep.subr.bf16.mxu0 %v7961_v11  ;;  %v7759_v11 = vld [vmem:[#allocation6 + $0x168] sm:$0xff] }
 0xfba   :  { %8122 = vmatpush1.bf16.msra.mxu0 %v7960_v30  ;;  %v7825_v30 = vld [vmem:[#allocation6 + $0x378] sm:$0xff] }
 0xfbb   :  { %8123 = vmatprep.subr.bf16.mxu0 %v7965_v31  ;;  %v7758_v31 = vld [vmem:[#allocation6 + $0x160] sm:$0xff] }
 0xfbe   :  { %8124 = vmatpush1.bf16.msra.mxu0 %v7964_v6  ;;  %v7824_v6 = vld [vmem:[#allocation6 + $0x370] sm:$0xff] }
 0xfbf   :  { %8125 = vmatprep.subr.bf16.mxu0 %v7969_v15  ;;  %v7763_v15 = vld [vmem:[#allocation6 + $0x188] sm:$0xff] }
 0xfc2   :  { %8126 = vmatpush1.bf16.msra.mxu0 %v7968_v0  ;;  %v7829_v0 = vld [vmem:[#allocation6 + $0x398] sm:$0xff] }
 0xfc3   :  { %8127 = vmatprep.subr.bf16.mxu0 %v7973_v28  ;;  %v7762_v28 = vld [vmem:[#allocation6 + $0x180] sm:$0xff] }
 0xfc6   :  { %8128 = vmatpush1.bf16.msra.mxu0 %v7972_v18  ;;  %v7828_v18 = vld [vmem:[#allocation6 + $0x390] sm:$0xff] }
 0xfc7   :  { %8138 = vmatprep.subr.bf16.mxu0 %v7715_v39  ;;  %v7767_v39 = vld [vmem:[#allocation6 + $0x1a8] sm:$0xff] }
 0xfc9   :  { %8130 = vmatmul.mubr.bf16.vlgmr.msra.gmra.mrb[68].mxu0 %v11543_v7  ;;  %v7793_v7 = vld [vmem:[#allocation6 + $0x278] sm:$0xff] }
 0xfca   :  { %8139 = vmatpush1.bf16.msra.mxu0 %v7714_v10  ;;  %8170 = vmatprep.mubr.bf16.mxu0 %v11551_v14  ;;  %v7766_v10 = vld [vmem:[#allocation6 + $0x1a0] sm:$0xff] }
 0xfcb   :  { %8140 = vmatprep.subr.bf16.mxu0 %v7719_v26  ;;  %8267 = vmatprep.subr.bf16.mxu1 %v7793_v7  ;;  %v7832_v26 = vld [vmem:[#allocation6 + $0x3b0] sm:$0xff]  ;;  %v11566_v7 = vpack.c.bf16 %v11518_v56, %v11518_v56  ;;  %v7787_v56 = vld [vmem:[#allocation6 + $0x248] sm:$0xff] }
 0xfcc   :  { %8268 = vmatpush1.bf16.msra.mxu1 %v7792_v27  ;;  %v7778_v27 = vld [vmem:[#allocation6 + $0x200] sm:$0xff] }
 0xfcd   :  { %8269 = vmatprep.subr.bf16.mxu1 %v7797_v58  ;;  %v7782_v58 = vld [vmem:[#allocation6 + $0x220] sm:$0xff] }
 0xfce   :  { %8141 = vmatpush1.bf16.msra.mxu0 %v7718_v8  ;;  %v7770_v8 = vld [vmem:[#allocation6 + $0x1c0] sm:$0xff] }
 0xfcf   :  { %8142 = vmatprep.subr.bf16.mxu0 %v7723_v44  ;;  %v7775_v44 = vld [vmem:[#allocation6 + $0x1e8] sm:$0xff] }
 0xfd0   :  { %8270 = vmatpush1.bf16.msra.mxu1 %v7796_v59  ;;  %v7791_v59 = vld [vmem:[#allocation6 + $0x268] sm:$0xff] }
 0xfd1   :  { %8271 = vmatprep.subr.bf16.mxu1 %v7801_v63  ;;  %v7799_v63 = vld [vmem:[#allocation6 + $0x2a8] sm:$0xff] }
 0xfd2   :  { %8143 = vmatpush1.bf16.msra.mxu0 %v7722_v47  ;;  %v7774_v47 = vld [vmem:[#allocation6 + $0x1e0] sm:$0xff] }
 0xfd3   :  { %8144 = vmatprep.subr.bf16.mxu0 %v7727_v51  ;;  %v7779_v51 = vld [vmem:[#allocation6 + $0x208] sm:$0xff] }
 0xfd4   :  { %8272 = vmatpush1.bf16.msra.mxu1 %v7800_v50 }
 0xfd5   :  { %8273 = vmatprep.subr.bf16.mxu1 %v7805_v33 }
 0xfd6   :  { %8145 = vmatpush1.bf16.msra.mxu0 %v7726_v57  ;;  %v11570_v57 = vpack.c.bf16 %v11520_v9, %v11520_v9  ;;  %v7790_v9 = vld [vmem:[#allocation6 + $0x260] sm:$0xff] }
 0xfd7   :  { %8146 = vmatprep.subr.bf16.mxu0 %v7731_v60  ;;  %v7783_v60 = vld [vmem:[#allocation6 + $0x228] sm:$0xff] }
 0xfd8   :  { %8274 = vmatpush1.bf16.msra.mxu1 %v7804_v53 }
 0xfd9   :  { %8275 = vmatprep.subr.bf16.mxu1 %v7809_v13  ;;  %v7807_v13 = vld [vmem:[#allocation6 + $0x2e8] sm:$0xff] }
 0xfda   :  { %8147 = vmatpush1.bf16.msra.mxu0 %v7730_v34  ;;  %v7786_v34 = vld [vmem:[#allocation6 + $0x240] sm:$0xff] }
 0xfdb   :  { %8148 = vmatprep.subr.bf16.mxu0 %v7735_v61  ;;  %v7795_v61 = vld [vmem:[#allocation6 + $0x288] sm:$0xff] }
 0xfdc   :  { %v11560_v22 = vpop.f32.mrb[56].mxu0  ;;  %8276 = vmatpush1.bf16.msra.mxu1 %v7808_v32  ;;  %v7811_v32 = vld [vmem:[#allocation6 + $0x308] sm:$0xff] }
 0xfdd   :  { %v11562_v2 = vpop.f32.mrb[57].mxu0  ;;  %8277 = vmatprep.subr.bf16.mxu1 %v7813_v21  ;;  %v7815_v21 = vld [vmem:[#allocation6 + $0x328] sm:$0xff] }
 0xfde   :  { %v8012_v43 = vpop.f32.mrb[58].mxu0  ;;  %8149 = vmatpush1.bf16.msra.mxu0 %v7734_v35  ;;  %v7794_v35 = vld [vmem:[#allocation6 + $0x280] sm:$0xff] }
 0xfdf   :  { %v8013_v52 = vpop.f32.mrb[59].mxu0  ;;  %8150 = vmatprep.subr.bf16.mxu0 %v7739_v46  ;;  %v7798_v46 = vld [vmem:[#allocation6 + $0x2a0] sm:$0xff] }
 0xfe0   :  { %8278 = vmatpush1.bf16.msra.mxu1 %v7812_v17  ;;  %v7823_v17 = vld [vmem:[#allocation6 + $0x368] sm:$0xff] }
 0xfe1   :  { %8279 = vmatprep.subr.bf16.mxu1 %v7817_v62  ;;  %v7827_v62 = vld [vmem:[#allocation6 + $0x388] sm:$0xff] }
 0xfe2   :  { %8151 = vmatpush1.bf16.msra.mxu0 %v7738_v3 }
 0xfe3   :  { %8152 = vmatprep.subr.bf16.mxu0 %v7743_v36  ;;  %v7802_v36 = vld [vmem:[#allocation6 + $0x2c0] sm:$0xff] }
 0xfe4   :  { %8280 = vmatpush1.bf16.msra.mxu1 %v7816_v1  ;;  %v7831_v1 = vld [vmem:[#allocation6 + $0x3a8] sm:$0xff] }
 0xfe5   :  { %8281 = vmatprep.subr.bf16.mxu1 %v7821_v20  ;;  %v7835_v20 = vld [vmem:[#allocation6 + $0x3c8] sm:$0xff] }
 0xfe6   :  { %8153 = vmatpush1.bf16.msra.mxu0 %v7742_v55  ;;  %v7806_v55 = vld [vmem:[#allocation6 + $0x2e0] sm:$0xff] }
 0xfe7   :  { %8154 = vmatprep.subr.bf16.mxu0 %v7747_v29  ;;  %v7810_v29 = vld [vmem:[#allocation6 + $0x300] sm:$0xff] }
 0xfe8   :  { %8282 = vmatpush1.bf16.msra.mxu1 %v7820_v40  ;;  %v7839_v40 = vld [vmem:[#allocation6 + $0x3e8] sm:$0xff] }
 0xfe9   :  { %8283 = vmatprep.subr.bf16.mxu1 %v7825_v30  ;;  %v7717_v30 = vld [vmem:[#allocation6 + $0x18] sm:$0xff] }
 0xfea   :  { %8155 = vmatpush1.bf16.msra.mxu0 %v7746_v16  ;;  %v7819_v16 = vld [vmem:[#allocation6 + $0x348] sm:$0xff] }
 0xfeb   :  { %8156 = vmatprep.subr.bf16.mxu0 %v7751_v49  ;;  %v7822_v49 = vld [vmem:[#allocation6 + $0x360] sm:$0xff] }
 0xfec   :  { %8284 = vmatpush1.bf16.msra.mxu1 %v7824_v6  ;;  %v7721_v6 = vld [vmem:[#allocation6 + $0x38] sm:$0xff] }
 0xfed   :  { %8285 = vmatprep.subr.bf16.mxu1 %v7829_v0  ;;  %v7725_v0 = vld [vmem:[#allocation6 + $0x58] sm:$0xff] }
 0xfee   :  { %8157 = vmatpush1.bf16.msra.mxu0 %v7750_v19  ;;  %v7826_v19 = vld [vmem:[#allocation6 + $0x380] sm:$0xff] }
 0xfef   :  { %8158 = vmatprep.subr.bf16.mxu0 %v7755_v12  ;;  %v7830_v12 = vld [vmem:[#allocation6 + $0x3a0] sm:$0xff] }
 0xff0   :  { %8286 = vmatpush1.bf16.msra.mxu1 %v7828_v18  ;;  %v7729_v18 = vld [vmem:[#allocation6 + $0x78] sm:$0xff] }
 0xff1   :  { %8287 = vmatprep.subr.bf16.mxu1 %v7833_v41  ;;  %v7733_v41 = vld [vmem:[#allocation6 + $0x98] sm:$0xff] }
 0xff2   :  { %8159 = vmatpush1.bf16.msra.mxu0 %v7754_v24  ;;  %v7834_v24 = vld [vmem:[#allocation6 + $0x3c0] sm:$0xff] }
 0xff3   :  { %8160 = vmatprep.subr.bf16.mxu0 %v7759_v11  ;;  %v7838_v11 = vld [vmem:[#allocation6 + $0x3e0] sm:$0xff] }
 0xff4   :  { %8288 = vmatpush1.bf16.msra.mxu1 %v7832_v26  ;;  %v7737_v26 = vld [vmem:[#allocation6 + $0xb8] sm:$0xff] }
 0xff5   :  { %8289 = vmatprep.subr.bf16.mxu1 %v7837_v38 }
 0xff6   :  { %8161 = vmatpush1.bf16.msra.mxu0 %v7758_v31  ;;  %v7716_v31 = vld [vmem:[#allocation6 + $0x10] sm:$0xff] }
 0xff7   :  { %8162 = vmatprep.subr.bf16.mxu0 %v7763_v15  ;;  %v7720_v15 = vld [vmem:[#allocation6 + $0x30] sm:$0xff] }
 0xff8   :  { %8290 = vmatpush1.bf16.msra.mxu1 %v7836_v54 }
 0xff9   :  { %8291 = vmatprep.subr.bf16.mxu1 %v7841_v45  ;;  %v7740_v45 = vld [vmem:[#allocation6 + $0xd0] sm:$0xff] }
 0xffa   :  { %8163 = vmatpush1.bf16.msra.mxu0 %v7762_v28  ;;  %v7724_v28 = vld [vmem:[#allocation6 + $0x50] sm:$0xff] }
 0xffb   :  { %8164 = vmatprep.subr.bf16.mxu0 %v7767_v39  ;;  %v7728_v39 = vld [vmem:[#allocation6 + $0x70] sm:$0xff] }
 0xffc   :  { %8292 = vmatpush1.bf16.msra.mxu1 %v7840_v48  ;;  %v7744_v48 = vld [vmem:[#allocation6 + $0xf0] sm:$0xff] }
 0xffe   :  { %8165 = vmatpush1.bf16.msra.mxu0 %v7766_v10  ;;  %v7732_v10 = vld [vmem:[#allocation6 + $0x90] sm:$0xff] }
 0xfff   :  { %8166 = vmatprep.subr.bf16.mxu0 %v7771_v42  ;;  %8294 = vmatmul.mubr.bf16.vlgmr.msra.gmra.mrb[124].mxu1 %v11570_v57  ;;  %v7736_v42 = vld [vmem:[#allocation6 + $0xb0] sm:$0xff] }
0x1002   :  { %8167 = vmatpush1.bf16.msra.mxu0 %v7770_v8 }
0x1003   :  { %8168 = vmatprep.subr.bf16.mxu0 %v7775_v44 }
0x1006   :  { %8169 = vmatpush1.bf16.msra.mxu0 %v7774_v47  ;;  %v7745_v47 = vld [vmem:[#allocation6 + $0xf8] sm:$0xff] }
0x1007   :  { %8179 = vmatprep.subr.bf16.mxu0 %v7779_v51  ;;  %v7749_v51 = vld [vmem:[#allocation6 + $0x118] sm:$0xff] }
0x1009   :  { %8171 = vmatmul.mubr.bf16.vlgmr.msra.gmra.mrb[72].mxu0 %v11566_v7 }
0x100a   :  { %8180 = vmatpush1.bf16.msra.mxu0 %v7778_v27  ;;  %8211 = vmatprep.mubr.bf16.mxu0 %v11555_v37  ;;  %v7803_v37 = vld [vmem:[#allocation6 + $0x2c8] sm:$0xff]  ;;  %v7753_v27 = vld [vmem:[#allocation6 + $0x138] sm:$0xff] }
0x100b   :  { %8181 = vmatprep.subr.bf16.mxu0 %v7783_v60  ;;  %v7752_v60 = vld [vmem:[#allocation6 + $0x130] sm:$0xff] }
0x100e   :  { %8182 = vmatpush1.bf16.msra.mxu0 %v7782_v58  ;;  %v7757_v58 = vld [vmem:[#allocation6 + $0x158] sm:$0xff] }
0x100f   :  { %8183 = vmatprep.subr.bf16.mxu0 %v7787_v56  ;;  %v7756_v56 = vld [vmem:[#allocation6 + $0x150] sm:$0xff] }
0x1012   :  { %8184 = vmatpush1.bf16.msra.mxu0 %v7786_v34  ;;  %v7761_v34 = vld [vmem:[#allocation6 + $0x178] sm:$0xff] }
0x1013   :  { %8185 = vmatprep.subr.bf16.mxu0 %v7791_v59  ;;  %v7760_v59 = vld [vmem:[#allocation6 + $0x170] sm:$0xff] }
0x1016   :  { %8186 = vmatpush1.bf16.msra.mxu0 %v7790_v9  ;;  %v7765_v9 = vld [vmem:[#allocation6 + $0x198] sm:$0xff] }
0x1017   :  { %8187 = vmatprep.subr.bf16.mxu0 %v7795_v61  ;;  %v7764_v61 = vld [vmem:[#allocation6 + $0x190] sm:$0xff] }
0x101a   :  { %8188 = vmatpush1.bf16.msra.mxu0 %v7794_v35  ;;  %v7769_v35 = vld [vmem:[#allocation6 + $0x1b8] sm:$0xff] }
0x101b   :  { %8189 = vmatprep.subr.bf16.mxu0 %v7799_v63  ;;  %v7768_v63 = vld [vmem:[#allocation6 + $0x1b0] sm:$0xff] }
0x101c   :  { %v8049_v50 = vpop.f32.mrb[60].mxu0 }
0x101d   :  { %v11576_v43 = vadd.f32 %v8049_v50, %v11560_v22  ;;  %v8051_v52 = vpop.f32.mrb[61].mxu0  ;;  %v7814_v22 = vld [vmem:[#allocation6 + $0x320] sm:$0xff]  ;;  %v7772_v50 = vld [vmem:[#allocation6 + $0x1d0] sm:$0xff] }
0x101e   :  { %v11579_v3 = vadd.f32 %v8051_v52, %v11562_v2  ;;  %v8053_v33 = vpop.f32.mrb[62].mxu0  ;;  %8190 = vmatpush1.bf16.msra.mxu0 %v7798_v46  ;;  %v7818_v2 = vld [vmem:[#allocation6 + $0x340] sm:$0xff]  ;;  %v7773_v46 = vld [vmem:[#allocation6 + $0x1d8] sm:$0xff]  ;;  %v7776_v52 = vld [vmem:[#allocation6 + $0x1f0] sm:$0xff] }
0x101f   :  { %v8054_v53 = vpop.f32.mrb[63].mxu0  ;;  %8191 = vmatprep.subr.bf16.mxu0 %v7803_v37  ;;  %v7777_v37 = vld [vmem:[#allocation6 + $0x1f8] sm:$0xff] }
0x1022   :  { %8192 = vmatpush1.bf16.msra.mxu0 %v7802_v36 }
0x1023   :  { %8193 = vmatprep.subr.bf16.mxu0 %v7807_v13 }
0x1026   :  { %8194 = vmatpush1.bf16.msra.mxu0 %v7806_v55 }
0x1027   :  { %8195 = vmatprep.subr.bf16.mxu0 %v7811_v32 }
0x102a   :  { %8196 = vmatpush1.bf16.msra.mxu0 %v7810_v29 }
0x102b   :  { %8197 = vmatprep.subr.bf16.mxu0 %v7815_v21 }
0x102e   :  { %8198 = vmatpush1.bf16.msra.mxu0 %v7814_v22 }
0x102f   :  { %8199 = vmatprep.subr.bf16.mxu0 %v7819_v16 }
0x1032   :  { %8200 = vmatpush1.bf16.msra.mxu0 %v7818_v2 }
0x1033   :  { %8201 = vmatprep.subr.bf16.mxu0 %v7823_v17 }
0x1036   :  { %8202 = vmatpush1.bf16.msra.mxu0 %v7822_v49 }
0x1037   :  { %8203 = vmatprep.subr.bf16.mxu0 %v7827_v62 }
0x103a   :  { %8204 = vmatpush1.bf16.msra.mxu0 %v7826_v19 }
0x103b   :  { %8205 = vmatprep.subr.bf16.mxu0 %v7831_v1 }
0x103e   :  { %8206 = vmatpush1.bf16.msra.mxu0 %v7830_v12  ;;  %v8302_v12 = vld [vmem:[#allocation30] sm:$0xf] }
0x103f   :  { %8207 = vmatprep.subr.bf16.mxu0 %v7835_v20 }
0x1042   :  { %8208 = vmatpush1.bf16.msra.mxu0 %v7834_v24  ;;  %v8311_v24 = vrot.slane %v8302_v12, %v11243_v25 }
0x1043   :  { %8209 = vmatprep.subr.bf16.mxu0 %v7839_v40 }
0x1046   :  { %8210 = vmatpush1.bf16.msra.mxu0 %v7838_v11 }
0x1047   :  { %8220 = vmatprep.subr.bf16.mxu0 %v7717_v30 }
0x1049   :  { %8212 = vmatmul.mubr.bf16.vlgmr.msra.gmra.mrb[76].mxu0 %v11570_v57  ;;  %v7748_v57 = vld [vmem:[#allocation6 + $0x110] sm:$0xff] }
0x104a   :  { %8221 = vmatpush1.bf16.msra.mxu0 %v7716_v31  ;;  %8252 = vmatprep.mubr.bf16.mxu0 %v11551_v14  ;;  %v7741_v14 = vld [vmem:[#allocation6 + $0xd8] sm:$0xff] }
0x104b   :  { %8222 = vmatprep.subr.bf16.mxu0 %v7721_v6 }
0x104e   :  { %8223 = vmatpush1.bf16.msra.mxu0 %v7720_v15 }
0x104f   :  { %8224 = vmatprep.subr.bf16.mxu0 %v7725_v0 }
0x1052   :  { %8225 = vmatpush1.bf16.msra.mxu0 %v7724_v28 }
0x1053   :  { %8226 = vmatprep.subr.bf16.mxu0 %v7729_v18 }
0x1056   :  { %8227 = vmatpush1.bf16.msra.mxu0 %v7728_v39 }
0x1057   :  { %8228 = vmatprep.subr.bf16.mxu0 %v7733_v41 }
0x105a   :  { %8229 = vmatpush1.bf16.msra.mxu0 %v7732_v10  ;;  %v8315_v10 = vrot.slane %v8302_v12, %v11488_v5 }
0x105b   :  { %8230 = vmatprep.subr.bf16.mxu0 %v7737_v26 }
0x105c   :  { %v8090_v38 = vpop.f32.mrb[64].mxu0 }
0x105d   :  { %v8092_v8 = vpop.f32.mrb[65].mxu0 }
0x105e   :  { %v8094_v54 = vpop.f32.mrb[66].mxu0  ;;  %8231 = vmatpush1.bf16.msra.mxu0 %v7736_v42 }
0x105f   :  { %v8095_v44 = vpop.f32.mrb[67].mxu0  ;;  %8232 = vmatprep.subr.bf16.mxu0 %v7741_v14 }
0x1062   :  { %8233 = vmatpush1.bf16.msra.mxu0 %v7740_v45 }
0x1063   :  { %8234 = vmatprep.subr.bf16.mxu0 %v7745_v47 }
0x1066   :  { %8235 = vmatpush1.bf16.msra.mxu0 %v7744_v48 }
0x1067   :  { %8236 = vmatprep.subr.bf16.mxu0 %v7749_v51 }
0x106a   :  { %8237 = vmatpush1.bf16.msra.mxu0 %v7748_v57 }
0x106b   :  { %8238 = vmatprep.subr.bf16.mxu0 %v7753_v27 }
0x106e   :  { %8239 = vmatpush1.bf16.msra.mxu0 %v7752_v60 }
0x106f   :  { %8240 = vmatprep.subr.bf16.mxu0 %v7757_v58 }
0x1072   :  { %8241 = vmatpush1.bf16.msra.mxu0 %v7756_v56 }
0x1073   :  { %8242 = vmatprep.subr.bf16.mxu0 %v7761_v34 }
0x1076   :  { %8243 = vmatpush1.bf16.msra.mxu0 %v7760_v59 }
0x1077   :  { %8244 = vmatprep.subr.bf16.mxu0 %v7765_v9 }
0x107a   :  { %8245 = vmatpush1.bf16.msra.mxu0 %v7764_v61 }
0x107b   :  { %8246 = vmatprep.subr.bf16.mxu0 %v7769_v35 }
0x107e   :  { %8247 = vmatpush1.bf16.msra.mxu0 %v7768_v63 }
0x107f   :  { %8248 = vmatprep.subr.bf16.mxu0 %v7773_v46 }
0x1082   :  { %8249 = vmatpush1.bf16.msra.mxu0 %v7772_v50 }
0x1083   :  { %8250 = vmatprep.subr.bf16.mxu0 %v7777_v37 }
0x1086   :  { %8251 = vmatpush1.bf16.msra.mxu0 %v7776_v52 }
0x1089   :  { %8253 = vmatmul.mubr.bf16.vlgmr.msra.gmra.mrb[80].mxu0 %v11566_v7  ;;  %v8307_v7 = vrot.slane %v8302_v12, %v11240_v23 }
0x109c   :  { %v8131_v33 = vpop.f32.mrb[68].mxu0 }
0x109d   :  { %v8132_v53 = vadd.f32 %v8131_v33, %v8090_v38  ;;  %v8133_v36 = vpop.f32.mrb[69].mxu0  ;;  %v8319_v38 = vrot.slane %v8302_v12, %v11492_v4 }
0x109e   :  { %v8134_v13 = vadd.f32 %v8133_v36, %v8092_v8  ;;  %v8135_v55 = vpop.f32.mrb[70].mxu0 }
0x109f   :  { %v8136_v32 = vpop.f32.mrb[71].mxu0 }
0x10d2   :  { %v8295_v29 = vpop.f32.mrb[124].mxu1 }
0x10d3   :  { %v8297_v22 = vpop.f32.mrb[125].mxu1 }
0x10d4   :  { %v8299_v17 = vpop.f32.mrb[126].mxu1 }
0x10d5   :  { %v8300_v19 = vpop.f32.mrb[127].mxu1 }
0x10dc   :  { %v8172_v21 = vpop.f32.mrb[72].mxu0 }
0x10dd   :  { %v8173_v16 = vadd.f32 %v8172_v21, %v11576_v43  ;;  %v8174_v2 = vpop.f32.mrb[73].mxu0 }
0x10de   :  { %v8175_v49 = vadd.f32 %v8174_v2, %v11579_v3  ;;  %v8176_v62 = vpop.f32.mrb[74].mxu0 }
0x10df   :  { %v8177_v1 = vpop.f32.mrb[75].mxu0 }
0x111c   :  { %v8213_v20 = vpop.f32.mrb[76].mxu0 }
0x111d   :  { %v8214_v40 = vadd.f32 %v8213_v20, %v8173_v16  ;;  %v8215_v11 = vpop.f32.mrb[77].mxu0 }
0x111e   :  { %v8216_v30 = vadd.f32 %v8215_v11, %v8175_v49  ;;  %v8217_v31 = vpop.f32.mrb[78].mxu0 }
0x111f   :  { %v8324_v6 = vadd.f32 %v8307_v7, %v8214_v40  ;;  %v8218_v15 = vpop.f32.mrb[79].mxu0 }
0x1120   :  { %v8325_v43 = vadd.f32 %v8311_v24, %v8216_v30 }
0x1121   :  { %vm8328_vm2 = vcmp.gt.f32.partialorder %v8324_v6, 0.0  ;;  %v8332_v0 = vmul.f32 0.2, %v8324_v6 }
0x1122   :  { %vm8329_vm3 = vcmp.gt.f32.partialorder %v8325_v43, 0.0  ;;  %v8333_v3 = vmul.f32 0.2, %v8325_v43 }
0x1123   :  { %v11588_v28 = vsel %vm8328_vm2, %v8324_v6, %v8332_v0 }
0x1124   :  { %v8337_v18 = vsel %vm8329_vm3, %v8325_v43, %v8333_v3 }
0x115c   :  { %v8254_v39 = vpop.f32.mrb[80].mxu0 }
0x115d   :  { %v8255_v41 = vadd.f32 %v8254_v39, %v8132_v53  ;;  %v8256_v26 = vpop.f32.mrb[81].mxu0 }
0x115e   :  { %v8257_v42 = vadd.f32 %v8256_v26, %v8134_v13  ;;  %v8258_v14 = vpop.f32.mrb[82].mxu0 }
0x115f   :  { %v8296_v8 = vadd.f32 %v8295_v29, %v8255_v41  ;;  %v8259_v54 = vpop.f32.mrb[83].mxu0 }
0x1160   :  { %v8298_v44 = vadd.f32 %v8297_v22, %v8257_v42 }
0x1161   :  { %v8326_v45 = vadd.f32 %v8315_v10, %v8296_v8 }
0x1162   :  { %v8327_v47 = vadd.f32 %v8319_v38, %v8298_v44 }
0x1163   :  { %vm8330_vm4 = vcmp.gt.f32.partialorder %v8326_v45, 0.0  ;;  %v8334_v48 = vmul.f32 0.2, %v8326_v45 }
0x1164   :  { %vm8331_vm5 = vcmp.gt.f32.partialorder %v8327_v47, 0.0  ;;  %v8335_v51 = vmul.f32 0.2, %v8327_v47 }
0x1165   :  { %v11592_v57 = vsel %vm8330_vm4, %v8326_v45, %v8334_v48 }
0x1166   :  { %v11594_v27 = vsel %vm8331_vm5, %v8327_v47, %v8335_v51 }
0x1167   :  { %10664 = dma.done.wait [#allocation9 + $0x3], 8192 }
0x1168   :  { %10665 = vsyncadd [#allocation9 + $0x3], 4294959104  ;;  %v8344_v5 = vpack.c.bf16 %v8337_v18, %v8337_v18  ;;  %v8348_v60 = vld [vmem:[#allocation8 + $0x8] sm:$0xff]  ;;  %v8347_v4 = vld [vmem:[#allocation8] sm:$0xff]  ;;  %v8343_v41 = vpack.c.bf16 %v11588_v28, %v11588_v28  ;;  %v8346_v10 = vpack.c.bf16 %v11594_v27, %v11594_v27  ;;  %vm8694_vm8 = vcmask 1024   ;;  %s11714_s12 = sld [smem:[#allocation62_spill]] }
0x1169   :  { %v8350_v58 = vld [vmem:[#allocation8 + $0x18] sm:$0xff]  ;;  %8423 = vmatprep.subr.bf16.mxu0 %v8348_v60  ;;  %v8349_v56 = vld [vmem:[#allocation8 + $0x10] sm:$0xff]  ;;  %v8352_v34 = vld [vmem:[#allocation8 + $0x28] sm:$0xff] }
0x116a   :  { %8455 = vmatprep.mubr.bf16.mxu0 %v8344_v5  ;;  %8424 = vmatpush1.bf16.msra.mxu0 %v8347_v4  ;;  %v8351_v59 = vld [vmem:[#allocation8 + $0x20] sm:$0xff]  ;;  %v8354_v9 = vld [vmem:[#allocation8 + $0x38] sm:$0xff]  ;;  %v8353_v61 = vld [vmem:[#allocation8 + $0x30] sm:$0xff] }
0x116b   :  { %8425 = vmatprep.subr.bf16.mxu0 %v8350_v58  ;;  %v8356_v35 = vld [vmem:[#allocation8 + $0x48] sm:$0xff]  ;;  %v8355_v63 = vld [vmem:[#allocation8 + $0x40] sm:$0xff]  ;;  %v8358_v46 = vld [vmem:[#allocation8 + $0x58] sm:$0xff] }
0x116c   :  { %v8357_v50 = vld [vmem:[#allocation8 + $0x50] sm:$0xff]  ;;  %v8360_v37 = vld [vmem:[#allocation8 + $0x68] sm:$0xff]  ;;  %v8359_v52 = vld [vmem:[#allocation8 + $0x60] sm:$0xff] }
0x116d   :  { %v8362_v33 = vld [vmem:[#allocation8 + $0x78] sm:$0xff]  ;;  %v10314_v53 = vld [vmem:[%s11673_s18 + $0x40] sm:$0xff]   ;;  %v10316_v13 = vld [vmem:[%s11673_s18 + $0x48] sm:$0xff]  }
0x116e   :  { %8426 = vmatpush1.bf16.msra.mxu0 %v8349_v56  ;;  %v10315_v36 = vld [vmem:[%s11673_s18] sm:$0xff]   ;;  %9456 = vmatprep.subr.bf16.mxu1 %v10314_v53  ;;  %v10317_v55 = vld [vmem:[%s11673_s18 + $0x8] sm:$0xff]   ;;  %v10318_v32 = vld [vmem:[%s11673_s18 + $0x50] sm:$0xff]  }
0x116f   :  { %8427 = vmatprep.subr.bf16.mxu0 %v8352_v34  ;;  %9457 = vmatpush3.bf16.msra.mxu1 %v10315_v36  ;;  %v8361_v29 = vld [vmem:[#allocation8 + $0x70] sm:$0xff]  ;;  %v8364_v21 = vld [vmem:[#allocation8 + $0x88] sm:$0xff]  ;;  %v10320_v16 = vld [vmem:[%s11673_s18 + $0x58] sm:$0xff]  }
0x1170   :  { %9458 = vmatprep.subr.bf16.mxu1 %v10316_v13  ;;  %v10319_v22 = vld [vmem:[%s11673_s18 + $0x10] sm:$0xff]   ;;  %v8363_v2 = vld [vmem:[#allocation8 + $0x80] sm:$0xff]  ;;  %v8366_v17 = vld [vmem:[#allocation8 + $0x98] sm:$0xff]  ;;  %v8345_v13 = vpack.c.bf16 %v11592_v57, %v11592_v57 }
0x1171   :  { %v8365_v49 = vld [vmem:[#allocation8 + $0x90] sm:$0xff]  ;;  %v10321_v62 = vld [vmem:[%s11673_s18 + $0x18] sm:$0xff]   ;;  %v10322_v19 = vld [vmem:[%s11673_s18 + $0x60] sm:$0xff]  }
0x1172   :  { %8428 = vmatpush1.bf16.msra.mxu0 %v8351_v59  ;;  %v8368_v1 = vld [vmem:[#allocation8 + $0xa8] sm:$0xff]  ;;  %v10323_v12 = vld [vmem:[%s11673_s18 + $0x20] sm:$0xff]   ;;  %v8370_v24 = vld [vmem:[#allocation8 + $0xb8] sm:$0xff] }
0x1173   :  { %8429 = vmatprep.subr.bf16.mxu0 %v8354_v9  ;;  %9459 = vmatpush3.bf16.msra.mxu1 %v10317_v55  ;;  %v10324_v7 = vld [vmem:[%s11673_s18 + $0x68] sm:$0xff]   ;;  %v8367_v20 = vld [vmem:[#allocation8 + $0xa0] sm:$0xff]  ;;  %v8369_v11 = vld [vmem:[#allocation8 + $0xb0] sm:$0xff] }
0x1174   :  { %9460 = vmatprep.subr.bf16.mxu1 %v10318_v32  ;;  %v10325_v40 = vld [vmem:[%s11673_s18 + $0x28] sm:$0xff]   ;;  %v8371_v31 = vld [vmem:[#allocation8 + $0xc0] sm:$0xff]  ;;  %v8374_v6 = vld [vmem:[#allocation8 + $0xd8] sm:$0xff] }
0x1175   :  { %v8372_v30 = vld [vmem:[#allocation8 + $0xc8] sm:$0xff]  ;;  %v8373_v15 = vld [vmem:[#allocation8 + $0xd0] sm:$0xff]  ;;  %v8375_v0 = vld [vmem:[#allocation8 + $0xe0] sm:$0xff] }
0x1176   :  { %8430 = vmatpush1.bf16.msra.mxu0 %v8353_v61  ;;  %v8376_v43 = vld [vmem:[#allocation8 + $0xe8] sm:$0xff]  ;;  %v8378_v3 = vld [vmem:[#allocation8 + $0xf8] sm:$0xff]  ;;  %v8377_v18 = vld [vmem:[#allocation8 + $0xf0] sm:$0xff] }
0x1177   :  { %8431 = vmatprep.subr.bf16.mxu0 %v8356_v35  ;;  %9461 = vmatpush3.bf16.msra.mxu1 %v10319_v22  ;;  %v8380_v39 = vld [vmem:[#allocation8 + $0x108] sm:$0xff]  ;;  %v8379_v26 = vld [vmem:[#allocation8 + $0x100] sm:$0xff]  ;;  %v8382_v42 = vld [vmem:[#allocation8 + $0x118] sm:$0xff] }
0x1178   :  { %9462 = vmatprep.subr.bf16.mxu1 %v10320_v16  ;;  %v8381_v38 = vld [vmem:[#allocation8 + $0x110] sm:$0xff]  ;;  %v8384_v14 = vld [vmem:[#allocation8 + $0x128] sm:$0xff]  ;;  %v8383_v8 = vld [vmem:[#allocation8 + $0x120] sm:$0xff] }
0x1179   :  { %v8386_v54 = vld [vmem:[#allocation8 + $0x138] sm:$0xff]  ;;  %v8385_v28 = vld [vmem:[#allocation8 + $0x130] sm:$0xff]  ;;  %v8388_v44 = vld [vmem:[#allocation8 + $0x148] sm:$0xff] }
0x117a   :  { %8432 = vmatpush1.bf16.msra.mxu0 %v8355_v63  ;;  %v8387_v45 = vld [vmem:[#allocation8 + $0x140] sm:$0xff]  ;;  %v8390_v47 = vld [vmem:[#allocation8 + $0x158] sm:$0xff]  ;;  %v8389_v48 = vld [vmem:[#allocation8 + $0x150] sm:$0xff] }
0x117b   :  { %8433 = vmatprep.subr.bf16.mxu0 %v8358_v46  ;;  %9463 = vmatpush3.bf16.msra.mxu1 %v10321_v62  ;;  %v8392_v51 = vld [vmem:[#allocation8 + $0x168] sm:$0xff]  ;;  %v8391_v27 = vld [vmem:[#allocation8 + $0x160] sm:$0xff]  ;;  %v8394_v5 = vld [vmem:[#allocation8 + $0x178] sm:$0xff] }
0x117c   :  { %9464 = vmatprep.subr.bf16.mxu1 %v10322_v19  ;;  %v8393_v60 = vld [vmem:[#allocation8 + $0x170] sm:$0xff]  ;;  %v8396_v4 = vld [vmem:[#allocation8 + $0x188] sm:$0xff]  ;;  %v8395_v58 = vld [vmem:[#allocation8 + $0x180] sm:$0xff] }
0x117d   :  { %v8398_v56 = vld [vmem:[#allocation8 + $0x198] sm:$0xff]  ;;  %v8397_v34 = vld [vmem:[#allocation8 + $0x190] sm:$0xff]  ;;  %v8400_v59 = vld [vmem:[#allocation8 + $0x1a8] sm:$0xff] }
0x117e   :  { %8434 = vmatpush1.bf16.msra.mxu0 %v8357_v50  ;;  %v8399_v9 = vld [vmem:[#allocation8 + $0x1a0] sm:$0xff]  ;;  %v8402_v61 = vld [vmem:[#allocation8 + $0x1b8] sm:$0xff]  ;;  %v8401_v35 = vld [vmem:[#allocation8 + $0x1b0] sm:$0xff] }
0x117f   :  { %8435 = vmatprep.subr.bf16.mxu0 %v8360_v37  ;;  %9465 = vmatpush3.bf16.msra.mxu1 %v10323_v12  ;;  %v8404_v63 = vld [vmem:[#allocation8 + $0x1c8] sm:$0xff]  ;;  %v8403_v46 = vld [vmem:[#allocation8 + $0x1c0] sm:$0xff]  ;;  %v8406_v50 = vld [vmem:[#allocation8 + $0x1d8] sm:$0xff] }
0x1180   :  { %9466 = vmatprep.subr.bf16.mxu1 %v10324_v7  ;;  %v8405_v37 = vld [vmem:[#allocation8 + $0x1d0] sm:$0xff]  ;;  %v8410_v53 = vld [vmem:[#allocation8 + $0x1f8] sm:$0xff] }
0x1181   :  { %v8409_v36 = vld [vmem:[#allocation8 + $0x1f0] sm:$0xff]  ;;  %v10329_v57 = vld [vmem:[%s11673_s18 + $0x38] sm:$0xff]  }
0x1182   :  { %8436 = vmatpush1.bf16.msra.mxu0 %v8359_v52  ;;  %v8408_v52 = vld [vmem:[#allocation8 + $0x1e8] sm:$0xff]  ;;  %v10326_v55 = vld [vmem:[%s11673_s18 + $0x70] sm:$0xff]  }
0x1183   :  { %8437 = vmatprep.subr.bf16.mxu0 %v8362_v33  ;;  %9467 = vmatpush3.bf16.msra.mxu1 %v10325_v40  ;;  %v8407_v33 = vld [vmem:[#allocation8 + $0x1e0] sm:$0xff]  ;;  %v10327_v32 = vld [vmem:[%s11673_s18 + $0x30] sm:$0xff]  }
0x1184   :  { %9468 = vmatprep.subr.bf16.mxu1 %v10326_v55 }
0x1186   :  { %8438 = vmatpush1.bf16.msra.mxu0 %v8361_v29  ;;  %v10328_v29 = vld [vmem:[%s11673_s18 + $0x78] sm:$0xff]  }
0x1187   :  { %8439 = vmatprep.subr.bf16.mxu0 %v8364_v21  ;;  %9469 = vmatpush3.bf16.msra.mxu1 %v10327_v32  ;;  %v8411_v21 = vld [vmem:[#allocation31] sm:$0x3] }
0x1188   :  { %9470 = vmatprep.subr.bf16.mxu1 %v10328_v29  ;;  %v8416_v22 = vrot.slane %v8411_v21, %v11240_v23  ;;  %v8420_v16 = vrot.slane %v8411_v21, %v11243_v25  ;;  %v9201_v23 = vld [vmem:[#allocation10] ss:$0 sm:$0xff] }
0x118a   :  { %8440 = vmatpush1.bf16.msra.mxu0 %v8363_v2 }
0x118b   :  { %8441 = vmatprep.subr.bf16.mxu0 %v8366_v17  ;;  %9471 = vmatpush3.bf16.msra.mxu1 %v10329_v57 }
0x118e   :  { %8442 = vmatpush1.bf16.msra.mxu0 %v8365_v49 }
0x118f   :  { %8443 = vmatprep.subr.bf16.mxu0 %v8368_v1 }
0x1192   :  { %8444 = vmatpush1.bf16.msra.mxu0 %v8367_v20 }
0x1193   :  { %8445 = vmatprep.subr.bf16.mxu0 %v8370_v24 }
0x1196   :  { %8446 = vmatpush1.bf16.msra.mxu0 %v8369_v11 }
0x1197   :  { %8447 = vmatprep.subr.bf16.mxu0 %v8372_v30 }
0x119a   :  { %8448 = vmatpush1.bf16.msra.mxu0 %v8371_v31 }
0x119b   :  { %8449 = vmatprep.subr.bf16.mxu0 %v8374_v6 }
0x119e   :  { %8450 = vmatpush1.bf16.msra.mxu0 %v8373_v15 }
0x119f   :  { %8451 = vmatprep.subr.bf16.mxu0 %v8376_v43 }
0x11a2   :  { %8452 = vmatpush1.bf16.msra.mxu0 %v8375_v0 }
0x11a3   :  { %8453 = vmatprep.subr.bf16.mxu0 %v8378_v3 }
0x11a6   :  { %8454 = vmatpush1.bf16.msra.mxu0 %v8377_v18 }
0x11a7   :  { %8464 = vmatprep.subr.bf16.mxu0 %v8380_v39 }
0x11a9   :  { %8456 = vmatmul.mubr.bf16.vlgmr.msra.gmra.mrb[84].mxu0 %v8343_v41 }
0x11aa   :  { %8465 = vmatpush1.bf16.msra.mxu0 %v8379_v26  ;;  %8496 = vmatprep.mubr.bf16.mxu0 %v8346_v10 }
0x11ab   :  { %8466 = vmatprep.subr.bf16.mxu0 %v8382_v42 }
0x11ae   :  { %8467 = vmatpush1.bf16.msra.mxu0 %v8381_v38 }
0x11af   :  { %8468 = vmatprep.subr.bf16.mxu0 %v8384_v14 }
0x11b2   :  { %8469 = vmatpush1.bf16.msra.mxu0 %v8383_v8 }
0x11b3   :  { %8470 = vmatprep.subr.bf16.mxu0 %v8386_v54 }
0x11b6   :  { %8471 = vmatpush1.bf16.msra.mxu0 %v8385_v28 }
0x11b7   :  { %8472 = vmatprep.subr.bf16.mxu0 %v8388_v44 }
0x11ba   :  { %8473 = vmatpush1.bf16.msra.mxu0 %v8387_v45 }
0x11bb   :  { %8474 = vmatprep.subr.bf16.mxu0 %v8390_v47 }
0x11be   :  { %8475 = vmatpush1.bf16.msra.mxu0 %v8389_v48 }
0x11bf   :  { %8476 = vmatprep.subr.bf16.mxu0 %v8392_v51 }
0x11c2   :  { %8477 = vmatpush1.bf16.msra.mxu0 %v8391_v27 }
0x11c3   :  { %8478 = vmatprep.subr.bf16.mxu0 %v8394_v5 }
0x11c6   :  { %8479 = vmatpush1.bf16.msra.mxu0 %v8393_v60 }
0x11c7   :  { %8480 = vmatprep.subr.bf16.mxu0 %v8396_v4 }
0x11ca   :  { %8481 = vmatpush1.bf16.msra.mxu0 %v8395_v58 }
0x11cb   :  { %8482 = vmatprep.subr.bf16.mxu0 %v8398_v56 }
0x11ce   :  { %8483 = vmatpush1.bf16.msra.mxu0 %v8397_v34 }
0x11cf   :  { %8484 = vmatprep.subr.bf16.mxu0 %v8400_v59 }
0x11d2   :  { %8485 = vmatpush1.bf16.msra.mxu0 %v8399_v9 }
0x11d3   :  { %8486 = vmatprep.subr.bf16.mxu0 %v8402_v61 }
0x11d6   :  { %8487 = vmatpush1.bf16.msra.mxu0 %v8401_v35 }
0x11d7   :  { %8488 = vmatprep.subr.bf16.mxu0 %v8404_v63 }
0x11da   :  { %8489 = vmatpush1.bf16.msra.mxu0 %v8403_v46 }
0x11db   :  { %8490 = vmatprep.subr.bf16.mxu0 %v8406_v50 }
0x11de   :  { %8491 = vmatpush1.bf16.msra.mxu0 %v8405_v37 }
0x11df   :  { %8492 = vmatprep.subr.bf16.mxu0 %v8408_v52 }
0x11e2   :  { %8493 = vmatpush1.bf16.msra.mxu0 %v8407_v33 }
0x11e3   :  { %8494 = vmatprep.subr.bf16.mxu0 %v8410_v53 }
0x11e6   :  { %8495 = vmatpush1.bf16.msra.mxu0 %v8409_v36 }
0x11e9   :  { %8497 = vmatmul.mubr.bf16.vlgmr.msra.gmra.mrb[84].mxu0 %v8345_v13 }
0x12bc   :  { %v8498_v2 = vpop.f32.mrb[84].mxu0 }
0x12bd   :  { %v9596_v17 = vadd.f32 %v8498_v2, %v8416_v22  ;;  %v8500_v49 = vpop.f32.mrb[85].mxu0 }
0x12be   :  { %v9597_v62 = vadd.f32 %v8500_v49, %v8420_v16  ;;  %v8502_v19 = vpop.f32.mrb[86].mxu0 }
0x12bf   :  { %vm8505_vm6 = vcmp.gt.f32.partialorder %v9596_v17, 0.0  ;;  %v8507_v1 = vmul.f32 0.2, %v9596_v17  ;;  %v8503_v12 = vpop.f32.mrb[87].mxu0 }
0x12c0   :  { %vm8506_vm7 = vcmp.gt.f32.partialorder %v9597_v62, 0.0  ;;  %v8508_v7 = vmul.f32 0.2, %v9597_v62 }
0x12c1   :  { %v8509_v20 = vsel %vm8505_vm6, %v9596_v17, %v8507_v1 }
0x12c2   :  { %v8510_v24 = vsel %vm8506_vm7, %v9597_v62, %v8508_v7  ;;  %v8511_v11 = vpack.c.bf16 %v8509_v20, %v8509_v20 }
0x12c3   :  { %v8512_v40 = vpack.c.bf16 %v8510_v24, %v8510_v24 }
0x12c5   :  { %8680 = vmatprep.mubr.bf16.mxu1 %v8512_v40 }
0x12c6   :  { %8681 = vmatmul.mubr.bf16.vlgmr.msra.gmra.mrb[128].mxu1 %v8511_v11 }
0x1399   :  { %v9472_v30 = vpop.f32.mrb[128].mxu1 }
0x139a   :  { %v9473_v31 = vpop.f32.mrb[129].mxu1 }
0x139b   :  { %v9474_v25 = vadd.f32 %v9473_v31, %v9472_v30  ;;  %v9475_v6 = vpop.f32.mrb[130].mxu1 }
0x139c   :  { %v9476_v15 = vpop.f32.mrb[131].mxu1 }
0x139d   :  { %v8683_v43 = vadd.f32 %v9474_v25, %v9201_v23 }
0x139f   :  { %v8688_v0 = vsub.f32 0.0, %v8683_v43 }
0x13a1   :  { %v8689_v3 = vmul.f32 1.442695, %v8688_v0 }
0x13a3   :  { %10330 = vpow2.f32 %v8689_v3 }
0x13ad   :  { %v10331_v18 = vpop.eup %10330 }
0x13ae   :  { %v8691_v39 = vadd.f32 1.0, %v10331_v18 }
0x13b0   :  { %10332 = vrcp.f32 %v8691_v39 }
0x13ba   :  { %v10333_v41 = vpop.eup %10332 }
0x13bb   :  { %8695 = vst.msk [vmem:[%s11714_s12] sm:$0x3] %vm8694_vm8, %v10333_v41 }
0x13bc   :  { %8700 = vsyncpa [#allocation12], 1 }
0x13bd   :  { %8701 = vsyncpa [#allocation14], 1 }
0x13be   :  { %8702 = vsyncpa [#allocation17], 1 }
0x13bf   :  { %8703 = vsyncpa [#allocation20], 1 }
0x13c0   :  { %8704 = vsyncpa [#allocation23], 1 }
0x13c1   :  { %8705 = vsyncpa [#allocation26], 1 }
0x13c2   :  { %8706 = vsyncpa [#allocation29], 1 }
0x13c3   :  { %8707 = vsyncpa [#allocation32], 1 }
0x13c4   :  { %8708 = vsyncmov [#allocation9] }
0x13c7   :  { %s8709_s11 = vpop.sfrf %8708 }
0x13c8   :  { %p9218_p0 = scmp.ne.s32.totalorder %s8709_s11, 0 }
0x13ca   :  { %8713 = shalt.err (%p9218_p0)  }
0x13cb   :  { %8715 = vsyncmov [#allocation9 + $0x1] }
0x13ce   :  { %s8716_s5 = vpop.sfrf %8715 }
0x13cf   :  { %p9219_p1 = scmp.ne.s32.totalorder %s8716_s5, 0 }
0x13d1   :  { %8720 = shalt.err (%p9219_p1)  }
0x13d2   :  { %8722 = vsyncmov [#allocation9 + $0x2] }
0x13d5   :  { %s8723_s14 = vpop.sfrf %8722 }
0x13d6   :  { %p9220_p2 = scmp.ne.s32.totalorder %s8723_s14, 0 }
0x13d8   :  { %8727 = shalt.err (%p9220_p2)  }
0x13d9   :  { %8729 = vsyncmov [#allocation9 + $0x3] }
0x13dc   :  { %s8730_s1 = vpop.sfrf %8729 }
0x13dd   :  { %p9221_p3 = scmp.ne.s32.totalorder %s8730_s1, 0 }
0x13df   :  { %8734 = shalt.err (%p9221_p3)  }

</bundles_post_ra>
